<compile_context>
chip_gen: v5e
topology: v5e:2x2
jax: 0.10.0
libtpu: 0.0.40
codegen_flags: <defaults>
</compile_context>

<pallas_src>
import functools

import jax
import jax.numpy as jnp
from jax import lax
from jax.experimental import pallas as pl
from jax.experimental.pallas import tpu as pltpu

EPS = 1e-5


# ---------------------------------------------------------------------------
# Fused kernel: conv (single folded matmul) + BN batch-stats + ReLU.
# Grid = (phase, batch_block), phase-major:
#   phase 0: in-VMEM halo pad, one K=9*C_in MXU matmul, cache conv result,
#            accumulate per-channel sum / sum-of-squares.
#   phase 1: pure VPU epilogue (scale/shift + ReLU), lane-narrow bf16 store.
# ---------------------------------------------------------------------------
def _fused_conv_bn_relu_kernel(x_ref, w_ref, g_ref, b_ref, o_ref,
                               xpad_ref, lhs_ref, cache_ref, stats_ref,
                               *, inv_m):
    # x_ref    : (B_img, H, W, C_in)        bf16   unpadded NHWC input block
    # w_ref    : (9*C_in, C_out)            bf16   folded conv weights
    # g_ref    : (1, C_out)                 f32    gamma
    # b_ref    : (1, C_out)                 f32    beta
    # o_ref    : (B_img, H*W, C_out)        bf16   output block
    # xpad_ref : (B_img, H+2, W+2, C_in)    f32    halo-padded scratch
    # lhs_ref  : (B_img*H*W, 9*C_in)        f32    folded-tap LHS scratch
    # cache_ref: (NB, B_img*H*W, C_out)     f32    conv-result cache
    # stats_ref: (8, C_out)                 f32    rows: 0 sum, 1 sumsq,
    #                                              2 scale, 3 shift
    phase = pl.program_id(0)
    b = pl.program_id(1)

    B, H, W, C_in = x_ref.shape
    HW = H * W
    C_out = w_ref.shape[-1]

    # ---- one-time init: zero the stats and the halo border ----------------
    @pl.when(jnp.logical_and(phase == 0, b == 0))
    def _init():
        stats_ref[...] = jnp.zeros_like(stats_ref)
        xpad_ref[...] = jnp.zeros_like(xpad_ref)   # border stays 0 forever

    # ---- phase 0: conv + statistics ----------------------------------------
    @pl.when(phase == 0)
    def _conv_and_stats():
        # Halo padding fused in-kernel: only the interior is (re)written each
        # step, the zero border persists -> no padded HBM copy.
        xpad_ref[:, 1:H + 1, 1:W + 1, :] = x_ref[...].astype(xpad_ref.dtype)

        # Fold the 9 taps into the contraction dimension: assemble one
        # (B*HW, 9*C_in) LHS in VMEM, then a single MXU matmul (K = 9*C_in)
        # instead of nine tiny K=C_in matmuls + f32 VPU accumulation.
        for ki in range(3):
            for kj in range(3):
                t = ki * 3 + kj
                tap = xpad_ref[:, ki:ki + H, kj:kj + W, :]       # (B,H,W,Cin)
                lhs_ref[:, t * C_in:(t + 1) * C_in] = tap.reshape(B * HW, C_in)

        acc = jnp.dot(lhs_ref[...].astype(jnp.bfloat16), w_ref[...],
                      preferred_element_type=jnp.float32)        # (B*HW, Cout)

        # Cache the conv result so phase 1 never re-reads the input or reruns
        # the conv.
        # TODO(synk): recompute-from-input fallback when N*H*W*C_out exceeds
        # the VMEM budget (large batches).
        cache_ref[b] = acc

        # Per-channel batch statistics, accumulated in f32.  E[x^2]-E[x]^2 is
        # adequate for zero-centered conv outputs; a shifted/Welford pass
        # would be safer for channels with large mean and tiny variance.
        stats_ref[0:1, :] += jnp.sum(acc, axis=0, keepdims=True)
        stats_ref[1:2, :] += jnp.sum(acc * acc, axis=0, keepdims=True)

        # Defined placeholder: the output buffer is parked on block 0 during
        # phase 0, so even a (hypothetical) early writeback can never flush
        # stale VMEM; phase 1 (b=0) overwrites it before any index change.
        o_ref[...] = jnp.zeros_like(o_ref)

    # ---- phase 1: finalize BN coefficients once, then apply + ReLU ---------
    @pl.when(jnp.logical_and(phase == 1, b == 0))
    def _finalize_stats():
        mean = stats_ref[0:1, :] * inv_m
        var = jnp.maximum(stats_ref[1:2, :] * inv_m - mean * mean, 0.0)
        scale = g_ref[...] * lax.rsqrt(var + EPS)
        stats_ref[2:3, :] = scale
        stats_ref[3:4, :] = b_ref[...] - mean * scale

    @pl.when(phase == 1)
    def _emit():
        acc = cache_ref[b]                                       # (B*HW, Cout)
        y = jnp.maximum(acc * stats_ref[2:3, :] + stats_ref[3:4, :], 0.0)
        o_ref[...] = y.reshape(B, HW, C_out).astype(o_ref.dtype)


# ---------------------------------------------------------------------------
# Wrapper reproducing Conv.forward on NCHW inputs.
# ---------------------------------------------------------------------------
@jax.jit
def conv_bn_relu(x, weight, gamma, beta):
    # x: (N, C_in, H, W);  weight: (C_out, C_in, 3, 3)
    N, C_in, H, W = x.shape
    C_out = weight.shape[0]
    HW = H * W

    # Images per grid step: biggest divisor of N with a modest per-step tile
    # (healthy matmul M, bounded VMEM).
    B_img = 1
    for cand in range(N, 0, -1):
        if N % cand == 0 and cand * HW <= 4096:
            B_img = cand
            break
    NB = N // B_img

    # The conv cache holds the whole batch's conv output in VMEM (physically
    # lane-padded to 128).  TODO(synk): spill/recompute fallback for large N.
    cache_bytes = N * HW * ((C_out + 127) // 128) * 128 * 4
    assert cache_bytes <= 16 * 1024 * 1024, "conv cache would not fit in VMEM"

    # NCHW -> NHWC (thin, unavoidable XLA permute given the NCHW interface)
    # and bf16 activations (halved HBM read).  Halo padding happens in-kernel.
    x_nhwc = jnp.transpose(x, (0, 2, 3, 1)).astype(jnp.bfloat16)

    # weight (C_out, C_in, 3, 3) -> (9*C_in, C_out); K-order (tap, c_in)
    # matches the LHS assembly in the kernel.  No lane padding of C_out.
    w = jnp.transpose(weight, (2, 3, 1, 0)).reshape(9 * C_in, C_out)
    w = w.astype(jnp.bfloat16)

    g = gamma.astype(jnp.float32).reshape(1, C_out)
    bb = beta.astype(jnp.float32).reshape(1, C_out)

    kernel = functools.partial(_fused_conv_bn_relu_kernel,
                               inv_m=1.0 / float(N * HW))

    y = pl.pallas_call(
        kernel,
        out_shape=jax.ShapeDtypeStruct((N, HW, C_out), jnp.bfloat16),
        grid_spec=pltpu.PrefetchScalarGridSpec(
            num_scalar_prefetch=0,
            grid=(2, NB),                           # (phase, batch block)
            in_specs=[
                # Park the input on its last block during phase 1 so the
                # epilogue issues no input DMAs at all.
                pl.BlockSpec((B_img, H, W, C_in),
                             lambda p, b: (b * (1 - p) + (NB - 1) * p, 0, 0, 0)),
                pl.BlockSpec((9 * C_in, C_out), lambda p, b: (0, 0)),
                pl.BlockSpec((1, C_out), lambda p, b: (0, 0)),
                pl.BlockSpec((1, C_out), lambda p, b: (0, 0)),
            ],
            # Phase 0 parks on (and placeholder-writes) output block 0, which
            # phase 1 (b=0) overwrites before any index change; phase 1 then
            # writes every block exactly once.
            out_specs=pl.BlockSpec((B_img, HW, C_out),
                                   lambda p, b: (b * p, 0, 0)),
            scratch_shapes=[
                pltpu.VMEM((B_img, H + 2, W + 2, C_in), jnp.float32),  # halo pad
                pltpu.VMEM((B_img * HW, 9 * C_in), jnp.float32),       # folded LHS
                pltpu.VMEM((NB, B_img * HW, C_out), jnp.float32),      # conv cache
                pltpu.VMEM((8, C_out), jnp.float32),                   # BN stats
            ],
        ),
        compiler_params=pltpu.CompilerParams(
            # Stats/cache accumulate in persistent VMEM scratch across the
            # whole grid and phase 1 must observe all of phase 0 -> both axes
            # sequential.  (A v7x dual-TensorCore variant would shard the
            # batch axis per core with partial stats combined through CMEM.)
            dimension_semantics=("arbitrary", "arbitrary"),
            vmem_limit_bytes=32 * 1024 * 1024,
        ),
    )(x_nhwc, w, g, bb)

    # Back to NCHW, f32 (thin XLA glue on the already-small bf16 result).
    y = jnp.transpose(y.reshape(N, H, W, C_out), (0, 3, 1, 2))
    return y.astype(jnp.float32)


# ---------------------------------------------------------------------------
# Pure-JAX f32 reference for a sanity check.
# ---------------------------------------------------------------------------
def _reference(x, weight, gamma, beta):
    y = lax.conv_general_dilated(
        x.astype(jnp.float32), weight.astype(jnp.float32),
        window_strides=(1, 1), padding=((1, 1), (1, 1)),
        dimension_numbers=("NCHW", "OIHW", "NCHW"),
        precision=lax.Precision.HIGHEST,
    )
    mean = jnp.mean(y, axis=(0, 2, 3), keepdims=True)
    var = jnp.mean((y - mean) ** 2, axis=(0, 2, 3), keepdims=True)
    yn = (y - mean) * lax.rsqrt(var + EPS)
    yn = yn * gamma.reshape(1, -1, 1, 1) + beta.reshape(1, -1, 1, 1)
    return jnp.maximum(yn, 0.0)


if __name__ == "__main__":
    key = jax.random.PRNGKey(0)
    k_x, k_w = jax.random.split(key)

    N, C_in, H, W = 2, 4, 16, 16
    C_out = 8

    x = jax.random.normal(k_x, (N, C_in, H, W), dtype=jnp.float32)
    # Deterministic synthetic conv weight (stands in for kaiming-uniform init).
    weight = jax.random.normal(k_w, (C_out, C_in, 3, 3), dtype=jnp.float32) * 0.1
    # PyTorch BatchNorm2d default affine init.
    gamma = jnp.ones((C_out,), dtype=jnp.float32)
    beta = jnp.zeros((C_out,), dtype=jnp.float32)

    out = jax.block_until_ready(conv_bn_relu(x, weight, gamma, beta))

    ref = _reference(x, weight, gamma, beta)
    assert out.shape == (N, C_out, H, W)
    max_err = float(jnp.max(jnp.abs(out - ref)))
    # bf16 MXU operands + bf16 output with f32 accumulation / f32 BN stats ->
    # small, bounded deviation from the pure-f32 reference.
    assert jnp.allclose(out, ref, atol=2e-2, rtol=2e-2), (
        f"mismatch vs reference: max abs err {max_err}"
    )

    print("KERNEL_OK")
</pallas_src>

<mosaic_0001>
module attributes {stable_mosaic.version = 11 : i64} {
  func.func @_fused_conv_bn_relu_kernel(%arg0: i32, %arg1: i32, %arg2: memref<2x16x16x4xbf16, #tpu.memory_space<vmem>>, %arg3: memref<36x8xbf16, #tpu.memory_space<vmem>>, %arg4: memref<1x8xf32, #tpu.memory_space<vmem>>, %arg5: memref<1x8xf32, #tpu.memory_space<vmem>>, %arg6: memref<2x256x8xbf16, #tpu.memory_space<vmem>>, %arg7: memref<2x18x18x4xf32, #tpu.memory_space<vmem>>, %arg8: memref<512x36xf32, #tpu.memory_space<vmem>>, %arg9: memref<1x512x8xf32, #tpu.memory_space<vmem>>, %arg10: memref<8x8xf32, #tpu.memory_space<vmem>>) attributes {dimension_semantics = [#tpu.dimension_semantics<arbitrary>, #tpu.dimension_semantics<arbitrary>], iteration_bounds = array<i64: 2, 1>, scalar_prefetch = 0 : i64, scratch_operands = 4 : i64, tpu.core_type = #tpu.core_type<tc>, window_params = [{transform_indices = @transform_0, window_bounds = array<i64: 2, 16, 16, 4>}, {pipeline_mode = #tpu.pipeline_mode<synchronous>, transform_indices = @transform_1, window_bounds = array<i64: 36, 8>}, {pipeline_mode = #tpu.pipeline_mode<synchronous>, transform_indices = @transform_2, window_bounds = array<i64: 1, 8>}, {pipeline_mode = #tpu.pipeline_mode<synchronous>, transform_indices = @transform_3, window_bounds = array<i64: 1, 8>}, {transform_indices = @transform_4, window_bounds = array<i64: 2, 256, 8>}]} {
    %c0_i32 = arith.constant 0 : i32
    %0 = arith.cmpi eq, %arg0, %c0_i32 : i32
    %c0_i32_0 = arith.constant 0 : i32
    %1 = arith.cmpi eq, %arg1, %c0_i32_0 : i32
    %2 = arith.andi %0, %1 : i1
    %3 = arith.extui %2 : i1 to i32
    %c0_i32_1 = arith.constant 0 : i32
    %4 = arith.cmpi ne, %3, %c0_i32_1 : i32
    scf.if %4 {
      %cst = arith.constant 0.000000e+00 : f32
      %16 = vector.broadcast %cst : f32 to vector<8x8xf32>
      %c0 = arith.constant 0 : index
      %c0_8 = arith.constant 0 : index
      %17 = vector.load %arg10[%c0, %c0_8] : memref<8x8xf32, #tpu.memory_space<vmem>>, vector<8x8xf32>
      tpu.vector_store %arg10[%c0, %c0_8], %16 {strides = array<i32>} : memref<8x8xf32, #tpu.memory_space<vmem>>, vector<8x8xf32>,
      %cst_9 = arith.constant 0.000000e+00 : f32
      %18 = vector.broadcast %cst_9 : f32 to vector<2x18x18x4xf32>
      %c0_10 = arith.constant 0 : index
      %c0_11 = arith.constant 0 : index
      %c0_12 = arith.constant 0 : index
      %c0_13 = arith.constant 0 : index
      %19 = vector.load %arg7[%c0_10, %c0_11, %c0_12, %c0_13] : memref<2x18x18x4xf32, #tpu.memory_space<vmem>>, vector<2x18x18x4xf32>
      tpu.vector_store %arg7[%c0_10, %c0_11, %c0_12, %c0_13], %18 {strides = array<i32>} : memref<2x18x18x4xf32, #tpu.memory_space<vmem>>, vector<2x18x18x4xf32>,
    } else {
    }
    %c0_i32_2 = arith.constant 0 : i32
    %5 = arith.cmpi eq, %arg0, %c0_i32_2 : i32
    %6 = arith.extui %5 : i1 to i32
    %c0_i32_3 = arith.constant 0 : i32
    %7 = arith.cmpi ne, %6, %c0_i32_3 : i32
    scf.if %7 {
      %c0 = arith.constant 0 : index
      %c0_8 = arith.constant 0 : index
      %c0_9 = arith.constant 0 : index
      %c0_10 = arith.constant 0 : index
      %16 = vector.load %arg2[%c0, %c0_8, %c0_9, %c0_10] : memref<2x16x16x4xbf16, #tpu.memory_space<vmem>>, vector<2x16x16x4xbf16>
      %17 = arith.extf %16 : vector<2x16x16x4xbf16> to vector<2x16x16x4xf32>
      %c0_11 = arith.constant 0 : index
      %c1 = arith.constant 1 : index
      %c1_12 = arith.constant 1 : index
      %c0_13 = arith.constant 0 : index
      %18 = vector.load %arg7[%c0_11, %c1, %c1_12, %c0_13] : memref<2x18x18x4xf32, #tpu.memory_space<vmem>>, vector<2x16x16x4xf32>
      tpu.vector_store %arg7[%c0_11, %c1, %c1_12, %c0_13], %17 {strides = array<i32>} : memref<2x18x18x4xf32, #tpu.memory_space<vmem>>, vector<2x16x16x4xf32>,
      %c0_14 = arith.constant 0 : index
      %c0_15 = arith.constant 0 : index
      %c0_16 = arith.constant 0 : index
      %c0_17 = arith.constant 0 : index
      %19 = vector.load %arg7[%c0_14, %c0_15, %c0_16, %c0_17] : memref<2x18x18x4xf32, #tpu.memory_space<vmem>>, vector<2x16x16x4xf32>
      %20 = vector.shape_cast %19 : vector<2x16x16x4xf32> to vector<512x4xf32>
      %c0_18 = arith.constant 0 : index
      %c0_19 = arith.constant 0 : index
      %21 = vector.load %arg8[%c0_18, %c0_19] : memref<512x36xf32, #tpu.memory_space<vmem>>, vector<512x4xf32>
      tpu.vector_store %arg8[%c0_18, %c0_19], %20 {strides = array<i32>} : memref<512x36xf32, #tpu.memory_space<vmem>>, vector<512x4xf32>,
      %c0_20 = arith.constant 0 : index
      %c0_21 = arith.constant 0 : index
      %c1_22 = arith.constant 1 : index
      %c0_23 = arith.constant 0 : index
      %22 = vector.load %arg7[%c0_20, %c0_21, %c1_22, %c0_23] : memref<2x18x18x4xf32, #tpu.memory_space<vmem>>, vector<2x16x16x4xf32>
      %23 = vector.shape_cast %22 : vector<2x16x16x4xf32> to vector<512x4xf32>
      %c0_24 = arith.constant 0 : index
      %c4 = arith.constant 4 : index
      %24 = vector.load %arg8[%c0_24, %c4] : memref<512x36xf32, #tpu.memory_space<vmem>>, vector<512x4xf32>
      tpu.vector_store %arg8[%c0_24, %c4], %23 {strides = array<i32>} : memref<512x36xf32, #tpu.memory_space<vmem>>, vector<512x4xf32>,
      %c0_25 = arith.constant 0 : index
      %c0_26 = arith.constant 0 : index
      %c2 = arith.constant 2 : index
      %c0_27 = arith.constant 0 : index
      %25 = vector.load %arg7[%c0_25, %c0_26, %c2, %c0_27] : memref<2x18x18x4xf32, #tpu.memory_space<vmem>>, vector<2x16x16x4xf32>
      %26 = vector.shape_cast %25 : vector<2x16x16x4xf32> to vector<512x4xf32>
      %c0_28 = arith.constant 0 : index
      %c8 = arith.constant 8 : index
      %27 = vector.load %arg8[%c0_28, %c8] : memref<512x36xf32, #tpu.memory_space<vmem>>, vector<512x4xf32>
      tpu.vector_store %arg8[%c0_28, %c8], %26 {strides = array<i32>} : memref<512x36xf32, #tpu.memory_space<vmem>>, vector<512x4xf32>,
      %c0_29 = arith.constant 0 : index
      %c1_30 = arith.constant 1 : index
      %c0_31 = arith.constant 0 : index
      %c0_32 = arith.constant 0 : index
      %28 = vector.load %arg7[%c0_29, %c1_30, %c0_31, %c0_32] : memref<2x18x18x4xf32, #tpu.memory_space<vmem>>, vector<2x16x16x4xf32>
      %29 = vector.shape_cast %28 : vector<2x16x16x4xf32> to vector<512x4xf32>
      %c0_33 = arith.constant 0 : index
      %c12 = arith.constant 12 : index
      %30 = vector.load %arg8[%c0_33, %c12] : memref<512x36xf32, #tpu.memory_space<vmem>>, vector<512x4xf32>
      tpu.vector_store %arg8[%c0_33, %c12], %29 {strides = array<i32>} : memref<512x36xf32, #tpu.memory_space<vmem>>, vector<512x4xf32>,
      %c0_34 = arith.constant 0 : index
      %c1_35 = arith.constant 1 : index
      %c1_36 = arith.constant 1 : index
      %c0_37 = arith.constant 0 : index
      %31 = vector.load %arg7[%c0_34, %c1_35, %c1_36, %c0_37] : memref<2x18x18x4xf32, #tpu.memory_space<vmem>>, vector<2x16x16x4xf32>
      %32 = vector.shape_cast %31 : vector<2x16x16x4xf32> to vector<512x4xf32>
      %c0_38 = arith.constant 0 : index
      %c16 = arith.constant 16 : index
      %33 = vector.load %arg8[%c0_38, %c16] : memref<512x36xf32, #tpu.memory_space<vmem>>, vector<512x4xf32>
      tpu.vector_store %arg8[%c0_38, %c16], %32 {strides = array<i32>} : memref<512x36xf32, #tpu.memory_space<vmem>>, vector<512x4xf32>,
      %c0_39 = arith.constant 0 : index
      %c1_40 = arith.constant 1 : index
      %c2_41 = arith.constant 2 : index
      %c0_42 = arith.constant 0 : index
      %34 = vector.load %arg7[%c0_39, %c1_40, %c2_41, %c0_42] : memref<2x18x18x4xf32, #tpu.memory_space<vmem>>, vector<2x16x16x4xf32>
      %35 = vector.shape_cast %34 : vector<2x16x16x4xf32> to vector<512x4xf32>
      %c0_43 = arith.constant 0 : index
      %c20 = arith.constant 20 : index
      %36 = vector.load %arg8[%c0_43, %c20] : memref<512x36xf32, #tpu.memory_space<vmem>>, vector<512x4xf32>
      tpu.vector_store %arg8[%c0_43, %c20], %35 {strides = array<i32>} : memref<512x36xf32, #tpu.memory_space<vmem>>, vector<512x4xf32>,
      %c0_44 = arith.constant 0 : index
      %c2_45 = arith.constant 2 : index
      %c0_46 = arith.constant 0 : index
      %c0_47 = arith.constant 0 : index
      %37 = vector.load %arg7[%c0_44, %c2_45, %c0_46, %c0_47] : memref<2x18x18x4xf32, #tpu.memory_space<vmem>>, vector<2x16x16x4xf32>
      %38 = vector.shape_cast %37 : vector<2x16x16x4xf32> to vector<512x4xf32>
      %c0_48 = arith.constant 0 : index
      %c24 = arith.constant 24 : index
      %39 = vector.load %arg8[%c0_48, %c24] : memref<512x36xf32, #tpu.memory_space<vmem>>, vector<512x4xf32>
      tpu.vector_store %arg8[%c0_48, %c24], %38 {strides = array<i32>} : memref<512x36xf32, #tpu.memory_space<vmem>>, vector<512x4xf32>,
      %c0_49 = arith.constant 0 : index
      %c2_50 = arith.constant 2 : index
      %c1_51 = arith.constant 1 : index
      %c0_52 = arith.constant 0 : index
      %40 = vector.load %arg7[%c0_49, %c2_50, %c1_51, %c0_52] : memref<2x18x18x4xf32, #tpu.memory_space<vmem>>, vector<2x16x16x4xf32>
      %41 = vector.shape_cast %40 : vector<2x16x16x4xf32> to vector<512x4xf32>
      %c0_53 = arith.constant 0 : index
      %c28 = arith.constant 28 : index
      %42 = vector.load %arg8[%c0_53, %c28] : memref<512x36xf32, #tpu.memory_space<vmem>>, vector<512x4xf32>
      tpu.vector_store %arg8[%c0_53, %c28], %41 {strides = array<i32>} : memref<512x36xf32, #tpu.memory_space<vmem>>, vector<512x4xf32>,
      %c0_54 = arith.constant 0 : index
      %c2_55 = arith.constant 2 : index
      %c2_56 = arith.constant 2 : index
      %c0_57 = arith.constant 0 : index
      %43 = vector.load %arg7[%c0_54, %c2_55, %c2_56, %c0_57] : memref<2x18x18x4xf32, #tpu.memory_space<vmem>>, vector<2x16x16x4xf32>
      %44 = vector.shape_cast %43 : vector<2x16x16x4xf32> to vector<512x4xf32>
      %c0_58 = arith.constant 0 : index
      %c32 = arith.constant 32 : index
      %45 = vector.load %arg8[%c0_58, %c32] : memref<512x36xf32, #tpu.memory_space<vmem>>, vector<512x4xf32>
      tpu.vector_store %arg8[%c0_58, %c32], %44 {strides = array<i32>} : memref<512x36xf32, #tpu.memory_space<vmem>>, vector<512x4xf32>,
      %c0_59 = arith.constant 0 : index
      %c0_60 = arith.constant 0 : index
      %46 = vector.load %arg8[%c0_59, %c0_60] : memref<512x36xf32, #tpu.memory_space<vmem>>, vector<512x36xf32>
      %47 = arith.truncf %46 : vector<512x36xf32> to vector<512x36xbf16>
      %c0_61 = arith.constant 0 : index
      %c0_62 = arith.constant 0 : index
      %48 = vector.load %arg3[%c0_61, %c0_62] : memref<36x8xbf16, #tpu.memory_space<vmem>>, vector<36x8xbf16>
      %cst = arith.constant dense<0.000000e+00> : vector<512x8xf32>
      %49 = tpu.matmul %47, %48, %cst {dimension_numbers = #tpu.dot_dimension_numbers<[1], [0], [0], [1], [0, 0, 1, 1], [], []>} : vector<512x36xbf16>, vector<36x8xbf16>, vector<512x8xf32> -> vector<512x8xf32>
      %50 = arith.index_cast %arg1 : i32 to index
      %c0_63 = arith.constant 0 : index
      %c0_64 = arith.constant 0 : index
      %51 = vector.load %arg9[%50, %c0_63, %c0_64] : memref<1x512x8xf32, #tpu.memory_space<vmem>>, vector<1x512x8xf32>
      %52 = vector.shape_cast %51 : vector<1x512x8xf32> to vector<512x8xf32>
      %53 = vector.shape_cast %49 : vector<512x8xf32> to vector<1x512x8xf32>
      tpu.vector_store %arg9[%50, %c0_63, %c0_64], %53 {strides = array<i32>} : memref<1x512x8xf32, #tpu.memory_space<vmem>>, vector<1x512x8xf32>,
      %c0_65 = arith.constant 0 : index
      %c0_66 = arith.constant 0 : index
      %54 = vector.load %arg10[%c0_65, %c0_66] : memref<8x8xf32, #tpu.memory_space<vmem>>, vector<1x8xf32>
      %cst_67 = arith.constant dense<0.000000e+00> : vector<8xf32>
      %55 = vector.multi_reduction <add>, %49, %cst_67 [0] : vector<512x8xf32> to vector<8xf32>
      %56 = vector.shape_cast %55 : vector<8xf32> to vector<1x8xf32>
      %57 = arith.addf %54, %56 : vector<1x8xf32>
      %c0_68 = arith.constant 0 : index
      %c0_69 = arith.constant 0 : index
      %58 = vector.load %arg10[%c0_68, %c0_69] : memref<8x8xf32, #tpu.memory_space<vmem>>, vector<1x8xf32>
      tpu.vector_store %arg10[%c0_68, %c0_69], %57 {strides = array<i32>} : memref<8x8xf32, #tpu.memory_space<vmem>>, vector<1x8xf32>,
      %c1_70 = arith.constant 1 : index
      %c0_71 = arith.constant 0 : index
      %59 = vector.load %arg10[%c1_70, %c0_71] : memref<8x8xf32, #tpu.memory_space<vmem>>, vector<1x8xf32>
      %60 = arith.mulf %49, %49 : vector<512x8xf32>
      %cst_72 = arith.constant dense<0.000000e+00> : vector<8xf32>
      %61 = vector.multi_reduction <add>, %60, %cst_72 [0] : vector<512x8xf32> to vector<8xf32>
      %62 = vector.shape_cast %61 : vector<8xf32> to vector<1x8xf32>
      %63 = arith.addf %59, %62 : vector<1x8xf32>
      %c1_73 = arith.constant 1 : index
      %c0_74 = arith.constant 0 : index
      %64 = vector.load %arg10[%c1_73, %c0_74] : memref<8x8xf32, #tpu.memory_space<vmem>>, vector<1x8xf32>
      tpu.vector_store %arg10[%c1_73, %c0_74], %63 {strides = array<i32>} : memref<8x8xf32, #tpu.memory_space<vmem>>, vector<1x8xf32>,
      %cst_75 = arith.constant 0.000000e+00 : bf16
      %65 = vector.broadcast %cst_75 : bf16 to vector<2x256x8xbf16>
      %c0_76 = arith.constant 0 : index
      %c0_77 = arith.constant 0 : index
      %c0_78 = arith.constant 0 : index
      %66 = vector.load %arg6[%c0_76, %c0_77, %c0_78] : memref<2x256x8xbf16, #tpu.memory_space<vmem>>, vector<2x256x8xbf16>
      tpu.vector_store %arg6[%c0_76, %c0_77, %c0_78], %65 {strides = array<i32>} : memref<2x256x8xbf16, #tpu.memory_space<vmem>>, vector<2x256x8xbf16>,
    } else {
    }
    %c1_i32 = arith.constant 1 : i32
    %8 = arith.cmpi eq, %arg0, %c1_i32 : i32
    %c0_i32_4 = arith.constant 0 : i32
    %9 = arith.cmpi eq, %arg1, %c0_i32_4 : i32
    %10 = arith.andi %8, %9 : i1
    %11 = arith.extui %10 : i1 to i32
    %c0_i32_5 = arith.constant 0 : i32
    %12 = arith.cmpi ne, %11, %c0_i32_5 : i32
    scf.if %12 {
      %c0 = arith.constant 0 : index
      %c0_8 = arith.constant 0 : index
      %16 = vector.load %arg10[%c0, %c0_8] : memref<8x8xf32, #tpu.memory_space<vmem>>, vector<1x8xf32>
      %cst = arith.constant 0.001953125 : f32
      %17 = vector.broadcast %cst : f32 to vector<1x8xf32>
      %18 = arith.mulf %16, %17 : vector<1x8xf32>
      %c1 = arith.constant 1 : index
      %c0_9 = arith.constant 0 : index
      %19 = vector.load %arg10[%c1, %c0_9] : memref<8x8xf32, #tpu.memory_space<vmem>>, vector<1x8xf32>
      %cst_10 = arith.constant 0.001953125 : f32
      %20 = vector.broadcast %cst_10 : f32 to vector<1x8xf32>
      %21 = arith.mulf %19, %20 : vector<1x8xf32>
      %22 = arith.mulf %18, %18 : vector<1x8xf32>
      %23 = arith.subf %21, %22 : vector<1x8xf32>
      %cst_11 = arith.constant 0.000000e+00 : f32
      %24 = vector.broadcast %cst_11 : f32 to vector<1x8xf32>
      %25 = arith.maximumf %23, %24 : vector<1x8xf32>
      %c0_12 = arith.constant 0 : index
      %c0_13 = arith.constant 0 : index
      %26 = vector.load %arg4[%c0_12, %c0_13] : memref<1x8xf32, #tpu.memory_space<vmem>>, vector<1x8xf32>
      %cst_14 = arith.constant 9.99999974E-6 : f32
      %27 = vector.broadcast %cst_14 : f32 to vector<1x8xf32>
      %28 = arith.addf %25, %27 : vector<1x8xf32>
      %29 = math.rsqrt %28 : vector<1x8xf32>
      %30 = arith.mulf %26, %29 : vector<1x8xf32>
      %c2 = arith.constant 2 : index
      %c0_15 = arith.constant 0 : index
      %31 = vector.load %arg10[%c2, %c0_15] : memref<8x8xf32, #tpu.memory_space<vmem>>, vector<1x8xf32>
      tpu.vector_store %arg10[%c2, %c0_15], %30 {strides = array<i32>} : memref<8x8xf32, #tpu.memory_space<vmem>>, vector<1x8xf32>,
      %c0_16 = arith.constant 0 : index
      %c0_17 = arith.constant 0 : index
      %32 = vector.load %arg5[%c0_16, %c0_17] : memref<1x8xf32, #tpu.memory_space<vmem>>, vector<1x8xf32>
      %33 = arith.mulf %18, %30 : vector<1x8xf32>
      %34 = arith.subf %32, %33 : vector<1x8xf32>
      %c3 = arith.constant 3 : index
      %c0_18 = arith.constant 0 : index
      %35 = vector.load %arg10[%c3, %c0_18] : memref<8x8xf32, #tpu.memory_space<vmem>>, vector<1x8xf32>
      tpu.vector_store %arg10[%c3, %c0_18], %34 {strides = array<i32>} : memref<8x8xf32, #tpu.memory_space<vmem>>, vector<1x8xf32>,
    } else {
    }
    %c1_i32_6 = arith.constant 1 : i32
    %13 = arith.cmpi eq, %arg0, %c1_i32_6 : i32
    %14 = arith.extui %13 : i1 to i32
    %c0_i32_7 = arith.constant 0 : i32
    %15 = arith.cmpi ne, %14, %c0_i32_7 : i32
    scf.if %15 {
      %16 = arith.index_cast %arg1 : i32 to index
      %c0 = arith.constant 0 : index
      %c0_8 = arith.constant 0 : index
      %17 = vector.load %arg9[%16, %c0, %c0_8] : memref<1x512x8xf32, #tpu.memory_space<vmem>>, vector<1x512x8xf32>
      %18 = vector.shape_cast %17 : vector<1x512x8xf32> to vector<512x8xf32>
      %c2 = arith.constant 2 : index
      %c0_9 = arith.constant 0 : index
      %19 = vector.load %arg10[%c2, %c0_9] : memref<8x8xf32, #tpu.memory_space<vmem>>, vector<1x8xf32>
      %20 = vector.broadcast %19 : vector<1x8xf32> to vector<512x8xf32>
      %21 = arith.mulf %18, %20 : vector<512x8xf32>
      %c3 = arith.constant 3 : index
      %c0_10 = arith.constant 0 : index
      %22 = vector.load %arg10[%c3, %c0_10] : memref<8x8xf32, #tpu.memory_space<vmem>>, vector<1x8xf32>
      %23 = vector.broadcast %22 : vector<1x8xf32> to vector<512x8xf32>
      %24 = arith.addf %21, %23 : vector<512x8xf32>
      %cst = arith.constant 0.000000e+00 : f32
      %25 = vector.broadcast %cst : f32 to vector<512x8xf32>
      %26 = arith.maximumf %24, %25 : vector<512x8xf32>
      %27 = vector.shape_cast %26 : vector<512x8xf32> to vector<2x256x8xf32>
      %28 = arith.truncf %27 : vector<2x256x8xf32> to vector<2x256x8xbf16>
      %c0_11 = arith.constant 0 : index
      %c0_12 = arith.constant 0 : index
      %c0_13 = arith.constant 0 : index
      %29 = vector.load %arg6[%c0_11, %c0_12, %c0_13] : memref<2x256x8xbf16, #tpu.memory_space<vmem>>, vector<2x256x8xbf16>
      tpu.vector_store %arg6[%c0_11, %c0_12, %c0_13], %28 {strides = array<i32>} : memref<2x256x8xbf16, #tpu.memory_space<vmem>>, vector<2x256x8xbf16>,
    } else {
    }
    return
  }
  func.func @transform_0(%arg0: i32, %arg1: i32) -> (i32, i32, i32, i32) {
    %c1_i32 = arith.constant 1 : i32
    %0 = arith.subi %c1_i32, %arg0 : i32
    %1 = arith.muli %arg1, %0 : i32
    %c0_i32 = arith.constant 0 : i32
    %2 = arith.muli %c0_i32, %arg0 : i32
    %3 = arith.addi %1, %2 : i32
    %c0_i32_0 = arith.constant 0 : i32
    %c0_i32_1 = arith.constant 0 : i32
    %c0_i32_2 = arith.constant 0 : i32
    %c0_i32_3 = arith.constant 0 : i32
    return %3, %c0_i32_0, %c0_i32_1, %c0_i32_2 : i32, i32, i32, i32
  }
  func.func @transform_1(%arg0: i32, %arg1: i32) -> (i32, i32) {
    %c0_i32 = arith.constant 0 : i32
    %c0_i32_0 = arith.constant 0 : i32
    %c0_i32_1 = arith.constant 0 : i32
    return %c0_i32, %c0_i32_0 : i32, i32
  }
  func.func @transform_2(%arg0: i32, %arg1: i32) -> (i32, i32) {
    %c0_i32 = arith.constant 0 : i32
    %c0_i32_0 = arith.constant 0 : i32
    %c0_i32_1 = arith.constant 0 : i32
    return %c0_i32, %c0_i32_0 : i32, i32
  }
  func.func @transform_3(%arg0: i32, %arg1: i32) -> (i32, i32) {
    %c0_i32 = arith.constant 0 : i32
    %c0_i32_0 = arith.constant 0 : i32
    %c0_i32_1 = arith.constant 0 : i32
    return %c0_i32, %c0_i32_0 : i32, i32
  }
  func.func @transform_4(%arg0: i32, %arg1: i32) -> (i32, i32, i32) {
    %0 = arith.muli %arg1, %arg0 : i32
    %c0_i32 = arith.constant 0 : i32
    %c0_i32_0 = arith.constant 0 : i32
    %c0_i32_1 = arith.constant 0 : i32
    return %0, %c0_i32, %c0_i32_0 : i32, i32, i32
  }
}

</mosaic_0001>

<bundles_post_ra>
// kernel: conv_bn_relu.1
= control target key start
LH: loop header
LB: loop body
LE: loop exit
PB: predicated region body
PF: predicated region fallthrough
CT: control target
= control target key end

     0   :  { %s5439_s15 = smov 0   ;;  %s5441_s16 = smov 0   ;;  %s8386_s0 = inlined_call_operand.vmem [shape: bf16[2,16,16,4], index: 0, kind: input, shape index: {}]   ;;  %s8387_s1 = inlined_call_operand.vmem [shape: bf16[36,8], index: 1, kind: input, shape index: {}]   ;;  %s8388_s2 = inlined_call_operand.vmem [shape: f32[1,8], index: 2, kind: input, shape index: {}]   ;;  %s8389_s3 = inlined_call_operand.vmem [shape: f32[1,8], index: 3, kind: input, shape index: {}]   ;;  %s8390_s4 = inlined_call_operand.vmem [shape: bf16[2,256,8], index: 4, kind: output, shape index: {}]  }
   0x1   :  { %s5443_s17 = smov 0  }
   0x2 LB: > { %s26_s18 = sadd.s32 1, %s5398_s16  ;;  %p5121_p0 = scmp.ge.s32.totalorder %s5402_s17, 1  ;;  %s5402_s17 = sphi %s5443_s17, %s14_s17   ;;  %s5398_s16 = sphi %s5441_s16, %s8395_s16   ;;  %s5394_s15 = sphi %s5439_s15, %s8394_s15  }
   0x3   : > { %p28_p1 = scmp.ge.s32.totalorder %s26_s18, 2  ;;  %p186_p2 = scmp.lt.s32.totalorder %s5402_s17, 3 }
   0x5   : > { %s8397_s18 = smov (%p28_p1, %s26_s18), 0  ;;  %p187_p3 = pnand %p5121_p0, %p186_p2 }
   0x6   : > { %p238_p4 = scmp.eq.s32.totalorder (!%p187_p3), %s5394_s15, 0 }
   0x7   : > { %190 = sbr.rel (%p187_p3) target bundleno = 1919 (0x77f), region = 36 }
   0xc   : > { %243 = sbr.rel (!%p238_p4) target bundleno = 122 (0x7a), region = 40  ;;  %vm244_vm0 = vcmask (%p238_p4), 64512   ;;  %vm246_vm1 = vcmask (%p238_p4), 31744   ;;  %v5404_v0 = vmov (%p238_p4), 0.0   ;;  %vm249_vm2 = vcmask (%p238_p4), 25600  }
   0xd   : > { %245 = vst.msk [vmem:[#allocation5] sm:$0xff] (%p238_p4), %vm244_vm0, %v5404_v0 }
   0xe   : > { %247 = vst.msk [vmem:[#allocation2] sm:$0xff] (%p238_p4), %vm246_vm1, %v5404_v0 }
   0xf   : > { %248 = vst.msk [vmem:[#allocation2 + $0x8] sm:$0xff] (%p238_p4), %vm246_vm1, %v5404_v0 }
  0x10   : > { %251 = vst.msk [vmem:[#allocation2 + $0x18] sm:$0xff] (%p238_p4), %vm246_vm1, %v5404_v0 }
  0x11   : > { %252 = vst.msk [vmem:[#allocation2 + $0x20] sm:$0xff] %vm246_vm1, %v5404_v0 }
  0x12   : > { %254 = vst.msk [vmem:[#allocation2 + $0x30] sm:$0xff] %vm246_vm1, %v5404_v0 }
  0x13   : > { %255 = vst.msk [vmem:[#allocation2 + $0x38] sm:$0xff] %vm246_vm1, %v5404_v0 }
  0x14   : > { %257 = vst.msk [vmem:[#allocation2 + $0x48] sm:$0xff] %vm246_vm1, %v5404_v0 }
  0x15   : > { %258 = vst.msk [vmem:[#allocation2 + $0x50] sm:$0xff] %vm246_vm1, %v5404_v0 }
  0x16   : > { %260 = vst.msk [vmem:[#allocation2 + $0x60] sm:$0xff] %vm246_vm1, %v5404_v0 }
  0x17   : > { %261 = vst.msk [vmem:[#allocation2 + $0x68] sm:$0xff] %vm246_vm1, %v5404_v0 }
  0x18   : > { %263 = vst.msk [vmem:[#allocation2 + $0x78] sm:$0xff] %vm246_vm1, %v5404_v0 }
  0x19   : > { %264 = vst.msk [vmem:[#allocation2 + $0x80] sm:$0xff] %vm246_vm1, %v5404_v0 }
  0x1a   : > { %266 = vst.msk [vmem:[#allocation2 + $0x90] sm:$0xff] %vm246_vm1, %v5404_v0 }
  0x1b   : > { %267 = vst.msk [vmem:[#allocation2 + $0x98] sm:$0xff] %vm246_vm1, %v5404_v0 }
  0x1c   : > { %269 = vst.msk [vmem:[#allocation2 + $0xa8] sm:$0xff] %vm246_vm1, %v5404_v0 }
  0x1d   : > { %270 = vst.msk [vmem:[#allocation2 + $0xb0] sm:$0xff] %vm246_vm1, %v5404_v0 }
  0x1e   : > { %272 = vst.msk [vmem:[#allocation2 + $0xc0] sm:$0xff] %vm246_vm1, %v5404_v0 }
  0x1f   : > { %273 = vst.msk [vmem:[#allocation2 + $0xc8] sm:$0xff] %vm246_vm1, %v5404_v0 }
  0x20   : > { %275 = vst.msk [vmem:[#allocation2 + $0xd8] sm:$0xff] %vm246_vm1, %v5404_v0 }
  0x21   : > { %276 = vst.msk [vmem:[#allocation2 + $0xe0] sm:$0xff] %vm246_vm1, %v5404_v0 }
  0x22   : > { %278 = vst.msk [vmem:[#allocation2 + $0xf0] sm:$0xff] %vm246_vm1, %v5404_v0 }
  0x23   : > { %279 = vst.msk [vmem:[#allocation2 + $0xf8] sm:$0xff] %vm246_vm1, %v5404_v0 }
  0x24   : > { %281 = vst.msk [vmem:[#allocation2 + $0x108] sm:$0xff] %vm246_vm1, %v5404_v0 }
  0x25   : > { %282 = vst.msk [vmem:[#allocation2 + $0x110] sm:$0xff] %vm246_vm1, %v5404_v0 }
  0x26   : > { %284 = vst.msk [vmem:[#allocation2 + $0x120] sm:$0xff] %vm246_vm1, %v5404_v0 }
  0x27   : > { %285 = vst.msk [vmem:[#allocation2 + $0x128] sm:$0xff] %vm246_vm1, %v5404_v0 }
  0x28   : > { %287 = vst.msk [vmem:[#allocation2 + $0x138] sm:$0xff] %vm246_vm1, %v5404_v0 }
  0x29   : > { %288 = vst.msk [vmem:[#allocation2 + $0x140] sm:$0xff] %vm246_vm1, %v5404_v0 }
  0x2a   : > { %290 = vst.msk [vmem:[#allocation2 + $0x150] sm:$0xff] %vm246_vm1, %v5404_v0 }
  0x2b   : > { %291 = vst.msk [vmem:[#allocation2 + $0x158] sm:$0xff] %vm246_vm1, %v5404_v0 }
  0x2c   : > { %293 = vst.msk [vmem:[#allocation2 + $0x168] sm:$0xff] %vm246_vm1, %v5404_v0 }
  0x2d   : > { %294 = vst.msk [vmem:[#allocation2 + $0x170] sm:$0xff] %vm246_vm1, %v5404_v0 }
  0x2e   : > { %296 = vst.msk [vmem:[#allocation2 + $0x180] sm:$0xff] %vm246_vm1, %v5404_v0 }
  0x2f   : > { %297 = vst.msk [vmem:[#allocation2 + $0x188] sm:$0xff] %vm246_vm1, %v5404_v0 }
  0x30   : > { %299 = vst.msk [vmem:[#allocation2 + $0x198] sm:$0xff] %vm246_vm1, %v5404_v0 }
  0x31   : > { %300 = vst.msk [vmem:[#allocation2 + $0x1a0] sm:$0xff] %vm246_vm1, %v5404_v0 }
  0x32   : > { %302 = vst.msk [vmem:[#allocation2 + $0x1b0] sm:$0xff] %vm246_vm1, %v5404_v0 }
  0x33   : > { %303 = vst.msk [vmem:[#allocation2 + $0x1b8] sm:$0xff] %vm246_vm1, %v5404_v0 }
  0x34   : > { %305 = vst.msk [vmem:[#allocation2 + $0x1c8] sm:$0xff] %vm246_vm1, %v5404_v0 }
  0x35   : > { %306 = vst.msk [vmem:[#allocation2 + $0x1d0] sm:$0xff] %vm246_vm1, %v5404_v0 }
  0x36   : > { %308 = vst.msk [vmem:[#allocation2 + $0x1e0] sm:$0xff] %vm246_vm1, %v5404_v0 }
  0x37   : > { %309 = vst.msk [vmem:[#allocation2 + $0x1e8] sm:$0xff] %vm246_vm1, %v5404_v0 }
  0x38   : > { %311 = vst.msk [vmem:[#allocation2 + $0x1f8] sm:$0xff] %vm246_vm1, %v5404_v0 }
  0x39   : > { %312 = vst.msk [vmem:[#allocation2 + $0x200] sm:$0xff] %vm246_vm1, %v5404_v0 }
  0x3a   : > { %314 = vst.msk [vmem:[#allocation2 + $0x210] sm:$0xff] %vm246_vm1, %v5404_v0 }
  0x3b   : > { %315 = vst.msk [vmem:[#allocation2 + $0x218] sm:$0xff] %vm246_vm1, %v5404_v0 }
  0x3c   : > { %317 = vst.msk [vmem:[#allocation2 + $0x228] sm:$0xff] %vm246_vm1, %v5404_v0 }
  0x3d   : > { %318 = vst.msk [vmem:[#allocation2 + $0x230] sm:$0xff] %vm246_vm1, %v5404_v0 }
  0x3e   : > { %320 = vst.msk [vmem:[#allocation2 + $0x240] sm:$0xff] %vm246_vm1, %v5404_v0 }
  0x3f   : > { %321 = vst.msk [vmem:[#allocation2 + $0x248] sm:$0xff] %vm246_vm1, %v5404_v0 }
  0x40   : > { %323 = vst.msk [vmem:[#allocation2 + $0x258] sm:$0xff] %vm246_vm1, %v5404_v0 }
  0x41   : > { %324 = vst.msk [vmem:[#allocation2 + $0x260] sm:$0xff] %vm246_vm1, %v5404_v0 }
  0x42   : > { %326 = vst.msk [vmem:[#allocation2 + $0x270] sm:$0xff] %vm246_vm1, %v5404_v0 }
  0x43   : > { %327 = vst.msk [vmem:[#allocation2 + $0x278] sm:$0xff] %vm246_vm1, %v5404_v0 }
  0x44   : > { %329 = vst.msk [vmem:[#allocation2 + $0x288] sm:$0xff] %vm246_vm1, %v5404_v0 }
  0x45   : > { %330 = vst.msk [vmem:[#allocation2 + $0x290] sm:$0xff] %vm246_vm1, %v5404_v0 }
  0x46   : > { %332 = vst.msk [vmem:[#allocation2 + $0x2a0] sm:$0xff] %vm246_vm1, %v5404_v0 }
  0x47   : > { %333 = vst.msk [vmem:[#allocation2 + $0x2a8] sm:$0xff] %vm246_vm1, %v5404_v0 }
  0x48   : > { %335 = vst.msk [vmem:[#allocation2 + $0x2b8] sm:$0xff] %vm246_vm1, %v5404_v0 }
  0x49   : > { %336 = vst.msk [vmem:[#allocation2 + $0x2c0] sm:$0xff] %vm246_vm1, %v5404_v0 }
  0x4a   : > { %338 = vst.msk [vmem:[#allocation2 + $0x2d0] sm:$0xff] %vm246_vm1, %v5404_v0 }
  0x4b   : > { %339 = vst.msk [vmem:[#allocation2 + $0x2d8] sm:$0xff] %vm246_vm1, %v5404_v0 }
  0x4c   : > { %341 = vst.msk [vmem:[#allocation2 + $0x2e8] sm:$0xff] %vm246_vm1, %v5404_v0 }
  0x4d   : > { %342 = vst.msk [vmem:[#allocation2 + $0x2f0] sm:$0xff] %vm246_vm1, %v5404_v0 }
  0x4e   : > { %344 = vst.msk [vmem:[#allocation2 + $0x300] sm:$0xff] %vm246_vm1, %v5404_v0 }
  0x4f   : > { %345 = vst.msk [vmem:[#allocation2 + $0x308] sm:$0xff] %vm246_vm1, %v5404_v0 }
  0x50   : > { %347 = vst.msk [vmem:[#allocation2 + $0x318] sm:$0xff] %vm246_vm1, %v5404_v0 }
  0x51   : > { %348 = vst.msk [vmem:[#allocation2 + $0x320] sm:$0xff] %vm246_vm1, %v5404_v0 }
  0x52   : > { %350 = vst.msk [vmem:[#allocation2 + $0x330] sm:$0xff] %vm246_vm1, %v5404_v0 }
  0x53   : > { %351 = vst.msk [vmem:[#allocation2 + $0x338] sm:$0xff] %vm246_vm1, %v5404_v0 }
  0x54   : > { %353 = vst.msk [vmem:[#allocation2 + $0x348] sm:$0xff] %vm246_vm1, %v5404_v0 }
  0x55   : > { %354 = vst.msk [vmem:[#allocation2 + $0x350] sm:$0xff] %vm246_vm1, %v5404_v0 }
  0x56   : > { %250 = vst.msk [vmem:[#allocation2 + $0x10] sm:$0x3] %vm249_vm2, %v5404_v0 }
  0x57   : > { %253 = vst.msk [vmem:[#allocation2 + $0x28] sm:$0x3] %vm249_vm2, %v5404_v0 }
  0x58   : > { %256 = vst.msk [vmem:[#allocation2 + $0x40] sm:$0x3] %vm249_vm2, %v5404_v0 }
  0x59   : > { %259 = vst.msk [vmem:[#allocation2 + $0x58] sm:$0x3] %vm249_vm2, %v5404_v0 }
  0x5a   : > { %262 = vst.msk [vmem:[#allocation2 + $0x70] sm:$0x3] %vm249_vm2, %v5404_v0 }
  0x5b   : > { %265 = vst.msk [vmem:[#allocation2 + $0x88] sm:$0x3] %vm249_vm2, %v5404_v0 }
  0x5c   : > { %268 = vst.msk [vmem:[#allocation2 + $0xa0] sm:$0x3] %vm249_vm2, %v5404_v0 }
  0x5d   : > { %271 = vst.msk [vmem:[#allocation2 + $0xb8] sm:$0x3] %vm249_vm2, %v5404_v0 }
  0x5e   : > { %274 = vst.msk [vmem:[#allocation2 + $0xd0] sm:$0x3] %vm249_vm2, %v5404_v0 }
  0x5f   : > { %277 = vst.msk [vmem:[#allocation2 + $0xe8] sm:$0x3] %vm249_vm2, %v5404_v0 }
  0x60   : > { %280 = vst.msk [vmem:[#allocation2 + $0x100] sm:$0x3] %vm249_vm2, %v5404_v0 }
  0x61   : > { %283 = vst.msk [vmem:[#allocation2 + $0x118] sm:$0x3] %vm249_vm2, %v5404_v0 }
  0x62   : > { %286 = vst.msk [vmem:[#allocation2 + $0x130] sm:$0x3] %vm249_vm2, %v5404_v0 }
  0x63   : > { %289 = vst.msk [vmem:[#allocation2 + $0x148] sm:$0x3] %vm249_vm2, %v5404_v0 }
  0x64   : > { %292 = vst.msk [vmem:[#allocation2 + $0x160] sm:$0x3] %vm249_vm2, %v5404_v0 }
  0x65   : > { %295 = vst.msk [vmem:[#allocation2 + $0x178] sm:$0x3] %vm249_vm2, %v5404_v0 }
  0x66   : > { %298 = vst.msk [vmem:[#allocation2 + $0x190] sm:$0x3] %vm249_vm2, %v5404_v0 }
  0x67   : > { %301 = vst.msk [vmem:[#allocation2 + $0x1a8] sm:$0x3] %vm249_vm2, %v5404_v0 }
  0x68   : > { %304 = vst.msk [vmem:[#allocation2 + $0x1c0] sm:$0x3] %vm249_vm2, %v5404_v0 }
  0x69   : > { %307 = vst.msk [vmem:[#allocation2 + $0x1d8] sm:$0x3] %vm249_vm2, %v5404_v0 }
  0x6a   : > { %310 = vst.msk [vmem:[#allocation2 + $0x1f0] sm:$0x3] %vm249_vm2, %v5404_v0 }
  0x6b   : > { %313 = vst.msk [vmem:[#allocation2 + $0x208] sm:$0x3] %vm249_vm2, %v5404_v0 }
  0x6c   : > { %316 = vst.msk [vmem:[#allocation2 + $0x220] sm:$0x3] %vm249_vm2, %v5404_v0 }
  0x6d   : > { %319 = vst.msk [vmem:[#allocation2 + $0x238] sm:$0x3] %vm249_vm2, %v5404_v0 }
  0x6e   : > { %322 = vst.msk [vmem:[#allocation2 + $0x250] sm:$0x3] %vm249_vm2, %v5404_v0 }
  0x6f   : > { %325 = vst.msk [vmem:[#allocation2 + $0x268] sm:$0x3] %vm249_vm2, %v5404_v0 }
  0x70   : > { %328 = vst.msk [vmem:[#allocation2 + $0x280] sm:$0x3] %vm249_vm2, %v5404_v0 }
  0x71   : > { %331 = vst.msk [vmem:[#allocation2 + $0x298] sm:$0x3] %vm249_vm2, %v5404_v0 }
  0x72   : > { %334 = vst.msk [vmem:[#allocation2 + $0x2b0] sm:$0x3] %vm249_vm2, %v5404_v0 }
  0x73   : > { %337 = vst.msk [vmem:[#allocation2 + $0x2c8] sm:$0x3] %vm249_vm2, %v5404_v0 }
  0x74   : > { %340 = vst.msk [vmem:[#allocation2 + $0x2e0] sm:$0x3] %vm249_vm2, %v5404_v0 }
  0x75   : > { %343 = vst.msk [vmem:[#allocation2 + $0x2f8] sm:$0x3] %vm249_vm2, %v5404_v0 }
  0x76   : > { %346 = vst.msk [vmem:[#allocation2 + $0x310] sm:$0x3] %vm249_vm2, %v5404_v0 }
  0x77   : > { %349 = vst.msk [vmem:[#allocation2 + $0x328] sm:$0x3] %vm249_vm2, %v5404_v0 }
  0x78   : > { %352 = vst.msk [vmem:[#allocation2 + $0x340] sm:$0x3] %vm249_vm2, %v5404_v0 }
  0x79   : > { %355 = vst.msk [vmem:[#allocation2 + $0x358] sm:$0x3] %vm249_vm2, %v5404_v0 }
  0x7a PF: > { %p5123_p5 = scmp.ne.s32.totalorder %s5394_s15, 0 }
  0x7c   : > { %358 = sbr.rel (%p5123_p5) target bundleno = 1801 (0x709), region = 44 }
  0x81   : > { %v681_v1 = vld [vmem:[#allocation2 + $0x1] sm:$0xff]  ;;  %vm488_vm3 = vcmask 31744   ;;  %s5405_s21 = smov 4   ;;  %v5303_v4 = vld [vmem:[%s8386_s0 + $0x10] sm:$0xff]   ;;  %v5304_v6 = vld [vmem:[%s8386_s0 + $0x18] sm:$0xff]   ;;  %vm1001_vm4 = vcmask 64544  }
  0x82   : > { %v5175_v2 = vld [vmem:[%s8386_s0] sm:$0xff]   ;;  %809 = vrot.lane.b32.xlu0 %v681_v1, %s5405_s21  ;;  %v5306_v7 = vld [vmem:[%s8386_s0 + $0x28] sm:$0xff]   ;;  %v5184_v8 = vunpack.c.l.bf16 %v5303_v4  ;;  %v5189_v9 = vunpack.c.h.bf16 %v5304_v6  ;;  %v5185_v11 = vunpack.c.h.bf16 %v5303_v4  ;;  %v5307_v14 = vld [vmem:[%s8386_s0 + $0x30] sm:$0xff]   ;;  %v5188_v25 = vunpack.c.l.bf16 %v5304_v6  ;;  %s5406_s12 = smov 8   ;;  %s5408_s22 = smov 16  }
  0x83   : > { %v5176_v3 = vunpack.c.l.bf16 %v5175_v2  ;;  %v5177_v5 = vunpack.c.h.bf16 %v5175_v2  ;;  %v5302_v10 = vld [vmem:[%s8386_s0 + $0x8] sm:$0xff]   ;;  %v5305_v12 = vld [vmem:[%s8386_s0 + $0x20] sm:$0xff]   ;;  %v5196_v13 = vunpack.c.l.bf16 %v5306_v7  ;;  %v5201_v18 = vunpack.c.h.bf16 %v5307_v14  ;;  %v5308_v22 = vld [vmem:[%s8386_s0 + $0x38] sm:$0xff]   ;;  %s5409_s23 = smov 20   ;;  %s5410_s24 = smov 24  }
  0x84   : > { %493 = vst.msk [vmem:[#allocation2 + $0x49] sm:$0xff] %vm488_vm3, %v5184_v8  ;;  %v5180_v15 = vunpack.c.l.bf16 %v5302_v10  ;;  %v682_v16 = vld [vmem:[#allocation2 + $0x9] sm:$0xff]  ;;  %v5192_v17 = vunpack.c.l.bf16 %v5305_v12  ;;  %v5309_v19 = vld [vmem:[%s8386_s0 + $0x40] sm:$0xff]   ;;  %v5181_v20 = vunpack.c.h.bf16 %v5302_v10  ;;  %v5197_v21 = vunpack.c.h.bf16 %v5306_v7  ;;  %v5312_v36 = vld [vmem:[%s8386_s0 + $0x58] sm:$0xff]   ;;  %s5411_s25 = smov 28   ;;  %s5412_s26 = smov 32  }
  0x85   : > { %489 = vst.msk [vmem:[#allocation2 + $0x19] sm:$0xff] %vm488_vm3, %v5176_v3  ;;  %v5208_v24 = vunpack.c.l.bf16 %v5309_v19  ;;  %v5204_v26 = vunpack.c.l.bf16 %v5308_v22  ;;  %v5310_v28 = vld [vmem:[%s8386_s0 + $0x48] sm:$0xff]   ;;  %v5193_v30 = vunpack.c.h.bf16 %v5305_v12  ;;  %v5209_v33 = vunpack.c.h.bf16 %v5309_v19  ;;  %v5311_v40 = vld [vmem:[%s8386_s0 + $0x50] sm:$0xff]   ;;  %v5313_v44 = vld [vmem:[%s8386_s0 + $0x60] sm:$0xff]  }
  0x86   : > { %490 = vst.msk [vmem:[#allocation2 + $0x21] sm:$0xff] %vm488_vm3, %v5177_v5  ;;  %v5213_v29 = vunpack.c.h.bf16 %v5310_v28  ;;  %v5220_v37 = vunpack.c.l.bf16 %v5312_v36  ;;  %v5200_v38 = vunpack.c.l.bf16 %v5307_v14  ;;  %v5216_v41 = vunpack.c.l.bf16 %v5311_v40  ;;  %v5315_v51 = vld [vmem:[%s8386_s0 + $0x70] sm:$0xff]   ;;  %v5314_v55 = vld [vmem:[%s8386_s0 + $0x68] sm:$0xff]   ;;  %v5317_v4 = vld [vmem:[%s8386_s0 + $0x80] sm:$0xff]  }
  0x87   : > { %496 = vst.msk [vmem:[#allocation2 + $0x69] sm:$0xff] %vm488_vm3, %v5189_v9  ;;  %v5225_v45 = vunpack.c.h.bf16 %v5313_v44  ;;  %v5205_v46 = vunpack.c.h.bf16 %v5308_v22  ;;  %v5221_v48 = vunpack.c.h.bf16 %v5312_v36  ;;  %v5232_v52 = vunpack.c.l.bf16 %v5315_v51  ;;  %v5318_v0 = vld [vmem:[%s8386_s0 + $0x88] sm:$0xff]   ;;  %v5319_v8 = vld [vmem:[%s8386_s0 + $0x90] sm:$0xff]  }
  0x88   : > { %494 = vst.msk [vmem:[#allocation2 + $0x51] sm:$0xff] %vm488_vm3, %v5185_v11  ;;  %v5212_v53 = vunpack.c.l.bf16 %v5310_v28  ;;  %v5228_v56 = vunpack.c.l.bf16 %v5314_v55  ;;  %v5217_v59 = vunpack.c.h.bf16 %v5311_v40  ;;  %v5233_v61 = vunpack.c.h.bf16 %v5315_v51  ;;  %v5804_v22 = vld [vmem:[%s8386_s0 + $0xa8] sm:$0xff]   ;;  %v714_v28 = vld [vmem:[#allocation2 + $0x1b9] sm:$0xff]  ;;  %v713_v40 = vld [vmem:[#allocation2 + $0x1b1] sm:$0xff] }
  0x89   : > { %499 = vst.msk [vmem:[#allocation2 + $0x91] sm:$0xff] %vm488_vm3, %v5196_v13  ;;  %v5244_v1 = vunpack.c.l.bf16 %v5318_v0  ;;  %v5224_v2 = vunpack.c.l.bf16 %v5313_v44  ;;  %v5240_v5 = vunpack.c.l.bf16 %v5317_v4  ;;  %v5249_v9 = vunpack.c.h.bf16 %v5319_v8  ;;  %v554_v36 = vld [vmem:[#allocation2 + $0x8] sm:$0xff]  ;;  %v5327_v51 = vld [vmem:[%s8386_s0 + $0xd0] sm:$0xff]  }
  0x8a   : > { %811 = vrot.lane.b32.xlu0 %v682_v16, %s5405_s21  ;;  %491 = vst.msk [vmem:[#allocation2 + $0x31] sm:$0xff] %vm488_vm3, %v5180_v15  ;;  %v5229_v10 = vunpack.c.h.bf16 %v5314_v55  ;;  %v5245_v12 = vunpack.c.h.bf16 %v5318_v0  ;;  %v5321_v15 = vld [vmem:[%s8386_s0 + $0xa0] sm:$0xff]   ;;  %v5860_v55 = vld [vmem:[%s8386_s0 + $0xc8] sm:$0xff]   ;;  %vm1386_vm5 = vcmask 97344   ;;  %vm1771_vm6 = vcmask 130144  }
  0x8b   : > { %497 = vst.msk [vmem:[#allocation2 + $0x79] sm:$0xff] %vm488_vm3, %v5192_v17  ;;  %v687_v27 = vld [vmem:[#allocation2 + $0x49] sm:$0xff]  ;;  %v5256_v16 = vunpack.c.l.bf16 %v5321_v15  ;;  %vm2156_vm7 = vcmask 162944   ;;  %vm2541_vm8 = vcmask 195744   ;;  %vm2927_vm9 = vcmask 228544  }
  0x8c   : > { %v683_v23 = vld [vmem:[#allocation2 + $0x19] sm:$0xff]  ;;  %502 = vst.msk [vmem:[#allocation2 + $0xb1] sm:$0xff] %vm488_vm3, %v5201_v18  ;;  %vm3975_vm10 = vcmask 1041408   ;;  %vm3312_vm11 = vcmask 261344   ;;  %vm3697_vm12 = vcmask 294144   ;;  %vm3878_vm13 = vcmask 293888  }
  0x8d   : > { %813 = vrot.lane.b32.xlu1 %v683_v23, %s5405_s21  ;;  %492 = vst.msk [vmem:[#allocation2 + $0x39] sm:$0xff] %vm488_vm3, %v5181_v20  ;;  %v684_v31 = vld [vmem:[#allocation2 + $0x21] sm:$0xff]  ;;  %v5320_v18 = vld [vmem:[%s8386_s0 + $0x98] sm:$0xff]   ;;  %v5261_v23 = vunpack.c.h.bf16 %v5804_v22  ;;  %vm4150_vm14 = vcmask 64512   ;;  %vm4552_vm15 = vcmask 60416   ;;  %vm4350_vm0 = vcmask 57344  }
  0x8e   : > { %500 = vst.msk [vmem:[#allocation2 + $0x99] sm:$0xff] %vm488_vm3, %v5197_v21  ;;  %v690_v34 = vld [vmem:[#allocation2 + $0x69] sm:$0xff]  ;;  %v5252_v19 = vunpack.c.l.bf16 %v5320_v18 }
  0x8f   : > { %505 = vst.msk [vmem:[#allocation2 + $0xd9] sm:$0xff] %vm488_vm3, %v5208_v24  ;;  %v688_v39 = vld [vmem:[#allocation2 + $0x51] sm:$0xff]  ;;  %v5241_v24 = vunpack.c.h.bf16 %v5317_v4 }
  0x90   : > { %495 = vst.msk [vmem:[#allocation2 + $0x61] sm:$0xff] %vm488_vm3, %v5188_v25  ;;  %v693_v42 = vld [vmem:[#allocation2 + $0x91] sm:$0xff] }
  0x91   : > { %v685_v32 = vld [vmem:[#allocation2 + $0x31] sm:$0xff]  ;;  %503 = vst.msk [vmem:[#allocation2 + $0xc1] sm:$0xff] %vm488_vm3, %v5204_v26  ;;  %v5257_v26 = vunpack.c.h.bf16 %v5321_v15 }
  0x92   : > { %821 = vrot.lane.b32.xlu0 %v687_v27, %s5405_s21  ;;  %817 = vrot.lane.b32.xlu2 %v685_v32, %s5405_s21  ;;  %508 = vst.msk [vmem:[#allocation2 + $0xf9] sm:$0xff] %vm488_vm3, %v5213_v29  ;;  %v691_v47 = vld [vmem:[#allocation2 + $0x79] sm:$0xff]  ;;  %v5248_v32 = vunpack.c.l.bf16 %v5319_v8  ;;  %v5281_v8 = vunpack.c.h.bf16 %v5327_v51 }
  0x93   : > { %498 = vst.msk [vmem:[#allocation2 + $0x81] sm:$0xff] %vm488_vm3, %v5193_v30  ;;  %v696_v49 = vld [vmem:[#allocation2 + $0xb1] sm:$0xff]  ;;  %v553_v27 = vld [vmem:[#allocation2] sm:$0xff] }
  0x94   : > { %506 = vst.msk [vmem:[#allocation2 + $0xe1] sm:$0xff] %vm488_vm3, %v5209_v33  ;;  %v686_v35 = vld [vmem:[#allocation2 + $0x39] sm:$0xff] }
  0x95   : > { %815 = vrot.lane.b32.xlu1 %v684_v31, %s5405_s21  ;;  %511 = vst.msk [vmem:[#allocation2 + $0x121] sm:$0xff] %vm488_vm3, %v5220_v37  ;;  %v694_v54 = vld [vmem:[#allocation2 + $0x99] sm:$0xff]  ;;  %v557_v37 = vld [vmem:[#allocation2 + $0x30] sm:$0xff] }
  0x96   : > { %501 = vst.msk [vmem:[#allocation2 + $0xa9] sm:$0xff] %vm488_vm3, %v5200_v38  ;;  %v699_v57 = vld [vmem:[#allocation2 + $0xd9] sm:$0xff] }
  0x97   : > { %509 = vst.msk [vmem:[#allocation2 + $0x109] sm:$0xff] %vm488_vm3, %v5216_v41  ;;  %v689_v43 = vld [vmem:[#allocation2 + $0x61] sm:$0xff]  ;;  %v5324_v30 = vld [vmem:[%s8386_s0 + $0xb8] sm:$0xff]  }
  0x98   : > { %514 = vst.msk [vmem:[#allocation2 + $0x141] sm:$0xff] %vm488_vm3, %v5225_v45  ;;  %v697_v60 = vld [vmem:[#allocation2 + $0xc1] sm:$0xff]  ;;  %v5268_v31 = vunpack.c.l.bf16 %v5324_v30  ;;  %v555_v38 = vld [vmem:[#allocation2 + $0x18] sm:$0xff]  ;;  %v5269_v45 = vunpack.c.h.bf16 %v5324_v30 }
  0x99   : > { %504 = vst.msk [vmem:[#allocation2 + $0xc9] sm:$0xff] %vm488_vm3, %v5205_v46  ;;  %v702_v62 = vld [vmem:[#allocation2 + $0xf9] sm:$0xff]  ;;  %v5843_v46 = vld [vmem:[#allocation2 + $0x48] sm:$0xff] }
  0x9a   : > { %827 = vrot.lane.b32.xlu0 %v690_v34, %s5405_s21  ;;  %819 = vrot.lane.b32.xlu2 %v686_v35, %s5405_s21  ;;  %512 = vst.msk [vmem:[#allocation2 + $0x129] sm:$0xff] %vm488_vm3, %v5221_v48  ;;  %v692_v50 = vld [vmem:[#allocation2 + $0x81] sm:$0xff]  ;;  %v5820_v34 = vld [vmem:[%s8386_s0 + $0xb0] sm:$0xff]  }
  0x9b   : > { %517 = vst.msk [vmem:[#allocation2 + $0x169] sm:$0xff] %vm488_vm3, %v5232_v52  ;;  %v700_v3 = vld [vmem:[#allocation2 + $0xe1] sm:$0xff]  ;;  %v5264_v35 = vunpack.c.l.bf16 %v5820_v34  ;;  %v5280_v52 = vunpack.c.l.bf16 %v5327_v51 }
  0x9c   : > { %507 = vst.msk [vmem:[#allocation2 + $0xf1] sm:$0xff] %vm488_vm3, %v5212_v53  ;;  %v705_v6 = vld [vmem:[#allocation2 + $0x121] sm:$0xff]  ;;  %v5260_v53 = vunpack.c.l.bf16 %v5804_v22 }
  0x9d   : > { %823 = vrot.lane.b32.xlu1 %v688_v39, %s5405_s21  ;;  %515 = vst.msk [vmem:[#allocation2 + $0x151] sm:$0xff] %vm488_vm3, %v5228_v56  ;;  %v695_v58 = vld [vmem:[#allocation2 + $0xa9] sm:$0xff]  ;;  %v5835_v41 = vld [vmem:[%s8386_s0 + $0xc0] sm:$0xff]  }
  0x9e   : > { %510 = vst.msk [vmem:[#allocation2 + $0x111] sm:$0xff] %vm488_vm3, %v5217_v59  ;;  %v703_v11 = vld [vmem:[#allocation2 + $0x109] sm:$0xff]  ;;  %v5848_v48 = vld [vmem:[#allocation2 + $0x20] sm:$0xff] }
  0x9f   : > { %518 = vst.msk [vmem:[#allocation2 + $0x171] sm:$0xff] %vm488_vm3, %v5233_v61  ;;  %v708_v13 = vld [vmem:[#allocation2 + $0x141] sm:$0xff]  ;;  %v5912_v15 = vld [vmem:[#allocation2 + $0xb0] sm:$0xff] }
  0xa0   : > { %v698_v63 = vld [vmem:[#allocation2 + $0xc9] sm:$0xff]  ;;  %523 = vst.msk [vmem:[#allocation2 + $0x1e1] sm:$0xff] %vm488_vm3, %v5244_v1  ;;  %v561_v59 = vld [vmem:[#allocation2 + $0x60] sm:$0xff]  ;;  %v5265_v1 = vunpack.c.h.bf16 %v5820_v34  ;;  %v5277_v34 = vunpack.c.h.bf16 %v5860_v55 }
  0xa1   : > { %513 = vst.msk [vmem:[#allocation2 + $0x139] sm:$0xff] %vm488_vm3, %v5224_v2  ;;  %v706_v17 = vld [vmem:[#allocation2 + $0x129] sm:$0xff] }
  0xa2   : > { %833 = vrot.lane.b32.xlu0 %v693_v42, %s5405_s21  ;;  %825 = vrot.lane.b32.xlu2 %v689_v43, %s5405_s21  ;;  %521 = vst.msk [vmem:[#allocation2 + $0x1c9] sm:$0xff] %vm488_vm3, %v5240_v5  ;;  %v711_v20 = vld [vmem:[#allocation2 + $0x169] sm:$0xff]  ;;  %v5273_v42 = vunpack.c.h.bf16 %v5835_v41  ;;  %v5253_v43 = vunpack.c.h.bf16 %v5320_v18 }
  0xa3   : > { %v701_v7 = vld [vmem:[#allocation2 + $0xf1] sm:$0xff]  ;;  %526 = vst.msk [vmem:[#allocation2 + $0x201] sm:$0xff] %vm488_vm3, %v5249_v9  ;;  %v5864_v56 = vld [vmem:[#allocation2 + $0x68] sm:$0xff] }
  0xa4   : > { %516 = vst.msk [vmem:[#allocation2 + $0x159] sm:$0xff] %vm488_vm3, %v5229_v10  ;;  %v709_v25 = vld [vmem:[#allocation2 + $0x151] sm:$0xff] }
  0xa5   : > { %829 = vrot.lane.b32.xlu1 %v691_v47, %s5405_s21  ;;  %524 = vst.msk [vmem:[#allocation2 + $0x1e9] sm:$0xff] %vm488_vm3, %v5245_v12  ;;  %v704_v14 = vld [vmem:[#allocation2 + $0x111] sm:$0xff] }
  0xa6   : > { %529 = vst.msk [vmem:[#allocation2 + $0x229] sm:$0xff] %vm488_vm3, %v5256_v16  ;;  %v712_v33 = vld [vmem:[#allocation2 + $0x171] sm:$0xff]  ;;  %v5920_v16 = vld [vmem:[%s8386_s0 + $0xe0] sm:$0xff]  }
  0xa7   : > { %527 = vst.msk [vmem:[#allocation2 + $0x211] sm:$0xff] %vm488_vm3, %v5252_v19  ;;  %v717_v39 = vld [vmem:[#allocation2 + $0x1e1] sm:$0xff]  ;;  %v558_v47 = vld [vmem:[#allocation2 + $0x38] sm:$0xff]  ;;  %v5288_v22 = vunpack.c.l.bf16 %v5920_v16 }
  0xa8   : > { %v707_v21 = vld [vmem:[#allocation2 + $0x139] sm:$0xff]  ;;  %532 = vst.msk [vmem:[#allocation2 + $0x249] sm:$0xff] %vm488_vm3, %v5261_v23  ;;  %v5925_v19 = vld [vmem:[#allocation2 + $0xa8] sm:$0xff] }
  0xa9   : > { %522 = vst.msk [vmem:[#allocation2 + $0x1d1] sm:$0xff] %vm488_vm3, %v5241_v24  ;;  %v715_v44 = vld [vmem:[#allocation2 + $0x1c9] sm:$0xff] }
  0xaa   : > { %839 = vrot.lane.b32.xlu0 %v696_v49, %s5405_s21  ;;  %831 = vrot.lane.b32.xlu2 %v692_v50, %s5405_s21  ;;  %530 = vst.msk [vmem:[#allocation2 + $0x231] sm:$0xff] %vm488_vm3, %v5257_v26  ;;  %v720_v49 = vld [vmem:[#allocation2 + $0x201] sm:$0xff] }
  0xab   : > { %617 = vst.msk [vmem:[#allocation3] sm:$0xff] %vm488_vm3, %v553_v27  ;;  %v710_v29 = vld [vmem:[#allocation2 + $0x159] sm:$0xff] }
  0xac   : > { %535 = vst.msk [vmem:[#allocation2 + $0x271] sm:$0xff] %vm488_vm3, %v5268_v31  ;;  %v5952_v31 = vld [vmem:[#allocation2 + $0xc8] sm:$0xff] }
  0xad   : > { %835 = vrot.lane.b32.xlu1 %v694_v54, %s5405_s21  ;;  %525 = vst.msk [vmem:[#allocation2 + $0x1f9] sm:$0xff] %vm488_vm3, %v5248_v32  ;;  %v718_v54 = vld [vmem:[#allocation2 + $0x1e9] sm:$0xff] }
  0xae   : > { %533 = vst.msk [vmem:[#allocation2 + $0x259] sm:$0xff] %vm488_vm3, %v5264_v35  ;;  %v723_v61 = vld [vmem:[#allocation2 + $0x229] sm:$0xff]  ;;  %v721_v2 = vld [vmem:[#allocation2 + $0x211] sm:$0xff] }
  0xaf   : > { %618 = vst.msk [vmem:[#allocation3 + $0x8] sm:$0xff] %vm488_vm3, %v554_v36  ;;  %v726_v9 = vld [vmem:[#allocation2 + $0x249] sm:$0xff] }
  0xb0   : > { %621 = vst.msk [vmem:[#allocation3 + $0x20] sm:$0xff] %vm488_vm3, %v557_v37  ;;  %v716_v50 = vld [vmem:[#allocation2 + $0x1d1] sm:$0xff] }
  0xb1   : > { %619 = vst.msk [vmem:[#allocation3 + $0x10] sm:$0xff] %vm488_vm3, %v555_v38 }
  0xb2   : > { %845 = vrot.lane.b32.xlu0 %v699_v57, %s5405_s21  ;;  %837 = vrot.lane.b32.xlu2 %v695_v58, %s5405_s21  ;;  %538 = vst.msk [vmem:[#allocation2 + $0x291] sm:$0xff] %vm488_vm3, %v5273_v42  ;;  %v5276_v58 = vunpack.c.l.bf16 %v5860_v55  ;;  %v5973_v42 = vld [vmem:[#allocation2 + $0xf0] sm:$0xff] }
  0xb3   : > { %528 = vst.msk [vmem:[#allocation2 + $0x219] sm:$0xff] %vm488_vm3, %v5253_v43  ;;  %v729_v23 = vld [vmem:[#allocation2 + $0x271] sm:$0xff] }
  0xb4   : > { %536 = vst.msk [vmem:[#allocation2 + $0x279] sm:$0xff] %vm488_vm3, %v5269_v45  ;;  %v5995_v55 = vld [vmem:[#allocation2 + $0x110] sm:$0xff] }
  0xb5   : > { %841 = vrot.lane.b32.xlu1 %v697_v60, %s5405_s21  ;;  %623 = vst.msk [vmem:[#allocation3 + $0x30] sm:$0xff] %vm488_vm3, %v5843_v46  ;;  %v5873_v60 = vld [vmem:[#allocation2 + $0x50] sm:$0xff]  ;;  %v727_v27 = vld [vmem:[#allocation2 + $0x259] sm:$0xff] }
  0xb6   : > { %622 = vst.msk [vmem:[#allocation3 + $0x28] sm:$0xff] %vm488_vm3, %v558_v47 }
  0xb7   : > { %620 = vst.msk [vmem:[#allocation3 + $0x18] sm:$0xff] %vm488_vm3, %v5848_v48 }
  0xb8   : > { %541 = vst.msk [vmem:[#allocation2 + $0x2b9] sm:$0xff] %vm488_vm3, %v5280_v52  ;;  %v5988_v52 = vld [vmem:[#allocation2 + $0x120] sm:$0xff] }
  0xb9   : > { %626 = vst.msk [vmem:[#allocation3 + $0x48] sm:$0xff] %vm488_vm3, %v5864_v56  ;;  %v732_v35 = vld [vmem:[#allocation2 + $0x291] sm:$0xff] }
  0xba   : > { %851 = vrot.lane.b32.xlu0 %v702_v62, %s5405_s21  ;;  %843 = vrot.lane.b32.xlu2 %v698_v63, %s5405_s21  ;;  %531 = vst.msk [vmem:[#allocation2 + $0x241] sm:$0xff] %vm488_vm3, %v5260_v53  ;;  %v719_v62 = vld [vmem:[#allocation2 + $0x1f9] sm:$0xff] }
  0xbb   : > { %625 = vst.msk [vmem:[#allocation3 + $0x40] sm:$0xff] %vm488_vm3, %v561_v59  ;;  %v5881_v63 = vld [vmem:[%s8386_s0 + $0xd8] sm:$0xff]  }
  0xbc   : > { %624 = vst.msk [vmem:[#allocation3 + $0x38] sm:$0xff] %vm488_vm3, %v5873_v60  ;;  %v5285_v0 = vunpack.c.h.bf16 %v5881_v63  ;;  %v722_v10 = vld [vmem:[#allocation2 + $0x219] sm:$0xff]  ;;  %v5284_v45 = vunpack.c.l.bf16 %v5881_v63 }
  0xbd   : > { %847 = vrot.lane.b32.xlu1 %v700_v3, %s5405_s21  ;;  %539 = vst.msk [vmem:[#allocation2 + $0x2a1] sm:$0xff] %vm488_vm3, %v5276_v58  ;;  %v5888_v3 = vld [vmem:[#allocation2 + $0x90] sm:$0xff]  ;;  %v730_v38 = vld [vmem:[#allocation2 + $0x279] sm:$0xff]  ;;  %v5998_v58 = vld [vmem:[#allocation2 + $0x108] sm:$0xff] }
  0xbe   : > { %544 = vst.msk [vmem:[#allocation2 + $0x2d9] sm:$0xff] %vm488_vm3, %v5285_v0  ;;  %v6008_v0 = vld [vmem:[#allocation2 + $0x140] sm:$0xff] }
  0xbf   : > { %629 = vst.msk [vmem:[#allocation3 + $0x60] sm:$0xff] %vm488_vm3, %v5888_v3  ;;  %v735_v47 = vld [vmem:[#allocation2 + $0x2b9] sm:$0xff] }
  0xc0   : > { %534 = vst.msk [vmem:[#allocation2 + $0x261] sm:$0xff] %vm488_vm3, %v5265_v1 }
  0xc1   : > { %542 = vst.msk [vmem:[#allocation2 + $0x2c1] sm:$0xff] %vm488_vm3, %v5281_v8  ;;  %v725_v24 = vld [vmem:[#allocation2 + $0x241] sm:$0xff] }
  0xc2   : > { %857 = vrot.lane.b32.xlu0 %v705_v6, %s5405_s21  ;;  %849 = vrot.lane.b32.xlu2 %v701_v7, %s5405_s21  ;;  %v5896_v6 = vld [vmem:[#allocation2 + $0x80] sm:$0xff]  ;;  %v5898_v7 = vld [vmem:[#allocation2 + $0x78] sm:$0xff]  ;;  %632 = vst.msk [vmem:[#allocation3 + $0x78] sm:$0xff] %vm488_vm3, %v5912_v15  ;;  %v6018_v8 = vld [vmem:[#allocation2 + $0x128] sm:$0xff] }
  0xc3   : > { %628 = vst.msk [vmem:[#allocation3 + $0x58] sm:$0xff] %vm488_vm3, %v5896_v6 }
  0xc4   : > { %627 = vst.msk [vmem:[#allocation3 + $0x50] sm:$0xff] %vm488_vm3, %v5898_v7  ;;  %v733_v51 = vld [vmem:[#allocation2 + $0x2a1] sm:$0xff] }
  0xc5   : > { %853 = vrot.lane.b32.xlu1 %v703_v11, %s5405_s21  ;;  %v5330_v11 = vld [vmem:[%s8386_s0 + $0xe8] sm:$0xff]   ;;  %631 = vst.msk [vmem:[#allocation3 + $0x70] sm:$0xff] %vm488_vm3, %v5925_v19  ;;  %v738_v59 = vld [vmem:[#allocation2 + $0x2d9] sm:$0xff] }
  0xc6   : > { %v5292_v12 = vunpack.c.l.bf16 %v5330_v11  ;;  %545 = vst.msk [vmem:[#allocation2 + $0x2e9] sm:$0xff] %vm488_vm3, %v5288_v22  ;;  %v5293_v37 = vunpack.c.h.bf16 %v5330_v11 }
  0xc7   : > { %v728_v36 = vld [vmem:[#allocation2 + $0x261] sm:$0xff]  ;;  %634 = vst.msk [vmem:[#allocation3 + $0x88] sm:$0xff] %vm488_vm3, %v5952_v31 }
  0xc8   : > { %547 = vst.msk [vmem:[#allocation2 + $0x301] sm:$0xff] %vm488_vm3, %v5292_v12  ;;  %v736_v63 = vld [vmem:[#allocation2 + $0x2c1] sm:$0xff] }
  0xc9   : > { %540 = vst.msk [vmem:[#allocation2 + $0x2a9] sm:$0xff] %vm488_vm3, %v5277_v34  ;;  %v6027_v12 = vld [vmem:[#allocation2 + $0x168] sm:$0xff] }
  0xca   : > { %863 = vrot.lane.b32.xlu0 %v708_v13, %s5405_s21  ;;  %855 = vrot.lane.b32.xlu2 %v704_v14, %s5405_s21  ;;  %v5272_v13 = vunpack.c.l.bf16 %v5835_v41  ;;  %v724_v14 = vld [vmem:[#allocation2 + $0x231] sm:$0xff]  ;;  %548 = vst.msk [vmem:[#allocation2 + $0x309] sm:$0xff] %vm488_vm3, %v5293_v37 }
  0xcb   : > { %637 = vst.msk [vmem:[#allocation3 + $0xa0] sm:$0xff] %vm488_vm3, %v5973_v42 }
  0xcc   : > { %537 = vst.msk [vmem:[#allocation2 + $0x289] sm:$0xff] %vm488_vm3, %v5272_v13 }
  0xcd   : > { %859 = vrot.lane.b32.xlu1 %v706_v17, %s5405_s21  ;;  %543 = vst.msk [vmem:[#allocation2 + $0x2d1] sm:$0xff] %vm488_vm3, %v5284_v45  ;;  %v739_v11 = vld [vmem:[#allocation2 + $0x2e9] sm:$0xff]  ;;  %v1071_v45 = vld [vmem:[#allocation2 + $0x3a] sm:$0xff] }
  0xce   : > { %641 = vst.msk [vmem:[#allocation3 + $0xc0] sm:$0xff] %vm488_vm3, %v5988_v52 }
  0xcf   : > { %640 = vst.msk [vmem:[#allocation3 + $0xb8] sm:$0xff] %vm488_vm3, %v5995_v55 }
  0xd0   : > { %639 = vst.msk [vmem:[#allocation3 + $0xb0] sm:$0xff] %vm488_vm3, %v5998_v58 }
  0xd1   : > { %644 = vst.msk [vmem:[#allocation3 + $0xd8] sm:$0xff] %vm488_vm3, %v6008_v0 }
  0xd2   : > { %869 = vrot.lane.b32.xlu0 %v711_v20, %s5405_s21  ;;  %861 = vrot.lane.b32.xlu2 %v707_v21, %s5405_s21  ;;  %v5928_v21 = vld [vmem:[#allocation2 + $0x98] sm:$0xff]  ;;  %642 = vst.msk [vmem:[#allocation3 + $0xc8] sm:$0xff] %vm488_vm3, %v6018_v8 }
  0xd3   : > { %630 = vst.msk [vmem:[#allocation3 + $0x68] sm:$0xff] %vm488_vm3, %v5928_v21 }
  0xd4   : > { %647 = vst.msk [vmem:[#allocation3 + $0xf0] sm:$0xff] %vm488_vm3, %v6027_v12 }
  0xd5   : > { %865 = vrot.lane.b32.xlu1 %v709_v25, %s5405_s21  ;;  %v5935_v25 = vld [vmem:[%s8386_s0 + $0xf0] sm:$0xff]  }
  0xd6   : > { %v5297_v26 = vunpack.c.h.bf16 %v5935_v25 }
  0xd8   : > { %550 = vst.msk [vmem:[#allocation2 + $0x321] sm:$0xff] %vm488_vm3, %v5297_v26 }
  0xda   : > { %875 = vrot.lane.b32.xlu0 %v714_v28, %s5405_s21  ;;  %867 = vrot.lane.b32.xlu2 %v710_v29, %s5405_s21  ;;  %v5944_v28 = vld [vmem:[#allocation2 + $0xd8] sm:$0xff] }
  0xdb   : > { %635 = vst.msk [vmem:[#allocation3 + $0x90] sm:$0xff] %vm488_vm3, %v5944_v28 }
  0xdd   : > { %871 = vrot.lane.b32.xlu1 %v712_v33, %s5405_s21  ;;  %v5955_v33 = vld [vmem:[#allocation2 + $0xc0] sm:$0xff] }
  0xde   : > { %633 = vst.msk [vmem:[#allocation3 + $0x80] sm:$0xff] %vm488_vm3, %v5955_v33 }
  0xe2   : > { %881 = vrot.lane.b32.xlu0 %v717_v39, %s5405_s21  ;;  %873 = vrot.lane.b32.xlu2 %v713_v40, %s5405_s21  ;;  %v5966_v39 = vld [vmem:[#allocation2 + $0xf8] sm:$0xff] }
  0xe3   : > { %638 = vst.msk [vmem:[#allocation3 + $0xa8] sm:$0xff] %vm488_vm3, %v5966_v39 }
  0xe5   : > { %877 = vrot.lane.b32.xlu1 %v715_v44, %s5405_s21  ;;  %v5976_v44 = vld [vmem:[#allocation2 + $0xe0] sm:$0xff] }
  0xe6   : > { %636 = vst.msk [vmem:[#allocation3 + $0x98] sm:$0xff] %vm488_vm3, %v5976_v44 }
  0xea   : > { %887 = vrot.lane.b32.xlu0 %v720_v49, %s5405_s21  ;;  %879 = vrot.lane.b32.xlu2 %v716_v50, %s5405_s21  ;;  %v731_v49 = vld [vmem:[#allocation2 + $0x289] sm:$0xff]  ;;  %v5289_v50 = vunpack.c.h.bf16 %v5920_v16  ;;  %v6033_v16 = vld [vmem:[#allocation2 + $0x158] sm:$0xff] }
  0xeb   : > { %646 = vst.msk [vmem:[#allocation3 + $0xe8] sm:$0xff] %vm488_vm3, %v6033_v16 }
  0xec   : > { %v818_v57 = vpop.permute.xlu2 %817  ;;  %546 = vst.msk [vmem:[#allocation2 + $0x2f1] sm:$0xff] %vm488_vm3, %v5289_v50  ;;  %v6075_v50 = vld [vmem:[#allocation2 + $0x200] sm:$0xff] }
  0xed   : > { %883 = vrot.lane.b32.xlu1 %v718_v54, %s5405_s21  ;;  %1006 = vst.msk [vmem:[#allocation3 + $0x20] sm:$0xff] %vm1001_vm4, %v818_v57 }
  0xee   : > { %656 = vst.msk [vmem:[#allocation3 + $0x138] sm:$0xff] %vm488_vm3, %v6075_v50 }
  0xf2   : > { %893 = vrot.lane.b32.xlu0 %v723_v61, %s5405_s21  ;;  %885 = vrot.lane.b32.xlu2 %v719_v62, %s5405_s21  ;;  %v734_v61 = vld [vmem:[#allocation2 + $0x2a9] sm:$0xff]  ;;  %v5296_v62 = vunpack.c.l.bf16 %v5935_v25 }
  0xf3   : > { %v740_v22 = vld [vmem:[#allocation2 + $0x2f1] sm:$0xff] }
  0xf4   : > { %v810_v4 = vpop.permute.xlu0 %809  ;;  %v820_v5 = vpop.permute.xlu2 %819  ;;  %549 = vst.msk [vmem:[#allocation2 + $0x319] sm:$0xff] %vm488_vm3, %v5296_v62  ;;  %v1070_v62 = vld [vmem:[#allocation2 + $0x32] sm:$0xff] }
  0xf5   : > { %889 = vrot.lane.b32.xlu1 %v721_v2, %s5405_s21  ;;  %1002 = vst.msk [vmem:[#allocation3] sm:$0xff] %vm1001_vm4, %v810_v4  ;;  %v6015_v4 = vld [vmem:[#allocation2 + $0x138] sm:$0xff] }
  0xf6   : > { %1007 = vst.msk [vmem:[#allocation3 + $0x28] sm:$0xff] %vm1001_vm4, %v820_v5 }
  0xf7   : > { %643 = vst.msk [vmem:[#allocation3 + $0xd0] sm:$0xff] %vm488_vm3, %v6015_v4 }
  0xfa   : > { %899 = vrot.lane.b32.xlu0 %v726_v9, %s5405_s21  ;;  %891 = vrot.lane.b32.xlu2 %v722_v10, %s5405_s21  ;;  %v741_v9 = vld [vmem:[#allocation2 + $0x301] sm:$0xff]  ;;  %v737_v10 = vld [vmem:[#allocation2 + $0x2d1] sm:$0xff] }
  0xfb   : > { %v743_v34 = vld [vmem:[#allocation2 + $0x319] sm:$0xff] }
  0xfc   : > { %v812_v17 = vpop.permute.xlu0 %811  ;;  %v826_v18 = vpop.permute.xlu2 %825 }
  0xfd   : > { %895 = vrot.lane.b32.xlu1 %v724_v14, %s5405_s21  ;;  %1003 = vst.msk [vmem:[#allocation3 + $0x8] sm:$0xff] %vm1001_vm4, %v812_v17 }
  0xfe   : > { %1010 = vst.msk [vmem:[#allocation3 + $0x40] sm:$0xff] %vm1001_vm4, %v826_v18  ;;  %v6036_v18 = vld [vmem:[#allocation2 + $0x150] sm:$0xff] }
  0xff   : > { %v814_v20 = vpop.permute.xlu1 %813  ;;  %645 = vst.msk [vmem:[#allocation3 + $0xe0] sm:$0xff] %vm488_vm3, %v6036_v18 }
 0x100   : > { %1004 = vst.msk [vmem:[#allocation3 + $0x10] sm:$0xff] %vm1001_vm4, %v814_v20  ;;  %v744_v20 = vld [vmem:[#allocation2 + $0x321] sm:$0xff] }
 0x102   : > { %905 = vrot.lane.b32.xlu0 %v729_v23, %s5405_s21  ;;  %897 = vrot.lane.b32.xlu2 %v725_v24, %s5405_s21  ;;  %v742_v23 = vld [vmem:[#allocation2 + $0x309] sm:$0xff]  ;;  %v586_v24 = vld [vmem:[#allocation2 + $0x1b8] sm:$0xff] }
 0x103   : > { %650 = vst.msk [vmem:[#allocation3 + $0x108] sm:$0xff] %vm488_vm3, %v586_v24  ;;  %v6117_v24 = vld [vmem:[#allocation2 + $0x240] sm:$0xff] }
 0x104   : > { %v822_v29 = vpop.permute.xlu0 %821  ;;  %v832_v30 = vpop.permute.xlu2 %831  ;;  %661 = vst.msk [vmem:[#allocation3 + $0x160] sm:$0xff] %vm488_vm3, %v6117_v24 }
 0x105   : > { %901 = vrot.lane.b32.xlu1 %v727_v27, %s5405_s21  ;;  %1008 = vst.msk [vmem:[#allocation3 + $0x30] sm:$0xff] %vm1001_vm4, %v822_v29  ;;  %v585_v27 = vld [vmem:[#allocation2 + $0x1b0] sm:$0xff] }
 0x106   : > { %1013 = vst.msk [vmem:[#allocation3 + $0x58] sm:$0xff] %vm1001_vm4, %v832_v30  ;;  %v6049_v30 = vld [vmem:[#allocation2 + $0x170] sm:$0xff] }
 0x107   : > { %v816_v32 = vpop.permute.xlu1 %815  ;;  %649 = vst.msk [vmem:[#allocation3 + $0x100] sm:$0xff] %vm488_vm3, %v585_v27  ;;  %v1080_v27 = vld [vmem:[#allocation2 + $0xaa] sm:$0xff] }
 0x108   : > { %1005 = vst.msk [vmem:[#allocation3 + $0x18] sm:$0xff] %vm1001_vm4, %v816_v32  ;;  %v1068_v32 = vld [vmem:[#allocation2 + $0x1a] sm:$0xff] }
 0x109   : > { %648 = vst.msk [vmem:[#allocation3 + $0xf8] sm:$0xff] %vm488_vm3, %v6049_v30 }
 0x10a   : > { %911 = vrot.lane.b32.xlu0 %v732_v35, %s5405_s21  ;;  %903 = vrot.lane.b32.xlu2 %v728_v36, %s5405_s21  ;;  %v1066_v35 = vld [vmem:[#allocation2 + $0x2] sm:$0xff] }
 0x10b   : > { %v6057_v36 = vld [vmem:[#allocation2 + $0x1e0] sm:$0xff] }
 0x10c   : > { %v828_v40 = vpop.permute.xlu0 %827  ;;  %v838_v41 = vpop.permute.xlu2 %837  ;;  %653 = vst.msk [vmem:[#allocation3 + $0x120] sm:$0xff] %vm488_vm3, %v6057_v36 }
 0x10d   : > { %907 = vrot.lane.b32.xlu1 %v730_v38, %s5405_s21  ;;  %1011 = vst.msk [vmem:[#allocation3 + $0x48] sm:$0xff] %vm1001_vm4, %v828_v40  ;;  %v6063_v40 = vld [vmem:[#allocation2 + $0x1d0] sm:$0xff] }
 0x10e   : > { %1016 = vst.msk [vmem:[#allocation3 + $0x70] sm:$0xff] %vm1001_vm4, %v838_v41 }
 0x10f   : > { %v824_v43 = vpop.permute.xlu1 %823  ;;  %652 = vst.msk [vmem:[#allocation3 + $0x118] sm:$0xff] %vm488_vm3, %v6063_v40 }
 0x110   : > { %1009 = vst.msk [vmem:[#allocation3 + $0x38] sm:$0xff] %vm1001_vm4, %v824_v43  ;;  %v6066_v43 = vld [vmem:[#allocation2 + $0x1c8] sm:$0xff] }
 0x111   : > { %651 = vst.msk [vmem:[#allocation3 + $0x110] sm:$0xff] %vm488_vm3, %v6066_v43 }
 0x112   : > { %917 = vrot.lane.b32.xlu0 %v735_v47, %s5405_s21  ;;  %909 = vrot.lane.b32.xlu2 %v731_v49, %s5405_s21  ;;  %v1067_v47 = vld [vmem:[#allocation2 + $0xa] sm:$0xff]  ;;  %v1069_v49 = vld [vmem:[#allocation2 + $0x22] sm:$0xff] }
 0x114   : > { %v834_v53 = vpop.permute.xlu0 %833  ;;  %v844_v54 = vpop.permute.xlu2 %843 }
 0x115   : > { %913 = vrot.lane.b32.xlu1 %v733_v51, %s5405_s21  ;;  %1014 = vst.msk [vmem:[#allocation3 + $0x60] sm:$0xff] %vm1001_vm4, %v834_v53 }
 0x116   : > { %1019 = vst.msk [vmem:[#allocation3 + $0x88] sm:$0xff] %vm1001_vm4, %v844_v54  ;;  %v6081_v54 = vld [vmem:[#allocation2 + $0x1f8] sm:$0xff] }
 0x117   : > { %v830_v57 = vpop.permute.xlu1 %829  ;;  %655 = vst.msk [vmem:[#allocation3 + $0x130] sm:$0xff] %vm488_vm3, %v6081_v54 }
 0x118   : > { %1012 = vst.msk [vmem:[#allocation3 + $0x50] sm:$0xff] %vm1001_vm4, %v830_v57 }
 0x11a   : > { %923 = vrot.lane.b32.xlu0 %v738_v59, %s5405_s21  ;;  %915 = vrot.lane.b32.xlu2 %v734_v61, %s5405_s21  ;;  %v6084_v59 = vld [vmem:[#allocation2 + $0x1e8] sm:$0xff] }
 0x11b   : > { %v1074_v61 = vld [vmem:[#allocation2 + $0x62] sm:$0xff]  ;;  %654 = vst.msk [vmem:[#allocation3 + $0x128] sm:$0xff] %vm488_vm3, %v6084_v59 }
 0x11c   : > { %v840_v1 = vpop.permute.xlu0 %839  ;;  %v850_v2 = vpop.permute.xlu2 %849 }
 0x11d   : > { %919 = vrot.lane.b32.xlu1 %v736_v63, %s5405_s21  ;;  %1017 = vst.msk [vmem:[#allocation3 + $0x78] sm:$0xff] %vm1001_vm4, %v840_v1  ;;  %v1072_v63 = vld [vmem:[#allocation2 + $0x4a] sm:$0xff] }
 0x11e   : > { %1022 = vst.msk [vmem:[#allocation3 + $0xa0] sm:$0xff] %vm1001_vm4, %v850_v2  ;;  %v6093_v1 = vld [vmem:[#allocation2 + $0x228] sm:$0xff] }
 0x11f   : > { %v836_v5 = vpop.permute.xlu1 %835  ;;  %659 = vst.msk [vmem:[#allocation3 + $0x150] sm:$0xff] %vm488_vm3, %v6093_v1 }
 0x120   : > { %1015 = vst.msk [vmem:[#allocation3 + $0x68] sm:$0xff] %vm1001_vm4, %v836_v5 }
 0x122   : > { %929 = vrot.lane.b32.xlu0 %v741_v9, %s5405_s21  ;;  %921 = vrot.lane.b32.xlu2 %v737_v10, %s5405_s21  ;;  %v6099_v9 = vld [vmem:[#allocation2 + $0x218] sm:$0xff] }
 0x123   : > { %658 = vst.msk [vmem:[#allocation3 + $0x148] sm:$0xff] %vm488_vm3, %v6099_v9 }
 0x124   : > { %v846_v13 = vpop.permute.xlu0 %845  ;;  %v856_v14 = vpop.permute.xlu2 %855 }
 0x125   : > { %925 = vrot.lane.b32.xlu1 %v739_v11, %s5405_s21  ;;  %1020 = vst.msk [vmem:[#allocation3 + $0x90] sm:$0xff] %vm1001_vm4, %v846_v13  ;;  %v6102_v11 = vld [vmem:[#allocation2 + $0x210] sm:$0xff]  ;;  %v1077_v13 = vld [vmem:[#allocation2 + $0x82] sm:$0xff] }
 0x126   : > { %1025 = vst.msk [vmem:[#allocation3 + $0xb8] sm:$0xff] %vm1001_vm4, %v856_v14  ;;  %v1073_v14 = vld [vmem:[#allocation2 + $0x52] sm:$0xff] }
 0x127   : > { %v842_v17 = vpop.permute.xlu1 %841  ;;  %657 = vst.msk [vmem:[#allocation3 + $0x140] sm:$0xff] %vm488_vm3, %v6102_v11 }
 0x128   : > { %1018 = vst.msk [vmem:[#allocation3 + $0x80] sm:$0xff] %vm1001_vm4, %v842_v17  ;;  %v1075_v17 = vld [vmem:[#allocation2 + $0x6a] sm:$0xff] }
 0x12a   : > { %935 = vrot.lane.b32.xlu0 %v744_v20, %s5405_s21  ;;  %927 = vrot.lane.b32.xlu2 %v740_v22, %s5405_s21  ;;  %v6111_v20 = vld [vmem:[#allocation2 + $0x248] sm:$0xff] }
 0x12b   : > { %662 = vst.msk [vmem:[#allocation3 + $0x168] sm:$0xff] %vm488_vm3, %v6111_v20 }
 0x12c   : > { %v852_v25 = vpop.permute.xlu0 %851  ;;  %v862_v26 = vpop.permute.xlu2 %861 }
 0x12d   : > { %931 = vrot.lane.b32.xlu1 %v742_v23, %s5405_s21  ;;  %1023 = vst.msk [vmem:[#allocation3 + $0xa8] sm:$0xff] %vm1001_vm4, %v852_v25 }
 0x12e   : > { %1028 = vst.msk [vmem:[#allocation3 + $0xd0] sm:$0xff] %vm1001_vm4, %v862_v26  ;;  %v6120_v26 = vld [vmem:[#allocation2 + $0x230] sm:$0xff] }
 0x12f   : > { %v848_v29 = vpop.permute.xlu1 %847  ;;  %660 = vst.msk [vmem:[#allocation3 + $0x158] sm:$0xff] %vm488_vm3, %v6120_v26 }
 0x130   : > { %1021 = vst.msk [vmem:[#allocation3 + $0x98] sm:$0xff] %vm1001_vm4, %v848_v29  ;;  %v1076_v29 = vld [vmem:[#allocation2 + $0x7a] sm:$0xff] }
 0x132   : > { %1198 = vrot.lane.b32.xlu0 %v1068_v32, %s5406_s12  ;;  %933 = vrot.lane.b32.xlu2 %v743_v34, %s5405_s21  ;;  %v1078_v32 = vld [vmem:[#allocation2 + $0x92] sm:$0xff]  ;;  %s5407_s21 = smov 12  }
 0x133   : > { %v6129_v34 = vld [vmem:[#allocation2 + $0x270] sm:$0xff] }
 0x134   : > { %v858_v37 = vpop.permute.xlu0 %857  ;;  %v868_v38 = vpop.permute.xlu2 %867  ;;  %665 = vst.msk [vmem:[#allocation3 + $0x180] sm:$0xff] %vm488_vm3, %v6129_v34 }
 0x135   : > { %1194 = vrot.lane.b32.xlu1 %v1066_v35, %s5406_s12  ;;  %1026 = vst.msk [vmem:[#allocation3 + $0xc0] sm:$0xff] %vm1001_vm4, %v858_v37 }
 0x136   : > { %1031 = vst.msk [vmem:[#allocation3 + $0xe8] sm:$0xff] %vm1001_vm4, %v868_v38  ;;  %v6135_v38 = vld [vmem:[#allocation2 + $0x260] sm:$0xff] }
 0x137   : > { %v854_v41 = vpop.permute.xlu1 %853  ;;  %664 = vst.msk [vmem:[#allocation3 + $0x178] sm:$0xff] %vm488_vm3, %v6135_v38 }
 0x138   : > { %1024 = vst.msk [vmem:[#allocation3 + $0xb0] sm:$0xff] %vm1001_vm4, %v854_v41 }
 0x13a   : > { %1204 = vrot.lane.b32.xlu0 %v1071_v45, %s5406_s12  ;;  %1196 = vrot.lane.b32.xlu2 %v1067_v47, %s5406_s12  ;;  %v6138_v45 = vld [vmem:[#allocation2 + $0x258] sm:$0xff]  ;;  %v1083_v47 = vld [vmem:[#allocation2 + $0xca] sm:$0xff] }
 0x13b   : > { %663 = vst.msk [vmem:[#allocation3 + $0x170] sm:$0xff] %vm488_vm3, %v6138_v45 }
 0x13c   : > { %v864_v51 = vpop.permute.xlu0 %863  ;;  %v874_v53 = vpop.permute.xlu2 %873 }
 0x13d   : > { %1200 = vrot.lane.b32.xlu1 %v1069_v49, %s5406_s12  ;;  %1029 = vst.msk [vmem:[#allocation3 + $0xd8] sm:$0xff] %vm1001_vm4, %v864_v51  ;;  %v1079_v49 = vld [vmem:[#allocation2 + $0x9a] sm:$0xff]  ;;  %v1081_v51 = vld [vmem:[#allocation2 + $0xb2] sm:$0xff] }
 0x13e   : > { %1034 = vst.msk [vmem:[#allocation3 + $0x100] sm:$0xff] %vm1001_vm4, %v874_v53  ;;  %v6147_v53 = vld [vmem:[#allocation2 + $0x290] sm:$0xff] }
 0x13f   : > { %v860_v57 = vpop.permute.xlu1 %859  ;;  %668 = vst.msk [vmem:[#allocation3 + $0x198] sm:$0xff] %vm488_vm3, %v6147_v53 }
 0x140   : > { %1027 = vst.msk [vmem:[#allocation3 + $0xc8] sm:$0xff] %vm1001_vm4, %v860_v57 }
 0x142   : > { %1210 = vrot.lane.b32.xlu0 %v1074_v61, %s5406_s12  ;;  %1202 = vrot.lane.b32.xlu2 %v1070_v62, %s5406_s12  ;;  %v6153_v62 = vld [vmem:[#allocation2 + $0x288] sm:$0xff] }
 0x143   : > { %667 = vst.msk [vmem:[#allocation3 + $0x190] sm:$0xff] %vm488_vm3, %v6153_v62 }
 0x144   : > { %v870_v2 = vpop.permute.xlu0 %869  ;;  %v880_v5 = vpop.permute.xlu2 %879 }
 0x145   : > { %1206 = vrot.lane.b32.xlu1 %v1072_v63, %s5406_s12  ;;  %1032 = vst.msk [vmem:[#allocation3 + $0xf0] sm:$0xff] %vm1001_vm4, %v870_v2  ;;  %v6156_v2 = vld [vmem:[#allocation2 + $0x278] sm:$0xff] }
 0x146   : > { %1037 = vst.msk [vmem:[#allocation3 + $0x118] sm:$0xff] %vm1001_vm4, %v880_v5  ;;  %v1086_v5 = vld [vmem:[#allocation2 + $0xf2] sm:$0xff] }
 0x147   : > { %v866_v10 = vpop.permute.xlu1 %865  ;;  %666 = vst.msk [vmem:[#allocation3 + $0x188] sm:$0xff] %vm488_vm3, %v6156_v2 }
 0x148   : > { %1030 = vst.msk [vmem:[#allocation3 + $0xe0] sm:$0xff] %vm1001_vm4, %v866_v10  ;;  %v1082_v10 = vld [vmem:[#allocation2 + $0xc2] sm:$0xff] }
 0x14a   : > { %1216 = vrot.lane.b32.xlu0 %v1077_v13, %s5406_s12  ;;  %1208 = vrot.lane.b32.xlu2 %v1073_v14, %s5406_s12  ;;  %v1084_v13 = vld [vmem:[#allocation2 + $0xda] sm:$0xff] }
 0x14b   : > { %v6165_v14 = vld [vmem:[#allocation2 + $0x2b8] sm:$0xff] }
 0x14c   : > { %v876_v22 = vpop.permute.xlu0 %875  ;;  %v886_v23 = vpop.permute.xlu2 %885  ;;  %671 = vst.msk [vmem:[#allocation3 + $0x1b0] sm:$0xff] %vm488_vm3, %v6165_v14 }
 0x14d   : > { %1212 = vrot.lane.b32.xlu1 %v1075_v17, %s5406_s12  ;;  %1035 = vst.msk [vmem:[#allocation3 + $0x108] sm:$0xff] %vm1001_vm4, %v876_v22 }
 0x14e   : > { %1040 = vst.msk [vmem:[#allocation3 + $0x130] sm:$0xff] %vm1001_vm4, %v886_v23  ;;  %v6171_v23 = vld [vmem:[#allocation2 + $0x2a8] sm:$0xff] }
 0x14f   : > { %v872_v25 = vpop.permute.xlu1 %871  ;;  %670 = vst.msk [vmem:[#allocation3 + $0x1a8] sm:$0xff] %vm488_vm3, %v6171_v23 }
 0x150   : > { %1033 = vst.msk [vmem:[#allocation3 + $0xf8] sm:$0xff] %vm1001_vm4, %v872_v25 }
 0x152   : > { %1222 = vrot.lane.b32.xlu0 %v1080_v27, %s5406_s12  ;;  %1214 = vrot.lane.b32.xlu2 %v1076_v29, %s5406_s12  ;;  %v6174_v27 = vld [vmem:[#allocation2 + $0x2a0] sm:$0xff]  ;;  %v1089_v29 = vld [vmem:[#allocation2 + $0x112] sm:$0xff] }
 0x153   : > { %669 = vst.msk [vmem:[#allocation3 + $0x1a0] sm:$0xff] %vm488_vm3, %v6174_v27 }
 0x154   : > { %v882_v35 = vpop.permute.xlu0 %881  ;;  %v892_v37 = vpop.permute.xlu2 %891 }
 0x155   : > { %1218 = vrot.lane.b32.xlu1 %v1078_v32, %s5406_s12  ;;  %1038 = vst.msk [vmem:[#allocation3 + $0x120] sm:$0xff] %vm1001_vm4, %v882_v35  ;;  %v1085_v32 = vld [vmem:[#allocation2 + $0xe2] sm:$0xff]  ;;  %v1087_v35 = vld [vmem:[#allocation2 + $0xfa] sm:$0xff] }
 0x156   : > { %1043 = vst.msk [vmem:[#allocation3 + $0x148] sm:$0xff] %vm1001_vm4, %v892_v37  ;;  %v6183_v37 = vld [vmem:[#allocation2 + $0x2d8] sm:$0xff] }
 0x157   : > { %v878_v41 = vpop.permute.xlu1 %877  ;;  %674 = vst.msk [vmem:[#allocation3 + $0x1c8] sm:$0xff] %vm488_vm3, %v6183_v37 }
 0x158   : > { %1036 = vst.msk [vmem:[#allocation3 + $0x110] sm:$0xff] %vm1001_vm4, %v878_v41 }
 0x15a   : > { %1228 = vrot.lane.b32.xlu0 %v1083_v47, %s5406_s12  ;;  %1220 = vrot.lane.b32.xlu2 %v1079_v49, %s5406_s12  ;;  %v6189_v49 = vld [vmem:[#allocation2 + $0x2d0] sm:$0xff] }
 0x15b   : > { %673 = vst.msk [vmem:[#allocation3 + $0x1c0] sm:$0xff] %vm488_vm3, %v6189_v49 }
 0x15c   : > { %v888_v57 = vpop.permute.xlu0 %887  ;;  %v898_v61 = vpop.permute.xlu2 %897 }
 0x15d   : > { %1224 = vrot.lane.b32.xlu1 %v1081_v51, %s5406_s12  ;;  %1041 = vst.msk [vmem:[#allocation3 + $0x138] sm:$0xff] %vm1001_vm4, %v888_v57  ;;  %v6192_v57 = vld [vmem:[#allocation2 + $0x2c0] sm:$0xff] }
 0x15e   : > { %1046 = vst.msk [vmem:[#allocation3 + $0x160] sm:$0xff] %vm1001_vm4, %v898_v61  ;;  %v1092_v61 = vld [vmem:[#allocation2 + $0x13a] sm:$0xff] }
 0x15f   : > { %v884_v63 = vpop.permute.xlu1 %883  ;;  %672 = vst.msk [vmem:[#allocation3 + $0x1b8] sm:$0xff] %vm488_vm3, %v6192_v57 }
 0x160   : > { %1039 = vst.msk [vmem:[#allocation3 + $0x128] sm:$0xff] %vm1001_vm4, %v884_v63  ;;  %v1088_v63 = vld [vmem:[#allocation2 + $0x10a] sm:$0xff] }
 0x162   : > { %1234 = vrot.lane.b32.xlu0 %v1086_v5, %s5406_s12  ;;  %1226 = vrot.lane.b32.xlu2 %v1082_v10, %s5406_s12  ;;  %v1090_v5 = vld [vmem:[#allocation2 + $0x122] sm:$0xff] }
 0x163   : > { %v6201_v10 = vld [vmem:[#allocation2 + $0x300] sm:$0xff] }
 0x164   : > { %v894_v17 = vpop.permute.xlu0 %893  ;;  %v904_v22 = vpop.permute.xlu2 %903  ;;  %677 = vst.msk [vmem:[#allocation3 + $0x1e0] sm:$0xff] %vm488_vm3, %v6201_v10 }
 0x165   : > { %1230 = vrot.lane.b32.xlu1 %v1084_v13, %s5406_s12  ;;  %1044 = vst.msk [vmem:[#allocation3 + $0x150] sm:$0xff] %vm1001_vm4, %v894_v17 }
 0x166   : > { %1049 = vst.msk [vmem:[#allocation3 + $0x178] sm:$0xff] %vm1001_vm4, %v904_v22  ;;  %v6207_v22 = vld [vmem:[#allocation2 + $0x2f0] sm:$0xff] }
 0x167   : > { %v890_v25 = vpop.permute.xlu1 %889  ;;  %676 = vst.msk [vmem:[#allocation3 + $0x1d8] sm:$0xff] %vm488_vm3, %v6207_v22 }
 0x168   : > { %1042 = vst.msk [vmem:[#allocation3 + $0x140] sm:$0xff] %vm1001_vm4, %v890_v25 }
 0x16a   : > { %1240 = vrot.lane.b32.xlu0 %v1089_v29, %s5406_s12  ;;  %1232 = vrot.lane.b32.xlu2 %v1085_v32, %s5406_s12  ;;  %v6210_v29 = vld [vmem:[#allocation2 + $0x2e8] sm:$0xff]  ;;  %v1095_v32 = vld [vmem:[#allocation2 + $0x15a] sm:$0xff] }
 0x16b   : > { %675 = vst.msk [vmem:[#allocation3 + $0x1d0] sm:$0xff] %vm488_vm3, %v6210_v29 }
 0x16c   : > { %v900_v41 = vpop.permute.xlu0 %899  ;;  %v910_v47 = vpop.permute.xlu2 %909 }
 0x16d   : > { %1236 = vrot.lane.b32.xlu1 %v1087_v35, %s5406_s12  ;;  %1047 = vst.msk [vmem:[#allocation3 + $0x168] sm:$0xff] %vm1001_vm4, %v900_v41  ;;  %v1091_v35 = vld [vmem:[#allocation2 + $0x12a] sm:$0xff]  ;;  %v1093_v41 = vld [vmem:[#allocation2 + $0x142] sm:$0xff] }
 0x16e   : > { %1052 = vst.msk [vmem:[#allocation3 + $0x190] sm:$0xff] %vm1001_vm4, %v910_v47  ;;  %v6219_v47 = vld [vmem:[#allocation2 + $0x320] sm:$0xff] }
 0x16f   : > { %v896_v51 = vpop.permute.xlu1 %895  ;;  %680 = vst.msk [vmem:[#allocation3 + $0x1f8] sm:$0xff] %vm488_vm3, %v6219_v47 }
 0x170   : > { %1045 = vst.msk [vmem:[#allocation3 + $0x158] sm:$0xff] %vm1001_vm4, %v896_v51 }
 0x172   : > { %1246 = vrot.lane.b32.xlu0 %v1092_v61, %s5406_s12  ;;  %1238 = vrot.lane.b32.xlu2 %v1088_v63, %s5406_s12  ;;  %v6225_v63 = vld [vmem:[#allocation2 + $0x318] sm:$0xff] }
 0x173   : > { %8392 = vst [vmem:[#allocation6_spill] sm:$0xff] %v6225_v63 }
 0x174   : > { %v906_v13 = vpop.permute.xlu0 %905  ;;  %v916_v17 = vpop.permute.xlu2 %915  ;;  %679 = vst.msk [vmem:[#allocation3 + $0x1f0] sm:$0xff] %vm488_vm3, %v6225_v63  ;;  %v1099_v63 = vld [vmem:[#allocation2 + $0x1ba] sm:$0xff] }
 0x175   : > { %1242 = vrot.lane.b32.xlu1 %v1090_v5, %s5406_s12  ;;  %1050 = vst.msk [vmem:[#allocation3 + $0x180] sm:$0xff] %vm1001_vm4, %v906_v13  ;;  %v6228_v13 = vld [vmem:[#allocation2 + $0x308] sm:$0xff] }
 0x176   : > { %1055 = vst.msk [vmem:[#allocation3 + $0x1a8] sm:$0xff] %vm1001_vm4, %v916_v17  ;;  %v1098_v17 = vld [vmem:[#allocation2 + $0x1b2] sm:$0xff] }
 0x177   : > { %v902_v25 = vpop.permute.xlu1 %901  ;;  %678 = vst.msk [vmem:[#allocation3 + $0x1e8] sm:$0xff] %vm488_vm3, %v6228_v13 }
 0x178   : > { %1048 = vst.msk [vmem:[#allocation3 + $0x170] sm:$0xff] %vm1001_vm4, %v902_v25  ;;  %v1094_v25 = vld [vmem:[#allocation2 + $0x152] sm:$0xff] }
 0x17a   : > { %1252 = vrot.lane.b32.xlu0 %v1095_v32, %s5406_s12  ;;  %1244 = vrot.lane.b32.xlu2 %v1091_v35, %s5406_s12  ;;  %v1096_v32 = vld [vmem:[#allocation2 + $0x16a] sm:$0xff] }
 0x17c   : > { %v912_v51 = vpop.permute.xlu0 %911  ;;  %v922_v61 = vpop.permute.xlu2 %921 }
 0x17d   : > { %1248 = vrot.lane.b32.xlu1 %v1093_v41, %s5406_s12  ;;  %1053 = vst.msk [vmem:[#allocation3 + $0x198] sm:$0xff] %vm1001_vm4, %v912_v51 }
 0x17e   : > { %1058 = vst.msk [vmem:[#allocation3 + $0x1c0] sm:$0xff] %vm1001_vm4, %v922_v61  ;;  %v1101_v61 = vld [vmem:[#allocation2 + $0x1d2] sm:$0xff] }
 0x17f   : > { %v908_v5 = vpop.permute.xlu1 %907 }
 0x180   : > { %1051 = vst.msk [vmem:[#allocation3 + $0x188] sm:$0xff] %vm1001_vm4, %v908_v5  ;;  %v1097_v5 = vld [vmem:[#allocation2 + $0x172] sm:$0xff] }
 0x182   : > { %1258 = vrot.lane.b32.xlu0 %v1098_v17, %s5406_s12  ;;  %1250 = vrot.lane.b32.xlu2 %v1094_v25, %s5406_s12 }
 0x184   : > { %v918_v35 = vpop.permute.xlu0 %917  ;;  %v928_v41 = vpop.permute.xlu2 %927 }
 0x185   : > { %1254 = vrot.lane.b32.xlu1 %v1096_v32, %s5406_s12  ;;  %1056 = vst.msk [vmem:[#allocation3 + $0x1b0] sm:$0xff] %vm1001_vm4, %v918_v35  ;;  %v1104_v35 = vld [vmem:[#allocation2 + $0x1fa] sm:$0xff] }
 0x186   : > { %1061 = vst.msk [vmem:[#allocation3 + $0x1d8] sm:$0xff] %vm1001_vm4, %v928_v41  ;;  %v1100_v41 = vld [vmem:[#allocation2 + $0x1ca] sm:$0xff] }
 0x187   : > { %v914_v51 = vpop.permute.xlu1 %913 }
 0x188   : > { %1054 = vst.msk [vmem:[#allocation3 + $0x1a0] sm:$0xff] %vm1001_vm4, %v914_v51  ;;  %v1102_v51 = vld [vmem:[#allocation2 + $0x1e2] sm:$0xff] }
 0x18a   : > { %1264 = vrot.lane.b32.xlu0 %v1101_v61, %s5406_s12  ;;  %1256 = vrot.lane.b32.xlu2 %v1097_v5, %s5406_s12 }
 0x18c   : > { %v924_v17 = vpop.permute.xlu0 %923  ;;  %v934_v25 = vpop.permute.xlu2 %933 }
 0x18d   : > { %1260 = vrot.lane.b32.xlu1 %v1099_v63, %s5406_s12  ;;  %1059 = vst.msk [vmem:[#allocation3 + $0x1c8] sm:$0xff] %vm1001_vm4, %v924_v17  ;;  %v1107_v17 = vld [vmem:[#allocation2 + $0x21a] sm:$0xff] }
 0x18e   : > { %1064 = vst.msk [vmem:[#allocation3 + $0x1f0] sm:$0xff] %vm1001_vm4, %v934_v25  ;;  %v1103_v25 = vld [vmem:[#allocation2 + $0x1ea] sm:$0xff] }
 0x18f   : > { %v920_v32 = vpop.permute.xlu1 %919 }
 0x190   : > { %1057 = vst.msk [vmem:[#allocation3 + $0x1b8] sm:$0xff] %vm1001_vm4, %v920_v32  ;;  %v1105_v32 = vld [vmem:[#allocation2 + $0x202] sm:$0xff] }
 0x192   : > { %1270 = vrot.lane.b32.xlu0 %v1104_v35, %s5406_s12  ;;  %1262 = vrot.lane.b32.xlu2 %v1100_v41, %s5406_s12 }
 0x194   : > { %v930_v61 = vpop.permute.xlu0 %929  ;;  %v1197_v5 = vpop.permute.xlu2 %1196 }
 0x195   : > { %1266 = vrot.lane.b32.xlu1 %v1102_v51, %s5406_s12  ;;  %1062 = vst.msk [vmem:[#allocation3 + $0x1e0] sm:$0xff] %vm1001_vm4, %v930_v61  ;;  %v1110_v61 = vld [vmem:[#allocation2 + $0x242] sm:$0xff] }
 0x196   : > { %1388 = vst.msk [vmem:[#allocation3 + $0x8] sm:$0xff] %vm1386_vm5, %v1197_v5  ;;  %v1106_v5 = vld [vmem:[#allocation2 + $0x212] sm:$0xff] }
 0x197   : > { %v926_v63 = vpop.permute.xlu1 %925 }
 0x198   : > { %1060 = vst.msk [vmem:[#allocation3 + $0x1d0] sm:$0xff] %vm1001_vm4, %v926_v63  ;;  %v1108_v63 = vld [vmem:[#allocation2 + $0x22a] sm:$0xff] }
 0x19a   : > { %1276 = vrot.lane.b32.xlu0 %v1107_v17, %s5406_s12  ;;  %1268 = vrot.lane.b32.xlu2 %v1103_v25, %s5406_s12 }
 0x19c   : > { %v936_v35 = vpop.permute.xlu0 %935  ;;  %v1203_v41 = vpop.permute.xlu2 %1202 }
 0x19d   : > { %1272 = vrot.lane.b32.xlu1 %v1105_v32, %s5406_s12  ;;  %1065 = vst.msk [vmem:[#allocation3 + $0x1f8] sm:$0xff] %vm1001_vm4, %v936_v35  ;;  %v1113_v35 = vld [vmem:[#allocation2 + $0x262] sm:$0xff] }
 0x19e   : > { %1391 = vst.msk [vmem:[#allocation3 + $0x20] sm:$0xff] %vm1386_vm5, %v1203_v41  ;;  %v1109_v41 = vld [vmem:[#allocation2 + $0x232] sm:$0xff] }
 0x19f   : > { %v932_v51 = vpop.permute.xlu1 %931 }
 0x1a0   : > { %1063 = vst.msk [vmem:[#allocation3 + $0x1e8] sm:$0xff] %vm1001_vm4, %v932_v51  ;;  %v1111_v51 = vld [vmem:[#allocation2 + $0x24a] sm:$0xff] }
 0x1a2   : > { %1282 = vrot.lane.b32.xlu0 %v1110_v61, %s5406_s12  ;;  %1274 = vrot.lane.b32.xlu2 %v1106_v5, %s5406_s12 }
 0x1a4   : > { %v1199_v17 = vpop.permute.xlu0 %1198  ;;  %v1209_v25 = vpop.permute.xlu2 %1208 }
 0x1a5   : > { %1278 = vrot.lane.b32.xlu1 %v1108_v63, %s5406_s12  ;;  %1389 = vst.msk [vmem:[#allocation3 + $0x10] sm:$0xff] %vm1386_vm5, %v1199_v17  ;;  %v1116_v17 = vld [vmem:[#allocation2 + $0x28a] sm:$0xff] }
 0x1a6   : > { %1394 = vst.msk [vmem:[#allocation3 + $0x38] sm:$0xff] %vm1386_vm5, %v1209_v25  ;;  %v1112_v25 = vld [vmem:[#allocation2 + $0x25a] sm:$0xff] }
 0x1a7   : > { %v1195_v32 = vpop.permute.xlu1 %1194 }
 0x1a8   : > { %1387 = vst.msk [vmem:[#allocation3] sm:$0xff] %vm1386_vm5, %v1195_v32  ;;  %v1114_v32 = vld [vmem:[#allocation2 + $0x272] sm:$0xff] }
 0x1aa   : > { %1288 = vrot.lane.b32.xlu0 %v1113_v35, %s5406_s12  ;;  %1280 = vrot.lane.b32.xlu2 %v1109_v41, %s5406_s12 }
 0x1ac   : > { %v1205_v61 = vpop.permute.xlu0 %1204  ;;  %v1215_v5 = vpop.permute.xlu2 %1214 }
 0x1ad   : > { %1284 = vrot.lane.b32.xlu1 %v1111_v51, %s5406_s12  ;;  %1392 = vst.msk [vmem:[#allocation3 + $0x28] sm:$0xff] %vm1386_vm5, %v1205_v61  ;;  %v1119_v61 = vld [vmem:[#allocation2 + $0x2aa] sm:$0xff] }
 0x1ae   : > { %1397 = vst.msk [vmem:[#allocation3 + $0x50] sm:$0xff] %vm1386_vm5, %v1215_v5  ;;  %v1115_v5 = vld [vmem:[#allocation2 + $0x27a] sm:$0xff] }
 0x1af   : > { %v1201_v63 = vpop.permute.xlu1 %1200 }
 0x1b0   : > { %1390 = vst.msk [vmem:[#allocation3 + $0x18] sm:$0xff] %vm1386_vm5, %v1201_v63  ;;  %v1117_v63 = vld [vmem:[#allocation2 + $0x292] sm:$0xff] }
 0x1b2   : > { %1294 = vrot.lane.b32.xlu0 %v1116_v17, %s5406_s12  ;;  %1286 = vrot.lane.b32.xlu2 %v1112_v25, %s5406_s12 }
 0x1b4   : > { %v1211_v35 = vpop.permute.xlu0 %1210  ;;  %v1221_v41 = vpop.permute.xlu2 %1220 }
 0x1b5   : > { %1290 = vrot.lane.b32.xlu1 %v1114_v32, %s5406_s12  ;;  %1395 = vst.msk [vmem:[#allocation3 + $0x40] sm:$0xff] %vm1386_vm5, %v1211_v35  ;;  %v1122_v35 = vld [vmem:[#allocation2 + $0x2d2] sm:$0xff] }
 0x1b6   : > { %1400 = vst.msk [vmem:[#allocation3 + $0x68] sm:$0xff] %vm1386_vm5, %v1221_v41  ;;  %v1118_v41 = vld [vmem:[#allocation2 + $0x2a2] sm:$0xff] }
 0x1b7   : > { %v1207_v51 = vpop.permute.xlu1 %1206 }
 0x1b8   : > { %1393 = vst.msk [vmem:[#allocation3 + $0x30] sm:$0xff] %vm1386_vm5, %v1207_v51  ;;  %v1120_v51 = vld [vmem:[#allocation2 + $0x2ba] sm:$0xff] }
 0x1ba   : > { %1300 = vrot.lane.b32.xlu0 %v1119_v61, %s5406_s12  ;;  %1292 = vrot.lane.b32.xlu2 %v1115_v5, %s5406_s12 }
 0x1bc   : > { %v1217_v17 = vpop.permute.xlu0 %1216  ;;  %v1227_v25 = vpop.permute.xlu2 %1226 }
 0x1bd   : > { %1296 = vrot.lane.b32.xlu1 %v1117_v63, %s5406_s12  ;;  %1398 = vst.msk [vmem:[#allocation3 + $0x58] sm:$0xff] %vm1386_vm5, %v1217_v17  ;;  %v1125_v17 = vld [vmem:[#allocation2 + $0x2f2] sm:$0xff] }
 0x1be   : > { %1403 = vst.msk [vmem:[#allocation3 + $0x80] sm:$0xff] %vm1386_vm5, %v1227_v25  ;;  %v1121_v25 = vld [vmem:[#allocation2 + $0x2c2] sm:$0xff] }
 0x1bf   : > { %v1213_v32 = vpop.permute.xlu1 %1212 }
 0x1c0   : > { %1396 = vst.msk [vmem:[#allocation3 + $0x48] sm:$0xff] %vm1386_vm5, %v1213_v32  ;;  %v1123_v32 = vld [vmem:[#allocation2 + $0x2da] sm:$0xff] }
 0x1c2   : > { %1306 = vrot.lane.b32.xlu0 %v1122_v35, %s5406_s12  ;;  %1298 = vrot.lane.b32.xlu2 %v1118_v41, %s5406_s12 }
 0x1c4   : > { %v1223_v61 = vpop.permute.xlu0 %1222  ;;  %v1233_v5 = vpop.permute.xlu2 %1232 }
 0x1c5   : > { %1302 = vrot.lane.b32.xlu1 %v1120_v51, %s5406_s12  ;;  %1401 = vst.msk [vmem:[#allocation3 + $0x70] sm:$0xff] %vm1386_vm5, %v1223_v61  ;;  %v1128_v61 = vld [vmem:[#allocation2 + $0x31a] sm:$0xff] }
 0x1c6   : > { %1406 = vst.msk [vmem:[#allocation3 + $0x98] sm:$0xff] %vm1386_vm5, %v1233_v5  ;;  %v1124_v5 = vld [vmem:[#allocation2 + $0x2ea] sm:$0xff] }
 0x1c7   : > { %v1219_v63 = vpop.permute.xlu1 %1218 }
 0x1c8   : > { %1399 = vst.msk [vmem:[#allocation3 + $0x60] sm:$0xff] %vm1386_vm5, %v1219_v63  ;;  %v1126_v63 = vld [vmem:[#allocation2 + $0x302] sm:$0xff] }
 0x1ca   : > { %1312 = vrot.lane.b32.xlu0 %v1125_v17, %s5406_s12  ;;  %1304 = vrot.lane.b32.xlu2 %v1121_v25, %s5406_s12 }
 0x1cc   : > { %v1229_v35 = vpop.permute.xlu0 %1228  ;;  %v1239_v41 = vpop.permute.xlu2 %1238 }
 0x1cd   : > { %1308 = vrot.lane.b32.xlu1 %v1123_v32, %s5406_s12  ;;  %1404 = vst.msk [vmem:[#allocation3 + $0x88] sm:$0xff] %vm1386_vm5, %v1229_v35  ;;  %v1127_v35 = vld [vmem:[#allocation2 + $0x30a] sm:$0xff] }
 0x1ce   : > { %1409 = vst.msk [vmem:[#allocation3 + $0xb0] sm:$0xff] %vm1386_vm5, %v1239_v41  ;;  %v1129_v41 = vld [vmem:[#allocation2 + $0x322] sm:$0xff] }
 0x1cf   : > { %v1225_v51 = vpop.permute.xlu1 %1224 }
 0x1d0   : > { %1402 = vst.msk [vmem:[#allocation3 + $0x78] sm:$0xff] %vm1386_vm5, %v1225_v51 }
 0x1d2   : > { %1318 = vrot.lane.b32.xlu0 %v1128_v61, %s5406_s12  ;;  %1310 = vrot.lane.b32.xlu2 %v1124_v5, %s5406_s12 }
 0x1d4   : > { %v1235_v17 = vpop.permute.xlu0 %1234  ;;  %v1245_v25 = vpop.permute.xlu2 %1244 }
 0x1d5   : > { %1314 = vrot.lane.b32.xlu1 %v1126_v63, %s5406_s12  ;;  %1407 = vst.msk [vmem:[#allocation3 + $0xa0] sm:$0xff] %vm1386_vm5, %v1235_v17  ;;  %v1451_v63 = vld [vmem:[#allocation2 + $0x18] sm:$0xff]  ;;  %v1453_v17 = vld [vmem:[#allocation2 + $0x30] sm:$0xff] }
 0x1d6   : > { %1412 = vst.msk [vmem:[#allocation3 + $0xc8] sm:$0xff] %vm1386_vm5, %v1245_v25 }
 0x1d7   : > { %v1231_v32 = vpop.permute.xlu1 %1230 }
 0x1d8   : > { %1405 = vst.msk [vmem:[#allocation3 + $0x90] sm:$0xff] %vm1386_vm5, %v1231_v32 }
 0x1da   : > { %1581 = vrot.lane.b32.xlu0 %v5848_v48, %s5407_s21  ;;  %1316 = vrot.lane.b32.xlu2 %v1127_v35, %s5406_s12  ;;  %v1454_v35 = vld [vmem:[#allocation2 + $0x38] sm:$0xff] }
 0x1dc   : > { %v1241_v51 = vpop.permute.xlu0 %1240  ;;  %v1251_v61 = vpop.permute.xlu2 %1250 }
 0x1dd   : > { %1320 = vrot.lane.b32.xlu1 %v1129_v41, %s5406_s12  ;;  %1410 = vst.msk [vmem:[#allocation3 + $0xb8] sm:$0xff] %vm1386_vm5, %v1241_v51 }
 0x1de   : > { %1415 = vst.msk [vmem:[#allocation3 + $0xe0] sm:$0xff] %vm1386_vm5, %v1251_v61  ;;  %v1457_v61 = vld [vmem:[#allocation2 + $0x60] sm:$0xff] }
 0x1df   : > { %v1237_v5 = vpop.permute.xlu1 %1236 }
 0x1e0   : > { %1408 = vst.msk [vmem:[#allocation3 + $0xa8] sm:$0xff] %vm1386_vm5, %v1237_v5 }
 0x1e2   : > { %1587 = vrot.lane.b32.xlu0 %v5843_v46, %s5407_s21  ;;  %1579 = vrot.lane.b32.xlu2 %v1451_v63, %s5407_s21 }
 0x1e4   : > { %v1247_v48 = vpop.permute.xlu0 %1246  ;;  %v1257_v25 = vpop.permute.xlu2 %1256 }
 0x1e5   : > { %1583 = vrot.lane.b32.xlu1 %v1453_v17, %s5407_s21  ;;  %1413 = vst.msk [vmem:[#allocation3 + $0xd0] sm:$0xff] %vm1386_vm5, %v1247_v48  ;;  %v5316_v17 = vld [vmem:[%s8386_s0 + $0x78] sm:$0xff]  }
 0x1e6   : > { %1418 = vst.msk [vmem:[#allocation3 + $0xf8] sm:$0xff] %vm1386_vm5, %v1257_v25  ;;  %v5237_v48 = vunpack.c.h.bf16 %v5316_v17 }
 0x1e7   : > { %v1243_v32 = vpop.permute.xlu1 %1242 }
 0x1e8   : > { %1411 = vst.msk [vmem:[#allocation3 + $0xc0] sm:$0xff] %vm1386_vm5, %v1243_v32 }
 0x1e9   : > { %520 = vst.msk [vmem:[#allocation2 + $0x189] sm:$0xff] %vm488_vm3, %v5237_v48 }
 0x1ea   : > { %1593 = vrot.lane.b32.xlu0 %v5864_v56, %s5407_s21  ;;  %1585 = vrot.lane.b32.xlu2 %v1454_v35, %s5407_s21 }
 0x1ec   : > { %v1253_v46 = vpop.permute.xlu0 %1252  ;;  %v1263_v41 = vpop.permute.xlu2 %1262 }
 0x1ed   : > { %1589 = vrot.lane.b32.xlu1 %v5873_v60, %s5407_s21  ;;  %1416 = vst.msk [vmem:[#allocation3 + $0xe8] sm:$0xff] %vm1386_vm5, %v1253_v46 }
 0x1ee   : > { %1421 = vst.msk [vmem:[#allocation3 + $0x110] sm:$0xff] %vm1386_vm5, %v1263_v41 }
 0x1ef   : > { %v1249_v51 = vpop.permute.xlu1 %1248 }
 0x1f0   : > { %1414 = vst.msk [vmem:[#allocation3 + $0xd8] sm:$0xff] %vm1386_vm5, %v1249_v51  ;;  %v5332_v51 = vld [vmem:[%s8386_s0 + $0xf8] sm:$0xff]  }
 0x1f2   : > { %1599 = vrot.lane.b32.xlu0 %v5888_v3, %s5407_s21  ;;  %1591 = vrot.lane.b32.xlu2 %v1457_v61, %s5407_s21 }
 0x1f4   : > { %v1259_v56 = vpop.permute.xlu0 %1258  ;;  %v1269_v5 = vpop.permute.xlu2 %1268 }
 0x1f5   : > { %1595 = vrot.lane.b32.xlu1 %v5898_v7, %s5407_s21  ;;  %1419 = vst.msk [vmem:[#allocation3 + $0x100] sm:$0xff] %vm1386_vm5, %v1259_v56  ;;  %v5301_v56 = vunpack.c.h.bf16 %v5332_v51 }
 0x1f6   : > { %1424 = vst.msk [vmem:[#allocation3 + $0x128] sm:$0xff] %vm1386_vm5, %v1269_v5  ;;  %v1836_v5 = vld [vmem:[#allocation2 + $0x19] sm:$0xff] }
 0x1f7   : > { %v1255_v60 = vpop.permute.xlu1 %1254  ;;  %552 = vst.msk [vmem:[#allocation2 + $0x339] sm:$0xff] %vm488_vm3, %v5301_v56 }
 0x1f8   : > { %1417 = vst.msk [vmem:[#allocation3 + $0xf0] sm:$0xff] %vm1386_vm5, %v1255_v60 }
 0x1fa   : > { %1605 = vrot.lane.b32.xlu0 %v5912_v15, %s5407_s21  ;;  %1597 = vrot.lane.b32.xlu2 %v5896_v6, %s5407_s21  ;;  %v5236_v15 = vunpack.c.l.bf16 %v5316_v17  ;;  %v1837_v17 = vld [vmem:[#allocation2 + $0x21] sm:$0xff] }
 0x1fc   : > { %v1265_v3 = vpop.permute.xlu0 %1264  ;;  %v1275_v63 = vpop.permute.xlu2 %1274  ;;  %519 = vst.msk [vmem:[#allocation2 + $0x181] sm:$0xff] %vm488_vm3, %v5236_v15 }
 0x1fd   : > { %1601 = vrot.lane.b32.xlu1 %v5928_v21, %s5407_s21  ;;  %1422 = vst.msk [vmem:[#allocation3 + $0x118] sm:$0xff] %vm1386_vm5, %v1265_v3 }
 0x1fe   : > { %1427 = vst.msk [vmem:[#allocation3 + $0x140] sm:$0xff] %vm1386_vm5, %v1275_v63  ;;  %v1839_v63 = vld [vmem:[#allocation2 + $0x39] sm:$0xff] }
 0x1ff   : > { %v1261_v7 = vpop.permute.xlu1 %1260 }
 0x200   : > { %1420 = vst.msk [vmem:[#allocation3 + $0x108] sm:$0xff] %vm1386_vm5, %v1261_v7 }
 0x202   : > { %1611 = vrot.lane.b32.xlu0 %v5944_v28, %s5407_s21  ;;  %1603 = vrot.lane.b32.xlu2 %v5925_v19, %s5407_s21 }
 0x203   : > { %v1482_v32 = vld [vmem:[#allocation2 + $0x188] sm:$0xff]  ;;  %v1481_v35 = vld [vmem:[#allocation2 + $0x180] sm:$0xff] }
 0x204   : > { %v1271_v6 = vpop.permute.xlu0 %1270  ;;  %v1281_v21 = vpop.permute.xlu2 %1280 }
 0x205   : > { %1607 = vrot.lane.b32.xlu1 %v5955_v33, %s5407_s21  ;;  %1425 = vst.msk [vmem:[#allocation3 + $0x130] sm:$0xff] %vm1386_vm5, %v1271_v6 }
 0x206   : > { %1430 = vst.msk [vmem:[#allocation3 + $0x158] sm:$0xff] %vm1386_vm5, %v1281_v21  ;;  %v1842_v21 = vld [vmem:[#allocation2 + $0x61] sm:$0xff] }
 0x207   : > { %v1267_v25 = vpop.permute.xlu1 %1266 }
 0x208   : > { %1423 = vst.msk [vmem:[#allocation3 + $0x120] sm:$0xff] %vm1386_vm5, %v1267_v25  ;;  %v1838_v25 = vld [vmem:[#allocation2 + $0x31] sm:$0xff] }
 0x20a   : > { %1617 = vrot.lane.b32.xlu0 %v5966_v39, %s5407_s21  ;;  %1609 = vrot.lane.b32.xlu2 %v5952_v31, %s5407_s21 }
 0x20c   : > { %v1277_v19 = vpop.permute.xlu0 %1276  ;;  %v1287_v28 = vpop.permute.xlu2 %1286 }
 0x20d   : > { %1613 = vrot.lane.b32.xlu1 %v5976_v44, %s5407_s21  ;;  %1428 = vst.msk [vmem:[#allocation3 + $0x148] sm:$0xff] %vm1386_vm5, %v1277_v19  ;;  %v1840_v19 = vld [vmem:[#allocation2 + $0x49] sm:$0xff] }
 0x20e   : > { %1433 = vst.msk [vmem:[#allocation3 + $0x170] sm:$0xff] %vm1386_vm5, %v1287_v28 }
 0x20f   : > { %v1273_v33 = vpop.permute.xlu1 %1272 }
 0x210   : > { %1426 = vst.msk [vmem:[#allocation3 + $0x138] sm:$0xff] %vm1386_vm5, %v1273_v33 }
 0x212   : > { %1623 = vrot.lane.b32.xlu0 %v5988_v52, %s5407_s21  ;;  %1615 = vrot.lane.b32.xlu2 %v5973_v42, %s5407_s21 }
 0x214   : > { %v1283_v39 = vpop.permute.xlu0 %1282  ;;  %v1293_v31 = vpop.permute.xlu2 %1292 }
 0x215   : > { %1619 = vrot.lane.b32.xlu1 %v5998_v58, %s5407_s21  ;;  %1431 = vst.msk [vmem:[#allocation3 + $0x160] sm:$0xff] %vm1386_vm5, %v1283_v39 }
 0x216   : > { %1436 = vst.msk [vmem:[#allocation3 + $0x188] sm:$0xff] %vm1386_vm5, %v1293_v31  ;;  %v1845_v31 = vld [vmem:[#allocation2 + $0x81] sm:$0xff] }
 0x217   : > { %v1279_v44 = vpop.permute.xlu1 %1278 }
 0x218   : > { %1429 = vst.msk [vmem:[#allocation3 + $0x150] sm:$0xff] %vm1386_vm5, %v1279_v44  ;;  %v1841_v44 = vld [vmem:[#allocation2 + $0x51] sm:$0xff] }
 0x21a   : > { %1629 = vrot.lane.b32.xlu0 %v6008_v0, %s5407_s21  ;;  %1621 = vrot.lane.b32.xlu2 %v5995_v55, %s5407_s21 }
 0x21c   : > { %v1289_v52 = vpop.permute.xlu0 %1288  ;;  %v1299_v42 = vpop.permute.xlu2 %1298 }
 0x21d   : > { %1625 = vrot.lane.b32.xlu1 %v6018_v8, %s5407_s21  ;;  %1434 = vst.msk [vmem:[#allocation3 + $0x178] sm:$0xff] %vm1386_vm5, %v1289_v52  ;;  %v1843_v52 = vld [vmem:[#allocation2 + $0x69] sm:$0xff] }
 0x21e   : > { %1439 = vst.msk [vmem:[#allocation3 + $0x1a0] sm:$0xff] %vm1386_vm5, %v1299_v42 }
 0x21f   : > { %v1285_v58 = vpop.permute.xlu1 %1284 }
 0x220   : > { %1432 = vst.msk [vmem:[#allocation3 + $0x168] sm:$0xff] %vm1386_vm5, %v1285_v58 }
 0x222   : > { %1635 = vrot.lane.b32.xlu0 %v6027_v12, %s5407_s21  ;;  %1627 = vrot.lane.b32.xlu2 %v6015_v4, %s5407_s21 }
 0x224   : > { %v1295_v0 = vpop.permute.xlu0 %1294  ;;  %v1305_v55 = vpop.permute.xlu2 %1304 }
 0x225   : > { %1631 = vrot.lane.b32.xlu1 %v6036_v18, %s5407_s21  ;;  %1437 = vst.msk [vmem:[#allocation3 + $0x190] sm:$0xff] %vm1386_vm5, %v1295_v0 }
 0x226   : > { %1442 = vst.msk [vmem:[#allocation3 + $0x1b8] sm:$0xff] %vm1386_vm5, %v1305_v55  ;;  %v1848_v55 = vld [vmem:[#allocation2 + $0xa9] sm:$0xff] }
 0x227   : > { %v1291_v8 = vpop.permute.xlu1 %1290 }
 0x228   : > { %1435 = vst.msk [vmem:[#allocation3 + $0x180] sm:$0xff] %vm1386_vm5, %v1291_v8  ;;  %v1844_v8 = vld [vmem:[#allocation2 + $0x79] sm:$0xff] }
 0x22a   : > { %1641 = vrot.lane.b32.xlu0 %v1482_v32, %s5407_s21  ;;  %1633 = vrot.lane.b32.xlu2 %v6033_v16, %s5407_s21  ;;  %v1846_v32 = vld [vmem:[#allocation2 + $0x91] sm:$0xff] }
 0x22c   : > { %v1301_v12 = vpop.permute.xlu0 %1300  ;;  %v1311_v4 = vpop.permute.xlu2 %1310 }
 0x22d   : > { %1637 = vrot.lane.b32.xlu1 %v6049_v30, %s5407_s21  ;;  %1440 = vst.msk [vmem:[#allocation3 + $0x1a8] sm:$0xff] %vm1386_vm5, %v1301_v12 }
 0x22e   : > { %1445 = vst.msk [vmem:[#allocation3 + $0x1d0] sm:$0xff] %vm1386_vm5, %v1311_v4 }
 0x22f   : > { %v1297_v18 = vpop.permute.xlu1 %1296 }
 0x230   : > { %1438 = vst.msk [vmem:[#allocation3 + $0x198] sm:$0xff] %vm1386_vm5, %v1297_v18 }
 0x232   : > { %1647 = vrot.lane.b32.xlu0 %v6057_v36, %s5407_s21  ;;  %1639 = vrot.lane.b32.xlu2 %v1481_v35, %s5407_s21  ;;  %v1851_v35 = vld [vmem:[#allocation2 + $0xc9] sm:$0xff] }
 0x234   : > { %v1307_v46 = vpop.permute.xlu0 %1306  ;;  %v1317_v16 = vpop.permute.xlu2 %1316 }
 0x235   : > { %1643 = vrot.lane.b32.xlu1 %v6066_v43, %s5407_s21  ;;  %1443 = vst.msk [vmem:[#allocation3 + $0x1c0] sm:$0xff] %vm1386_vm5, %v1307_v46  ;;  %v1847_v46 = vld [vmem:[#allocation2 + $0x99] sm:$0xff] }
 0x236   : > { %1448 = vst.msk [vmem:[#allocation3 + $0x1e8] sm:$0xff] %vm1386_vm5, %v1317_v16  ;;  %v1849_v16 = vld [vmem:[#allocation2 + $0xb1] sm:$0xff] }
 0x237   : > { %v1303_v30 = vpop.permute.xlu1 %1302 }
 0x238   : > { %1441 = vst.msk [vmem:[#allocation3 + $0x1b0] sm:$0xff] %vm1386_vm5, %v1303_v30 }
 0x23a   : > { %1653 = vrot.lane.b32.xlu0 %v6075_v50, %s5407_s21  ;;  %1645 = vrot.lane.b32.xlu2 %v6063_v40, %s5407_s21 }
 0x23c   : > { %v1313_v36 = vpop.permute.xlu0 %1312  ;;  %v1580_v43 = vpop.permute.xlu2 %1579 }
 0x23d   : > { %1649 = vrot.lane.b32.xlu1 %v6084_v59, %s5407_s21  ;;  %1446 = vst.msk [vmem:[#allocation3 + $0x1d8] sm:$0xff] %vm1386_vm5, %v1313_v36 }
 0x23e   : > { %1772 = vst.msk [vmem:[#allocation3] sm:$0xff] %vm1771_vm6, %v1580_v43 }
 0x23f   : > { %v1309_v41 = vpop.permute.xlu1 %1308 }
 0x240   : > { %1444 = vst.msk [vmem:[#allocation3 + $0x1c8] sm:$0xff] %vm1386_vm5, %v1309_v41  ;;  %v1854_v41 = vld [vmem:[#allocation2 + $0xf1] sm:$0xff] }
 0x242   : > { %1659 = vrot.lane.b32.xlu0 %v6093_v1, %s5407_s21  ;;  %1651 = vrot.lane.b32.xlu2 %v6081_v54, %s5407_s21 }
 0x244   : > { %v1319_v40 = vpop.permute.xlu0 %1318  ;;  %v1586_v50 = vpop.permute.xlu2 %1585 }
 0x245   : > { %1655 = vrot.lane.b32.xlu1 %v6102_v11, %s5407_s21  ;;  %1449 = vst.msk [vmem:[#allocation3 + $0x1f0] sm:$0xff] %vm1386_vm5, %v1319_v40  ;;  %v1850_v40 = vld [vmem:[#allocation2 + $0xc1] sm:$0xff] }
 0x246   : > { %1775 = vst.msk [vmem:[#allocation3 + $0x18] sm:$0xff] %vm1771_vm6, %v1586_v50  ;;  %v1852_v50 = vld [vmem:[#allocation2 + $0xd9] sm:$0xff] }
 0x247   : > { %v1315_v59 = vpop.permute.xlu1 %1314 }
 0x248   : > { %1447 = vst.msk [vmem:[#allocation3 + $0x1e0] sm:$0xff] %vm1386_vm5, %v1315_v59 }
 0x24a   : > { %1665 = vrot.lane.b32.xlu0 %v6111_v20, %s5407_s21  ;;  %1657 = vrot.lane.b32.xlu2 %v6099_v9, %s5407_s21 }
 0x24c   : > { %v1582_v1 = vpop.permute.xlu0 %1581  ;;  %v1592_v54 = vpop.permute.xlu2 %1591 }
 0x24d   : > { %1661 = vrot.lane.b32.xlu1 %v6120_v26, %s5407_s21  ;;  %1773 = vst.msk [vmem:[#allocation3 + $0x8] sm:$0xff] %vm1771_vm6, %v1582_v1 }
 0x24e   : > { %1778 = vst.msk [vmem:[#allocation3 + $0x30] sm:$0xff] %vm1771_vm6, %v1592_v54 }
 0x24f   : > { %v1321_v11 = vpop.permute.xlu1 %1320 }
 0x250   : > { %1450 = vst.msk [vmem:[#allocation3 + $0x1f8] sm:$0xff] %vm1386_vm5, %v1321_v11  ;;  %v1857_v11 = vld [vmem:[#allocation2 + $0x111] sm:$0xff] }
 0x252   : > { %1671 = vrot.lane.b32.xlu0 %v6129_v34, %s5407_s21  ;;  %1663 = vrot.lane.b32.xlu2 %v6117_v24, %s5407_s21  ;;  %v5300_v24 = vunpack.c.l.bf16 %v5332_v51 }
 0x254   : > { %v1588_v20 = vpop.permute.xlu0 %1587  ;;  %v1598_v9 = vpop.permute.xlu2 %1597  ;;  %551 = vst.msk [vmem:[#allocation2 + $0x331] sm:$0xff] %vm488_vm3, %v5300_v24 }
 0x255   : > { %1667 = vrot.lane.b32.xlu1 %v6138_v45, %s5407_s21  ;;  %1776 = vst.msk [vmem:[#allocation3 + $0x20] sm:$0xff] %vm1771_vm6, %v1588_v20  ;;  %v1853_v20 = vld [vmem:[#allocation2 + $0xe1] sm:$0xff] }
 0x256   : > { %1781 = vst.msk [vmem:[#allocation3 + $0x48] sm:$0xff] %vm1771_vm6, %v1598_v9  ;;  %v1855_v9 = vld [vmem:[#allocation2 + $0xf9] sm:$0xff] }
 0x257   : > { %v1584_v26 = vpop.permute.xlu1 %1583 }
 0x258   : > { %1774 = vst.msk [vmem:[#allocation3 + $0x10] sm:$0xff] %vm1771_vm6, %v1584_v26 }
 0x25a   : > { %1677 = vrot.lane.b32.xlu0 %v6147_v53, %s5407_s21  ;;  %1669 = vrot.lane.b32.xlu2 %v6135_v38, %s5407_s21 }
 0x25b   : > { %v1513_v60 = vld [vmem:[#allocation2 + $0x330] sm:$0xff]  ;;  %v1514_v7 = vld [vmem:[#allocation2 + $0x338] sm:$0xff] }
 0x25c   : > { %v1594_v34 = vpop.permute.xlu0 %1593  ;;  %v1604_v45 = vpop.permute.xlu2 %1603 }
 0x25d   : > { %1673 = vrot.lane.b32.xlu1 %v6156_v2, %s5407_s21  ;;  %1779 = vst.msk [vmem:[#allocation3 + $0x38] sm:$0xff] %vm1771_vm6, %v1594_v34  ;;  %v1860_v34 = vld [vmem:[#allocation2 + $0x139] sm:$0xff] }
 0x25e   : > { %1784 = vst.msk [vmem:[#allocation3 + $0x60] sm:$0xff] %vm1771_vm6, %v1604_v45  ;;  %v1856_v45 = vld [vmem:[#allocation2 + $0x109] sm:$0xff] }
 0x25f   : > { %v1590_v61 = vpop.permute.xlu1 %1589 }
 0x260   : > { %1777 = vst.msk [vmem:[#allocation3 + $0x28] sm:$0xff] %vm1771_vm6, %v1590_v61  ;;  %v1858_v61 = vld [vmem:[#allocation2 + $0x121] sm:$0xff] }
 0x262   : > { %1683 = vrot.lane.b32.xlu0 %v6165_v14, %s5407_s21  ;;  %1675 = vrot.lane.b32.xlu2 %v6153_v62, %s5407_s21 }
 0x264   : > { %v1600_v38 = vpop.permute.xlu0 %1599  ;;  %v1610_v53 = vpop.permute.xlu2 %1609 }
 0x265   : > { %1679 = vrot.lane.b32.xlu1 %v6174_v27, %s5407_s21  ;;  %1782 = vst.msk [vmem:[#allocation3 + $0x50] sm:$0xff] %vm1771_vm6, %v1600_v38 }
 0x266   : > { %1787 = vst.msk [vmem:[#allocation3 + $0x78] sm:$0xff] %vm1771_vm6, %v1610_v53 }
 0x267   : > { %v1596_v2 = vpop.permute.xlu1 %1595 }
 0x268   : > { %1780 = vst.msk [vmem:[#allocation3 + $0x40] sm:$0xff] %vm1771_vm6, %v1596_v2 }
 0x26a   : > { %1689 = vrot.lane.b32.xlu0 %v6183_v37, %s5407_s21  ;;  %1681 = vrot.lane.b32.xlu2 %v6171_v23, %s5407_s21 }
 0x26c   : > { %v1606_v14 = vpop.permute.xlu0 %1605  ;;  %v1616_v62 = vpop.permute.xlu2 %1615 }
 0x26d   : > { %1685 = vrot.lane.b32.xlu1 %v6192_v57, %s5407_s21  ;;  %1785 = vst.msk [vmem:[#allocation3 + $0x68] sm:$0xff] %vm1771_vm6, %v1606_v14  ;;  %v1863_v14 = vld [vmem:[#allocation2 + $0x159] sm:$0xff] }
 0x26e   : > { %1790 = vst.msk [vmem:[#allocation3 + $0x90] sm:$0xff] %vm1771_vm6, %v1616_v62  ;;  %v1859_v62 = vld [vmem:[#allocation2 + $0x129] sm:$0xff] }
 0x26f   : > { %v1602_v27 = vpop.permute.xlu1 %1601 }
 0x270   : > { %1783 = vst.msk [vmem:[#allocation3 + $0x58] sm:$0xff] %vm1771_vm6, %v1602_v27  ;;  %v1861_v27 = vld [vmem:[#allocation2 + $0x141] sm:$0xff] }
 0x272   : > { %1695 = vrot.lane.b32.xlu0 %v6201_v10, %s5407_s21  ;;  %1687 = vrot.lane.b32.xlu2 %v6189_v49, %s5407_s21 }
 0x274   : > { %v1612_v23 = vpop.permute.xlu0 %1611  ;;  %v1622_v37 = vpop.permute.xlu2 %1621 }
 0x275   : > { %1691 = vrot.lane.b32.xlu1 %v6210_v29, %s5407_s21  ;;  %1788 = vst.msk [vmem:[#allocation3 + $0x80] sm:$0xff] %vm1771_vm6, %v1612_v23 }
 0x276   : > { %1793 = vst.msk [vmem:[#allocation3 + $0xa8] sm:$0xff] %vm1771_vm6, %v1622_v37 }
 0x277   : > { %v1608_v57 = vpop.permute.xlu1 %1607 }
 0x278   : > { %1786 = vst.msk [vmem:[#allocation3 + $0x70] sm:$0xff] %vm1771_vm6, %v1608_v57  ;;  %v1866_v57 = vld [vmem:[#allocation2 + $0x181] sm:$0xff] }
 0x27a   : > { %1701 = vrot.lane.b32.xlu0 %v6219_v47, %s5407_s21  ;;  %1693 = vrot.lane.b32.xlu2 %v6207_v22, %s5407_s21  ;;  %v8393_v47 = vld [vmem:[#allocation6_spill] sm:$0xff] }
 0x27c   : > { %v1618_v49 = vpop.permute.xlu0 %1617  ;;  %v1628_v10 = vpop.permute.xlu2 %1627 }
 0x27d   : > { %1697 = vrot.lane.b32.xlu1 %v6228_v13, %s5407_s21  ;;  %1791 = vst.msk [vmem:[#allocation3 + $0x98] sm:$0xff] %vm1771_vm6, %v1618_v49  ;;  %v1862_v49 = vld [vmem:[#allocation2 + $0x151] sm:$0xff] }
 0x27e   : > { %1796 = vst.msk [vmem:[#allocation3 + $0xc0] sm:$0xff] %vm1771_vm6, %v1628_v10  ;;  %v1864_v10 = vld [vmem:[#allocation2 + $0x169] sm:$0xff] }
 0x27f   : > { %v1614_v29 = vpop.permute.xlu1 %1613 }
 0x280   : > { %1789 = vst.msk [vmem:[#allocation3 + $0x88] sm:$0xff] %vm1771_vm6, %v1614_v29 }
 0x282   : > { %1964 = vrot.lane.b32.xlu0 %v1836_v5, %s5408_s22  ;;  %1699 = vrot.lane.b32.xlu2 %v8393_v47, %s5407_s21  ;;  %v1869_v47 = vld [vmem:[#allocation2 + $0x1d1] sm:$0xff] }
 0x284   : > { %v1624_v22 = vpop.permute.xlu0 %1623  ;;  %v1634_v13 = vpop.permute.xlu2 %1633 }
 0x285   : > { %1703 = vrot.lane.b32.xlu1 %v1513_v60, %s5407_s21  ;;  %1794 = vst.msk [vmem:[#allocation3 + $0xb0] sm:$0xff] %vm1771_vm6, %v1624_v22  ;;  %v1865_v22 = vld [vmem:[#allocation2 + $0x171] sm:$0xff] }
 0x286   : > { %1799 = vst.msk [vmem:[#allocation3 + $0xd8] sm:$0xff] %vm1771_vm6, %v1634_v13  ;;  %v1867_v13 = vld [vmem:[#allocation2 + $0x189] sm:$0xff] }
 0x287   : > { %v1620_v3 = vpop.permute.xlu1 %1619 }
 0x288   : > { %1792 = vst.msk [vmem:[#allocation3 + $0xa0] sm:$0xff] %vm1771_vm6, %v1620_v3 }
 0x28a   : > { %1970 = vrot.lane.b32.xlu0 %v1839_v63, %s5408_s22  ;;  %1705 = vrot.lane.b32.xlu2 %v1514_v7, %s5407_s21 }
 0x28c   : > { %v1630_v15 = vpop.permute.xlu0 %1629  ;;  %v1640_v48 = vpop.permute.xlu2 %1639 }
 0x28d   : > { %1966 = vrot.lane.b32.xlu1 %v1837_v17, %s5408_s22  ;;  %1797 = vst.msk [vmem:[#allocation3 + $0xc8] sm:$0xff] %vm1771_vm6, %v1630_v15  ;;  %v1872_v17 = vld [vmem:[#allocation2 + $0x1f9] sm:$0xff]  ;;  %v1868_v15 = vld [vmem:[#allocation2 + $0x1c9] sm:$0xff] }
 0x28e   : > { %1802 = vst.msk [vmem:[#allocation3 + $0xf0] sm:$0xff] %vm1771_vm6, %v1640_v48  ;;  %v1870_v48 = vld [vmem:[#allocation2 + $0x1e1] sm:$0xff] }
 0x28f   : > { %v1626_v6 = vpop.permute.xlu1 %1625 }
 0x290   : > { %1795 = vst.msk [vmem:[#allocation3 + $0xb8] sm:$0xff] %vm1771_vm6, %v1626_v6 }
 0x292   : > { %1976 = vrot.lane.b32.xlu0 %v1842_v21, %s5408_s22  ;;  %1968 = vrot.lane.b32.xlu2 %v1838_v25, %s5408_s22 }
 0x294   : > { %v1636_v28 = vpop.permute.xlu0 %1635  ;;  %v1646_v33 = vpop.permute.xlu2 %1645 }
 0x295   : > { %1972 = vrot.lane.b32.xlu1 %v1840_v19, %s5408_s22  ;;  %1800 = vst.msk [vmem:[#allocation3 + $0xe0] sm:$0xff] %vm1771_vm6, %v1636_v28  ;;  %v1875_v19 = vld [vmem:[#allocation2 + $0x219] sm:$0xff]  ;;  %v1871_v28 = vld [vmem:[#allocation2 + $0x1e9] sm:$0xff] }
 0x296   : > { %1805 = vst.msk [vmem:[#allocation3 + $0x108] sm:$0xff] %vm1771_vm6, %v1646_v33  ;;  %v1873_v33 = vld [vmem:[#allocation2 + $0x201] sm:$0xff] }
 0x297   : > { %v1632_v39 = vpop.permute.xlu1 %1631 }
 0x298   : > { %1798 = vst.msk [vmem:[#allocation3 + $0xd0] sm:$0xff] %vm1771_vm6, %v1632_v39 }
 0x29a   : > { %1982 = vrot.lane.b32.xlu0 %v1845_v31, %s5408_s22  ;;  %1974 = vrot.lane.b32.xlu2 %v1841_v44, %s5408_s22 }
 0x29c   : > { %v1642_v42 = vpop.permute.xlu0 %1641  ;;  %v1652_v58 = vpop.permute.xlu2 %1651 }
 0x29d   : > { %1978 = vrot.lane.b32.xlu1 %v1843_v52, %s5408_s22  ;;  %1803 = vst.msk [vmem:[#allocation3 + $0xf8] sm:$0xff] %vm1771_vm6, %v1642_v42  ;;  %v1878_v52 = vld [vmem:[#allocation2 + $0x241] sm:$0xff]  ;;  %v1874_v42 = vld [vmem:[#allocation2 + $0x211] sm:$0xff] }
 0x29e   : > { %1808 = vst.msk [vmem:[#allocation3 + $0x120] sm:$0xff] %vm1771_vm6, %v1652_v58  ;;  %v1876_v58 = vld [vmem:[#allocation2 + $0x229] sm:$0xff] }
 0x29f   : > { %v1638_v0 = vpop.permute.xlu1 %1637 }
 0x2a0   : > { %1801 = vst.msk [vmem:[#allocation3 + $0xe8] sm:$0xff] %vm1771_vm6, %v1638_v0 }
 0x2a2   : > { %1988 = vrot.lane.b32.xlu0 %v1848_v55, %s5408_s22  ;;  %1980 = vrot.lane.b32.xlu2 %v1844_v8, %s5408_s22 }
 0x2a4   : > { %v1648_v12 = vpop.permute.xlu0 %1647  ;;  %v1658_v4 = vpop.permute.xlu2 %1657 }
 0x2a5   : > { %1984 = vrot.lane.b32.xlu1 %v1846_v32, %s5408_s22  ;;  %1806 = vst.msk [vmem:[#allocation3 + $0x110] sm:$0xff] %vm1771_vm6, %v1648_v12  ;;  %v1881_v32 = vld [vmem:[#allocation2 + $0x261] sm:$0xff]  ;;  %v1877_v12 = vld [vmem:[#allocation2 + $0x231] sm:$0xff] }
 0x2a6   : > { %1811 = vst.msk [vmem:[#allocation3 + $0x138] sm:$0xff] %vm1771_vm6, %v1658_v4  ;;  %v1879_v4 = vld [vmem:[#allocation2 + $0x249] sm:$0xff] }
 0x2a7   : > { %v1644_v18 = vpop.permute.xlu1 %1643 }
 0x2a8   : > { %1804 = vst.msk [vmem:[#allocation3 + $0x100] sm:$0xff] %vm1771_vm6, %v1644_v18 }
 0x2aa   : > { %1994 = vrot.lane.b32.xlu0 %v1851_v35, %s5408_s22  ;;  %1986 = vrot.lane.b32.xlu2 %v1847_v46, %s5408_s22 }
 0x2ac   : > { %v1654_v30 = vpop.permute.xlu0 %1653  ;;  %v1664_v36 = vpop.permute.xlu2 %1663 }
 0x2ad   : > { %1990 = vrot.lane.b32.xlu1 %v1849_v16, %s5408_s22  ;;  %1809 = vst.msk [vmem:[#allocation3 + $0x128] sm:$0xff] %vm1771_vm6, %v1654_v30  ;;  %v1884_v16 = vld [vmem:[#allocation2 + $0x289] sm:$0xff]  ;;  %v1880_v30 = vld [vmem:[#allocation2 + $0x259] sm:$0xff] }
 0x2ae   : > { %1814 = vst.msk [vmem:[#allocation3 + $0x150] sm:$0xff] %vm1771_vm6, %v1664_v36  ;;  %v1882_v36 = vld [vmem:[#allocation2 + $0x271] sm:$0xff] }
 0x2af   : > { %v1650_v43 = vpop.permute.xlu1 %1649 }
 0x2b0   : > { %1807 = vst.msk [vmem:[#allocation3 + $0x118] sm:$0xff] %vm1771_vm6, %v1650_v43 }
 0x2b2   : > { %2000 = vrot.lane.b32.xlu0 %v1854_v41, %s5408_s22  ;;  %1992 = vrot.lane.b32.xlu2 %v1850_v40, %s5408_s22 }
 0x2b4   : > { %v1660_v59 = vpop.permute.xlu0 %1659  ;;  %v1670_v1 = vpop.permute.xlu2 %1669 }
 0x2b5   : > { %1996 = vrot.lane.b32.xlu1 %v1852_v50, %s5408_s22  ;;  %1812 = vst.msk [vmem:[#allocation3 + $0x140] sm:$0xff] %vm1771_vm6, %v1660_v59  ;;  %v1887_v50 = vld [vmem:[#allocation2 + $0x2a9] sm:$0xff]  ;;  %v1883_v59 = vld [vmem:[#allocation2 + $0x279] sm:$0xff] }
 0x2b6   : > { %1817 = vst.msk [vmem:[#allocation3 + $0x168] sm:$0xff] %vm1771_vm6, %v1670_v1  ;;  %v1885_v1 = vld [vmem:[#allocation2 + $0x291] sm:$0xff] }
 0x2b7   : > { %v1656_v54 = vpop.permute.xlu1 %1655 }
 0x2b8   : > { %1810 = vst.msk [vmem:[#allocation3 + $0x130] sm:$0xff] %vm1771_vm6, %v1656_v54 }
 0x2ba   : > { %2006 = vrot.lane.b32.xlu0 %v1857_v11, %s5408_s22  ;;  %1998 = vrot.lane.b32.xlu2 %v1853_v20, %s5408_s22 }
 0x2bc   : > { %v1666_v26 = vpop.permute.xlu0 %1665  ;;  %v1676_v51 = vpop.permute.xlu2 %1675 }
 0x2bd   : > { %2002 = vrot.lane.b32.xlu1 %v1855_v9, %s5408_s22  ;;  %1815 = vst.msk [vmem:[#allocation3 + $0x158] sm:$0xff] %vm1771_vm6, %v1666_v26  ;;  %v1890_v9 = vld [vmem:[#allocation2 + $0x2d1] sm:$0xff]  ;;  %v1886_v26 = vld [vmem:[#allocation2 + $0x2a1] sm:$0xff] }
 0x2be   : > { %1820 = vst.msk [vmem:[#allocation3 + $0x180] sm:$0xff] %vm1771_vm6, %v1676_v51  ;;  %v1888_v51 = vld [vmem:[#allocation2 + $0x2b9] sm:$0xff] }
 0x2bf   : > { %v1662_v24 = vpop.permute.xlu1 %1661 }
 0x2c0   : > { %1813 = vst.msk [vmem:[#allocation3 + $0x148] sm:$0xff] %vm1771_vm6, %v1662_v24 }
 0x2c2   : > { %2012 = vrot.lane.b32.xlu0 %v1860_v34, %s5408_s22  ;;  %2004 = vrot.lane.b32.xlu2 %v1856_v45, %s5408_s22 }
 0x2c4   : > { %v1672_v38 = vpop.permute.xlu0 %1671  ;;  %v1682_v53 = vpop.permute.xlu2 %1681 }
 0x2c5   : > { %2008 = vrot.lane.b32.xlu1 %v1858_v61, %s5408_s22  ;;  %1818 = vst.msk [vmem:[#allocation3 + $0x170] sm:$0xff] %vm1771_vm6, %v1672_v38  ;;  %v1893_v61 = vld [vmem:[#allocation2 + $0x2f1] sm:$0xff]  ;;  %v1889_v38 = vld [vmem:[#allocation2 + $0x2c1] sm:$0xff] }
 0x2c6   : > { %1823 = vst.msk [vmem:[#allocation3 + $0x198] sm:$0xff] %vm1771_vm6, %v1682_v53  ;;  %v1891_v53 = vld [vmem:[#allocation2 + $0x2d9] sm:$0xff] }
 0x2c7   : > { %v1668_v2 = vpop.permute.xlu1 %1667 }
 0x2c8   : > { %1816 = vst.msk [vmem:[#allocation3 + $0x160] sm:$0xff] %vm1771_vm6, %v1668_v2 }
 0x2ca   : > { %2018 = vrot.lane.b32.xlu0 %v1863_v14, %s5408_s22  ;;  %2010 = vrot.lane.b32.xlu2 %v1859_v62, %s5408_s22 }
 0x2cc   : > { %v1678_v56 = vpop.permute.xlu0 %1677  ;;  %v1688_v23 = vpop.permute.xlu2 %1687 }
 0x2cd   : > { %2014 = vrot.lane.b32.xlu1 %v1861_v27, %s5408_s22  ;;  %1821 = vst.msk [vmem:[#allocation3 + $0x188] sm:$0xff] %vm1771_vm6, %v1678_v56  ;;  %v1896_v27 = vld [vmem:[#allocation2 + $0x319] sm:$0xff]  ;;  %v1892_v56 = vld [vmem:[#allocation2 + $0x2e9] sm:$0xff] }
 0x2ce   : > { %1826 = vst.msk [vmem:[#allocation3 + $0x1b0] sm:$0xff] %vm1771_vm6, %v1688_v23  ;;  %v1894_v23 = vld [vmem:[#allocation2 + $0x301] sm:$0xff] }
 0x2cf   : > { %v1674_v37 = vpop.permute.xlu1 %1673 }
 0x2d0   : > { %1819 = vst.msk [vmem:[#allocation3 + $0x178] sm:$0xff] %vm1771_vm6, %v1674_v37 }
 0x2d2   : > { %2024 = vrot.lane.b32.xlu0 %v1866_v57, %s5408_s22  ;;  %2016 = vrot.lane.b32.xlu2 %v1862_v49, %s5408_s22 }
 0x2d4   : > { %v1684_v29 = vpop.permute.xlu0 %1683  ;;  %v1694_v5 = vpop.permute.xlu2 %1693 }
 0x2d5   : > { %2020 = vrot.lane.b32.xlu1 %v1864_v10, %s5408_s22  ;;  %1824 = vst.msk [vmem:[#allocation3 + $0x1a0] sm:$0xff] %vm1771_vm6, %v1684_v29  ;;  %v1899_v10 = vld [vmem:[#allocation2 + $0x339] sm:$0xff]  ;;  %v1895_v29 = vld [vmem:[#allocation2 + $0x309] sm:$0xff] }
 0x2d6   : > { %1829 = vst.msk [vmem:[#allocation3 + $0x1c8] sm:$0xff] %vm1771_vm6, %v1694_v5  ;;  %v1897_v5 = vld [vmem:[#allocation2 + $0x321] sm:$0xff] }
 0x2d7   : > { %v1680_v60 = vpop.permute.xlu1 %1679 }
 0x2d8   : > { %1822 = vst.msk [vmem:[#allocation3 + $0x190] sm:$0xff] %vm1771_vm6, %v1680_v60 }
 0x2da   : > { %2030 = vrot.lane.b32.xlu0 %v1869_v47, %s5408_s22  ;;  %2022 = vrot.lane.b32.xlu2 %v1865_v22, %s5408_s22 }
 0x2dc   : > { %v1690_v3 = vpop.permute.xlu0 %1689  ;;  %v1700_v63 = vpop.permute.xlu2 %1699 }
 0x2dd   : > { %2026 = vrot.lane.b32.xlu1 %v1867_v13, %s5408_s22  ;;  %1827 = vst.msk [vmem:[#allocation3 + $0x1b8] sm:$0xff] %vm1771_vm6, %v1690_v3  ;;  %v2223_v13 = vld [vmem:[#allocation2 + $0x32] sm:$0xff] }
 0x2de   : > { %1832 = vst.msk [vmem:[#allocation3 + $0x1e0] sm:$0xff] %vm1771_vm6, %v1700_v63  ;;  %v1898_v3 = vld [vmem:[#allocation2 + $0x331] sm:$0xff]  ;;  %v2221_v63 = vld [vmem:[#allocation2 + $0x1a] sm:$0xff] }
 0x2df   : > { %v1686_v7 = vpop.permute.xlu1 %1685 }
 0x2e0   : > { %1825 = vst.msk [vmem:[#allocation3 + $0x1a8] sm:$0xff] %vm1771_vm6, %v1686_v7 }
 0x2e2   : > { %2036 = vrot.lane.b32.xlu0 %v1872_v17, %s5408_s22  ;;  %2028 = vrot.lane.b32.xlu2 %v1868_v15, %s5408_s22 }
 0x2e4   : > { %v1696_v6 = vpop.permute.xlu0 %1695  ;;  %v1706_v21 = vpop.permute.xlu2 %1705 }
 0x2e5   : > { %2032 = vrot.lane.b32.xlu1 %v1870_v48, %s5408_s22  ;;  %1830 = vst.msk [vmem:[#allocation3 + $0x1d0] sm:$0xff] %vm1771_vm6, %v1696_v6  ;;  %v6631_v48 = vld [vmem:[#allocation2 + $0x52] sm:$0xff]  ;;  %v2222_v6 = vld [vmem:[#allocation2 + $0x22] sm:$0xff] }
 0x2e6   : > { %1835 = vst.msk [vmem:[#allocation3 + $0x1f8] sm:$0xff] %vm1771_vm6, %v1706_v21  ;;  %v6633_v21 = vld [vmem:[#allocation2 + $0x3a] sm:$0xff] }
 0x2e7   : > { %v1692_v25 = vpop.permute.xlu1 %1691 }
 0x2e8   : > { %1828 = vst.msk [vmem:[#allocation3 + $0x1c0] sm:$0xff] %vm1771_vm6, %v1692_v25 }
 0x2ea   : > { %2042 = vrot.lane.b32.xlu0 %v1875_v19, %s5408_s22  ;;  %2034 = vrot.lane.b32.xlu2 %v1871_v28, %s5408_s22 }
 0x2ec   : > { %v1702_v39 = vpop.permute.xlu0 %1701  ;;  %v1969_v31 = vpop.permute.xlu2 %1968 }
 0x2ed   : > { %2038 = vrot.lane.b32.xlu1 %v1873_v33, %s5408_s22  ;;  %1833 = vst.msk [vmem:[#allocation3 + $0x1e8] sm:$0xff] %vm1771_vm6, %v1702_v39  ;;  %v2229_v33 = vld [vmem:[#allocation2 + $0x7a] sm:$0xff]  ;;  %v6643_v39 = vld [vmem:[#allocation2 + $0x4a] sm:$0xff] }
 0x2ee   : > { %2159 = vst.msk [vmem:[#allocation3 + $0x10] sm:$0xff] %vm2156_vm7, %v1969_v31  ;;  %v6645_v31 = vld [vmem:[#allocation2 + $0x62] sm:$0xff] }
 0x2ef   : > { %v1698_v44 = vpop.permute.xlu1 %1697 }
 0x2f0   : > { %1831 = vst.msk [vmem:[#allocation3 + $0x1d8] sm:$0xff] %vm1771_vm6, %v1698_v44 }
 0x2f2   : > { %2048 = vrot.lane.b32.xlu0 %v1878_v52, %s5408_s22  ;;  %2040 = vrot.lane.b32.xlu2 %v1874_v42, %s5408_s22 }
 0x2f4   : > { %v1965_v0 = vpop.permute.xlu0 %1964  ;;  %v1975_v55 = vpop.permute.xlu2 %1974 }
 0x2f5   : > { %2044 = vrot.lane.b32.xlu1 %v1876_v58, %s5408_s22  ;;  %2157 = vst.msk [vmem:[#allocation3] sm:$0xff] %vm2156_vm7, %v1965_v0  ;;  %v2232_v58 = vld [vmem:[#allocation2 + $0x9a] sm:$0xff]  ;;  %v6655_v0 = vld [vmem:[#allocation2 + $0x6a] sm:$0xff] }
 0x2f6   : > { %2162 = vst.msk [vmem:[#allocation3 + $0x28] sm:$0xff] %vm2156_vm7, %v1975_v55  ;;  %v2230_v55 = vld [vmem:[#allocation2 + $0x82] sm:$0xff] }
 0x2f7   : > { %v1704_v8 = vpop.permute.xlu1 %1703 }
 0x2f8   : > { %1834 = vst.msk [vmem:[#allocation3 + $0x1f0] sm:$0xff] %vm1771_vm6, %v1704_v8 }
 0x2fa   : > { %2054 = vrot.lane.b32.xlu0 %v1881_v32, %s5408_s22  ;;  %2046 = vrot.lane.b32.xlu2 %v1877_v12, %s5408_s22 }
 0x2fc   : > { %v1971_v18 = vpop.permute.xlu0 %1970  ;;  %v1981_v35 = vpop.permute.xlu2 %1980 }
 0x2fd   : > { %2050 = vrot.lane.b32.xlu1 %v1879_v4, %s5408_s22  ;;  %2160 = vst.msk [vmem:[#allocation3 + $0x18] sm:$0xff] %vm2156_vm7, %v1971_v18  ;;  %v2235_v4 = vld [vmem:[#allocation2 + $0xc2] sm:$0xff]  ;;  %v2231_v18 = vld [vmem:[#allocation2 + $0x92] sm:$0xff] }
 0x2fe   : > { %2165 = vst.msk [vmem:[#allocation3 + $0x40] sm:$0xff] %vm2156_vm7, %v1981_v35  ;;  %v2233_v35 = vld [vmem:[#allocation2 + $0xaa] sm:$0xff] }
 0x2ff   : > { %v1967_v46 = vpop.permute.xlu1 %1966 }
 0x300   : > { %2158 = vst.msk [vmem:[#allocation3 + $0x8] sm:$0xff] %vm2156_vm7, %v1967_v46 }
 0x302   : > { %2060 = vrot.lane.b32.xlu0 %v1884_v16, %s5408_s22  ;;  %2052 = vrot.lane.b32.xlu2 %v1880_v30, %s5408_s22 }
 0x304   : > { %v1977_v43 = vpop.permute.xlu0 %1976  ;;  %v1987_v41 = vpop.permute.xlu2 %1986 }
 0x305   : > { %2056 = vrot.lane.b32.xlu1 %v1882_v36, %s5408_s22  ;;  %2163 = vst.msk [vmem:[#allocation3 + $0x30] sm:$0xff] %vm2156_vm7, %v1977_v43  ;;  %v2238_v36 = vld [vmem:[#allocation2 + $0xe2] sm:$0xff]  ;;  %v2234_v43 = vld [vmem:[#allocation2 + $0xb2] sm:$0xff] }
 0x306   : > { %2168 = vst.msk [vmem:[#allocation3 + $0x58] sm:$0xff] %vm2156_vm7, %v1987_v41  ;;  %v2236_v41 = vld [vmem:[#allocation2 + $0xca] sm:$0xff] }
 0x307   : > { %v1973_v40 = vpop.permute.xlu1 %1972 }
 0x308   : > { %2161 = vst.msk [vmem:[#allocation3 + $0x20] sm:$0xff] %vm2156_vm7, %v1973_v40 }
 0x30a   : > { %2066 = vrot.lane.b32.xlu0 %v1887_v50, %s5408_s22  ;;  %2058 = vrot.lane.b32.xlu2 %v1883_v59, %s5408_s22 }
 0x30c   : > { %v1983_v54 = vpop.permute.xlu0 %1982  ;;  %v1993_v11 = vpop.permute.xlu2 %1992 }
 0x30d   : > { %2062 = vrot.lane.b32.xlu1 %v1885_v1, %s5408_s22  ;;  %2166 = vst.msk [vmem:[#allocation3 + $0x48] sm:$0xff] %vm2156_vm7, %v1983_v54  ;;  %v2241_v1 = vld [vmem:[#allocation2 + $0x10a] sm:$0xff]  ;;  %v2237_v54 = vld [vmem:[#allocation2 + $0xda] sm:$0xff] }
 0x30e   : > { %2171 = vst.msk [vmem:[#allocation3 + $0x70] sm:$0xff] %vm2156_vm7, %v1993_v11  ;;  %v6676_v11 = vld [vmem:[#allocation2 + $0xf2] sm:$0xff] }
 0x30f   : > { %v1979_v20 = vpop.permute.xlu1 %1978 }
 0x310   : > { %2164 = vst.msk [vmem:[#allocation3 + $0x38] sm:$0xff] %vm2156_vm7, %v1979_v20 }
 0x312   : > { %2072 = vrot.lane.b32.xlu0 %v1890_v9, %s5408_s22  ;;  %2064 = vrot.lane.b32.xlu2 %v1886_v26, %s5408_s22 }
 0x314   : > { %v1989_v24 = vpop.permute.xlu0 %1988  ;;  %v1999_v34 = vpop.permute.xlu2 %1998 }
 0x315   : > { %2068 = vrot.lane.b32.xlu1 %v1888_v51, %s5408_s22  ;;  %2169 = vst.msk [vmem:[#allocation3 + $0x60] sm:$0xff] %vm2156_vm7, %v1989_v24  ;;  %v2244_v51 = vld [vmem:[#allocation2 + $0x12a] sm:$0xff]  ;;  %v6685_v24 = vld [vmem:[#allocation2 + $0xfa] sm:$0xff] }
 0x316   : > { %2174 = vst.msk [vmem:[#allocation3 + $0x88] sm:$0xff] %vm2156_vm7, %v1999_v34  ;;  %v2242_v34 = vld [vmem:[#allocation2 + $0x112] sm:$0xff] }
 0x317   : > { %v1985_v45 = vpop.permute.xlu1 %1984 }
 0x318   : > { %2167 = vst.msk [vmem:[#allocation3 + $0x50] sm:$0xff] %vm2156_vm7, %v1985_v45 }
 0x31a   : > { %2078 = vrot.lane.b32.xlu0 %v1893_v61, %s5408_s22  ;;  %2070 = vrot.lane.b32.xlu2 %v1889_v38, %s5408_s22 }
 0x31c   : > { %v1995_v2 = vpop.permute.xlu0 %1994  ;;  %v2005_v14 = vpop.permute.xlu2 %2004 }
 0x31d   : > { %2074 = vrot.lane.b32.xlu1 %v1891_v53, %s5408_s22  ;;  %2172 = vst.msk [vmem:[#allocation3 + $0x78] sm:$0xff] %vm2156_vm7, %v1995_v2  ;;  %v2247_v53 = vld [vmem:[#allocation2 + $0x152] sm:$0xff]  ;;  %v2243_v2 = vld [vmem:[#allocation2 + $0x122] sm:$0xff] }
 0x31e   : > { %2177 = vst.msk [vmem:[#allocation3 + $0xa0] sm:$0xff] %vm2156_vm7, %v2005_v14  ;;  %v2245_v14 = vld [vmem:[#allocation2 + $0x13a] sm:$0xff] }
 0x31f   : > { %v1991_v62 = vpop.permute.xlu1 %1990 }
 0x320   : > { %2170 = vst.msk [vmem:[#allocation3 + $0x68] sm:$0xff] %vm2156_vm7, %v1991_v62 }
 0x322   : > { %2084 = vrot.lane.b32.xlu0 %v1896_v27, %s5408_s22  ;;  %2076 = vrot.lane.b32.xlu2 %v1892_v56, %s5408_s22 }
 0x324   : > { %v2001_v37 = vpop.permute.xlu0 %2000  ;;  %v2011_v57 = vpop.permute.xlu2 %2010 }
 0x325   : > { %2080 = vrot.lane.b32.xlu1 %v1894_v23, %s5408_s22  ;;  %2175 = vst.msk [vmem:[#allocation3 + $0x90] sm:$0xff] %vm2156_vm7, %v2001_v37  ;;  %v2250_v23 = vld [vmem:[#allocation2 + $0x172] sm:$0xff]  ;;  %v2246_v37 = vld [vmem:[#allocation2 + $0x142] sm:$0xff] }
 0x326   : > { %2180 = vst.msk [vmem:[#allocation3 + $0xb8] sm:$0xff] %vm2156_vm7, %v2011_v57  ;;  %v2248_v57 = vld [vmem:[#allocation2 + $0x15a] sm:$0xff] }
 0x327   : > { %v1997_v49 = vpop.permute.xlu1 %1996 }
 0x328   : > { %2173 = vst.msk [vmem:[#allocation3 + $0x80] sm:$0xff] %vm2156_vm7, %v1997_v49 }
 0x32a   : > { %2090 = vrot.lane.b32.xlu0 %v1899_v10, %s5408_s22  ;;  %2082 = vrot.lane.b32.xlu2 %v1895_v29, %s5408_s22 }
 0x32c   : > { %v2007_v60 = vpop.permute.xlu0 %2006  ;;  %v2017_v47 = vpop.permute.xlu2 %2016 }
 0x32d   : > { %2086 = vrot.lane.b32.xlu1 %v1897_v5, %s5408_s22  ;;  %2178 = vst.msk [vmem:[#allocation3 + $0xa8] sm:$0xff] %vm2156_vm7, %v2007_v60  ;;  %v2253_v5 = vld [vmem:[#allocation2 + $0x1ca] sm:$0xff] }
 0x32e   : > { %2183 = vst.msk [vmem:[#allocation3 + $0xd0] sm:$0xff] %vm2156_vm7, %v2017_v47  ;;  %v2249_v60 = vld [vmem:[#allocation2 + $0x16a] sm:$0xff]  ;;  %v2251_v47 = vld [vmem:[#allocation2 + $0x182] sm:$0xff] }
 0x32f   : > { %v2003_v22 = vpop.permute.xlu1 %2002 }
 0x330   : > { %2176 = vst.msk [vmem:[#allocation3 + $0x98] sm:$0xff] %vm2156_vm7, %v2003_v22 }
 0x332   : > { %2353 = vrot.lane.b32.xlu0 %v2223_v13, %s5409_s23  ;;  %2088 = vrot.lane.b32.xlu2 %v1898_v3, %s5408_s22 }
 0x334   : > { %v2013_v7 = vpop.permute.xlu0 %2012  ;;  %v2023_v17 = vpop.permute.xlu2 %2022 }
 0x335   : > { %2349 = vrot.lane.b32.xlu1 %v2221_v63, %s5409_s23  ;;  %2181 = vst.msk [vmem:[#allocation3 + $0xc0] sm:$0xff] %vm2156_vm7, %v2013_v7  ;;  %v6712_v63 = vld [vmem:[#allocation2 + $0x1ea] sm:$0xff] }
 0x336   : > { %2186 = vst.msk [vmem:[#allocation3 + $0xe8] sm:$0xff] %vm2156_vm7, %v2023_v17  ;;  %v2252_v7 = vld [vmem:[#allocation2 + $0x18a] sm:$0xff]  ;;  %v2254_v17 = vld [vmem:[#allocation2 + $0x1d2] sm:$0xff] }
 0x337   : > { %v2009_v15 = vpop.permute.xlu1 %2008 }
 0x338   : > { %2179 = vst.msk [vmem:[#allocation3 + $0xb0] sm:$0xff] %vm2156_vm7, %v2009_v15 }
 0x33a   : > { %2359 = vrot.lane.b32.xlu0 %v6631_v48, %s5409_s23  ;;  %2351 = vrot.lane.b32.xlu2 %v2222_v6, %s5409_s23 }
 0x33c   : > { %v2019_v25 = vpop.permute.xlu0 %2018  ;;  %v2029_v19 = vpop.permute.xlu2 %2028 }
 0x33d   : > { %2355 = vrot.lane.b32.xlu1 %v6633_v21, %s5409_s23  ;;  %2184 = vst.msk [vmem:[#allocation3 + $0xd8] sm:$0xff] %vm2156_vm7, %v2019_v25 }
 0x33e   : > { %2189 = vst.msk [vmem:[#allocation3 + $0x100] sm:$0xff] %vm2156_vm7, %v2029_v19  ;;  %v2259_v19 = vld [vmem:[#allocation2 + $0x212] sm:$0xff] }
 0x33f   : > { %v2015_v28 = vpop.permute.xlu1 %2014 }
 0x340   : > { %2182 = vst.msk [vmem:[#allocation3 + $0xc8] sm:$0xff] %vm2156_vm7, %v2015_v28  ;;  %v6721_v28 = vld [vmem:[#allocation2 + $0x1e2] sm:$0xff] }
 0x342   : > { %2365 = vrot.lane.b32.xlu0 %v2229_v33, %s5409_s23  ;;  %2357 = vrot.lane.b32.xlu2 %v6643_v39, %s5409_s23  ;;  %v2257_v33 = vld [vmem:[#allocation2 + $0x1fa] sm:$0xff] }
 0x344   : > { %v2025_v44 = vpop.permute.xlu0 %2024  ;;  %v2035_v52 = vpop.permute.xlu2 %2034 }
 0x345   : > { %2361 = vrot.lane.b32.xlu1 %v6645_v31, %s5409_s23  ;;  %2187 = vst.msk [vmem:[#allocation3 + $0xf0] sm:$0xff] %vm2156_vm7, %v2025_v44 }
 0x346   : > { %2192 = vst.msk [vmem:[#allocation3 + $0x118] sm:$0xff] %vm2156_vm7, %v2035_v52 }
 0x347   : > { %v2021_v42 = vpop.permute.xlu1 %2020 }
 0x348   : > { %2185 = vst.msk [vmem:[#allocation3 + $0xe0] sm:$0xff] %vm2156_vm7, %v2021_v42 }
 0x34a   : > { %2371 = vrot.lane.b32.xlu0 %v2232_v58, %s5409_s23  ;;  %2363 = vrot.lane.b32.xlu2 %v6655_v0, %s5409_s23  ;;  %v2262_v58 = vld [vmem:[#allocation2 + $0x232] sm:$0xff] }
 0x34c   : > { %v2031_v8 = vpop.permute.xlu0 %2030  ;;  %v2041_v32 = vpop.permute.xlu2 %2040 }
 0x34d   : > { %2367 = vrot.lane.b32.xlu1 %v2230_v55, %s5409_s23  ;;  %2190 = vst.msk [vmem:[#allocation3 + $0x108] sm:$0xff] %vm2156_vm7, %v2031_v8  ;;  %v6730_v55 = vld [vmem:[#allocation2 + $0x202] sm:$0xff]  ;;  %v2260_v8 = vld [vmem:[#allocation2 + $0x21a] sm:$0xff] }
 0x34e   : > { %2195 = vst.msk [vmem:[#allocation3 + $0x130] sm:$0xff] %vm2156_vm7, %v2041_v32 }
 0x34f   : > { %v2027_v12 = vpop.permute.xlu1 %2026 }
 0x350   : > { %2188 = vst.msk [vmem:[#allocation3 + $0xf8] sm:$0xff] %vm2156_vm7, %v2027_v12 }
 0x352   : > { %2377 = vrot.lane.b32.xlu0 %v2235_v4, %s5409_s23  ;;  %2369 = vrot.lane.b32.xlu2 %v2231_v18, %s5409_s23  ;;  %v2265_v18 = vld [vmem:[#allocation2 + $0x25a] sm:$0xff] }
 0x354   : > { %v2037_v46 = vpop.permute.xlu0 %2036  ;;  %v2047_v16 = vpop.permute.xlu2 %2046 }
 0x355   : > { %2373 = vrot.lane.b32.xlu1 %v2233_v35, %s5409_s23  ;;  %2193 = vst.msk [vmem:[#allocation3 + $0x120] sm:$0xff] %vm2156_vm7, %v2037_v46  ;;  %v2261_v35 = vld [vmem:[#allocation2 + $0x22a] sm:$0xff]  ;;  %v2263_v46 = vld [vmem:[#allocation2 + $0x242] sm:$0xff] }
 0x356   : > { %2198 = vst.msk [vmem:[#allocation3 + $0x148] sm:$0xff] %vm2156_vm7, %v2047_v16 }
 0x357   : > { %v2033_v30 = vpop.permute.xlu1 %2032 }
 0x358   : > { %2191 = vst.msk [vmem:[#allocation3 + $0x110] sm:$0xff] %vm2156_vm7, %v2033_v30 }
 0x35a   : > { %2383 = vrot.lane.b32.xlu0 %v2238_v36, %s5409_s23  ;;  %2375 = vrot.lane.b32.xlu2 %v2234_v43, %s5409_s23  ;;  %v2268_v43 = vld [vmem:[#allocation2 + $0x27a] sm:$0xff] }
 0x35c   : > { %v2043_v40 = vpop.permute.xlu0 %2042  ;;  %v2053_v50 = vpop.permute.xlu2 %2052 }
 0x35d   : > { %2379 = vrot.lane.b32.xlu1 %v2236_v41, %s5409_s23  ;;  %2196 = vst.msk [vmem:[#allocation3 + $0x138] sm:$0xff] %vm2156_vm7, %v2043_v40  ;;  %v2264_v41 = vld [vmem:[#allocation2 + $0x24a] sm:$0xff]  ;;  %v2266_v40 = vld [vmem:[#allocation2 + $0x262] sm:$0xff] }
 0x35e   : > { %2201 = vst.msk [vmem:[#allocation3 + $0x160] sm:$0xff] %vm2156_vm7, %v2053_v50 }
 0x35f   : > { %v2039_v59 = vpop.permute.xlu1 %2038 }
 0x360   : > { %2194 = vst.msk [vmem:[#allocation3 + $0x128] sm:$0xff] %vm2156_vm7, %v2039_v59 }
 0x362   : > { %2389 = vrot.lane.b32.xlu0 %v2241_v1, %s5409_s23  ;;  %2381 = vrot.lane.b32.xlu2 %v2237_v54, %s5409_s23  ;;  %v2271_v54 = vld [vmem:[#allocation2 + $0x2a2] sm:$0xff] }
 0x364   : > { %v2049_v20 = vpop.permute.xlu0 %2048  ;;  %v2059_v9 = vpop.permute.xlu2 %2058 }
 0x365   : > { %2385 = vrot.lane.b32.xlu1 %v6676_v11, %s5409_s23  ;;  %2199 = vst.msk [vmem:[#allocation3 + $0x150] sm:$0xff] %vm2156_vm7, %v2049_v20  ;;  %v2267_v20 = vld [vmem:[#allocation2 + $0x272] sm:$0xff] }
 0x366   : > { %2204 = vst.msk [vmem:[#allocation3 + $0x178] sm:$0xff] %vm2156_vm7, %v2059_v9  ;;  %v2269_v9 = vld [vmem:[#allocation2 + $0x28a] sm:$0xff] }
 0x367   : > { %v2045_v26 = vpop.permute.xlu1 %2044 }
 0x368   : > { %2197 = vst.msk [vmem:[#allocation3 + $0x140] sm:$0xff] %vm2156_vm7, %v2045_v26 }
 0x36a   : > { %2395 = vrot.lane.b32.xlu0 %v2244_v51, %s5409_s23  ;;  %2387 = vrot.lane.b32.xlu2 %v6685_v24, %s5409_s23 }
 0x36c   : > { %v2055_v45 = vpop.permute.xlu0 %2054  ;;  %v2065_v61 = vpop.permute.xlu2 %2064 }
 0x36d   : > { %2391 = vrot.lane.b32.xlu1 %v2242_v34, %s5409_s23  ;;  %2202 = vst.msk [vmem:[#allocation3 + $0x168] sm:$0xff] %vm2156_vm7, %v2055_v45  ;;  %v2274_v45 = vld [vmem:[#allocation2 + $0x2c2] sm:$0xff] }
 0x36e   : > { %2207 = vst.msk [vmem:[#allocation3 + $0x190] sm:$0xff] %vm2156_vm7, %v2065_v61  ;;  %v2270_v61 = vld [vmem:[#allocation2 + $0x292] sm:$0xff] }
 0x36f   : > { %v2051_v38 = vpop.permute.xlu1 %2050 }
 0x370   : > { %2200 = vst.msk [vmem:[#allocation3 + $0x158] sm:$0xff] %vm2156_vm7, %v2051_v38  ;;  %v2272_v38 = vld [vmem:[#allocation2 + $0x2aa] sm:$0xff] }
 0x372   : > { %2401 = vrot.lane.b32.xlu0 %v2247_v53, %s5409_s23  ;;  %2393 = vrot.lane.b32.xlu2 %v2243_v2, %s5409_s23 }
 0x374   : > { %v2061_v62 = vpop.permute.xlu0 %2060  ;;  %v2071_v27 = vpop.permute.xlu2 %2070 }
 0x375   : > { %2397 = vrot.lane.b32.xlu1 %v2245_v14, %s5409_s23  ;;  %2205 = vst.msk [vmem:[#allocation3 + $0x180] sm:$0xff] %vm2156_vm7, %v2061_v62  ;;  %v2277_v62 = vld [vmem:[#allocation2 + $0x2ea] sm:$0xff] }
 0x376   : > { %2210 = vst.msk [vmem:[#allocation3 + $0x1a8] sm:$0xff] %vm2156_vm7, %v2071_v27  ;;  %v2273_v27 = vld [vmem:[#allocation2 + $0x2ba] sm:$0xff] }
 0x377   : > { %v2057_v56 = vpop.permute.xlu1 %2056 }
 0x378   : > { %2203 = vst.msk [vmem:[#allocation3 + $0x170] sm:$0xff] %vm2156_vm7, %v2057_v56  ;;  %v2275_v56 = vld [vmem:[#allocation2 + $0x2d2] sm:$0xff] }
 0x37a   : > { %2407 = vrot.lane.b32.xlu0 %v2250_v23, %s5409_s23  ;;  %2399 = vrot.lane.b32.xlu2 %v2246_v37, %s5409_s23 }
 0x37c   : > { %v2067_v49 = vpop.permute.xlu0 %2066  ;;  %v2077_v10 = vpop.permute.xlu2 %2076 }
 0x37d   : > { %2403 = vrot.lane.b32.xlu1 %v2248_v57, %s5409_s23  ;;  %2208 = vst.msk [vmem:[#allocation3 + $0x198] sm:$0xff] %vm2156_vm7, %v2067_v49  ;;  %v2280_v49 = vld [vmem:[#allocation2 + $0x30a] sm:$0xff] }
 0x37e   : > { %2213 = vst.msk [vmem:[#allocation3 + $0x1c0] sm:$0xff] %vm2156_vm7, %v2077_v10  ;;  %v2276_v10 = vld [vmem:[#allocation2 + $0x2da] sm:$0xff] }
 0x37f   : > { %v2063_v29 = vpop.permute.xlu1 %2062 }
 0x380   : > { %2206 = vst.msk [vmem:[#allocation3 + $0x188] sm:$0xff] %vm2156_vm7, %v2063_v29  ;;  %v2278_v29 = vld [vmem:[#allocation2 + $0x2f2] sm:$0xff] }
 0x382   : > { %2413 = vrot.lane.b32.xlu0 %v2253_v5, %s5409_s23  ;;  %2405 = vrot.lane.b32.xlu2 %v2249_v60, %s5409_s23 }
 0x384   : > { %v2073_v22 = vpop.permute.xlu0 %2072  ;;  %v2083_v13 = vpop.permute.xlu2 %2082 }
 0x385   : > { %2409 = vrot.lane.b32.xlu1 %v2251_v47, %s5409_s23  ;;  %2211 = vst.msk [vmem:[#allocation3 + $0x1b0] sm:$0xff] %vm2156_vm7, %v2073_v22  ;;  %v2283_v22 = vld [vmem:[#allocation2 + $0x332] sm:$0xff] }
 0x386   : > { %2216 = vst.msk [vmem:[#allocation3 + $0x1d8] sm:$0xff] %vm2156_vm7, %v2083_v13  ;;  %v2279_v13 = vld [vmem:[#allocation2 + $0x302] sm:$0xff] }
 0x387   : > { %v2069_v3 = vpop.permute.xlu1 %2068 }
 0x388   : > { %2209 = vst.msk [vmem:[#allocation3 + $0x1a0] sm:$0xff] %vm2156_vm7, %v2069_v3  ;;  %v2281_v3 = vld [vmem:[#allocation2 + $0x31a] sm:$0xff] }
 0x38a   : > { %2419 = vrot.lane.b32.xlu0 %v6712_v63, %s5409_s23  ;;  %2411 = vrot.lane.b32.xlu2 %v2252_v7, %s5409_s23 }
 0x38c   : > { %v2079_v15 = vpop.permute.xlu0 %2078  ;;  %v2089_v6 = vpop.permute.xlu2 %2088 }
 0x38d   : > { %2415 = vrot.lane.b32.xlu1 %v2254_v17, %s5409_s23  ;;  %2214 = vst.msk [vmem:[#allocation3 + $0x1c8] sm:$0xff] %vm2156_vm7, %v2079_v15 }
 0x38e   : > { %2219 = vst.msk [vmem:[#allocation3 + $0x1f0] sm:$0xff] %vm2156_vm7, %v2089_v6  ;;  %v2608_v6 = vld [vmem:[#allocation2 + $0x38] sm:$0xff] }
 0x38f   : > { %v2075_v25 = vpop.permute.xlu1 %2074 }
 0x390   : > { %2212 = vst.msk [vmem:[#allocation3 + $0x1b8] sm:$0xff] %vm2156_vm7, %v2075_v25  ;;  %v2282_v25 = vld [vmem:[#allocation2 + $0x322] sm:$0xff] }
 0x392   : > { %2425 = vrot.lane.b32.xlu0 %v2259_v19, %s5409_s23  ;;  %2417 = vrot.lane.b32.xlu2 %v6721_v28, %s5409_s23  ;;  %v2284_v19 = vld [vmem:[#allocation2 + $0x33a] sm:$0xff] }
 0x394   : > { %v2085_v44 = vpop.permute.xlu0 %2084  ;;  %v2352_v52 = vpop.permute.xlu2 %2351 }
 0x395   : > { %2421 = vrot.lane.b32.xlu1 %v2257_v33, %s5409_s23  ;;  %2217 = vst.msk [vmem:[#allocation3 + $0x1e0] sm:$0xff] %vm2156_vm7, %v2085_v44 }
 0x396   : > { %2543 = vst.msk [vmem:[#allocation3 + $0x8] sm:$0xff] %vm2541_vm8, %v2352_v52 }
 0x397   : > { %v2081_v42 = vpop.permute.xlu1 %2080 }
 0x398   : > { %2215 = vst.msk [vmem:[#allocation3 + $0x1d0] sm:$0xff] %vm2156_vm7, %v2081_v42  ;;  %v2611_v42 = vld [vmem:[#allocation2 + $0x60] sm:$0xff] }
 0x39a   : > { %2431 = vrot.lane.b32.xlu0 %v2262_v58, %s5409_s23  ;;  %2423 = vrot.lane.b32.xlu2 %v6730_v55, %s5409_s23  ;;  %v2607_v58 = vld [vmem:[#allocation2 + $0x30] sm:$0xff] }
 0x39c   : > { %v2091_v32 = vpop.permute.xlu0 %2090  ;;  %v2358_v12 = vpop.permute.xlu2 %2357 }
 0x39d   : > { %2427 = vrot.lane.b32.xlu1 %v2260_v8, %s5409_s23  ;;  %2220 = vst.msk [vmem:[#allocation3 + $0x1f8] sm:$0xff] %vm2156_vm7, %v2091_v32  ;;  %v2609_v8 = vld [vmem:[#allocation2 + $0x48] sm:$0xff] }
 0x39e   : > { %2546 = vst.msk [vmem:[#allocation3 + $0x20] sm:$0xff] %vm2541_vm8, %v2358_v12 }
 0x39f   : > { %v2087_v4 = vpop.permute.xlu1 %2086 }
 0x3a0   : > { %2218 = vst.msk [vmem:[#allocation3 + $0x1e8] sm:$0xff] %vm2156_vm7, %v2087_v4 }
 0x3a2   : > { %2437 = vrot.lane.b32.xlu0 %v2265_v18, %s5409_s23  ;;  %2429 = vrot.lane.b32.xlu2 %v2261_v35, %s5409_s23  ;;  %v2614_v18 = vld [vmem:[#allocation2 + $0x80] sm:$0xff]  ;;  %v2610_v35 = vld [vmem:[#allocation2 + $0x50] sm:$0xff] }
 0x3a4   : > { %v2354_v16 = vpop.permute.xlu0 %2353  ;;  %v2364_v30 = vpop.permute.xlu2 %2363 }
 0x3a5   : > { %2433 = vrot.lane.b32.xlu1 %v2263_v46, %s5409_s23  ;;  %2544 = vst.msk [vmem:[#allocation3 + $0x10] sm:$0xff] %vm2541_vm8, %v2354_v16  ;;  %v2612_v46 = vld [vmem:[#allocation2 + $0x68] sm:$0xff] }
 0x3a6   : > { %2549 = vst.msk [vmem:[#allocation3 + $0x38] sm:$0xff] %vm2541_vm8, %v2364_v30 }
 0x3a7   : > { %v2350_v36 = vpop.permute.xlu1 %2349 }
 0x3a8   : > { %2542 = vst.msk [vmem:[#allocation3] sm:$0xff] %vm2541_vm8, %v2350_v36 }
 0x3aa   : > { %2443 = vrot.lane.b32.xlu0 %v2268_v43, %s5409_s23  ;;  %2435 = vrot.lane.b32.xlu2 %v2264_v41, %s5409_s23  ;;  %v2617_v43 = vld [vmem:[#allocation2 + $0xa8] sm:$0xff]  ;;  %v2613_v41 = vld [vmem:[#allocation2 + $0x78] sm:$0xff] }
 0x3ac   : > { %v2360_v50 = vpop.permute.xlu0 %2359  ;;  %v2370_v59 = vpop.permute.xlu2 %2369 }
 0x3ad   : > { %2439 = vrot.lane.b32.xlu1 %v2266_v40, %s5409_s23  ;;  %2547 = vst.msk [vmem:[#allocation3 + $0x28] sm:$0xff] %vm2541_vm8, %v2360_v50  ;;  %v2615_v40 = vld [vmem:[#allocation2 + $0x90] sm:$0xff] }
 0x3ae   : > { %2552 = vst.msk [vmem:[#allocation3 + $0x50] sm:$0xff] %vm2541_vm8, %v2370_v59 }
 0x3af   : > { %v2356_v1 = vpop.permute.xlu1 %2355 }
 0x3b0   : > { %2545 = vst.msk [vmem:[#allocation3 + $0x18] sm:$0xff] %vm2541_vm8, %v2356_v1 }
 0x3b2   : > { %2449 = vrot.lane.b32.xlu0 %v2271_v54, %s5409_s23  ;;  %2441 = vrot.lane.b32.xlu2 %v2267_v20, %s5409_s23  ;;  %v2620_v54 = vld [vmem:[#allocation2 + $0xc8] sm:$0xff]  ;;  %v2616_v20 = vld [vmem:[#allocation2 + $0x98] sm:$0xff] }
 0x3b4   : > { %v2366_v26 = vpop.permute.xlu0 %2365  ;;  %v2376_v51 = vpop.permute.xlu2 %2375 }
 0x3b5   : > { %2445 = vrot.lane.b32.xlu1 %v2269_v9, %s5409_s23  ;;  %2550 = vst.msk [vmem:[#allocation3 + $0x40] sm:$0xff] %vm2541_vm8, %v2366_v26  ;;  %v2618_v9 = vld [vmem:[#allocation2 + $0xb0] sm:$0xff] }
 0x3b6   : > { %2555 = vst.msk [vmem:[#allocation3 + $0x68] sm:$0xff] %vm2541_vm8, %v2376_v51 }
 0x3b7   : > { %v2362_v34 = vpop.permute.xlu1 %2361 }
 0x3b8   : > { %2548 = vst.msk [vmem:[#allocation3 + $0x30] sm:$0xff] %vm2541_vm8, %v2362_v34 }
 0x3ba   : > { %2455 = vrot.lane.b32.xlu0 %v2274_v45, %s5409_s23  ;;  %2447 = vrot.lane.b32.xlu2 %v2270_v61, %s5409_s23  ;;  %v2623_v45 = vld [vmem:[#allocation2 + $0xf0] sm:$0xff]  ;;  %v2619_v61 = vld [vmem:[#allocation2 + $0xc0] sm:$0xff] }
 0x3bc   : > { %v2372_v53 = vpop.permute.xlu0 %2371  ;;  %v2382_v2 = vpop.permute.xlu2 %2381 }
 0x3bd   : > { %2451 = vrot.lane.b32.xlu1 %v2272_v38, %s5409_s23  ;;  %2553 = vst.msk [vmem:[#allocation3 + $0x58] sm:$0xff] %vm2541_vm8, %v2372_v53  ;;  %v2621_v38 = vld [vmem:[#allocation2 + $0xd8] sm:$0xff] }
 0x3be   : > { %2558 = vst.msk [vmem:[#allocation3 + $0x80] sm:$0xff] %vm2541_vm8, %v2382_v2 }
 0x3bf   : > { %v2368_v14 = vpop.permute.xlu1 %2367 }
 0x3c0   : > { %2551 = vst.msk [vmem:[#allocation3 + $0x48] sm:$0xff] %vm2541_vm8, %v2368_v14 }
 0x3c2   : > { %2461 = vrot.lane.b32.xlu0 %v2277_v62, %s5409_s23  ;;  %2453 = vrot.lane.b32.xlu2 %v2273_v27, %s5409_s23  ;;  %v2626_v62 = vld [vmem:[#allocation2 + $0x110] sm:$0xff]  ;;  %v2622_v27 = vld [vmem:[#allocation2 + $0xe0] sm:$0xff] }
 0x3c4   : > { %v2378_v23 = vpop.permute.xlu0 %2377  ;;  %v2388_v37 = vpop.permute.xlu2 %2387 }
 0x3c5   : > { %2457 = vrot.lane.b32.xlu1 %v2275_v56, %s5409_s23  ;;  %2556 = vst.msk [vmem:[#allocation3 + $0x70] sm:$0xff] %vm2541_vm8, %v2378_v23  ;;  %v2624_v56 = vld [vmem:[#allocation2 + $0xf8] sm:$0xff] }
 0x3c6   : > { %2561 = vst.msk [vmem:[#allocation3 + $0x98] sm:$0xff] %vm2541_vm8, %v2388_v37 }
 0x3c7   : > { %v2374_v57 = vpop.permute.xlu1 %2373 }
 0x3c8   : > { %2554 = vst.msk [vmem:[#allocation3 + $0x60] sm:$0xff] %vm2541_vm8, %v2374_v57 }
 0x3ca   : > { %2467 = vrot.lane.b32.xlu0 %v2280_v49, %s5409_s23  ;;  %2459 = vrot.lane.b32.xlu2 %v2276_v10, %s5409_s23  ;;  %v2629_v49 = vld [vmem:[#allocation2 + $0x138] sm:$0xff]  ;;  %v2625_v10 = vld [vmem:[#allocation2 + $0x108] sm:$0xff] }
 0x3cc   : > { %v2384_v5 = vpop.permute.xlu0 %2383  ;;  %v2394_v60 = vpop.permute.xlu2 %2393 }
 0x3cd   : > { %2463 = vrot.lane.b32.xlu1 %v2278_v29, %s5409_s23  ;;  %2559 = vst.msk [vmem:[#allocation3 + $0x88] sm:$0xff] %vm2541_vm8, %v2384_v5  ;;  %v2627_v29 = vld [vmem:[#allocation2 + $0x120] sm:$0xff] }
 0x3ce   : > { %2564 = vst.msk [vmem:[#allocation3 + $0xb0] sm:$0xff] %vm2541_vm8, %v2394_v60 }
 0x3cf   : > { %v2380_v47 = vpop.permute.xlu1 %2379 }
 0x3d0   : > { %2557 = vst.msk [vmem:[#allocation3 + $0x78] sm:$0xff] %vm2541_vm8, %v2380_v47 }
 0x3d2   : > { %2473 = vrot.lane.b32.xlu0 %v2283_v22, %s5409_s23  ;;  %2465 = vrot.lane.b32.xlu2 %v2279_v13, %s5409_s23  ;;  %v2632_v22 = vld [vmem:[#allocation2 + $0x158] sm:$0xff]  ;;  %v2628_v13 = vld [vmem:[#allocation2 + $0x128] sm:$0xff] }
 0x3d4   : > { %v2390_v7 = vpop.permute.xlu0 %2389  ;;  %v2400_v17 = vpop.permute.xlu2 %2399 }
 0x3d5   : > { %2469 = vrot.lane.b32.xlu1 %v2281_v3, %s5409_s23  ;;  %2562 = vst.msk [vmem:[#allocation3 + $0xa0] sm:$0xff] %vm2541_vm8, %v2390_v7  ;;  %v2630_v3 = vld [vmem:[#allocation2 + $0x140] sm:$0xff] }
 0x3d6   : > { %2567 = vst.msk [vmem:[#allocation3 + $0xc8] sm:$0xff] %vm2541_vm8, %v2400_v17 }
 0x3d7   : > { %v2386_v15 = vpop.permute.xlu1 %2385 }
 0x3d8   : > { %2560 = vst.msk [vmem:[#allocation3 + $0x90] sm:$0xff] %vm2541_vm8, %v2386_v15 }
 0x3da   : > { %2737 = vrot.lane.b32.xlu0 %v2608_v6, %s5410_s24  ;;  %2471 = vrot.lane.b32.xlu2 %v2282_v25, %s5409_s23  ;;  %v2635_v6 = vld [vmem:[#allocation2 + $0x180] sm:$0xff]  ;;  %v2631_v25 = vld [vmem:[#allocation2 + $0x150] sm:$0xff] }
 0x3dc   : > { %v2396_v33 = vpop.permute.xlu0 %2395  ;;  %v2406_v44 = vpop.permute.xlu2 %2405 }
 0x3dd   : > { %2475 = vrot.lane.b32.xlu1 %v2284_v19, %s5409_s23  ;;  %2565 = vst.msk [vmem:[#allocation3 + $0xb8] sm:$0xff] %vm2541_vm8, %v2396_v33  ;;  %v2633_v19 = vld [vmem:[#allocation2 + $0x168] sm:$0xff] }
 0x3de   : > { %2570 = vst.msk [vmem:[#allocation3 + $0xe0] sm:$0xff] %vm2541_vm8, %v2406_v44 }
 0x3df   : > { %v2392_v52 = vpop.permute.xlu1 %2391 }
 0x3e0   : > { %2563 = vst.msk [vmem:[#allocation3 + $0xa8] sm:$0xff] %vm2541_vm8, %v2392_v52 }
 0x3e2   : > { %2743 = vrot.lane.b32.xlu0 %v2611_v42, %s5410_s24  ;;  %2735 = vrot.lane.b32.xlu2 %v2607_v58, %s5410_s24  ;;  %v2638_v42 = vld [vmem:[#allocation2 + $0x1a0] sm:$0xff]  ;;  %v2634_v58 = vld [vmem:[#allocation2 + $0x170] sm:$0xff] }
 0x3e4   : > { %v2402_v32 = vpop.permute.xlu0 %2401  ;;  %v2412_v12 = vpop.permute.xlu2 %2411 }
 0x3e5   : > { %2739 = vrot.lane.b32.xlu1 %v2609_v8, %s5410_s24  ;;  %2568 = vst.msk [vmem:[#allocation3 + $0xd0] sm:$0xff] %vm2541_vm8, %v2402_v32  ;;  %v2636_v8 = vld [vmem:[#allocation2 + $0x188] sm:$0xff] }
 0x3e6   : > { %2573 = vst.msk [vmem:[#allocation3 + $0xf8] sm:$0xff] %vm2541_vm8, %v2412_v12 }
 0x3e7   : > { %v2398_v4 = vpop.permute.xlu1 %2397 }
 0x3e8   : > { %2566 = vst.msk [vmem:[#allocation3 + $0xc0] sm:$0xff] %vm2541_vm8, %v2398_v4 }
 0x3ea   : > { %2749 = vrot.lane.b32.xlu0 %v2614_v18, %s5410_s24  ;;  %2741 = vrot.lane.b32.xlu2 %v2610_v35, %s5410_s24  ;;  %v2641_v18 = vld [vmem:[#allocation2 + $0x1f8] sm:$0xff] }
 0x3eb   : > { %v2637_v35 = vld [vmem:[#allocation2 + $0x198] sm:$0xff] }
 0x3ec   : > { %v2408_v16 = vpop.permute.xlu0 %2407  ;;  %v2418_v30 = vpop.permute.xlu2 %2417 }
 0x3ed   : > { %2745 = vrot.lane.b32.xlu1 %v2612_v46, %s5410_s24  ;;  %2571 = vst.msk [vmem:[#allocation3 + $0xe8] sm:$0xff] %vm2541_vm8, %v2408_v16  ;;  %v2639_v46 = vld [vmem:[#allocation2 + $0x1e0] sm:$0xff] }
 0x3ee   : > { %2576 = vst.msk [vmem:[#allocation3 + $0x110] sm:$0xff] %vm2541_vm8, %v2418_v30 }
 0x3ef   : > { %v2404_v36 = vpop.permute.xlu1 %2403 }
 0x3f0   : > { %2569 = vst.msk [vmem:[#allocation3 + $0xd8] sm:$0xff] %vm2541_vm8, %v2404_v36 }
 0x3f2   : > { %2755 = vrot.lane.b32.xlu0 %v2617_v43, %s5410_s24  ;;  %2747 = vrot.lane.b32.xlu2 %v2613_v41, %s5410_s24  ;;  %v2644_v43 = vld [vmem:[#allocation2 + $0x218] sm:$0xff]  ;;  %v2640_v41 = vld [vmem:[#allocation2 + $0x1e8] sm:$0xff] }
 0x3f4   : > { %v2414_v50 = vpop.permute.xlu0 %2413  ;;  %v2424_v59 = vpop.permute.xlu2 %2423 }
 0x3f5   : > { %2751 = vrot.lane.b32.xlu1 %v2615_v40, %s5410_s24  ;;  %2574 = vst.msk [vmem:[#allocation3 + $0x100] sm:$0xff] %vm2541_vm8, %v2414_v50  ;;  %v2642_v40 = vld [vmem:[#allocation2 + $0x200] sm:$0xff] }
 0x3f6   : > { %2579 = vst.msk [vmem:[#allocation3 + $0x128] sm:$0xff] %vm2541_vm8, %v2424_v59 }
 0x3f7   : > { %v2410_v1 = vpop.permute.xlu1 %2409 }
 0x3f8   : > { %2572 = vst.msk [vmem:[#allocation3 + $0xf0] sm:$0xff] %vm2541_vm8, %v2410_v1 }
 0x3fa   : > { %2761 = vrot.lane.b32.xlu0 %v2620_v54, %s5410_s24  ;;  %2753 = vrot.lane.b32.xlu2 %v2616_v20, %s5410_s24  ;;  %v2647_v54 = vld [vmem:[#allocation2 + $0x240] sm:$0xff]  ;;  %v2643_v20 = vld [vmem:[#allocation2 + $0x210] sm:$0xff] }
 0x3fc   : > { %v2420_v26 = vpop.permute.xlu0 %2419  ;;  %v2430_v51 = vpop.permute.xlu2 %2429 }
 0x3fd   : > { %2757 = vrot.lane.b32.xlu1 %v2618_v9, %s5410_s24  ;;  %2577 = vst.msk [vmem:[#allocation3 + $0x118] sm:$0xff] %vm2541_vm8, %v2420_v26  ;;  %v2645_v9 = vld [vmem:[#allocation2 + $0x228] sm:$0xff] }
 0x3fe   : > { %2582 = vst.msk [vmem:[#allocation3 + $0x140] sm:$0xff] %vm2541_vm8, %v2430_v51 }
 0x3ff   : > { %v2416_v34 = vpop.permute.xlu1 %2415 }
 0x400   : > { %2575 = vst.msk [vmem:[#allocation3 + $0x108] sm:$0xff] %vm2541_vm8, %v2416_v34 }
 0x402   : > { %2767 = vrot.lane.b32.xlu0 %v2623_v45, %s5410_s24  ;;  %2759 = vrot.lane.b32.xlu2 %v2619_v61, %s5410_s24  ;;  %v2650_v45 = vld [vmem:[#allocation2 + $0x260] sm:$0xff]  ;;  %v2646_v61 = vld [vmem:[#allocation2 + $0x230] sm:$0xff] }
 0x404   : > { %v2426_v53 = vpop.permute.xlu0 %2425  ;;  %v2436_v2 = vpop.permute.xlu2 %2435 }
 0x405   : > { %2763 = vrot.lane.b32.xlu1 %v2621_v38, %s5410_s24  ;;  %2580 = vst.msk [vmem:[#allocation3 + $0x130] sm:$0xff] %vm2541_vm8, %v2426_v53  ;;  %v2648_v38 = vld [vmem:[#allocation2 + $0x248] sm:$0xff] }
 0x406   : > { %2585 = vst.msk [vmem:[#allocation3 + $0x158] sm:$0xff] %vm2541_vm8, %v2436_v2 }
 0x407   : > { %v2422_v14 = vpop.permute.xlu1 %2421 }
 0x408   : > { %2578 = vst.msk [vmem:[#allocation3 + $0x120] sm:$0xff] %vm2541_vm8, %v2422_v14 }
 0x40a   : > { %2773 = vrot.lane.b32.xlu0 %v2626_v62, %s5410_s24  ;;  %2765 = vrot.lane.b32.xlu2 %v2622_v27, %s5410_s24  ;;  %v2653_v62 = vld [vmem:[#allocation2 + $0x288] sm:$0xff]  ;;  %v2649_v27 = vld [vmem:[#allocation2 + $0x258] sm:$0xff] }
 0x40c   : > { %v2432_v23 = vpop.permute.xlu0 %2431  ;;  %v2442_v37 = vpop.permute.xlu2 %2441 }
 0x40d   : > { %2769 = vrot.lane.b32.xlu1 %v2624_v56, %s5410_s24  ;;  %2583 = vst.msk [vmem:[#allocation3 + $0x148] sm:$0xff] %vm2541_vm8, %v2432_v23  ;;  %v2651_v56 = vld [vmem:[#allocation2 + $0x270] sm:$0xff] }
 0x40e   : > { %2588 = vst.msk [vmem:[#allocation3 + $0x170] sm:$0xff] %vm2541_vm8, %v2442_v37 }
 0x40f   : > { %v2428_v57 = vpop.permute.xlu1 %2427 }
 0x410   : > { %2581 = vst.msk [vmem:[#allocation3 + $0x138] sm:$0xff] %vm2541_vm8, %v2428_v57 }
 0x412   : > { %2779 = vrot.lane.b32.xlu0 %v2629_v49, %s5410_s24  ;;  %2771 = vrot.lane.b32.xlu2 %v2625_v10, %s5410_s24  ;;  %v2656_v49 = vld [vmem:[#allocation2 + $0x2a8] sm:$0xff]  ;;  %v2652_v10 = vld [vmem:[#allocation2 + $0x278] sm:$0xff] }
 0x414   : > { %v2438_v5 = vpop.permute.xlu0 %2437  ;;  %v2448_v60 = vpop.permute.xlu2 %2447 }
 0x415   : > { %2775 = vrot.lane.b32.xlu1 %v2627_v29, %s5410_s24  ;;  %2586 = vst.msk [vmem:[#allocation3 + $0x160] sm:$0xff] %vm2541_vm8, %v2438_v5  ;;  %v2654_v29 = vld [vmem:[#allocation2 + $0x290] sm:$0xff] }
 0x416   : > { %2591 = vst.msk [vmem:[#allocation3 + $0x188] sm:$0xff] %vm2541_vm8, %v2448_v60 }
 0x417   : > { %v2434_v47 = vpop.permute.xlu1 %2433 }
 0x418   : > { %2584 = vst.msk [vmem:[#allocation3 + $0x150] sm:$0xff] %vm2541_vm8, %v2434_v47 }
 0x41a   : > { %2785 = vrot.lane.b32.xlu0 %v2632_v22, %s5410_s24  ;;  %2777 = vrot.lane.b32.xlu2 %v2628_v13, %s5410_s24  ;;  %v2659_v22 = vld [vmem:[#allocation2 + $0x2d0] sm:$0xff]  ;;  %v2655_v13 = vld [vmem:[#allocation2 + $0x2a0] sm:$0xff] }
 0x41c   : > { %v2444_v7 = vpop.permute.xlu0 %2443  ;;  %v2454_v17 = vpop.permute.xlu2 %2453 }
 0x41d   : > { %2781 = vrot.lane.b32.xlu1 %v2630_v3, %s5410_s24  ;;  %2589 = vst.msk [vmem:[#allocation3 + $0x178] sm:$0xff] %vm2541_vm8, %v2444_v7  ;;  %v2657_v3 = vld [vmem:[#allocation2 + $0x2b8] sm:$0xff] }
 0x41e   : > { %2594 = vst.msk [vmem:[#allocation3 + $0x1a0] sm:$0xff] %vm2541_vm8, %v2454_v17 }
 0x41f   : > { %v2440_v15 = vpop.permute.xlu1 %2439 }
 0x420   : > { %2587 = vst.msk [vmem:[#allocation3 + $0x168] sm:$0xff] %vm2541_vm8, %v2440_v15 }
 0x422   : > { %2791 = vrot.lane.b32.xlu0 %v2635_v6, %s5410_s24  ;;  %2783 = vrot.lane.b32.xlu2 %v2631_v25, %s5410_s24  ;;  %v2992_v6 = vld [vmem:[#allocation2 + $0x31] sm:$0xff]  ;;  %v2658_v25 = vld [vmem:[#allocation2 + $0x2c0] sm:$0xff] }
 0x424   : > { %v2450_v33 = vpop.permute.xlu0 %2449  ;;  %v2460_v44 = vpop.permute.xlu2 %2459 }
 0x425   : > { %2787 = vrot.lane.b32.xlu1 %v2633_v19, %s5410_s24  ;;  %2592 = vst.msk [vmem:[#allocation3 + $0x190] sm:$0xff] %vm2541_vm8, %v2450_v33  ;;  %v2660_v19 = vld [vmem:[#allocation2 + $0x2d8] sm:$0xff] }
 0x426   : > { %2597 = vst.msk [vmem:[#allocation3 + $0x1b8] sm:$0xff] %vm2541_vm8, %v2460_v44 }
 0x427   : > { %v2446_v52 = vpop.permute.xlu1 %2445 }
 0x428   : > { %2590 = vst.msk [vmem:[#allocation3 + $0x180] sm:$0xff] %vm2541_vm8, %v2446_v52 }
 0x42a   : > { %2797 = vrot.lane.b32.xlu0 %v2638_v42, %s5410_s24  ;;  %2789 = vrot.lane.b32.xlu2 %v2634_v58, %s5410_s24  ;;  %v2661_v42 = vld [vmem:[#allocation2 + $0x2e8] sm:$0xff]  ;;  %v2993_v58 = vld [vmem:[#allocation2 + $0x39] sm:$0xff] }
 0x42c   : > { %v2456_v32 = vpop.permute.xlu0 %2455  ;;  %v2466_v12 = vpop.permute.xlu2 %2465 }
 0x42d   : > { %2793 = vrot.lane.b32.xlu1 %v2636_v8, %s5410_s24  ;;  %2595 = vst.msk [vmem:[#allocation3 + $0x1a8] sm:$0xff] %vm2541_vm8, %v2456_v32 }
 0x42e   : > { %2600 = vst.msk [vmem:[#allocation3 + $0x1d0] sm:$0xff] %vm2541_vm8, %v2466_v12 }
 0x42f   : > { %v2452_v4 = vpop.permute.xlu1 %2451 }
 0x430   : > { %2593 = vst.msk [vmem:[#allocation3 + $0x198] sm:$0xff] %vm2541_vm8, %v2452_v4  ;;  %v2994_v4 = vld [vmem:[#allocation2 + $0x49] sm:$0xff] }
 0x432   : > { %2803 = vrot.lane.b32.xlu0 %v2641_v18, %s5410_s24  ;;  %2795 = vrot.lane.b32.xlu2 %v2637_v35, %s5410_s24  ;;  %v3377_v18 = vld [vmem:[#allocation2 + $0x32] sm:$0xff] }
 0x433   : > { %v2662_v35 = vld [vmem:[#allocation2 + $0x2f0] sm:$0xff] }
 0x434   : > { %v2462_v16 = vpop.permute.xlu0 %2461  ;;  %v2472_v30 = vpop.permute.xlu2 %2471 }
 0x435   : > { %2799 = vrot.lane.b32.xlu1 %v2639_v46, %s5410_s24  ;;  %2598 = vst.msk [vmem:[#allocation3 + $0x1c0] sm:$0xff] %vm2541_vm8, %v2462_v16 }
 0x436   : > { %2603 = vst.msk [vmem:[#allocation3 + $0x1e8] sm:$0xff] %vm2541_vm8, %v2472_v30  ;;  %v2663_v30 = vld [vmem:[#allocation2 + $0x300] sm:$0xff] }
 0x437   : > { %v2458_v36 = vpop.permute.xlu1 %2457 }
 0x438   : > { %2596 = vst.msk [vmem:[#allocation3 + $0x1b0] sm:$0xff] %vm2541_vm8, %v2458_v36  ;;  %v2995_v36 = vld [vmem:[#allocation2 + $0x51] sm:$0xff] }
 0x43a   : > { %2809 = vrot.lane.b32.xlu0 %v2644_v43, %s5410_s24  ;;  %2801 = vrot.lane.b32.xlu2 %v2640_v41, %s5410_s24 }
 0x43c   : > { %v2468_v50 = vpop.permute.xlu0 %2467  ;;  %v2736_v59 = vpop.permute.xlu2 %2735 }
 0x43d   : > { %2805 = vrot.lane.b32.xlu1 %v2642_v40, %s5410_s24  ;;  %2601 = vst.msk [vmem:[#allocation3 + $0x1d8] sm:$0xff] %vm2541_vm8, %v2468_v50  ;;  %v2997_v50 = vld [vmem:[#allocation2 + $0x69] sm:$0xff] }
 0x43e   : > { %2928 = vst.msk [vmem:[#allocation3] sm:$0xff] %vm2927_vm9, %v2736_v59  ;;  %v2664_v59 = vld [vmem:[#allocation2 + $0x308] sm:$0xff] }
 0x43f   : > { %v2464_v1 = vpop.permute.xlu1 %2463 }
 0x440   : > { %2599 = vst.msk [vmem:[#allocation3 + $0x1c8] sm:$0xff] %vm2541_vm8, %v2464_v1 }
 0x442   : > { %2815 = vrot.lane.b32.xlu0 %v2647_v54, %s5410_s24  ;;  %2807 = vrot.lane.b32.xlu2 %v2643_v20, %s5410_s24  ;;  %v2996_v20 = vld [vmem:[#allocation2 + $0x61] sm:$0xff] }
 0x444   : > { %v2474_v26 = vpop.permute.xlu0 %2473  ;;  %v2742_v51 = vpop.permute.xlu2 %2741 }
 0x445   : > { %2811 = vrot.lane.b32.xlu1 %v2645_v9, %s5410_s24  ;;  %2604 = vst.msk [vmem:[#allocation3 + $0x1f0] sm:$0xff] %vm2541_vm8, %v2474_v26  ;;  %v3008_v9 = vld [vmem:[#allocation2 + $0xf1] sm:$0xff] }
 0x446   : > { %2931 = vst.msk [vmem:[#allocation3 + $0x18] sm:$0xff] %vm2927_vm9, %v2742_v51 }
 0x447   : > { %v2470_v34 = vpop.permute.xlu1 %2469 }
 0x448   : > { %2602 = vst.msk [vmem:[#allocation3 + $0x1e0] sm:$0xff] %vm2541_vm8, %v2470_v34  ;;  %v3009_v34 = vld [vmem:[#allocation2 + $0xf9] sm:$0xff] }
 0x44a   : > { %2821 = vrot.lane.b32.xlu0 %v2650_v45, %s5410_s24  ;;  %2813 = vrot.lane.b32.xlu2 %v2646_v61, %s5410_s24 }
 0x44c   : > { %v2738_v53 = vpop.permute.xlu0 %2737  ;;  %v2748_v2 = vpop.permute.xlu2 %2747 }
 0x44d   : > { %2817 = vrot.lane.b32.xlu1 %v2648_v38, %s5410_s24  ;;  %2929 = vst.msk [vmem:[#allocation3 + $0x8] sm:$0xff] %vm2927_vm9, %v2738_v53  ;;  %v3010_v38 = vld [vmem:[#allocation2 + $0x109] sm:$0xff]  ;;  %v2998_v53 = vld [vmem:[#allocation2 + $0x79] sm:$0xff] }
 0x44e   : > { %2934 = vst.msk [vmem:[#allocation3 + $0x30] sm:$0xff] %vm2927_vm9, %v2748_v2 }
 0x44f   : > { %v2476_v14 = vpop.permute.xlu1 %2475 }
 0x450   : > { %2605 = vst.msk [vmem:[#allocation3 + $0x1f8] sm:$0xff] %vm2541_vm8, %v2476_v14  ;;  %v3384_v14 = vld [vmem:[#allocation2 + $0x82] sm:$0xff] }
 0x452   : > { %2827 = vrot.lane.b32.xlu0 %v2653_v62, %s5410_s24  ;;  %2819 = vrot.lane.b32.xlu2 %v2649_v27, %s5410_s24  ;;  %v2999_v62 = vld [vmem:[#allocation2 + $0x81] sm:$0xff]  ;;  %v3011_v27 = vld [vmem:[#allocation2 + $0x111] sm:$0xff] }
 0x454   : > { %v2744_v23 = vpop.permute.xlu0 %2743  ;;  %v2754_v37 = vpop.permute.xlu2 %2753 }
 0x455   : > { %2823 = vrot.lane.b32.xlu1 %v2651_v56, %s5410_s24  ;;  %2932 = vst.msk [vmem:[#allocation3 + $0x20] sm:$0xff] %vm2927_vm9, %v2744_v23 }
 0x456   : > { %2937 = vst.msk [vmem:[#allocation3 + $0x48] sm:$0xff] %vm2927_vm9, %v2754_v37  ;;  %v3024_v37 = vld [vmem:[#allocation2 + $0x1e1] sm:$0xff] }
 0x457   : > { %v2740_v57 = vpop.permute.xlu1 %2739 }
 0x458   : > { %2930 = vst.msk [vmem:[#allocation3 + $0x10] sm:$0xff] %vm2927_vm9, %v2740_v57  ;;  %v3383_v57 = vld [vmem:[#allocation2 + $0x7a] sm:$0xff] }
 0x45a   : > { %2833 = vrot.lane.b32.xlu0 %v2656_v49, %s5410_s24  ;;  %2825 = vrot.lane.b32.xlu2 %v2652_v10, %s5410_s24  ;;  %v3395_v49 = vld [vmem:[#allocation2 + $0x10a] sm:$0xff] }
 0x45c   : > { %v2750_v5 = vpop.permute.xlu0 %2749  ;;  %v2760_v60 = vpop.permute.xlu2 %2759 }
 0x45d   : > { %2829 = vrot.lane.b32.xlu1 %v2654_v29, %s5410_s24  ;;  %2935 = vst.msk [vmem:[#allocation3 + $0x38] sm:$0xff] %vm2927_vm9, %v2750_v5 }
 0x45e   : > { %2940 = vst.msk [vmem:[#allocation3 + $0x60] sm:$0xff] %vm2927_vm9, %v2760_v60  ;;  %v3396_v60 = vld [vmem:[#allocation2 + $0x112] sm:$0xff] }
 0x45f   : > { %v2746_v47 = vpop.permute.xlu1 %2745 }
 0x460   : > { %2933 = vst.msk [vmem:[#allocation3 + $0x28] sm:$0xff] %vm2927_vm9, %v2746_v47  ;;  %v3025_v47 = vld [vmem:[#allocation2 + $0x1e9] sm:$0xff] }
 0x462   : > { %2839 = vrot.lane.b32.xlu0 %v2659_v22, %s5410_s24  ;;  %2831 = vrot.lane.b32.xlu2 %v2655_v13, %s5410_s24 }
 0x464   : > { %v2756_v7 = vpop.permute.xlu0 %2755  ;;  %v2766_v17 = vpop.permute.xlu2 %2765 }
 0x465   : > { %2835 = vrot.lane.b32.xlu1 %v2657_v3, %s5410_s24  ;;  %2938 = vst.msk [vmem:[#allocation3 + $0x50] sm:$0xff] %vm2927_vm9, %v2756_v7  ;;  %v3012_v7 = vld [vmem:[#allocation2 + $0x121] sm:$0xff] }
 0x466   : > { %2943 = vst.msk [vmem:[#allocation3 + $0x78] sm:$0xff] %vm2927_vm9, %v2766_v17  ;;  %v3000_v17 = vld [vmem:[#allocation2 + $0x91] sm:$0xff] }
 0x467   : > { %v2752_v15 = vpop.permute.xlu1 %2751 }
 0x468   : > { %2936 = vst.msk [vmem:[#allocation3 + $0x40] sm:$0xff] %vm2927_vm9, %v2752_v15  ;;  %v3862_v15 = vld [vmem:[%s8387_s1 + $0x10] sm:$0x3] }
 0x46a   : > { %3120 = vrot.lane.b32.xlu0 %v2992_v6, %s5411_s25  ;;  %2837 = vrot.lane.b32.xlu2 %v2658_v25, %s5410_s24 }
 0x46c   : > { %v2762_v33 = vpop.permute.xlu0 %2761  ;;  %v2772_v44 = vpop.permute.xlu2 %2771 }
 0x46d   : > { %2841 = vrot.lane.b32.xlu1 %v2660_v19, %s5410_s24  ;;  %2941 = vst.msk [vmem:[#allocation3 + $0x68] sm:$0xff] %vm2927_vm9, %v2762_v33 }
 0x46e   : > { %2946 = vst.msk [vmem:[#allocation3 + $0x90] sm:$0xff] %vm2927_vm9, %v2772_v44 }
 0x46f   : > { %v2758_v52 = vpop.permute.xlu1 %2757 }
 0x470   : > { %2939 = vst.msk [vmem:[#allocation3 + $0x58] sm:$0xff] %vm2927_vm9, %v2758_v52  ;;  %v3386_v52 = vld [vmem:[#allocation2 + $0x9a] sm:$0xff] }
 0x472   : > { %3507 = vrot.lane.b32.xlu0 %v6633_v21, %s5412_s26  ;;  %2843 = vrot.lane.b32.xlu2 %v2661_v42, %s5410_s24  ;;  %v3001_v42 = vld [vmem:[#allocation2 + $0x99] sm:$0xff] }
 0x474   : > { %v2768_v8 = vpop.permute.xlu0 %2767  ;;  %v2778_v32 = vpop.permute.xlu2 %2777 }
 0x475   : > { %3122 = vrot.lane.b32.xlu1 %v2993_v58, %s5411_s25  ;;  %2944 = vst.msk [vmem:[#allocation3 + $0x80] sm:$0xff] %vm2927_vm9, %v2768_v8  ;;  %v5172_v58 = vld [vmem:[%s8387_s1 + $0x8] sm:$0xff] }
 0x476   : > { %2949 = vst.msk [vmem:[#allocation3 + $0xa8] sm:$0xff] %vm2927_vm9, %v2778_v32 }
 0x477   : > { %v2764_v12 = vpop.permute.xlu1 %2763 }
 0x478   : > { %2942 = vst.msk [vmem:[#allocation3 + $0x70] sm:$0xff] %vm2927_vm9, %v2764_v12  ;;  %v5171_v12 = vld [vmem:[%s8387_s1] sm:$0xff] }
 0x47a   : > { %3124 = vrot.lane.b32.xlu0 %v2994_v4, %s5411_s25  ;;  %3505 = vrot.lane.b32.xlu2 %v3377_v18, %s5412_s26  ;;  %v3026_v18 = vld [vmem:[#allocation2 + $0x1f9] sm:$0xff] }
 0x47c   : > { %v2774_v21 = vpop.permute.xlu0 %2773  ;;  %v2784_v46 = vpop.permute.xlu2 %2783 }
 0x47d   : > { %2845 = vrot.lane.b32.xlu1 %v2662_v35, %s5410_s24  ;;  %2947 = vst.msk [vmem:[#allocation3 + $0x98] sm:$0xff] %vm2927_vm9, %v2774_v21  ;;  %v3385_v35 = vld [vmem:[#allocation2 + $0x92] sm:$0xff]  ;;  %v3397_v21 = vld [vmem:[#allocation2 + $0x122] sm:$0xff] }
 0x47e   : > { %2952 = vst.msk [vmem:[#allocation3 + $0xc0] sm:$0xff] %vm2927_vm9, %v2784_v46 }
 0x47f   : > { %v2770_v16 = vpop.permute.xlu1 %2769 }
 0x480   : > { %2945 = vst.msk [vmem:[#allocation3 + $0x88] sm:$0xff] %vm2927_vm9, %v2770_v16 }
 0x482   : > { %3511 = vrot.lane.b32.xlu0 %v6631_v48, %s5412_s26  ;;  %2847 = vrot.lane.b32.xlu2 %v2663_v30, %s5410_s24 }
 0x484   : > { %v2780_v43 = vpop.permute.xlu0 %2779  ;;  %v2790_v41 = vpop.permute.xlu2 %2789 }
 0x485   : > { %3126 = vrot.lane.b32.xlu1 %v2995_v36, %s5411_s25  ;;  %2950 = vst.msk [vmem:[#allocation3 + $0xb0] sm:$0xff] %vm2927_vm9, %v2780_v43  ;;  %v3398_v36 = vld [vmem:[#allocation2 + $0x12a] sm:$0xff]  ;;  %v3027_v43 = vld [vmem:[#allocation2 + $0x201] sm:$0xff] }
 0x486   : > { %2955 = vst.msk [vmem:[#allocation3 + $0xd8] sm:$0xff] %vm2927_vm9, %v2790_v41 }
 0x487   : > { %v2776_v40 = vpop.permute.xlu1 %2775 }
 0x488   : > { %2948 = vst.msk [vmem:[#allocation3 + $0xa0] sm:$0xff] %vm2927_vm9, %v2776_v40 }
 0x48a   : > { %3130 = vrot.lane.b32.xlu0 %v2997_v50, %s5411_s25  ;;  %3509 = vrot.lane.b32.xlu2 %v6643_v39, %s5412_s26 }
 0x48c   : > { %v2786_v48 = vpop.permute.xlu0 %2785  ;;  %v2796_v1 = vpop.permute.xlu2 %2795 }
 0x48d   : > { %2849 = vrot.lane.b32.xlu1 %v2664_v59, %s5410_s24  ;;  %2953 = vst.msk [vmem:[#allocation3 + $0xc8] sm:$0xff] %vm2927_vm9, %v2786_v48  ;;  %v3014_v59 = vld [vmem:[#allocation2 + $0x139] sm:$0xff] }
 0x48e   : > { %2958 = vst.msk [vmem:[#allocation3 + $0xf0] sm:$0xff] %vm2927_vm9, %v2796_v1  ;;  %v3411_v48 = vld [vmem:[#allocation2 + $0x1fa] sm:$0xff] }
 0x48f   : > { %v2782_v54 = vpop.permute.xlu1 %2781 }
 0x490   : > { %2951 = vst.msk [vmem:[#allocation3 + $0xb8] sm:$0xff] %vm2927_vm9, %v2782_v54 }
 0x492   : > { %3513 = vrot.lane.b32.xlu0 %v6645_v31, %s5412_s26  ;;  %3128 = vrot.lane.b32.xlu2 %v2996_v20, %s5411_s25 }
 0x494   : > { %v2792_v26 = vpop.permute.xlu0 %2791  ;;  %v2802_v39 = vpop.permute.xlu2 %2801 }
 0x495   : > { %3152 = vrot.lane.b32.xlu1 %v3008_v9, %s5411_s25  ;;  %2956 = vst.msk [vmem:[#allocation3 + $0xe0] sm:$0xff] %vm2927_vm9, %v2792_v26  ;;  %v3388_v9 = vld [vmem:[#allocation2 + $0xb2] sm:$0xff] }
 0x496   : > { %2961 = vst.msk [vmem:[#allocation3 + $0x108] sm:$0xff] %vm2927_vm9, %v2802_v39  ;;  %v3003_v26 = vld [vmem:[#allocation2 + $0xb1] sm:$0xff]  ;;  %v3015_v39 = vld [vmem:[#allocation2 + $0x141] sm:$0xff] }
 0x497   : > { %v2788_v51 = vpop.permute.xlu1 %2787 }
 0x498   : > { %2954 = vst.msk [vmem:[#allocation3 + $0xd0] sm:$0xff] %vm2927_vm9, %v2788_v51 }
 0x49a   : > { %3539 = vrot.lane.b32.xlu0 %v6685_v24, %s5412_s26  ;;  %3154 = vrot.lane.b32.xlu2 %v3009_v34, %s5411_s25 }
 0x49c   : > { %v2798_v31 = vpop.permute.xlu0 %2797  ;;  %v2808_v45 = vpop.permute.xlu2 %2807 }
 0x49d   : > { %3515 = vrot.lane.b32.xlu1 %v6655_v0, %s5412_s26  ;;  %2959 = vst.msk [vmem:[#allocation3 + $0xf8] sm:$0xff] %vm2927_vm9, %v2798_v31 }
 0x49e   : > { %2964 = vst.msk [vmem:[#allocation3 + $0x120] sm:$0xff] %vm2927_vm9, %v2808_v45 }
 0x49f   : > { %v2794_v61 = vpop.permute.xlu1 %2793 }
 0x4a0   : > { %2957 = vst.msk [vmem:[#allocation3 + $0xe8] sm:$0xff] %vm2927_vm9, %v2794_v61 }
 0x4a2   : > { %3156 = vrot.lane.b32.xlu0 %v3010_v38, %s5411_s25  ;;  %3537 = vrot.lane.b32.xlu2 %v6676_v11, %s5412_s26  ;;  %v3028_v38 = vld [vmem:[#allocation2 + $0x211] sm:$0xff] }
 0x4a4   : > { %v2804_v24 = vpop.permute.xlu0 %2803  ;;  %v2814_v2 = vpop.permute.xlu2 %2813 }
 0x4a5   : > { %3132 = vrot.lane.b32.xlu1 %v2998_v53, %s5411_s25  ;;  %2962 = vst.msk [vmem:[#allocation3 + $0x110] sm:$0xff] %vm2927_vm9, %v2804_v24  ;;  %v3387_v24 = vld [vmem:[#allocation2 + $0xaa] sm:$0xff] }
 0x4a6   : > { %2967 = vst.msk [vmem:[#allocation3 + $0x138] sm:$0xff] %vm2927_vm9, %v2814_v2  ;;  %v3399_v2 = vld [vmem:[#allocation2 + $0x13a] sm:$0xff] }
 0x4a7   : > { %v2800_v0 = vpop.permute.xlu1 %2799 }
 0x4a8   : > { %2960 = vst.msk [vmem:[#allocation3 + $0x100] sm:$0xff] %vm2927_vm9, %v2800_v0 }
 0x4aa   : > { %3519 = vrot.lane.b32.xlu0 %v3384_v14, %s5412_s26  ;;  %3134 = vrot.lane.b32.xlu2 %v2999_v62, %s5411_s25 }
 0x4ac   : > { %v2810_v56 = vpop.permute.xlu0 %2809  ;;  %v2820_v11 = vpop.permute.xlu2 %2819 }
 0x4ad   : > { %3158 = vrot.lane.b32.xlu1 %v3011_v27, %s5411_s25  ;;  %2965 = vst.msk [vmem:[#allocation3 + $0x128] sm:$0xff] %vm2927_vm9, %v2810_v56  ;;  %v3041_v27 = vld [vmem:[#allocation2 + $0x2a9] sm:$0xff] }
 0x4ae   : > { %2970 = vst.msk [vmem:[#allocation3 + $0x150] sm:$0xff] %vm2927_vm9, %v2820_v11  ;;  %v3400_v56 = vld [vmem:[#allocation2 + $0x142] sm:$0xff]  ;;  %v3029_v11 = vld [vmem:[#allocation2 + $0x219] sm:$0xff] }
 0x4af   : > { %v2806_v23 = vpop.permute.xlu1 %2805 }
 0x4b0   : > { %2963 = vst.msk [vmem:[#allocation3 + $0x118] sm:$0xff] %vm2927_vm9, %v2806_v23 }
 0x4b2   : > { %3184 = vrot.lane.b32.xlu0 %v3024_v37, %s5411_s25  ;;  %3517 = vrot.lane.b32.xlu2 %v3383_v57, %s5412_s26 }
 0x4b4   : > { %v2816_v10 = vpop.permute.xlu0 %2815  ;;  %v2826_v29 = vpop.permute.xlu2 %2825 }
 0x4b5   : > { %3541 = vrot.lane.b32.xlu1 %v3395_v49, %s5412_s26  ;;  %2968 = vst.msk [vmem:[#allocation3 + $0x140] sm:$0xff] %vm2927_vm9, %v2816_v10 }
 0x4b6   : > { %2973 = vst.msk [vmem:[#allocation3 + $0x168] sm:$0xff] %vm2927_vm9, %v2826_v29  ;;  %v3425_v29 = vld [vmem:[#allocation2 + $0x2a2] sm:$0xff] }
 0x4b7   : > { %v2812_v5 = vpop.permute.xlu1 %2811 }
 0x4b8   : > { %2966 = vst.msk [vmem:[#allocation3 + $0x130] sm:$0xff] %vm2927_vm9, %v2812_v5 }
 0x4ba   : > { %3571 = vrot.lane.b32.xlu0 %v6712_v63, %s5412_s26  ;;  %3543 = vrot.lane.b32.xlu2 %v3396_v60, %s5412_s26  ;;  %v3872_v63 = vunpack.c.l.b16 %v3862_v15  ;;  %v3040_v60 = vld [vmem:[#allocation2 + $0x2a1] sm:$0xff]  ;;  %v3426_v15 = vld [vmem:[#allocation2 + $0x2aa] sm:$0xff] }
 0x4bc   : > { %v2822_v22 = vpop.permute.xlu0 %2821  ;;  %v2832_v13 = vpop.permute.xlu2 %2831  ;;  %v3875_v19 = vpack.c.b16 %v3872_v63, %v3872_v63 }
 0x4bd   : > { %3186 = vrot.lane.b32.xlu1 %v3025_v47, %s5411_s25  ;;  %2971 = vst.msk [vmem:[#allocation3 + $0x158] sm:$0xff] %vm2927_vm9, %v2822_v22  ;;  %v3413_v47 = vld [vmem:[#allocation2 + $0x212] sm:$0xff] }
 0x4be   : > { %2976 = vst.msk [vmem:[#allocation3 + $0x180] sm:$0xff] %vm2927_vm9, %v2832_v13  ;;  %v3977_v44 = vsel %vm3975_vm10, %v3875_v19, 0  ;;  %v3389_v19 = vld [vmem:[#allocation2 + $0xc2] sm:$0xff] }
 0x4bf   : > { %v2818_v3 = vpop.permute.xlu1 %2817  ;;  %3984 = vmatpush.bf16.msra.mxu0 %v3977_v44  ;;  %5333 = vmatpush.bf16.msra.mxu1 %v3977_v44 }
 0x4c0   : > { %2969 = vst.msk [vmem:[#allocation3 + $0x148] sm:$0xff] %vm2927_vm9, %v2818_v3  ;;  %5334 = vmatpush.bf16.msra.mxu2 %v3977_v44  ;;  %5335 = vmatpush.bf16.msra.mxu3 %v3977_v44  ;;  %v3016_v44 = vld [vmem:[#allocation2 + $0x151] sm:$0xff] }
 0x4c2   : > { %3160 = vrot.lane.b32.xlu0 %v3012_v7, %s5411_s25  ;;  %3569 = vrot.lane.b32.xlu2 %v6721_v28, %s5412_s26  ;;  %v3013_v28 = vld [vmem:[#allocation2 + $0x129] sm:$0xff] }
 0x4c3   : > { %3985 = vmatpush.bf16.msra.mxu0 %v5172_v58  ;;  %5336 = vmatpush.bf16.msra.mxu1 %v5172_v58  ;;  %v3005_v7 = vld [vmem:[#allocation2 + $0xc9] sm:$0xff] }
 0x4c4   : > { %v2828_v6 = vpop.permute.xlu0 %2827  ;;  %v2838_v25 = vpop.permute.xlu2 %2837  ;;  %5337 = vmatpush.bf16.msra.mxu2 %v5172_v58  ;;  %5338 = vmatpush.bf16.msra.mxu3 %v5172_v58 }
 0x4c5   : > { %3136 = vrot.lane.b32.xlu1 %v3000_v17, %s5411_s25  ;;  %2974 = vst.msk [vmem:[#allocation3 + $0x170] sm:$0xff] %vm2927_vm9, %v2828_v6  ;;  %v3414_v17 = vld [vmem:[#allocation2 + $0x21a] sm:$0xff] }
 0x4c6   : > { %2979 = vst.msk [vmem:[#allocation3 + $0x198] sm:$0xff] %vm2927_vm9, %v2838_v25 }
 0x4c7   : > { %v2824_v33 = vpop.permute.xlu1 %2823  ;;  %3986 = vmatpush.bf16.msra.mxu0 %v5171_v12  ;;  %5339 = vmatpush.bf16.msra.mxu1 %v5171_v12 }
 0x4c8   : > { %2972 = vst.msk [vmem:[#allocation3 + $0x160] sm:$0xff] %vm2927_vm9, %v2824_v33  ;;  %5340 = vmatpush.bf16.msra.mxu2 %v5171_v12  ;;  %5341 = vmatpush.bf16.msra.mxu3 %v5171_v12  ;;  %v3004_v33 = vld [vmem:[#allocation2 + $0xc1] sm:$0xff] }
 0x4ca   : > { %3523 = vrot.lane.b32.xlu0 %v3386_v52, %s5412_s26  ;;  %3138 = vrot.lane.b32.xlu2 %v3001_v42, %s5411_s25 }
 0x4cc   : > { %v2834_v8 = vpop.permute.xlu0 %2833  ;;  %v2844_v32 = vpop.permute.xlu2 %2843 }
 0x4cd   : > { %3162 = vrot.lane.b32.xlu1 %v3013_v28, %s5411_s25  ;;  %2977 = vst.msk [vmem:[#allocation3 + $0x188] sm:$0xff] %vm2927_vm9, %v2834_v8 }
 0x4ce   : > { %2982 = vst.msk [vmem:[#allocation3 + $0x1b0] sm:$0xff] %vm2927_vm9, %v2844_v32 }
 0x4cf   : > { %v2830_v4 = vpop.permute.xlu1 %2829 }
 0x4d0   : > { %2975 = vst.msk [vmem:[#allocation3 + $0x178] sm:$0xff] %vm2927_vm9, %v2830_v4 }
 0x4d2   : > { %3188 = vrot.lane.b32.xlu0 %v3026_v18, %s5411_s25  ;;  %3521 = vrot.lane.b32.xlu2 %v3385_v35, %s5412_s26  ;;  %v3402_v35 = vld [vmem:[#allocation2 + $0x15a] sm:$0xff] }
 0x4d4   : > { %v2840_v46 = vpop.permute.xlu0 %2839  ;;  %v3506_v16 = vpop.permute.xlu2 %3505 }
 0x4d5   : > { %3545 = vrot.lane.b32.xlu1 %v3397_v21, %s5412_s26  ;;  %2980 = vst.msk [vmem:[#allocation3 + $0x1a0] sm:$0xff] %vm2927_vm9, %v2840_v46  ;;  %v3017_v21 = vld [vmem:[#allocation2 + $0x159] sm:$0xff]  ;;  %v3390_v46 = vld [vmem:[#allocation2 + $0xca] sm:$0xff] }
 0x4d7   : > { %v2836_v30 = vpop.permute.xlu1 %2835 }
 0x4d8   : > { %2978 = vst.msk [vmem:[#allocation3 + $0x190] sm:$0xff] %vm2927_vm9, %v2836_v30 }
 0x4da   : > { %3575 = vrot.lane.b32.xlu0 %v6730_v55, %s5412_s26  ;;  %3547 = vrot.lane.b32.xlu2 %v3398_v36, %s5412_s26  ;;  %v3002_v55 = vld [vmem:[#allocation2 + $0xa9] sm:$0xff] }
 0x4dc   : > { %v3121_v41 = vpop.permute.xlu0 %3120  ;;  %v2848_v40 = vpop.permute.xlu2 %2847 }
 0x4dd   : > { %3190 = vrot.lane.b32.xlu1 %v3027_v43, %s5411_s25  ;;  %3313 = vst.msk [vmem:[#allocation3] sm:$0xff] %vm3312_vm11, %v3121_v41  ;;  %v3042_v43 = vld [vmem:[#allocation2 + $0x2b9] sm:$0xff] }
 0x4de   : > { %3698 = vst.msk [vmem:[#allocation3] sm:$0xff] %vm3697_vm12, %v3506_v16  ;;  %v3401_v41 = vld [vmem:[#allocation2 + $0x152] sm:$0xff] }
 0x4df   : > { %v2842_v50 = vpop.permute.xlu1 %2841  ;;  %2984 = vst.msk [vmem:[#allocation3 + $0x1c0] sm:$0xff] %vm2927_vm9, %v2848_v40  ;;  %v3030_v40 = vld [vmem:[#allocation2 + $0x229] sm:$0xff] }
 0x4e0   : > { %2981 = vst.msk [vmem:[#allocation3 + $0x1a8] sm:$0xff] %vm2927_vm9, %v2842_v50 }
 0x4e2   : > { %3164 = vrot.lane.b32.xlu0 %v3014_v59, %s5411_s25  ;;  %3573 = vrot.lane.b32.xlu2 %v3411_v48, %s5412_s26 }
 0x4e4   : > { %v3508_v1 = vpop.permute.xlu0 %3507  ;;  %v3510_v54 = vpop.permute.xlu2 %3509 }
 0x4e5   : > { %3140 = vrot.lane.b32.xlu1 %v3002_v55, %s5411_s25  ;;  %v3762_v31 = vld [vmem:[#allocation3] sm:$0xff] }
 0x4e7   : > { %v3123_v20 = vpop.permute.xlu1 %3122 }
 0x4e8   : > { %3314 = vst.msk [vmem:[#allocation3 + $0x8] sm:$0xff] %vm3312_vm11, %v3123_v20  ;;  %v3416_v20 = vld [vmem:[#allocation2 + $0x232] sm:$0xff] }
 0x4e9   : > { %3699 = vst.msk [vmem:[#allocation3 + $0x8] sm:$0xff] %vm3697_vm12, %v3508_v1 }
 0x4ea   : > { %3527 = vrot.lane.b32.xlu0 %v3388_v9, %s5412_s26  ;;  %3142 = vrot.lane.b32.xlu2 %v3003_v26, %s5411_s25  ;;  %v3031_v9 = vld [vmem:[#allocation2 + $0x231] sm:$0xff]  ;;  %v3043_v26 = vld [vmem:[#allocation2 + $0x2c1] sm:$0xff] }
 0x4ec   : > { %v3125_v51 = vpop.permute.xlu0 %3124  ;;  %v3129_v34 = vpop.permute.xlu2 %3128 }
 0x4ed   : > { %3166 = vrot.lane.b32.xlu1 %v3015_v39, %s5411_s25  ;;  %3315 = vst.msk [vmem:[#allocation3 + $0x10] sm:$0xff] %vm3312_vm11, %v3125_v51 }
 0x4ee   : > { %3700 = vst.msk [vmem:[#allocation3 + $0x10] sm:$0xff] %vm3697_vm12, %v3510_v54 }
 0x4ef   : > { %v2846_v45 = vpop.permute.xlu1 %2845  ;;  %3317 = vst.msk [vmem:[#allocation3 + $0x20] sm:$0xff] %vm3312_vm11, %v3129_v34 }
 0x4f0   : > { %2983 = vst.msk [vmem:[#allocation3 + $0x1b8] sm:$0xff] %vm2927_vm9, %v2846_v45  ;;  %v3763_v61 = vld [vmem:[#allocation3 + $0x8] sm:$0xff] }
 0x4f1   : > { %v3826_v53 = vpack.c.bf16 %v3763_v61, %v3762_v31 }
 0x4f2   : > { %3192 = vrot.lane.b32.xlu0 %v3028_v38, %s5411_s25  ;;  %3525 = vrot.lane.b32.xlu2 %v3387_v24, %s5412_s26  ;;  %v3006_v38 = vld [vmem:[#allocation2 + $0xd9] sm:$0xff] }
 0x4f3   : > { %5132 = vmatmul.msk.bf16.vlgmr.msra.gmra.mxu0 %vm3878_vm13, %v3826_v53  ;;  %v3415_v53 = vld [vmem:[#allocation2 + $0x22a] sm:$0xff]  ;;  %v3427_v24 = vld [vmem:[#allocation2 + $0x2ba] sm:$0xff] }
 0x4f4   : > { %v3512_v0 = vpop.permute.xlu0 %3511  ;;  %v3155_v14 = vpop.permute.xlu2 %3154 }
 0x4f5   : > { %3549 = vrot.lane.b32.xlu1 %v3399_v2, %s5412_s26  ;;  %3330 = vst.msk [vmem:[#allocation3 + $0x88] sm:$0xff] %vm3312_vm11, %v3155_v14  ;;  %v3764_v57 = vld [vmem:[#allocation3 + $0x10] sm:$0xff] }
 0x4f7   : > { %v3127_v62 = vpop.permute.xlu1 %3126 }
 0x4f8   : > { %3316 = vst.msk [vmem:[#allocation3 + $0x18] sm:$0xff] %vm3312_vm11, %v3127_v62 }
 0x4f9   : > { %3701 = vst.msk [vmem:[#allocation3 + $0x18] sm:$0xff] %vm3697_vm12, %v3512_v0 }
 0x4fa   : > { %3218 = vrot.lane.b32.xlu0 %v3041_v27, %s5411_s25  ;;  %3551 = vrot.lane.b32.xlu2 %v3400_v56, %s5412_s26  ;;  %v3019_v56 = vld [vmem:[#allocation2 + $0x171] sm:$0xff] }
 0x4fc   : > { %v3131_v23 = vpop.permute.xlu0 %3130  ;;  %v3538_v37 = vpop.permute.xlu2 %3537 }
 0x4fd   : > { %3194 = vrot.lane.b32.xlu1 %v3029_v11, %s5411_s25  ;;  %3318 = vst.msk [vmem:[#allocation3 + $0x28] sm:$0xff] %vm3312_vm11, %v3131_v23  ;;  %v3428_v23 = vld [vmem:[#allocation2 + $0x2c2] sm:$0xff] }
 0x4ff   : > { %v2850_v49 = vpop.permute.xlu1 %2849 }
 0x500   : > { %2985 = vst.msk [vmem:[#allocation3 + $0x1c8] sm:$0xff] %vm2927_vm9, %v2850_v49  ;;  %v3765_v10 = vld [vmem:[#allocation3 + $0x18] sm:$0xff] }
 0x501   : > { %v3827_v5 = vpack.c.bf16 %v3765_v10, %v3764_v57 }
 0x502   : > { %3601 = vrot.lane.b32.xlu0 %v3425_v29, %s5412_s26  ;;  %3216 = vrot.lane.b32.xlu2 %v3040_v60, %s5411_s25  ;;  %v3403_v29 = vld [vmem:[#allocation2 + $0x16a] sm:$0xff]  ;;  %v3391_v60 = vld [vmem:[#allocation2 + $0xda] sm:$0xff] }
 0x503   : > { %5133 = vmatmul.msk.bf16.gmra.mxu0 %vm3878_vm13, %v3827_v5  ;;  %v3018_v5 = vld [vmem:[#allocation2 + $0x169] sm:$0xff] }
 0x504   : > { %v3514_v22 = vpop.permute.xlu0 %3513  ;;  %v3135_v13 = vpop.permute.xlu2 %3134 }
 0x505   : > { %3577 = vrot.lane.b32.xlu1 %v3413_v47, %s5412_s26  ;;  %3702 = vst.msk [vmem:[#allocation3 + $0x20] sm:$0xff] %vm3697_vm12, %v3514_v22 }
 0x506   : > { %3320 = vst.msk [vmem:[#allocation3 + $0x38] sm:$0xff] %vm3312_vm11, %v3135_v13 }
 0x507   : > { %v3153_v3 = vpop.permute.xlu1 %3152 }
 0x508   : > { %3329 = vst.msk [vmem:[#allocation3 + $0x80] sm:$0xff] %vm3312_vm11, %v3153_v3 }
 0x509   : > { %3714 = vst.msk [vmem:[#allocation3 + $0x80] sm:$0xff] %vm3697_vm12, %v3538_v37  ;;  %v3007_v37 = vld [vmem:[#allocation2 + $0xe1] sm:$0xff] }
 0x50a   : > { %3146 = vrot.lane.b32.xlu0 %v3005_v7, %s5411_s25  ;;  %3579 = vrot.lane.b32.xlu2 %v3414_v17, %s5412_s26 }
 0x50c   : > { %v3540_v63 = vpop.permute.xlu0 %3539  ;;  %v3518_v6 = vpop.permute.xlu2 %3517  ;;  %v3766_v58 = vld [vmem:[#allocation3 + $0x20] sm:$0xff] }
 0x50d   : > { %3603 = vrot.lane.b32.xlu1 %v3426_v15, %s5412_s26  ;;  %3715 = vst.msk [vmem:[#allocation3 + $0x88] sm:$0xff] %vm3697_vm12, %v3540_v63  ;;  %v3033_v15 = vld [vmem:[#allocation2 + $0x249] sm:$0xff] }
 0x50e   : > { %v3392_v63 = vld [vmem:[#allocation2 + $0xe2] sm:$0xff] }
 0x50f   : > { %v3516_v25 = vpop.permute.xlu1 %3515 }
 0x510   : > { %3703 = vst.msk [vmem:[#allocation3 + $0x28] sm:$0xff] %vm3697_vm12, %v3516_v25  ;;  %v3778_v52 = vld [vmem:[#allocation3 + $0x80] sm:$0xff] }
 0x512   : > { %3529 = vrot.lane.b32.xlu0 %v3389_v19, %s5412_s26  ;;  %3144 = vrot.lane.b32.xlu2 %v3004_v33, %s5411_s25 }
 0x514   : > { %v3157_v42 = vpop.permute.xlu0 %3156  ;;  %v3779_v28 = vld [vmem:[#allocation3 + $0x88] sm:$0xff]  ;;  %v3544_v8 = vpop.permute.xlu2 %3543 }
 0x515   : > { %3168 = vrot.lane.b32.xlu1 %v3016_v44, %s5411_s25  ;;  %3331 = vst.msk [vmem:[#allocation3 + $0x90] sm:$0xff] %vm3312_vm11, %v3157_v42  ;;  %v3834_v32 = vpack.c.bf16 %v3779_v28, %v3778_v52  ;;  %v3417_v28 = vld [vmem:[#allocation2 + $0x242] sm:$0xff] }
 0x517   : > { %v3133_v12 = vpop.permute.xlu1 %3132  ;;  %v3767_v4 = vld [vmem:[#allocation3 + $0x28] sm:$0xff]  ;;  %5140 = vmatmul.msk.bf16.vlgmr.msra.gmra.mxu1 %vm3878_vm13, %v3834_v32 }
 0x518   : > { %3319 = vst.msk [vmem:[#allocation3 + $0x30] sm:$0xff] %vm3312_vm11, %v3133_v12  ;;  %v3828_v18 = vpack.c.bf16 %v3767_v4, %v3766_v58  ;;  %v3032_v58 = vld [vmem:[#allocation2 + $0x241] sm:$0xff] }
 0x519   : > { %3704 = vst.msk [vmem:[#allocation3 + $0x30] sm:$0xff] %vm3697_vm12, %v3518_v6  ;;  %v3404_v6 = vld [vmem:[#allocation2 + $0x172] sm:$0xff] }
 0x51a   : > { %5134 = vmatmul.msk.bf16.gmra.mxu0 %vm3878_vm13, %v3828_v18  ;;  %3555 = vrot.lane.b32.xlu0 %v3402_v35, %s5412_s26 }
 0x51b   : > { %3170 = vrot.lane.b32.xlu2 %v3017_v21, %s5411_s25  ;;  %v3430_v21 = vld [vmem:[#allocation2 + $0x2da] sm:$0xff] }
 0x51c   : > { %v3520_v16 = vpop.permute.xlu0 %3519  ;;  %v3570_v30 = vpop.permute.xlu2 %3569 }
 0x51d   : > { %3531 = vrot.lane.b32.xlu1 %v3390_v46, %s5412_s26  ;;  %3705 = vst.msk [vmem:[#allocation3 + $0x38] sm:$0xff] %vm3697_vm12, %v3520_v16  ;;  %v3045_v16 = vld [vmem:[#allocation2 + $0x2d9] sm:$0xff] }
 0x51f   : > { %v3159_v36 = vpop.permute.xlu1 %3158 }
 0x520   : > { %3332 = vst.msk [vmem:[#allocation3 + $0x98] sm:$0xff] %vm3312_vm11, %v3159_v36  ;;  %v3768_v50 = vld [vmem:[#allocation3 + $0x30] sm:$0xff] }
 0x521   : > { %3717 = vst.msk [vmem:[#allocation3 + $0x98] sm:$0xff] %vm3697_vm12, %v3544_v8  ;;  %v3044_v8 = vld [vmem:[#allocation2 + $0x2d1] sm:$0xff] }
 0x522   : > { %3220 = vrot.lane.b32.xlu0 %v3042_v43, %s5411_s25 }
 0x523   : > { %3553 = vrot.lane.b32.xlu2 %v3401_v41, %s5412_s26 }
 0x524   : > { %v3185_v59 = vpop.permute.xlu0 %3184  ;;  %v3769_v48 = vld [vmem:[#allocation3 + $0x38] sm:$0xff]  ;;  %v3139_v55 = vpop.permute.xlu2 %3138 }
 0x525   : > { %3196 = vrot.lane.b32.xlu1 %v3030_v40, %s5411_s25  ;;  %3345 = vst.msk [vmem:[#allocation3 + $0x100] sm:$0xff] %vm3312_vm11, %v3185_v59  ;;  %v3829_v1 = vpack.c.bf16 %v3769_v48, %v3768_v50  ;;  %v3405_v40 = vld [vmem:[#allocation2 + $0x182] sm:$0xff]  ;;  %v3429_v50 = vld [vmem:[#allocation2 + $0x2d2] sm:$0xff] }
 0x526   : > { %3730 = vst.msk [vmem:[#allocation3 + $0x100] sm:$0xff] %vm3697_vm12, %v3570_v30  ;;  %v3418_v30 = vld [vmem:[#allocation2 + $0x24a] sm:$0xff]  ;;  %v3020_v59 = vld [vmem:[#allocation2 + $0x181] sm:$0xff] }
 0x527   : > { %v3542_v54 = vpop.permute.xlu1 %3541  ;;  %3322 = vst.msk [vmem:[#allocation3 + $0x48] sm:$0xff] %vm3312_vm11, %v3139_v55 }
 0x528   : > { %3716 = vst.msk [vmem:[#allocation3 + $0x90] sm:$0xff] %vm3697_vm12, %v3542_v54  ;;  %v3781_v51 = vld [vmem:[#allocation3 + $0x98] sm:$0xff] }
 0x52a   : > { %5135 = vmatmul.msk.bf16.gmra.mxu0 %vm3878_vm13, %v3829_v1  ;;  %3583 = vrot.lane.b32.xlu0 %v3416_v20, %s5412_s26 }
 0x52b   : > { %3198 = vrot.lane.b32.xlu2 %v3031_v9, %s5411_s25 }
 0x52c   : > { %v3572_v39 = vpop.permute.xlu0 %3571  ;;  %v3522_v34 = vpop.permute.xlu2 %3521 }
 0x52d   : > { %3222 = vrot.lane.b32.xlu1 %v3043_v26, %s5411_s25  ;;  %v3794_v14 = vld [vmem:[#allocation3 + $0x100] sm:$0xff] }
 0x52e   : > { %v3035_v26 = vld [vmem:[#allocation2 + $0x261] sm:$0xff] }
 0x52f   : > { %v3187_v31 = vpop.permute.xlu1 %3186  ;;  %v3780_v45 = vld [vmem:[#allocation3 + $0x90] sm:$0xff] }
 0x530   : > { %3346 = vst.msk [vmem:[#allocation3 + $0x108] sm:$0xff] %vm3312_vm11, %v3187_v31  ;;  %v3835_v61 = vpack.c.bf16 %v3781_v51, %v3780_v45  ;;  %v3406_v51 = vld [vmem:[#allocation2 + $0x18a] sm:$0xff] }
 0x531   : > { %3731 = vst.msk [vmem:[#allocation3 + $0x108] sm:$0xff] %vm3697_vm12, %v3572_v39  ;;  %v3021_v39 = vld [vmem:[#allocation2 + $0x189] sm:$0xff] }
 0x532   : > { %5141 = vmatmul.msk.bf16.gmra.mxu1 %vm3878_vm13, %v3835_v61  ;;  %3148 = vrot.lane.b32.xlu0 %v3006_v38, %s5411_s25 }
 0x533   : > { %3581 = vrot.lane.b32.xlu2 %v3415_v53, %s5412_s26 }
 0x534   : > { %v3161_v2 = vpop.permute.xlu0 %3160  ;;  %v3548_v0 = vpop.permute.xlu2 %3547 }
 0x535   : > { %3605 = vrot.lane.b32.xlu1 %v3427_v24, %s5412_s26  ;;  %3333 = vst.msk [vmem:[#allocation3 + $0xa0] sm:$0xff] %vm3312_vm11, %v3161_v2  ;;  %v3419_v2 = vld [vmem:[#allocation2 + $0x25a] sm:$0xff] }
 0x537   : > { %v3137_v62 = vpop.permute.xlu1 %3136 }
 0x538   : > { %3321 = vst.msk [vmem:[#allocation3 + $0x40] sm:$0xff] %vm3312_vm11, %v3137_v62  ;;  %v3795_v27 = vld [vmem:[#allocation3 + $0x108] sm:$0xff] }
 0x539   : > { %v3842_v11 = vpack.c.bf16 %v3795_v27, %v3794_v14  ;;  %3706 = vst.msk [vmem:[#allocation3 + $0x40] sm:$0xff] %vm3697_vm12, %v3522_v34  ;;  %v3046_v14 = vld [vmem:[#allocation2 + $0x2e9] sm:$0xff] }
 0x53a   : > { %3174 = vrot.lane.b32.xlu0 %v3019_v56, %s5411_s25 }
 0x53b   : > { %5148 = vmatmul.msk.bf16.vlgmr.msra.gmra.mxu2 %vm3878_vm13, %v3842_v11  ;;  %3607 = vrot.lane.b32.xlu2 %v3428_v23, %s5412_s26 }
 0x53c   : > { %v3524_v57 = vpop.permute.xlu0 %3523  ;;  %v3574_v49 = vpop.permute.xlu2 %3573 }
 0x53d   : > { %3150 = vrot.lane.b32.xlu1 %v3007_v37, %s5411_s25  ;;  %3707 = vst.msk [vmem:[#allocation3 + $0x48] sm:$0xff] %vm3697_vm12, %v3524_v57  ;;  %v3432_v37 = vld [vmem:[#allocation2 + $0x2f2] sm:$0xff] }
 0x53f   : > { %v3163_v10 = vpop.permute.xlu1 %3162 }
 0x540   : > { %3334 = vst.msk [vmem:[#allocation3 + $0xa8] sm:$0xff] %vm3312_vm11, %v3163_v10  ;;  %v3770_v47 = vld [vmem:[#allocation3 + $0x40] sm:$0xff] }
 0x541   : > { %3719 = vst.msk [vmem:[#allocation3 + $0xa8] sm:$0xff] %vm3697_vm12, %v3548_v0  ;;  %v3034_v0 = vld [vmem:[#allocation2 + $0x259] sm:$0xff] }
 0x542   : > { %3557 = vrot.lane.b32.xlu0 %v3403_v29, %s5412_s26  ;;  %v3047_v29 = vld [vmem:[#allocation2 + $0x2f1] sm:$0xff] }
 0x543   : > { %3172 = vrot.lane.b32.xlu2 %v3018_v5, %s5411_s25 }
 0x544   : > { %v3189_v22 = vpop.permute.xlu0 %3188  ;;  %v3771_v13 = vld [vmem:[#allocation3 + $0x48] sm:$0xff]  ;;  %v3143_v3 = vpop.permute.xlu2 %3142 }
 0x545   : > { %3533 = vrot.lane.b32.xlu1 %v3391_v60, %s5412_s26  ;;  %3347 = vst.msk [vmem:[#allocation3 + $0x110] sm:$0xff] %vm3312_vm11, %v3189_v22  ;;  %v3830_v7 = vpack.c.bf16 %v3771_v13, %v3770_v47  ;;  %v3420_v60 = vld [vmem:[#allocation2 + $0x262] sm:$0xff] }
 0x546   : > { %3732 = vst.msk [vmem:[#allocation3 + $0x110] sm:$0xff] %vm3697_vm12, %v3574_v49 }
 0x547   : > { %v3546_v17 = vpop.permute.xlu1 %3545  ;;  %5136 = vmatmul.msk.bf16.gmra.mxu0 %vm3878_vm13, %v3830_v7  ;;  %3324 = vst.msk [vmem:[#allocation3 + $0x58] sm:$0xff] %vm3312_vm11, %v3143_v3 }
 0x548   : > { %3718 = vst.msk [vmem:[#allocation3 + $0xa0] sm:$0xff] %vm3697_vm12, %v3546_v17  ;;  %v3783_v19 = vld [vmem:[#allocation3 + $0xa8] sm:$0xff] }
 0x54a   : > { %3202 = vrot.lane.b32.xlu0 %v3033_v15, %s5411_s25 }
 0x54b   : > { %3535 = vrot.lane.b32.xlu2 %v3392_v63, %s5412_s26 }
 0x54c   : > { %v3576_v25 = vpop.permute.xlu0 %3575  ;;  %v3526_v33 = vpop.permute.xlu2 %3525 }
 0x54d   : > { %3559 = vrot.lane.b32.xlu1 %v3404_v6, %s5412_s26  ;;  %v3796_v12 = vld [vmem:[#allocation3 + $0x110] sm:$0xff] }
 0x54f   : > { %v3191_v44 = vpop.permute.xlu1 %3190  ;;  %v3782_v52 = vld [vmem:[#allocation3 + $0xa0] sm:$0xff] }
 0x550   : > { %3348 = vst.msk [vmem:[#allocation3 + $0x118] sm:$0xff] %vm3312_vm11, %v3191_v44  ;;  %v3836_v42 = vpack.c.bf16 %v3783_v19, %v3782_v52  ;;  %v3407_v19 = vld [vmem:[#allocation2 + $0x19a] sm:$0xff]  ;;  %v3431_v52 = vld [vmem:[#allocation2 + $0x2ea] sm:$0xff] }
 0x551   : > { %3733 = vst.msk [vmem:[#allocation3 + $0x118] sm:$0xff] %vm3697_vm12, %v3576_v25 }
 0x552   : > { %5142 = vmatmul.msk.bf16.gmra.mxu1 %vm3878_vm13, %v3836_v42  ;;  %3585 = vrot.lane.b32.xlu0 %v3417_v28, %s5412_s26  ;;  %v3022_v28 = vld [vmem:[#allocation2 + $0x199] sm:$0xff] }
 0x553   : > { %3200 = vrot.lane.b32.xlu2 %v3032_v58, %s5411_s25 }
 0x554   : > { %v3165_v32 = vpop.permute.xlu0 %3164  ;;  %v3552_v4 = vpop.permute.xlu2 %3551 }
 0x555   : > { %3224 = vrot.lane.b32.xlu1 %v3044_v8, %s5411_s25  ;;  %3335 = vst.msk [vmem:[#allocation3 + $0xb0] sm:$0xff] %vm3312_vm11, %v3165_v32 }
 0x557   : > { %v3141_v18 = vpop.permute.xlu1 %3140 }
 0x558   : > { %3323 = vst.msk [vmem:[#allocation3 + $0x50] sm:$0xff] %vm3312_vm11, %v3141_v18  ;;  %v3797_v35 = vld [vmem:[#allocation3 + $0x118] sm:$0xff] }
 0x559   : > { %v3843_v46 = vpack.c.bf16 %v3797_v35, %v3796_v12  ;;  %3708 = vst.msk [vmem:[#allocation3 + $0x50] sm:$0xff] %vm3697_vm12, %v3526_v33 }
 0x55a   : > { %3611 = vrot.lane.b32.xlu0 %v3430_v21, %s5412_s26 }
 0x55b   : > { %5149 = vmatmul.msk.bf16.gmra.mxu2 %vm3878_vm13, %v3843_v46  ;;  %3226 = vrot.lane.b32.xlu2 %v3045_v16, %s5411_s25  ;;  %v3037_v16 = vld [vmem:[#allocation2 + $0x279] sm:$0xff] }
 0x55c   : > { %v3528_v36 = vpop.permute.xlu0 %3527  ;;  %v3217_v43 = vpop.permute.xlu2 %3216 }
 0x55d   : > { %3587 = vrot.lane.b32.xlu1 %v3418_v30, %s5412_s26  ;;  %3709 = vst.msk [vmem:[#allocation3 + $0x58] sm:$0xff] %vm3697_vm12, %v3528_v36 }
 0x55e   : > { %3361 = vst.msk [vmem:[#allocation3 + $0x180] sm:$0xff] %vm3312_vm11, %v3217_v43  ;;  %v3023_v43 = vld [vmem:[#allocation2 + $0x1a1] sm:$0xff] }
 0x55f   : > { %v3167_v41 = vpop.permute.xlu1 %3166 }
 0x560   : > { %3336 = vst.msk [vmem:[#allocation3 + $0xb8] sm:$0xff] %vm3312_vm11, %v3167_v41  ;;  %v3772_v48 = vld [vmem:[#allocation3 + $0x50] sm:$0xff] }
 0x561   : > { %3721 = vst.msk [vmem:[#allocation3 + $0xb8] sm:$0xff] %vm3697_vm12, %v3552_v4 }
 0x562   : > { %3561 = vrot.lane.b32.xlu0 %v3405_v40, %s5412_s26  ;;  %v3408_v40 = vld [vmem:[#allocation2 + $0x1a2] sm:$0xff] }
 0x563   : > { %3609 = vrot.lane.b32.xlu2 %v3429_v50, %s5412_s26 }
 0x564   : > { %v3193_v55 = vpop.permute.xlu0 %3192  ;;  %v3773_v1 = vld [vmem:[#allocation3 + $0x58] sm:$0xff]  ;;  %v3580_v20 = vpop.permute.xlu2 %3579 }
 0x565   : > { %3176 = vrot.lane.b32.xlu1 %v3020_v59, %s5411_s25  ;;  %3349 = vst.msk [vmem:[#allocation3 + $0x120] sm:$0xff] %vm3312_vm11, %v3193_v55  ;;  %v3831_v54 = vpack.c.bf16 %v3773_v1, %v3772_v48 }
 0x567   : > { %v3550_v9 = vpop.permute.xlu1 %3549  ;;  %5137 = vmatmul.msk.bf16.gmra.mxu0 %vm3878_vm13, %v3831_v54  ;;  %v3421_v54 = vld [vmem:[#allocation2 + $0x272] sm:$0xff] }
 0x568   : > { %3720 = vst.msk [vmem:[#allocation3 + $0xb0] sm:$0xff] %vm3697_vm12, %v3550_v9  ;;  %v3785_v31 = vld [vmem:[#allocation3 + $0xb8] sm:$0xff]  ;;  %v3048_v9 = vld [vmem:[#allocation2 + $0x301] sm:$0xff] }
 0x56a   : > { %3206 = vrot.lane.b32.xlu0 %v3035_v26, %s5411_s25 }
 0x56b   : > { %3178 = vrot.lane.b32.xlu2 %v3021_v39, %s5411_s25 }
 0x56c   : > { %v3219_v34 = vpop.permute.xlu0 %3218  ;;  %v3145_v45 = vpop.permute.xlu2 %3144 }
 0x56d   : > { %3563 = vrot.lane.b32.xlu1 %v3406_v51, %s5412_s26  ;;  %3362 = vst.msk [vmem:[#allocation3 + $0x188] sm:$0xff] %vm3312_vm11, %v3219_v34 }
 0x56e   : > { %3325 = vst.msk [vmem:[#allocation3 + $0x60] sm:$0xff] %vm3312_vm11, %v3145_v45 }
 0x56f   : > { %v3195_v61 = vpop.permute.xlu1 %3194  ;;  %v3784_v38 = vld [vmem:[#allocation3 + $0xb0] sm:$0xff] }
 0x570   : > { %3350 = vst.msk [vmem:[#allocation3 + $0x128] sm:$0xff] %vm3312_vm11, %v3195_v61  ;;  %v3988_v53 = vpop.f32.mrf.mxu0  ;;  %v3837_v24 = vpack.c.bf16 %v3785_v31, %v3784_v38 }
 0x571   : > { %4151 = vst.msk [vmem:[#allocation4] sm:$0xff] %vm4150_vm14, %v3988_v53  ;;  %v4353_v56 = vmul.f32 %v3988_v53, %v3988_v53  ;;  %v4216_v57 = vsel %vm4150_vm14, %v3988_v53, 0.0 }
 0x572   : > { %5143 = vmatmul.msk.bf16.gmra.mxu1 %vm3878_vm13, %v3837_v24  ;;  %3735 = vst.msk [vmem:[#allocation3 + $0x128] sm:$0xff] %vm3697_vm12, %v3580_v20  ;;  %3589 = vrot.lane.b32.xlu0 %v3419_v2, %s5412_s26  ;;  %v3036_v20 = vld [vmem:[#allocation2 + $0x271] sm:$0xff] }
 0x573   : > { %3204 = vrot.lane.b32.xlu2 %v3034_v0, %s5411_s25  ;;  %v4417_v47 = vsel %vm4150_vm14, %v4353_v56, 0.0  ;;  %v3049_v56 = vld [vmem:[#allocation2 + $0x309] sm:$0xff] }
 0x574   : > { %v3602_v62 = vpop.permute.xlu0 %3601 }
 0x575   : > { %3228 = vrot.lane.b32.xlu1 %v3046_v14, %s5411_s25  ;;  %3746 = vst.msk [vmem:[#allocation3 + $0x180] sm:$0xff] %vm3697_vm12, %v3602_v62  ;;  %v3171_v27 = vpop.permute.xlu2 %3170  ;;  %v3434_v62 = vld [vmem:[#allocation2 + $0x30a] sm:$0xff] }
 0x576   : > { %3338 = vst.msk [vmem:[#allocation3 + $0xc8] sm:$0xff] %vm3312_vm11, %v3171_v27 }
 0x577   : > { %v3578_v11 = vpop.permute.xlu1 %3577 }
 0x578   : > { %3734 = vst.msk [vmem:[#allocation3 + $0x120] sm:$0xff] %vm3697_vm12, %v3578_v11  ;;  %v3990_v23 = vpop.f32.mrf.mxu0 }
 0x579   : > { %4152 = vst.msk [vmem:[#allocation4 + $0x8] sm:$0xff] %vm4150_vm14, %v3990_v23  ;;  %v4217_v49 = vsel %vm4150_vm14, %v3990_v23, 0.0  ;;  %v4354_v10 = vmul.f32 %v3990_v23, %v3990_v23  ;;  %v3799_v7 = vld [vmem:[#allocation3 + $0x128] sm:$0xff]  ;;  %v3422_v23 = vld [vmem:[#allocation2 + $0x27a] sm:$0xff] }
 0x57a   : > { %v4218_v5 = vadd.f32 %v4217_v49, %v4216_v57  ;;  %3615 = vrot.lane.b32.xlu0 %v3432_v37, %s5412_s26 }
 0x57b   : > { %v4418_v22 = vsel %vm4150_vm14, %v4354_v10, 0.0  ;;  %3230 = vrot.lane.b32.xlu2 %v3047_v29, %s5411_s25 }
 0x57c   : > { %v4419_v13 = vadd.f32 %v4418_v22, %v4417_v47  ;;  %v3147_v3 = vpop.permute.xlu0 %3146  ;;  %v3810_v12 = vld [vmem:[#allocation3 + $0x180] sm:$0xff]  ;;  %v3038_v22 = vld [vmem:[#allocation2 + $0x289] sm:$0xff] }
 0x57d   : > { %3591 = vrot.lane.b32.xlu1 %v3420_v60, %s5412_s26  ;;  %3326 = vst.msk [vmem:[#allocation3 + $0x68] sm:$0xff] %vm3312_vm11, %v3147_v3  ;;  %v3554_v17 = vpop.permute.xlu2 %3553  ;;  %v3433_v3 = vld [vmem:[#allocation2 + $0x302] sm:$0xff] }
 0x57f   : > { %v3604_v15 = vpop.permute.xlu1 %3603  ;;  %v3798_v63 = vld [vmem:[#allocation3 + $0x120] sm:$0xff] }
 0x580   : > { %3747 = vst.msk [vmem:[#allocation3 + $0x188] sm:$0xff] %vm3697_vm12, %v3604_v15  ;;  %v3993_v6 = vpop.f32.mrf.mxu0  ;;  %v3844_v25 = vpack.c.bf16 %v3799_v7, %v3798_v63 }
 0x581   : > { %4153 = vst.msk [vmem:[#allocation4 + $0x10] sm:$0xff] %vm4150_vm14, %v3993_v6  ;;  %v4219_v33 = vsel %vm4150_vm14, %v3993_v6, 0.0  ;;  %v4355_v44 = vmul.f32 %v3993_v6, %v3993_v6 }
 0x582   : > { %v4220_v42 = vadd.f32 %v4219_v33, %v4218_v5  ;;  %5150 = vmatmul.msk.bf16.gmra.mxu2 %vm3878_vm13, %v3844_v25  ;;  %3565 = vrot.lane.b32.xlu0 %v3407_v19, %s5412_s26 }
 0x583   : > { %v4420_v58 = vsel %vm4150_vm14, %v4355_v44, 0.0  ;;  %3613 = vrot.lane.b32.xlu2 %v3431_v52, %s5412_s26 }
 0x584   : > { %v4421_v8 = vadd.f32 %v4420_v58, %v4419_v13  ;;  %v3530_v32 = vpop.permute.xlu0 %3529  ;;  %v3051_v58 = vld [vmem:[#allocation2 + $0x321] sm:$0xff] }
 0x585   : > { %3180 = vrot.lane.b32.xlu1 %v3022_v28, %s5411_s25  ;;  %3710 = vst.msk [vmem:[#allocation3 + $0x60] sm:$0xff] %vm3697_vm12, %v3530_v32  ;;  %v3199_v4 = vpop.permute.xlu2 %3198  ;;  %v2666_v32 = vld [vmem:[#allocation2 + $0x320] sm:$0xff] }
 0x586   : > { %3352 = vst.msk [vmem:[#allocation3 + $0x138] sm:$0xff] %vm3312_vm11, %v3199_v4  ;;  %v3039_v4 = vld [vmem:[#allocation2 + $0x291] sm:$0xff] }
 0x587   : > { %v3169_v18 = vpop.permute.xlu1 %3168  ;;  %v3811_v35 = vld [vmem:[#allocation3 + $0x188] sm:$0xff] }
 0x588   : > { %3337 = vst.msk [vmem:[#allocation3 + $0xc0] sm:$0xff] %vm3312_vm11, %v3169_v18  ;;  %v3995_v21 = vpop.f32.mrf.mxu0  ;;  %v3850_v46 = vpack.c.bf16 %v3811_v35, %v3810_v12 }
 0x589   : > { %4154 = vst.msk [vmem:[#allocation4 + $0x18] sm:$0xff] %vm4150_vm14, %v3995_v21  ;;  %v4221_v30 = vsel %vm4150_vm14, %v3995_v21, 0.0  ;;  %v4356_v36 = vmul.f32 %v3995_v21, %v3995_v21 }
 0x58a   : > { %v4222_v41 = vadd.f32 %v4221_v30, %v4220_v42  ;;  %5156 = vmatmul.msk.bf16.vlgmr.msra.gmra.mxu3 %vm3878_vm13, %v3850_v46  ;;  %3722 = vst.msk [vmem:[#allocation3 + $0xc0] sm:$0xff] %vm3697_vm12, %v3554_v17  ;;  %3210 = vrot.lane.b32.xlu0 %v3037_v16, %s5411_s25  ;;  %v2665_v17 = vld [vmem:[#allocation2 + $0x318] sm:$0xff] }
 0x58b   : > { %v4422_v50 = vsel %vm4150_vm14, %v4356_v36, 0.0  ;;  %3182 = vrot.lane.b32.xlu2 %v3023_v43, %s5411_s25 }
 0x58c   : > { %v4423_v59 = vadd.f32 %v4422_v50, %v4421_v8  ;;  %v3556_v48 = vpop.permute.xlu0 %3555  ;;  %v3774_v31 = vld [vmem:[#allocation3 + $0x60] sm:$0xff] }
 0x58d   : > { %3567 = vrot.lane.b32.xlu1 %v3408_v40, %s5412_s26  ;;  %3723 = vst.msk [vmem:[#allocation3 + $0xc8] sm:$0xff] %vm3697_vm12, %v3556_v48  ;;  %v3582_v55 = vpop.permute.xlu2 %3581  ;;  %v3435_v40 = vld [vmem:[#allocation2 + $0x31a] sm:$0xff] }
 0x58e   : > { %v3050_v48 = vld [vmem:[#allocation2 + $0x319] sm:$0xff] }
 0x58f   : > { %v3532_v1 = vpop.permute.xlu1 %3531 }
 0x590   : > { %3711 = vst.msk [vmem:[#allocation3 + $0x68] sm:$0xff] %vm3697_vm12, %v3532_v1  ;;  %v3423_v1 = vld [vmem:[#allocation2 + $0x28a] sm:$0xff] }
 0x591   : > { %v3786_v26 = vld [vmem:[#allocation3 + $0xc0] sm:$0xff] }
 0x592   : > { %3593 = vrot.lane.b32.xlu0 %v3421_v54, %s5412_s26 }
 0x593   : > { %3208 = vrot.lane.b32.xlu2 %v3036_v20, %s5411_s25 }
 0x594   : > { %v3221_v39 = vpop.permute.xlu0 %3220  ;;  %v7158_v51 = vpop.f32.mrf.mxu1  ;;  %v3787_v34 = vld [vmem:[#allocation3 + $0xc8] sm:$0xff] }
 0x595   : > { %3232 = vrot.lane.b32.xlu1 %v3048_v9, %s5411_s25  ;;  %3363 = vst.msk [vmem:[#allocation3 + $0x190] sm:$0xff] %vm3312_vm11, %v3221_v39  ;;  %v3838_v45 = vpack.c.bf16 %v3787_v34, %v3786_v26  ;;  %v3608_v61 = vpop.permute.xlu2 %3607 }
 0x596   : > { %4167 = vst.msk [vmem:[#allocation4 + $0x80] sm:$0xff] %vm4150_vm14, %v7158_v51 }
 0x597   : > { %v3197_v38 = vpop.permute.xlu1 %3196  ;;  %v3998_v53 = vpop.f32.mrf.mxu0  ;;  %v3775_v24 = vld [vmem:[#allocation3 + $0x68] sm:$0xff]  ;;  %5144 = vmatmul.msk.bf16.gmra.mxu1 %vm3878_vm13, %v3838_v45  ;;  %v3424_v45 = vld [vmem:[#allocation2 + $0x292] sm:$0xff] }
 0x598   : > { %3351 = vst.msk [vmem:[#allocation3 + $0x130] sm:$0xff] %vm3312_vm11, %v3197_v38  ;;  %v4223_v2 = vsel %vm4150_vm14, %v3998_v53, 0.0  ;;  %v4357_v0 = vmul.f32 %v3998_v53, %v3998_v53  ;;  %v3832_v14 = vpack.c.bf16 %v3775_v24, %v3774_v31  ;;  %v2668_v31 = vld [vmem:[#allocation2 + $0x338] sm:$0xff] }
 0x599   : > { %4155 = vst.msk [vmem:[#allocation4 + $0x20] sm:$0xff] %vm4150_vm14, %v3998_v53  ;;  %v4224_v27 = vadd.f32 %v4223_v2, %v4222_v41 }
 0x59a   : > { %v4424_v11 = vsel %vm4150_vm14, %v4357_v0, 0.0  ;;  %5138 = vmatmul.msk.bf16.gmra.mxu0 %vm3878_vm13, %v3832_v14  ;;  %3736 = vst.msk [vmem:[#allocation3 + $0x130] sm:$0xff] %vm3697_vm12, %v3582_v55  ;;  %3619 = vrot.lane.b32.xlu0 %v3434_v62, %s5412_s26  ;;  %v3437_v62 = vld [vmem:[#allocation2 + $0x332] sm:$0xff] }
 0x59b   : > { %v4425_v37 = vadd.f32 %v4424_v11, %v4423_v59  ;;  %3234 = vrot.lane.b32.xlu2 %v3049_v56, %s5411_s25  ;;  %v2667_v56 = vld [vmem:[#allocation2 + $0x330] sm:$0xff] }
 0x59c   : > { %v3584_v57 = vpop.permute.xlu0 %3583  ;;  %v7173_v49 = vpop.f32.mrf.mxu1  ;;  %v3052_v11 = vld [vmem:[#allocation2 + $0x331] sm:$0xff] }
 0x59d   : > { %3595 = vrot.lane.b32.xlu1 %v3422_v23, %s5412_s26  ;;  %3737 = vst.msk [vmem:[#allocation3 + $0x138] sm:$0xff] %vm3697_vm12, %v3584_v57  ;;  %v3173_v10 = vpop.permute.xlu2 %3172 }
 0x59e   : > { %4168 = vst.msk [vmem:[#allocation4 + $0x88] sm:$0xff] %vm4150_vm14, %v7173_v49 }
 0x59f   : > { %v3223_v29 = vpop.permute.xlu1 %3222  ;;  %v4000_v5 = vpop.f32.mrf.mxu0  ;;  %3339 = vst.msk [vmem:[#allocation3 + $0xd0] sm:$0xff] %vm3312_vm11, %v3173_v10 }
 0x5a0   : > { %3364 = vst.msk [vmem:[#allocation3 + $0x198] sm:$0xff] %vm3312_vm11, %v3223_v29  ;;  %v4225_v60 = vsel %vm4150_vm14, %v4000_v5, 0.0  ;;  %v4358_v47 = vmul.f32 %v4000_v5, %v4000_v5 }
 0x5a1   : > { %4156 = vst.msk [vmem:[#allocation4 + $0x28] sm:$0xff] %vm4150_vm14, %v4000_v5  ;;  %v4226_v13 = vadd.f32 %v4225_v60, %v4224_v27  ;;  %v3800_v63 = vld [vmem:[#allocation3 + $0x130] sm:$0xff] }
 0x5a2   : > { %v4426_v7 = vsel %vm4150_vm14, %v4358_v47, 0.0  ;;  %3749 = vst.msk [vmem:[#allocation3 + $0x198] sm:$0xff] %vm3697_vm12, %v3608_v61  ;;  %3212 = vrot.lane.b32.xlu0 %v3038_v22, %s5411_s25  ;;  %v3436_v61 = vld [vmem:[#allocation2 + $0x322] sm:$0xff] }
 0x5a3   : > { %v4427_v15 = vadd.f32 %v4426_v7, %v4425_v37  ;;  %3617 = vrot.lane.b32.xlu2 %v3433_v3, %s5412_s26 }
 0x5a4   : > { %v3149_v6 = vpop.permute.xlu0 %3148  ;;  %v3801_v25 = vld [vmem:[#allocation3 + $0x138] sm:$0xff] }
 0x5a5   : > { %2851 = vrot.lane.b32.xlu1 %v2665_v17, %s5410_s24  ;;  %3327 = vst.msk [vmem:[#allocation3 + $0x70] sm:$0xff] %vm3312_vm11, %v3149_v6  ;;  %v3845_v19 = vpack.c.bf16 %v3801_v25, %v3800_v63  ;;  %v3536_v33 = vpop.permute.xlu2 %3535  ;;  %v2670_v17 = vld [vmem:[#allocation2 + $0x350] sm:$0xff]  ;;  %v3053_v63 = vld [vmem:[#allocation2 + $0x339] sm:$0xff] }
 0x5a6   : > { %v3438_v6 = vld [vmem:[#allocation2 + $0x33a] sm:$0xff] }
 0x5a7   : > { %v3606_v44 = vpop.permute.xlu1 %3605  ;;  %v4003_v52 = vpop.f32.mrf.mxu0  ;;  %5151 = vmatmul.msk.bf16.gmra.mxu2 %vm3878_vm13, %v3845_v19 }
 0x5a8   : > { %3748 = vst.msk [vmem:[#allocation3 + $0x190] sm:$0xff] %vm3697_vm12, %v3606_v44  ;;  %v4227_v42 = vsel %vm4150_vm14, %v4003_v52, 0.0  ;;  %v4359_v28 = vmul.f32 %v4003_v52, %v4003_v52 }
 0x5a9   : > { %4157 = vst.msk [vmem:[#allocation4 + $0x30] sm:$0xff] %vm4150_vm14, %v4003_v52  ;;  %v4228_v8 = vadd.f32 %v4227_v42, %v4226_v13  ;;  %v3813_v21 = vld [vmem:[#allocation3 + $0x198] sm:$0xff] }
 0x5aa   : > { %v4428_v12 = vsel %vm4150_vm14, %v4359_v28, 0.0  ;;  %3238 = vrot.lane.b32.xlu0 %v3051_v58, %s5411_s25 }
 0x5ab   : > { %v4429_v18 = vadd.f32 %v4428_v12, %v4427_v15  ;;  %2853 = vrot.lane.b32.xlu2 %v2666_v32, %s5410_s24  ;;  %v3439_v32 = vld [vmem:[#allocation2 + $0x34a] sm:$0xff] }
 0x5ac   : > { %v3175_v35 = vpop.permute.xlu0 %3174 }
 0x5ad   : > { %3214 = vrot.lane.b32.xlu1 %v3039_v4, %s5411_s25  ;;  %3340 = vst.msk [vmem:[#allocation3 + $0xd8] sm:$0xff] %vm3312_vm11, %v3175_v35  ;;  %v3201_v46 = vpop.permute.xlu2 %3200  ;;  %v2669_v4 = vld [vmem:[#allocation2 + $0x348] sm:$0xff] }
 0x5ae   : > { %3353 = vst.msk [vmem:[#allocation3 + $0x140] sm:$0xff] %vm3312_vm11, %v3201_v46 }
 0x5af   : > { %v7197_v16 = vpop.f32.mrf.mxu1  ;;  %v3151_v30 = vpop.permute.xlu1 %3150  ;;  %v3812_v36 = vld [vmem:[#allocation3 + $0x190] sm:$0xff] }
 0x5b0   : > { %4169 = vst.msk [vmem:[#allocation4 + $0x90] sm:$0xff] %vm4150_vm14, %v7197_v16  ;;  %v4005_v43 = vpop.f32.mrf.mxu0  ;;  %v3851_v41 = vpack.c.bf16 %v3813_v21, %v3812_v36 }
 0x5b1   : > { %3328 = vst.msk [vmem:[#allocation3 + $0x78] sm:$0xff] %vm3312_vm11, %v3151_v30  ;;  %v4229_v50 = vsel %vm4150_vm14, %v4005_v43, 0.0  ;;  %v4360_v59 = vmul.f32 %v4005_v43, %v4005_v43 }
 0x5b2   : > { %4158 = vst.msk [vmem:[#allocation4 + $0x38] sm:$0xff] %vm4150_vm14, %v4005_v43  ;;  %v4230_v55 = vadd.f32 %v4229_v50, %v4228_v8  ;;  %5157 = vmatmul.msk.bf16.gmra.mxu3 %vm3878_vm13, %v3851_v41  ;;  %3621 = vrot.lane.b32.xlu0 %v3435_v40, %s5412_s26 }
 0x5b3   : > { %v4430_v54 = vsel %vm4150_vm14, %v4360_v59, 0.0  ;;  %3713 = vst.msk [vmem:[#allocation3 + $0x78] sm:$0xff] %vm3697_vm12, %v3536_v33  ;;  %3236 = vrot.lane.b32.xlu2 %v3050_v48, %s5411_s25  ;;  %v3055_v48 = vld [vmem:[#allocation2 + $0x351] sm:$0xff] }
 0x5b4   : > { %v4431_v20 = vadd.f32 %v4430_v54, %v4429_v18  ;;  %v3558_v9 = vpop.permute.xlu0 %3557  ;;  %v3054_v18 = vld [vmem:[#allocation2 + $0x349] sm:$0xff] }
 0x5b5   : > { %3597 = vrot.lane.b32.xlu1 %v3423_v1, %s5412_s26  ;;  %3724 = vst.msk [vmem:[#allocation3 + $0xd0] sm:$0xff] %vm3697_vm12, %v3558_v9  ;;  %v3227_v26 = vpop.permute.xlu2 %3226 }
 0x5b6   : > { %3366 = vst.msk [vmem:[#allocation3 + $0x1a8] sm:$0xff] %vm3312_vm11, %v3227_v26 }
 0x5b7   : > { %v7212_v39 = vpop.f32.mrf.mxu1  ;;  %v3534_v34 = vpop.permute.xlu1 %3533 }
 0x5b8   : > { %4170 = vst.msk [vmem:[#allocation4 + $0x98] sm:$0xff] %vm4150_vm14, %v7212_v39 }
 0x5b9   : > { %3712 = vst.msk [vmem:[#allocation3 + $0x70] sm:$0xff] %vm3697_vm12, %v3534_v34 }
 0x5ba   : > { %2857 = vrot.lane.b32.xlu0 %v2668_v31, %s5410_s24  ;;  %v3777_v24 = vld [vmem:[#allocation3 + $0x78] sm:$0xff] }
 0x5bb   : > { %3599 = vrot.lane.b32.xlu2 %v3424_v45, %s5412_s26 }
 0x5bc   : > { %v3203_v38 = vpop.permute.xlu0 %3202  ;;  %v3788_v57 = vld [vmem:[#allocation3 + $0xd0] sm:$0xff] }
 0x5bd   : > { %3623 = vrot.lane.b32.xlu1 %v3436_v61, %s5412_s26  ;;  %3354 = vst.msk [vmem:[#allocation3 + $0x148] sm:$0xff] %vm3312_vm11, %v3203_v38  ;;  %v3610_v2 = vpop.permute.xlu2 %3609 }
 0x5be   : > { %v7222_v53 = vpop.f32.mrf.mxu2 }
 0x5bf   : > { %4183 = vst.msk [vmem:[#allocation4 + $0x100] sm:$0xff] %vm4150_vm14, %v7222_v53  ;;  %v3560_v0 = vpop.permute.xlu1 %3559 }
 0x5c0   : > { %3725 = vst.msk [vmem:[#allocation3 + $0xd8] sm:$0xff] %vm3697_vm12, %v3560_v0  ;;  %v3776_v14 = vld [vmem:[#allocation3 + $0x70] sm:$0xff] }
 0x5c1   : > { %v3833_v27 = vpack.c.bf16 %v3777_v24, %v3776_v14 }
 0x5c2   : > { %3625 = vrot.lane.b32.xlu0 %v3437_v62, %s5412_s26 }
 0x5c3   : > { %5139 = vmatmul.msk.bf16.gmra.mxu0 %vm3878_vm13, %v3833_v27  ;;  %2855 = vrot.lane.b32.xlu2 %v2667_v56, %s5410_s24 }
 0x5c4   : > { %v4008_v23 = vpop.f32.mrf.mxu0  ;;  %v3586_v37 = vpop.permute.xlu0 %3585 }
 0x5c5   : > { %3240 = vrot.lane.b32.xlu1 %v3052_v11, %s5411_s25  ;;  %4159 = vst.msk [vmem:[#allocation4 + $0x40] sm:$0xff] %vm4150_vm14, %v4008_v23  ;;  %v4231_v10 = vsel %vm4150_vm14, %v4008_v23, 0.0  ;;  %v4361_v29 = vmul.f32 %v4008_v23, %v4008_v23  ;;  %v3179_v60 = vpop.permute.xlu2 %3178 }
 0x5c6   : > { %v7233_v5 = vpop.f32.mrf.mxu2  ;;  %v4232_v47 = vadd.f32 %v4231_v10, %v4230_v55  ;;  %3738 = vst.msk [vmem:[#allocation3 + $0x140] sm:$0xff] %vm3697_vm12, %v3586_v37  ;;  %v3440_v55 = vld [vmem:[#allocation2 + $0x352] sm:$0xff] }
 0x5c7   : > { %v3225_v22 = vpop.permute.xlu1 %3224  ;;  %v3789_v13 = vld [vmem:[#allocation3 + $0xd8] sm:$0xff]  ;;  %v4432_v3 = vsel %vm4150_vm14, %v4361_v29, 0.0  ;;  %4184 = vst.msk [vmem:[#allocation4 + $0x108] sm:$0xff] %vm4150_vm14, %v7233_v5 }
 0x5c8   : > { %v3839_v7 = vpack.c.bf16 %v3789_v13, %v3788_v57  ;;  %v4433_v15 = vadd.f32 %v4432_v3, %v4431_v20  ;;  %3365 = vst.msk [vmem:[#allocation3 + $0x1a0] sm:$0xff] %vm3312_vm11, %v3225_v22 }
 0x5c9   : > { %3750 = vst.msk [vmem:[#allocation3 + $0x1a0] sm:$0xff] %vm3697_vm12, %v3610_v2 }
 0x5ca   : > { %5145 = vmatmul.msk.bf16.gmra.mxu1 %vm3878_vm13, %v3839_v7  ;;  %2861 = vrot.lane.b32.xlu0 %v2670_v17, %s5410_s24  ;;  %3342 = vst.msk [vmem:[#allocation3 + $0xe8] sm:$0xff] %vm3312_vm11, %v3179_v60 }
 0x5cb   : > { %3242 = vrot.lane.b32.xlu2 %v3053_v63, %s5411_s25 }
 0x5cc   : > { %v4010_v25 = vpop.f32.mrf.mxu0  ;;  %v3612_v19 = vpop.permute.xlu0 %3611 }
 0x5cd   : > { %3627 = vrot.lane.b32.xlu1 %v3438_v6, %s5412_s26  ;;  %4160 = vst.msk [vmem:[#allocation4 + $0x48] sm:$0xff] %vm4150_vm14, %v4010_v25  ;;  %v4233_v33 = vsel %vm4150_vm14, %v4010_v25, 0.0  ;;  %v4362_v44 = vmul.f32 %v4010_v25, %v4010_v25  ;;  %v3205_v52 = vpop.permute.xlu2 %3204  ;;  %v3802_v30 = vld [vmem:[#allocation3 + $0x140] sm:$0xff] }
 0x5ce   : > { %v4234_v42 = vadd.f32 %v4233_v33, %v4232_v47  ;;  %3751 = vst.msk [vmem:[#allocation3 + $0x1a8] sm:$0xff] %vm3697_vm12, %v3612_v19 }
 0x5cf   : > { %v7249_v28 = vpop.f32.mrf.mxu1  ;;  %v3588_v58 = vpop.permute.xlu1 %3587  ;;  %v4434_v8 = vsel %vm4150_vm14, %v4362_v44, 0.0  ;;  %3355 = vst.msk [vmem:[#allocation3 + $0x150] sm:$0xff] %vm3312_vm11, %v3205_v52 }
 0x5d0   : > { %4171 = vst.msk [vmem:[#allocation4 + $0xa0] sm:$0xff] %vm4150_vm14, %v7249_v28  ;;  %v4435_v12 = vadd.f32 %v4434_v8, %v4433_v15  ;;  %v3814_v35 = vld [vmem:[#allocation3 + $0x1a0] sm:$0xff] }
 0x5d1   : > { %3739 = vst.msk [vmem:[#allocation3 + $0x148] sm:$0xff] %vm3697_vm12, %v3588_v58 }
 0x5d2   : > { %3629 = vrot.lane.b32.xlu0 %v3439_v32, %s5412_s26 }
 0x5d3   : > { %2859 = vrot.lane.b32.xlu2 %v2669_v4, %s5410_s24 }
 0x5d4   : > { %v3562_v21 = vpop.permute.xlu0 %3561 }
 0x5d5   : > { %3244 = vrot.lane.b32.xlu1 %v3054_v18, %s5411_s25  ;;  %v3815_v46 = vld [vmem:[#allocation3 + $0x1a8] sm:$0xff]  ;;  %v3231_v36 = vpop.permute.xlu2 %3230 }
 0x5d6   : > { %v3852_v40 = vpack.c.bf16 %v3815_v46, %v3814_v35  ;;  %3368 = vst.msk [vmem:[#allocation3 + $0x1b8] sm:$0xff] %vm3312_vm11, %v3231_v36 }
 0x5d7   : > { %v7259_v43 = vpop.f32.mrf.mxu1  ;;  %v3177_v41 = vpop.permute.xlu1 %3176 }
 0x5d8   : > { %4172 = vst.msk [vmem:[#allocation4 + $0xa8] sm:$0xff] %vm4150_vm14, %v7259_v43  ;;  %v3803_v50 = vld [vmem:[#allocation3 + $0x148] sm:$0xff]  ;;  %5158 = vmatmul.msk.bf16.gmra.mxu3 %vm3878_vm13, %v3852_v40 }
 0x5d9   : > { %3341 = vst.msk [vmem:[#allocation3 + $0xe0] sm:$0xff] %vm3312_vm11, %v3177_v41  ;;  %v3846_v59 = vpack.c.bf16 %v3803_v50, %v3802_v30 }
 0x5da   : > { %3726 = vst.msk [vmem:[#allocation3 + $0xe0] sm:$0xff] %vm3697_vm12, %v3562_v21 }
 0x5db   : > { %5152 = vmatmul.msk.bf16.gmra.mxu2 %vm3878_vm13, %v3846_v59  ;;  %3246 = vrot.lane.b32.xlu2 %v3055_v48, %s5411_s25 }
 0x5dc   : > { %v3207_v1 = vpop.permute.xlu0 %3206 }
 0x5dd   : > { %3631 = vrot.lane.b32.xlu1 %v3440_v55, %s5412_s26  ;;  %3356 = vst.msk [vmem:[#allocation3 + $0x158] sm:$0xff] %vm3312_vm11, %v3207_v1  ;;  %v3614_v20 = vpop.permute.xlu2 %3613 }
 0x5de   : > { %v7271_v54 = vpop.f32.mrf.mxu2 }
 0x5df   : > { %4185 = vst.msk [vmem:[#allocation4 + $0x110] sm:$0xff] %vm4150_vm14, %v7271_v54  ;;  %v3564_v9 = vpop.permute.xlu1 %3563 }
 0x5e0   : > { %3727 = vst.msk [vmem:[#allocation3 + $0xe8] sm:$0xff] %vm3697_vm12, %v3564_v9 }
 0x5e1   : > { %v3790_v31 = vld [vmem:[#allocation3 + $0xe0] sm:$0xff] }
 0x5e4   : > { %v4013_v26 = vpop.f32.mrf.mxu0  ;;  %v3590_v34 = vpop.permute.xlu0 %3589 }
 0x5e5   : > { %4161 = vst.msk [vmem:[#allocation4 + $0x50] sm:$0xff] %vm4150_vm14, %v4013_v26  ;;  %v4235_v45 = vsel %vm4150_vm14, %v4013_v26, 0.0  ;;  %v4363_v61 = vmul.f32 %v4013_v26, %v4013_v26  ;;  %v3183_v24 = vpop.permute.xlu2 %3182 }
 0x5e6   : > { %v7278_v38 = vpop.f32.mrf.mxu2  ;;  %v4236_v2 = vadd.f32 %v4235_v45, %v4234_v42  ;;  %3740 = vst.msk [vmem:[#allocation3 + $0x150] sm:$0xff] %vm3697_vm12, %v3590_v34 }
 0x5e7   : > { %v3229_v0 = vpop.permute.xlu1 %3228  ;;  %v3791_v14 = vld [vmem:[#allocation3 + $0xe8] sm:$0xff]  ;;  %v4436_v62 = vsel %vm4150_vm14, %v4363_v61, 0.0  ;;  %4186 = vst.msk [vmem:[#allocation4 + $0x118] sm:$0xff] %vm4150_vm14, %v7278_v38 }
 0x5e8   : > { %v3840_v27 = vpack.c.bf16 %v3791_v14, %v3790_v31  ;;  %v4437_v56 = vadd.f32 %v4436_v62, %v4435_v12  ;;  %3367 = vst.msk [vmem:[#allocation3 + $0x1b0] sm:$0xff] %vm3312_vm11, %v3229_v0 }
 0x5e9   : > { %3752 = vst.msk [vmem:[#allocation3 + $0x1b0] sm:$0xff] %vm3697_vm12, %v3614_v20 }
 0x5ea   : > { %5146 = vmatmul.msk.bf16.gmra.mxu1 %vm3878_vm13, %v3840_v27  ;;  %3344 = vst.msk [vmem:[#allocation3 + $0xf8] sm:$0xff] %vm3312_vm11, %v3183_v24 }
 0x5ec   : > { %v4015_v11 = vpop.f32.mrf.mxu0  ;;  %v3616_v23 = vpop.permute.xlu0 %3615 }
 0x5ed   : > { %4162 = vst.msk [vmem:[#allocation4 + $0x58] sm:$0xff] %vm4150_vm14, %v4015_v11  ;;  %v4237_v37 = vsel %vm4150_vm14, %v4015_v11, 0.0  ;;  %v4364_v57 = vmul.f32 %v4015_v11, %v4015_v11  ;;  %v3209_v10 = vpop.permute.xlu2 %3208  ;;  %v3804_v15 = vld [vmem:[#allocation3 + $0x150] sm:$0xff] }
 0x5ee   : > { %v7290_v29 = vadd.f32 %v4237_v37, %v4236_v2  ;;  %3753 = vst.msk [vmem:[#allocation3 + $0x1b8] sm:$0xff] %vm3697_vm12, %v3616_v23 }
 0x5ef   : > { %v7293_v60 = vpop.f32.mrf.mxu1  ;;  %v3592_v47 = vpop.permute.xlu1 %3591  ;;  %v4438_v22 = vsel %vm4150_vm14, %v4364_v57, 0.0  ;;  %3357 = vst.msk [vmem:[#allocation3 + $0x160] sm:$0xff] %vm3312_vm11, %v3209_v10 }
 0x5f0   : > { %4173 = vst.msk [vmem:[#allocation4 + $0xb0] sm:$0xff] %vm4150_vm14, %v7293_v60  ;;  %v7298_v13 = vadd.f32 %v4438_v22, %v4437_v56  ;;  %v3816_v3 = vld [vmem:[#allocation3 + $0x1b0] sm:$0xff] }
 0x5f1   : > { %3741 = vst.msk [vmem:[#allocation3 + $0x158] sm:$0xff] %vm3697_vm12, %v3592_v47 }
 0x5f4   : > { %v3566_v7 = vpop.permute.xlu0 %3565 }
 0x5f5   : > { %v3817_v17 = vld [vmem:[#allocation3 + $0x1b8] sm:$0xff]  ;;  %v3235_v63 = vpop.permute.xlu2 %3234 }
 0x5f6   : > { %v3853_v19 = vpack.c.bf16 %v3817_v17, %v3816_v3  ;;  %3370 = vst.msk [vmem:[#allocation3 + $0x1c8] sm:$0xff] %vm3312_vm11, %v3235_v63 }
 0x5f7   : > { %v7302_v6 = vpop.f32.mrf.mxu1  ;;  %v3181_v25 = vpop.permute.xlu1 %3180 }
 0x5f8   : > { %4174 = vst.msk [vmem:[#allocation4 + $0xb8] sm:$0xff] %vm4150_vm14, %v7302_v6  ;;  %v3805_v33 = vld [vmem:[#allocation3 + $0x158] sm:$0xff]  ;;  %5159 = vmatmul.msk.bf16.gmra.mxu3 %vm3878_vm13, %v3853_v19 }
 0x5f9   : > { %3343 = vst.msk [vmem:[#allocation3 + $0xf0] sm:$0xff] %vm3312_vm11, %v3181_v25  ;;  %v3847_v44 = vpack.c.bf16 %v3805_v33, %v3804_v15 }
 0x5fa   : > { %3728 = vst.msk [vmem:[#allocation3 + $0xf0] sm:$0xff] %vm3697_vm12, %v3566_v7 }
 0x5fb   : > { %5153 = vmatmul.msk.bf16.gmra.mxu2 %vm3878_vm13, %v3847_v44 }
 0x5fc   : > { %v3211_v52 = vpop.permute.xlu0 %3210 }
 0x5fd   : > { %3358 = vst.msk [vmem:[#allocation3 + $0x168] sm:$0xff] %vm3312_vm11, %v3211_v52  ;;  %v3618_v42 = vpop.permute.xlu2 %3617 }
 0x5ff   : > { %v3568_v58 = vpop.permute.xlu1 %3567 }
 0x600   : > { %3729 = vst.msk [vmem:[#allocation3 + $0xf8] sm:$0xff] %vm3697_vm12, %v3568_v58 }
 0x601   : > { %v3792_v12 = vld [vmem:[#allocation3 + $0xf0] sm:$0xff] }
 0x604   : > { %v3594_v32 = vpop.permute.xlu0 %3593 }
 0x605   : > { %v7313_v8 = vpop.f32.mrf.mxu2  ;;  %v2854_v4 = vpop.permute.xlu2 %2853  ;;  %3742 = vst.msk [vmem:[#allocation3 + $0x160] sm:$0xff] %vm3697_vm12, %v3594_v32 }
 0x606   : > { %4187 = vst.msk [vmem:[#allocation4 + $0x120] sm:$0xff] %vm4150_vm14, %v7313_v8 }
 0x607   : > { %v3233_v18 = vpop.permute.xlu1 %3232  ;;  %v3793_v35 = vld [vmem:[#allocation3 + $0xf8] sm:$0xff]  ;;  %2987 = vst.msk [vmem:[#allocation3 + $0x1d8] sm:$0xff] %vm2927_vm9, %v2854_v4 }
 0x608   : > { %3369 = vst.msk [vmem:[#allocation3 + $0x1c0] sm:$0xff] %vm3312_vm11, %v3233_v18  ;;  %v3841_v21 = vpack.c.bf16 %v3793_v35, %v3792_v12 }
 0x609   : > { %3754 = vst.msk [vmem:[#allocation3 + $0x1c0] sm:$0xff] %vm3697_vm12, %v3618_v42 }
 0x60a   : > { %5147 = vmatmul.msk.bf16.gmra.mxu1 %vm3878_vm13, %v3841_v21 }
 0x60c   : > { %v3620_v36 = vpop.permute.xlu0 %3619  ;;  %v3806_v55 = vld [vmem:[#allocation3 + $0x160] sm:$0xff] }
 0x60d   : > { %v7322_v46 = vpop.f32.mrf.mxu2  ;;  %v7324_v30 = vpop.f32.mrf.mxu3  ;;  %3755 = vst.msk [vmem:[#allocation3 + $0x1c8] sm:$0xff] %vm3697_vm12, %v3620_v36 }
 0x60e   : > { %4188 = vst.msk [vmem:[#allocation4 + $0x128] sm:$0xff] %vm4150_vm14, %v7322_v46  ;;  %v3237_v41 = vpop.permute.xlu2 %3236 }
 0x60f   : > { %4199 = vst.msk [vmem:[#allocation4 + $0x180] sm:$0xff] %vm4150_vm14, %v7324_v30  ;;  %v3596_v40 = vpop.permute.xlu1 %3595 }
 0x610   : > { %3743 = vst.msk [vmem:[#allocation3 + $0x168] sm:$0xff] %vm3697_vm12, %v3596_v40  ;;  %v3818_v48 = vld [vmem:[#allocation3 + $0x1c0] sm:$0xff] }
 0x614   : > { %v7334_v59 = vpop.f32.mrf.mxu1  ;;  %v3213_v1 = vpop.permute.xlu0 %3212  ;;  %v3819_v34 = vld [vmem:[#allocation3 + $0x1c8] sm:$0xff] }
 0x615   : > { %v7332_v50 = vpop.f32.mrf.mxu3  ;;  %4175 = vst.msk [vmem:[#allocation4 + $0xc0] sm:$0xff] %vm4150_vm14, %v7334_v59  ;;  %v3854_v2 = vpack.c.bf16 %v3819_v34, %v3818_v48 }
 0x616   : > { %4200 = vst.msk [vmem:[#allocation4 + $0x188] sm:$0xff] %vm4150_vm14, %v7332_v50  ;;  %v3600_v20 = vpop.permute.xlu2 %3599 }
 0x617   : > { %v2852_v9 = vpop.permute.xlu1 %2851  ;;  %v4018_v26 = vpop.f32.mrf.mxu0  ;;  %v3807_v61 = vld [vmem:[#allocation3 + $0x168] sm:$0xff]  ;;  %5160 = vmatmul.msk.bf16.gmra.mxu3 %vm3878_vm13, %v3854_v2  ;;  %3359 = vst.msk [vmem:[#allocation3 + $0x170] sm:$0xff] %vm3312_vm11, %v3213_v1 }
 0x618   : > { %2986 = vst.msk [vmem:[#allocation3 + $0x1d0] sm:$0xff] %vm2927_vm9, %v2852_v9  ;;  %v4239_v31 = vsel %vm4150_vm14, %v4018_v26, 0.0  ;;  %v4365_v45 = vmul.f32 %v4018_v26, %v4018_v26  ;;  %v3848_v0 = vpack.c.bf16 %v3807_v61, %v3806_v55 }
 0x619   : > { %4163 = vst.msk [vmem:[#allocation4 + $0x60] sm:$0xff] %vm4150_vm14, %v4018_v26  ;;  %v4240_v24 = vadd.f32 %v4239_v31, %v7290_v29 }
 0x61a   : > { %v4440_v14 = vsel %vm4150_vm14, %v4365_v45, 0.0  ;;  %3371 = vst.msk [vmem:[#allocation3 + $0x1d0] sm:$0xff] %vm3312_vm11, %v3237_v41  ;;  %5154 = vmatmul.msk.bf16.gmra.mxu2 %vm3878_vm13, %v3848_v0  ;;  %v4369_v0 = vmul.f32 %v7158_v51, %v7158_v51 }
 0x61b   : > { %v4441_v62 = vadd.f32 %v4440_v14, %v7298_v13 }
 0x61c   : > { %v7350_v27 = vpop.f32.mrf.mxu1  ;;  %v3239_v56 = vpop.permute.xlu0 %3238 }
 0x61d   : > { %4176 = vst.msk [vmem:[#allocation4 + $0xc8] sm:$0xff] %vm4150_vm14, %v7350_v27 }
 0x61e   : > { %v2856_v11 = vpop.permute.xlu2 %2855  ;;  %3372 = vst.msk [vmem:[#allocation3 + $0x1d8] sm:$0xff] %vm3312_vm11, %v3239_v56 }
 0x61f   : > { %v3215_v23 = vpop.permute.xlu1 %3214  ;;  %v4020_v37 = vpop.f32.mrf.mxu0  ;;  %2988 = vst.msk [vmem:[#allocation3 + $0x1e0] sm:$0xff] %vm2927_vm9, %v2856_v11  ;;  %v4247_v11 = vsel %vm4150_vm14, %v7158_v51, 0.0 }
 0x620   : > { %3360 = vst.msk [vmem:[#allocation3 + $0x178] sm:$0xff] %vm3312_vm11, %v3215_v23  ;;  %v4241_v57 = vsel %vm4150_vm14, %v4020_v37, 0.0  ;;  %v4366_v10 = vmul.f32 %v4020_v37, %v4020_v37  ;;  %v4370_v23 = vmul.f32 %v7173_v49, %v7173_v49 }
 0x621   : > { %4164 = vst.msk [vmem:[#allocation4 + $0x68] sm:$0xff] %vm4150_vm14, %v4020_v37  ;;  %v4242_v29 = vadd.f32 %v4241_v57, %v4240_v24 }
 0x622   : > { %v4442_v47 = vsel %vm4150_vm14, %v4366_v10, 0.0  ;;  %3745 = vst.msk [vmem:[#allocation3 + $0x178] sm:$0xff] %vm3697_vm12, %v3600_v20  ;;  %v4450_v51 = vsel %vm4150_vm14, %v4370_v23, 0.0 }
 0x623   : > { %v4443_v22 = vadd.f32 %v4442_v47, %v4441_v62  ;;  %v4249_v47 = vsel %vm4150_vm14, %v7173_v49, 0.0 }
 0x624   : > { %v3622_v13 = vpop.permute.xlu0 %3621 }
 0x625   : > { %3756 = vst.msk [vmem:[#allocation3 + $0x1d0] sm:$0xff] %vm3697_vm12, %v3622_v13 }
 0x626   : > { %v3243_v3 = vpop.permute.xlu2 %3242 }
 0x627   : > { %v3598_v7 = vpop.permute.xlu1 %3597 }
 0x628   : > { %3744 = vst.msk [vmem:[#allocation3 + $0x170] sm:$0xff] %vm3697_vm12, %v3598_v7  ;;  %v4251_v7 = vsel %vm4150_vm14, %v7197_v16, 0.0 }
 0x629   : > { %v3809_v15 = vld [vmem:[#allocation3 + $0x178] sm:$0xff] }
 0x62a   : > { %v7363_v17 = vpop.f32.mrf.mxu2 }
 0x62b   : > { %4189 = vst.msk [vmem:[#allocation4 + $0x130] sm:$0xff] %vm4150_vm14, %v7363_v17 }
 0x62c   : > { %v2858_v63 = vpop.permute.xlu0 %2857  ;;  %v3820_v58 = vld [vmem:[#allocation3 + $0x1d0] sm:$0xff] }
 0x62d   : > { %2989 = vst.msk [vmem:[#allocation3 + $0x1e8] sm:$0xff] %vm2927_vm9, %v2858_v63 }
 0x62e   : > { %v2860_v33 = vpop.permute.xlu2 %2859  ;;  %3374 = vst.msk [vmem:[#allocation3 + $0x1e8] sm:$0xff] %vm3312_vm11, %v3243_v3 }
 0x62f   : > { %v3624_v25 = vpop.permute.xlu1 %3623  ;;  %v3808_v19 = vld [vmem:[#allocation3 + $0x170] sm:$0xff]  ;;  %2990 = vst.msk [vmem:[#allocation3 + $0x1f0] sm:$0xff] %vm2927_vm9, %v2860_v33 }
 0x630   : > { %3757 = vst.msk [vmem:[#allocation3 + $0x1d8] sm:$0xff] %vm3697_vm12, %v3624_v25  ;;  %v3849_v44 = vpack.c.bf16 %v3809_v15, %v3808_v19  ;;  %v4372_v15 = vmul.f32 %v7212_v39, %v7212_v39 }
 0x632   : > { %5155 = vmatmul.msk.bf16.gmra.mxu2 %vm3878_vm13, %v3849_v44  ;;  %v7372_v52 = vpop.f32.mrf.mxu2  ;;  %v4253_v44 = vsel %vm4150_vm14, %v7212_v39, 0.0  ;;  %v4257_v39 = vsel %vm4150_vm14, %v7259_v43, 0.0 }
 0x633   : > { %4190 = vst.msk [vmem:[#allocation4 + $0x138] sm:$0xff] %vm4150_vm14, %v7372_v52 }
 0x634   : > { %v3626_v32 = vpop.permute.xlu0 %3625 }
 0x635   : > { %v7376_v42 = vpop.f32.mrf.mxu3 }
 0x636   : > { %4201 = vst.msk [vmem:[#allocation4 + $0x190] sm:$0xff] %vm4150_vm14, %v7376_v42  ;;  %v3247_v41 = vpop.permute.xlu2 %3246 }
 0x637   : > { %v3241_v12 = vpop.permute.xlu1 %3240  ;;  %v3821_v4 = vld [vmem:[#allocation3 + $0x1d8] sm:$0xff] }
 0x638   : > { %3373 = vst.msk [vmem:[#allocation3 + $0x1e0] sm:$0xff] %vm3312_vm11, %v3241_v12  ;;  %v3855_v18 = vpack.c.bf16 %v3821_v4, %v3820_v58  ;;  %v4373_v58 = vmul.f32 %v7249_v28, %v7249_v28  ;;  %v4454_v12 = vsel %vm4150_vm14, %v4372_v15, 0.0  ;;  %v4255_v4 = vsel %vm4150_vm14, %v7249_v28, 0.0 }
 0x639   : > { %3758 = vst.msk [vmem:[#allocation3 + $0x1e0] sm:$0xff] %vm3697_vm12, %v3626_v32  ;;  %v4259_v28 = vsel %vm4150_vm14, %v7293_v60, 0.0 }
 0x63a   : > { %5161 = vmatmul.msk.bf16.gmra.mxu3 %vm3878_vm13, %v3855_v18  ;;  %v4374_v18 = vmul.f32 %v7259_v43, %v7259_v43  ;;  %v4261_v43 = vsel %vm4150_vm14, %v7302_v6, 0.0 }
 0x63c   : > { %v2862_v21 = vpop.permute.xlu0 %2861 }
 0x63d   : > { %v7383_v35 = vpop.f32.mrf.mxu3  ;;  %2991 = vst.msk [vmem:[#allocation3 + $0x1f8] sm:$0xff] %vm2927_vm9, %v2862_v21 }
 0x63e   : > { %4202 = vst.msk [vmem:[#allocation4 + $0x198] sm:$0xff] %vm4150_vm14, %v7383_v35 }
 0x63f   : > { %v3628_v36 = vpop.permute.xlu1 %3627  ;;  %3376 = vst.msk [vmem:[#allocation3 + $0x1f8] sm:$0xff] %vm3312_vm11, %v3247_v41  ;;  %v4456_v41 = vsel %vm4150_vm14, %v4373_v58, 0.0 }
 0x640   : > { %3759 = vst.msk [vmem:[#allocation3 + $0x1e8] sm:$0xff] %vm3697_vm12, %v3628_v36  ;;  %v4023_v40 = vpop.f32.mrf.mxu0  ;;  %v3822_v26 = vld [vmem:[#allocation3 + $0x1e0] sm:$0xff] }
 0x641   : > { %4165 = vst.msk [vmem:[#allocation4 + $0x70] sm:$0xff] %vm4150_vm14, %v4023_v40  ;;  %v4243_v48 = vsel %vm4150_vm14, %v4023_v40, 0.0  ;;  %v4367_v55 = vmul.f32 %v4023_v40, %v4023_v40  ;;  %v4375_v40 = vmul.f32 %v7293_v60, %v7293_v60  ;;  %v4263_v60 = vsel %vm4150_vm14, %v7334_v59, 0.0 }
 0x642   : > { %v4244_v1 = vadd.f32 %v4243_v48, %v4242_v29  ;;  %v4448_v29 = vsel %vm4150_vm14, %v4369_v0, 0.0 }
 0x643   : > { %v4444_v20 = vsel %vm4150_vm14, %v4367_v55, 0.0 }
 0x644   : > { %v4445_v9 = vadd.f32 %v4444_v20, %v4443_v22  ;;  %v3630_v2 = vpop.permute.xlu0 %3629  ;;  %v4371_v22 = vmul.f32 %v7197_v16, %v7197_v16  ;;  %v4458_v20 = vsel %vm4150_vm14, %v4374_v18, 0.0 }
 0x646   : > { %v4452_v49 = vsel %vm4150_vm14, %v4371_v22, 0.0 }
 0x647   : > { %v7393_v34 = vpop.f32.mrf.mxu1  ;;  %v3245_v31 = vpop.permute.xlu1 %3244  ;;  %v3823_v45 = vld [vmem:[#allocation3 + $0x1e8] sm:$0xff] }
 0x648   : > { %4177 = vst.msk [vmem:[#allocation4 + $0xd0] sm:$0xff] %vm4150_vm14, %v7393_v34  ;;  %v4025_v61 = vpop.f32.mrf.mxu0  ;;  %v3856_v24 = vpack.c.bf16 %v3823_v45, %v3822_v26 }
 0x649   : > { %3375 = vst.msk [vmem:[#allocation3 + $0x1f0] sm:$0xff] %vm3312_vm11, %v3245_v31  ;;  %v4245_v14 = vsel %vm4150_vm14, %v4025_v61, 0.0  ;;  %v4368_v62 = vmul.f32 %v4025_v61, %v4025_v61 }
 0x64a   : > { %4166 = vst.msk [vmem:[#allocation4 + $0x78] sm:$0xff] %vm4150_vm14, %v4025_v61  ;;  %v4246_v56 = vadd.f32 %v4245_v14, %v4244_v1  ;;  %5162 = vmatmul.msk.bf16.gmra.mxu3 %vm3878_vm13, %v3856_v24  ;;  %v4460_v61 = vsel %vm4150_vm14, %v4375_v40, 0.0  ;;  %v4377_v24 = vmul.f32 %v7334_v59, %v7334_v59 }
 0x64b   : > { %v4446_v37 = vsel %vm4150_vm14, %v4368_v62, 0.0  ;;  %3760 = vst.msk [vmem:[#allocation3 + $0x1f0] sm:$0xff] %vm3697_vm12, %v3630_v2 }
 0x64c   : > { %v4248_v57 = vadd.f32 %v4247_v11, %v4246_v56  ;;  %v4447_v10 = vadd.f32 %v4446_v37, %v4445_v9  ;;  %v4376_v9 = vmul.f32 %v7302_v6, %v7302_v6  ;;  %v4378_v56 = vmul.f32 %v7350_v27, %v7350_v27 }
 0x64d   : > { %v4464_v6 = vsel %vm4150_vm14, %v4377_v24, 0.0 }
 0x64e   : > { %v4250_v13 = vadd.f32 %v4249_v47, %v4248_v57  ;;  %v4449_v3 = vadd.f32 %v4448_v29, %v4447_v10  ;;  %v4462_v62 = vsel %vm4150_vm14, %v4376_v9, 0.0  ;;  %v4265_v57 = vsel %vm4150_vm14, %v7350_v27, 0.0 }
 0x64f   : > { %v4055_v63 = vpop.f32.mrf.mxu1  ;;  %v3632_v25 = vpop.permute.xlu1 %3631  ;;  %v4379_v10 = vmul.f32 %v7393_v34, %v7393_v34  ;;  %v4466_v22 = vsel %vm4150_vm14, %v4378_v56, 0.0 }
 0x650   : > { %v4252_v19 = vadd.f32 %v4251_v7, %v4250_v13  ;;  %v4451_v33 = vadd.f32 %v4450_v51, %v4449_v3  ;;  %4178 = vst.msk [vmem:[#allocation4 + $0xd8] sm:$0xff] %vm4150_vm14, %v4055_v63  ;;  %v4267_v13 = vsel %vm4150_vm14, %v7393_v34, 0.0  ;;  %v4380_v3 = vmul.f32 %v4055_v63, %v4055_v63 }
 0x651   : > { %3761 = vst.msk [vmem:[#allocation3 + $0x1f8] sm:$0xff] %vm3697_vm12, %v3632_v25  ;;  %v4468_v7 = vsel %vm4150_vm14, %v4379_v10, 0.0  ;;  %v4269_v15 = vsel %vm4150_vm14, %v4055_v63, 0.0  ;;  %v4387_v10 = vmul.f32 %v7271_v54, %v7271_v54 }
 0x652   : > { %v4254_v16 = vadd.f32 %v4253_v44, %v4252_v19  ;;  %v4453_v32 = vadd.f32 %v4452_v49, %v4451_v33  ;;  %v3824_v1 = vld [vmem:[#allocation3 + $0x1f0] sm:$0xff]  ;;  %v4470_v33 = vsel %vm4150_vm14, %v4380_v3, 0.0 }
 0x654   : > { %v4256_v21 = vadd.f32 %v4255_v4, %v4254_v16  ;;  %v4455_v36 = vadd.f32 %v4454_v12, %v4453_v32 }
 0x656   : > { %v4258_v48 = vadd.f32 %v4257_v39, %v4256_v21  ;;  %v4457_v55 = vadd.f32 %v4456_v41, %v4455_v36 }
 0x658   : > { %v4459_v26 = vadd.f32 %v4458_v20, %v4457_v55  ;;  %v4260_v31 = vadd.f32 %v4259_v28, %v4258_v48  ;;  %v3825_v45 = vld [vmem:[#allocation3 + $0x1f8] sm:$0xff] }
 0x659   : > { %v3857_v2 = vpack.c.bf16 %v3825_v45, %v3824_v1 }
 0x65a   : > { %v4262_v0 = vadd.f32 %v4261_v43, %v4260_v31  ;;  %v4461_v14 = vadd.f32 %v4460_v61, %v4459_v26  ;;  %v4385_v43 = vmul.f32 %v7222_v53, %v7222_v53 }
 0x65b   : > { %5163 = vmatmul.msk.bf16.gmra.mxu3 %vm3878_vm13, %v3857_v2  ;;  %v7452_v37 = vpop.f32.mrf.mxu3 }
 0x65c   : > { %v4264_v11 = vadd.f32 %v4263_v60, %v4262_v0  ;;  %v4463_v23 = vadd.f32 %v4462_v62, %v4461_v14  ;;  %4203 = vst.msk [vmem:[#allocation4 + $0x1a0] sm:$0xff] %vm4150_vm14, %v7452_v37  ;;  %v4279_v62 = vsel %vm4150_vm14, %v7222_v53, 0.0  ;;  %v4386_v60 = vmul.f32 %v7233_v5, %v7233_v5 }
 0x65d   : > { %v4283_v53 = vsel %vm4150_vm14, %v7271_v54, 0.0  ;;  %v4287_v54 = vsel %vm4150_vm14, %v7313_v8, 0.0 }
 0x65e   : > { %v4266_v59 = vadd.f32 %v4265_v57, %v4264_v11  ;;  %v4465_v29 = vadd.f32 %v4464_v6, %v4463_v23  ;;  %v7461_v47 = vpop.f32.mrf.mxu2  ;;  %v4480_v6 = vsel %vm4150_vm14, %v4385_v43, 0.0  ;;  %v4281_v57 = vsel %vm4150_vm14, %v7233_v5, 0.0 }
 0x65f   : > { %4191 = vst.msk [vmem:[#allocation4 + $0x140] sm:$0xff] %vm4150_vm14, %v7461_v47  ;;  %v4285_v5 = vsel %vm4150_vm14, %v7278_v38, 0.0 }
 0x660   : > { %v4268_v27 = vadd.f32 %v4267_v13, %v4266_v59  ;;  %v4467_v51 = vadd.f32 %v4466_v22, %v4465_v29  ;;  %v4482_v22 = vsel %vm4150_vm14, %v4386_v60, 0.0  ;;  %v4388_v13 = vmul.f32 %v7278_v38, %v7278_v38 }
 0x661   : > { %v4289_v38 = vsel %vm4150_vm14, %v7322_v46, 0.0 }
 0x662   : > { %v4270_v25 = vadd.f32 %v4269_v15, %v4268_v27  ;;  %v4469_v19 = vadd.f32 %v4468_v7, %v4467_v51  ;;  %v4484_v51 = vsel %vm4150_vm14, %v4387_v10, 0.0  ;;  %v4389_v7 = vmul.f32 %v7313_v8, %v7313_v8 }
 0x663   : > { %v7471_v44 = vpop.f32.mrf.mxu3  ;;  %v4291_v8 = vsel %vm4150_vm14, %v7363_v17, 0.0 }
 0x664   : > { %v4471_v49 = vadd.f32 %v4470_v33, %v4469_v19  ;;  %4204 = vst.msk [vmem:[#allocation4 + $0x1a8] sm:$0xff] %vm4150_vm14, %v7471_v44  ;;  %v4486_v19 = vsel %vm4150_vm14, %v4388_v13, 0.0  ;;  %v4390_v33 = vmul.f32 %v7322_v46, %v7322_v46 }
 0x666   : > { %v7475_v34 = vpop.f32.mrf.mxu2 }
 0x667   : > { %4192 = vst.msk [vmem:[#allocation4 + $0x148] sm:$0xff] %vm4150_vm14, %v7475_v34  ;;  %v4058_v58 = vpop.f32.mrf.mxu1 }
 0x668   : > { %4179 = vst.msk [vmem:[#allocation4 + $0xe0] sm:$0xff] %vm4150_vm14, %v4058_v58  ;;  %v4381_v4 = vmul.f32 %v4058_v58, %v4058_v58  ;;  %v4271_v36 = vsel %vm4150_vm14, %v4058_v58, 0.0 }
 0x669   : > { %v4272_v55 = vadd.f32 %v4271_v36, %v4270_v25 }
 0x66a   : > { %v4472_v39 = vsel %vm4150_vm14, %v4381_v4, 0.0  ;;  %v4391_v4 = vmul.f32 %v7363_v17, %v7363_v17 }
 0x66b   : > { %v4473_v28 = vadd.f32 %v4472_v39, %v4471_v49  ;;  %v4392_v39 = vmul.f32 %v7372_v52, %v7372_v52 }
 0x66f   : > { %v4060_v16 = vpop.f32.mrf.mxu1 }
 0x670   : > { %4180 = vst.msk [vmem:[#allocation4 + $0xe8] sm:$0xff] %vm4150_vm14, %v4060_v16  ;;  %v4382_v41 = vmul.f32 %v4060_v16, %v4060_v16  ;;  %v4273_v40 = vsel %vm4150_vm14, %v4060_v16, 0.0  ;;  %v4488_v16 = vsel %vm4150_vm14, %v4389_v7, 0.0 }
 0x671   : > { %v4274_v9 = vadd.f32 %v4273_v40, %v4272_v55 }
 0x672   : > { %v4474_v1 = vsel %vm4150_vm14, %v4382_v41, 0.0  ;;  %v4490_v41 = vsel %vm4150_vm14, %v4390_v33, 0.0 }
 0x673   : > { %v4475_v31 = vadd.f32 %v4474_v1, %v4473_v28  ;;  %v4492_v1 = vsel %vm4150_vm14, %v4391_v4, 0.0  ;;  %v4393_v28 = vmul.f32 %v7461_v47, %v7461_v47 }
 0x67b   : > { %v7481_v63 = vpop.f32.mrf.mxu3 }
 0x67c   : > { %4205 = vst.msk [vmem:[#allocation4 + $0x1b0] sm:$0xff] %vm4150_vm14, %v7481_v63 }
 0x67e   : > { %v7485_v32 = vpop.f32.mrf.mxu2 }
 0x67f   : > { %4193 = vst.msk [vmem:[#allocation4 + $0x150] sm:$0xff] %vm4150_vm14, %v7485_v32 }
 0x683   : > { %v7489_v12 = vpop.f32.mrf.mxu3 }
 0x684   : > { %4206 = vst.msk [vmem:[#allocation4 + $0x1b8] sm:$0xff] %vm4150_vm14, %v7489_v12 }
 0x686   : > { %v7493_v18 = vpop.f32.mrf.mxu2 }
 0x687   : > { %4194 = vst.msk [vmem:[#allocation4 + $0x158] sm:$0xff] %vm4150_vm14, %v7493_v18  ;;  %v4063_v21 = vpop.f32.mrf.mxu1  ;;  %v4301_v10 = vsel %vm4150_vm14, %v7493_v18, 0.0 }
 0x688   : > { %4181 = vst.msk [vmem:[#allocation4 + $0xf0] sm:$0xff] %vm4150_vm14, %v4063_v21  ;;  %v4383_v48 = vmul.f32 %v4063_v21, %v4063_v21  ;;  %v4275_v20 = vsel %vm4150_vm14, %v4063_v21, 0.0 }
 0x689   : > { %v4276_v45 = vadd.f32 %v4275_v20, %v4274_v9  ;;  %v4293_v20 = vsel %vm4150_vm14, %v7372_v52, 0.0  ;;  %v4297_v52 = vsel %vm4150_vm14, %v7475_v34, 0.0 }
 0x68a   : > { %v4476_v26 = vsel %vm4150_vm14, %v4383_v48, 0.0 }
 0x68b   : > { %v4477_v0 = vadd.f32 %v4476_v26, %v4475_v31  ;;  %v4494_v26 = vsel %vm4150_vm14, %v4392_v39, 0.0  ;;  %v4295_v31 = vsel %vm4150_vm14, %v7461_v47, 0.0  ;;  %v4395_v47 = vmul.f32 %v7485_v32, %v7485_v32 }
 0x68c   : > { %v4402_v39 = vmul.f32 %v7332_v50, %v7332_v50 }
 0x68f   : > { %v4065_v61 = vpop.f32.mrf.mxu1 }
 0x690   : > { %4182 = vst.msk [vmem:[#allocation4 + $0xf8] sm:$0xff] %vm4150_vm14, %v4065_v61  ;;  %v4277_v24 = vsel %vm4150_vm14, %v4065_v61, 0.0  ;;  %v4384_v2 = vmul.f32 %v4065_v61, %v4065_v61 }
 0x691   : > { %v4278_v14 = vadd.f32 %v4277_v24, %v4276_v45  ;;  %v4394_v45 = vmul.f32 %v7475_v34, %v7475_v34  ;;  %v4496_v24 = vsel %vm4150_vm14, %v4393_v28, 0.0  ;;  %v4403_v28 = vmul.f32 %v7376_v42, %v7376_v42 }
 0x692   : > { %v4478_v56 = vsel %vm4150_vm14, %v4384_v2, 0.0 }
 0x693   : > { %v4280_v11 = vadd.f32 %v4279_v62, %v4278_v14  ;;  %v4479_v23 = vadd.f32 %v4478_v56, %v4477_v0  ;;  %v4498_v14 = vsel %vm4150_vm14, %v4394_v45, 0.0 }
 0x695   : > { %v4282_v59 = vadd.f32 %v4281_v57, %v4280_v11  ;;  %v4481_v29 = vadd.f32 %v4480_v6, %v4479_v23  ;;  %v4299_v11 = vsel %vm4150_vm14, %v7485_v32, 0.0  ;;  %v4500_v23 = vsel %vm4150_vm14, %v4395_v47, 0.0 }
 0x696   : > { %v4396_v6 = vmul.f32 %v7493_v18, %v7493_v18 }
 0x697   : > { %v4284_v3 = vadd.f32 %v4283_v53, %v4282_v59  ;;  %v4483_v27 = vadd.f32 %v4482_v22, %v4481_v29 }
 0x698   : > { %v4502_v29 = vsel %vm4150_vm14, %v4396_v6, 0.0 }
 0x699   : > { %v4286_v15 = vadd.f32 %v4285_v5, %v4284_v3  ;;  %v4485_v25 = vadd.f32 %v4484_v51, %v4483_v27 }
 0x69a   : > { %v7543_v40 = vpop.f32.mrf.mxu3 }
 0x69b   : > { %v4288_v49 = vadd.f32 %v4287_v54, %v4286_v15  ;;  %v4487_v58 = vadd.f32 %v4486_v19, %v4485_v25  ;;  %4207 = vst.msk [vmem:[#allocation4 + $0x1c0] sm:$0xff] %vm4150_vm14, %v7543_v40 }
 0x69d   : > { %v4290_v21 = vadd.f32 %v4289_v38, %v4288_v49  ;;  %v4489_v36 = vadd.f32 %v4488_v16, %v4487_v58  ;;  %v4098_v48 = vpop.f32.mrf.mxu2  ;;  %v4401_v38 = vmul.f32 %v7324_v30, %v7324_v30 }
 0x69e   : > { %4195 = vst.msk [vmem:[#allocation4 + $0x160] sm:$0xff] %vm4150_vm14, %v4098_v48  ;;  %v4397_v22 = vmul.f32 %v4098_v48, %v4098_v48  ;;  %v4303_v3 = vsel %vm4150_vm14, %v4098_v48, 0.0 }
 0x69f   : > { %v4491_v55 = vadd.f32 %v4490_v41, %v4489_v36  ;;  %v4292_v46 = vadd.f32 %v4291_v8, %v4290_v21  ;;  %v4311_v8 = vsel %vm4150_vm14, %v7324_v30, 0.0  ;;  %v4315_v30 = vsel %vm4150_vm14, %v7376_v42, 0.0 }
 0x6a0   : > { %v4504_v27 = vsel %vm4150_vm14, %v4397_v22, 0.0 }
 0x6a1   : > { %v4294_v17 = vadd.f32 %v4293_v20, %v4292_v46  ;;  %v4493_v9 = vadd.f32 %v4492_v1, %v4491_v55  ;;  %v4512_v1 = vsel %vm4150_vm14, %v4401_v38, 0.0  ;;  %v4313_v20 = vsel %vm4150_vm14, %v7332_v50, 0.0 }
 0x6a2   : > { %v7562_v62 = vpop.f32.mrf.mxu3  ;;  %v4317_v50 = vsel %vm4150_vm14, %v7383_v35, 0.0 }
 0x6a3   : > { %v4296_v61 = vadd.f32 %v4295_v31, %v4294_v17  ;;  %v4495_v43 = vadd.f32 %v4494_v26, %v4493_v9  ;;  %4208 = vst.msk [vmem:[#allocation4 + $0x1c8] sm:$0xff] %vm4150_vm14, %v7562_v62  ;;  %v4514_v26 = vsel %vm4150_vm14, %v4402_v39, 0.0  ;;  %v4404_v31 = vmul.f32 %v7383_v35, %v7383_v35 }
 0x6a4   : > { %v4321_v35 = vsel %vm4150_vm14, %v7471_v44, 0.0 }
 0x6a5   : > { %v4298_v2 = vadd.f32 %v4297_v52, %v4296_v61  ;;  %v4497_v0 = vadd.f32 %v4496_v24, %v4495_v43  ;;  %v4100_v60 = vpop.f32.mrf.mxu2  ;;  %v4516_v24 = vsel %vm4150_vm14, %v4403_v28, 0.0  ;;  %v4405_v52 = vmul.f32 %v7452_v37, %v7452_v37 }
 0x6a6   : > { %4196 = vst.msk [vmem:[#allocation4 + $0x168] sm:$0xff] %vm4150_vm14, %v4100_v60  ;;  %v4398_v51 = vmul.f32 %v4100_v60, %v4100_v60  ;;  %v4305_v15 = vsel %vm4150_vm14, %v4100_v60, 0.0  ;;  %v4518_v42 = vsel %vm4150_vm14, %v4404_v31, 0.0  ;;  %v4406_v60 = vmul.f32 %v7471_v44, %v7471_v44 }
 0x6a7   : > { %v4499_v56 = vadd.f32 %v4498_v14, %v4497_v0  ;;  %v4300_v34 = vadd.f32 %v4299_v11, %v4298_v2  ;;  %v4319_v14 = vsel %vm4150_vm14, %v7452_v37, 0.0  ;;  %v4520_v11 = vsel %vm4150_vm14, %v4405_v52, 0.0 }
 0x6a8   : > { %v4506_v19 = vsel %vm4150_vm14, %v4398_v51, 0.0  ;;  %v4323_v37 = vsel %vm4150_vm14, %v7481_v63, 0.0  ;;  %v4325_v44 = vsel %vm4150_vm14, %v7489_v12, 0.0  ;;  %v4410_v51 = vmul.f32 %v7562_v62, %v7562_v62 }
 0x6a9   : > { %v4501_v57 = vadd.f32 %v4500_v23, %v4499_v56  ;;  %v4302_v59 = vadd.f32 %v4301_v10, %v4300_v34  ;;  %v4407_v34 = vmul.f32 %v7481_v63, %v7481_v63  ;;  %v4408_v10 = vmul.f32 %v7489_v12, %v7489_v12 }
 0x6aa   : > { %v4329_v12 = vsel %vm4150_vm14, %v7562_v62, 0.0 }
 0x6ab   : > { %v4503_v53 = vadd.f32 %v4502_v29, %v4501_v57  ;;  %v4304_v32 = vadd.f32 %v4303_v3, %v4302_v59  ;;  %v4522_v57 = vsel %vm4150_vm14, %v4406_v60, 0.0  ;;  %v4526_v63 = vsel %vm4150_vm14, %v4408_v10, 0.0 }
 0x6ad   : > { %v4505_v7 = vadd.f32 %v4504_v27, %v4503_v53  ;;  %v4306_v25 = vadd.f32 %v4305_v15, %v4304_v32  ;;  %v4524_v53 = vsel %vm4150_vm14, %v4407_v34, 0.0  ;;  %v4327_v27 = vsel %vm4150_vm14, %v7543_v40, 0.0 }
 0x6af   : > { %v4507_v33 = vadd.f32 %v4506_v19, %v4505_v7  ;;  %v4530_v19 = vsel %vm4150_vm14, %v4410_v51, 0.0 }
 0x6b5   : > { %v4103_v13 = vpop.f32.mrf.mxu2 }
 0x6b6   : > { %4197 = vst.msk [vmem:[#allocation4 + $0x170] sm:$0xff] %vm4150_vm14, %v4103_v13  ;;  %v4399_v5 = vmul.f32 %v4103_v13, %v4103_v13  ;;  %v4307_v18 = vsel %vm4150_vm14, %v4103_v13, 0.0  ;;  %v4409_v13 = vmul.f32 %v7543_v40, %v7543_v40 }
 0x6b7   : > { %v4308_v49 = vadd.f32 %v4307_v18, %v4306_v25 }
 0x6b8   : > { %v4508_v54 = vsel %vm4150_vm14, %v4399_v5, 0.0  ;;  %v4528_v15 = vsel %vm4150_vm14, %v4409_v13, 0.0 }
 0x6b9   : > { %v4509_v36 = vadd.f32 %v4508_v54, %v4507_v33 }
 0x6bd   : > { %v4105_v58 = vpop.f32.mrf.mxu2  ;;  %v7584_v16 = vpop.f32.mrf.mxu3 }
 0x6be   : > { %4198 = vst.msk [vmem:[#allocation4 + $0x178] sm:$0xff] %vm4150_vm14, %v4105_v58  ;;  %v4309_v4 = vsel %vm4150_vm14, %v4105_v58, 0.0  ;;  %v4400_v21 = vmul.f32 %v4105_v58, %v4105_v58  ;;  %v4411_v54 = vmul.f32 %v7584_v16, %v7584_v16  ;;  %v4331_v40 = vsel %vm4150_vm14, %v7584_v16, 0.0 }
 0x6bf   : > { %v4310_v41 = vadd.f32 %v4309_v4, %v4308_v49  ;;  %4209 = vst.msk [vmem:[#allocation4 + $0x1d0] sm:$0xff] %vm4150_vm14, %v7584_v16 }
 0x6c0   : > { %v4510_v48 = vsel %vm4150_vm14, %v4400_v21, 0.0  ;;  %v4532_v38 = vsel %vm4150_vm14, %v4411_v54, 0.0 }
 0x6c1   : > { %v4312_v55 = vadd.f32 %v4311_v8, %v4310_v41  ;;  %v4511_v46 = vadd.f32 %v4510_v48, %v4509_v36  ;;  %v5413_v36 = vmov 0  }
 0x6c2   : > { %4553 = vst.msk [vmem:[%s8390_s4] sm:$0xf] %vm4552_vm15, %v5413_v36 }
 0x6c3   : > { %v4314_v17 = vadd.f32 %v4313_v20, %v4312_v55  ;;  %v4513_v9 = vadd.f32 %v4512_v1, %v4511_v46  ;;  %4554 = vst.msk [vmem:[%s8390_s4 + $0x4] sm:$0xf] %vm4552_vm15, %v5413_v36 }
 0x6c4   : > { %4555 = vst.msk [vmem:[%s8390_s4 + $0x8] sm:$0xf] %vm4552_vm15, %v5413_v36 }
 0x6c5   : > { %v4316_v45 = vadd.f32 %v4315_v30, %v4314_v17  ;;  %v4515_v61 = vadd.f32 %v4514_v26, %v4513_v9  ;;  %v4135_v43 = vpop.f32.mrf.mxu3  ;;  %4556 = vst.msk [vmem:[%s8390_s4 + $0xc] sm:$0xf] %vm4552_vm15, %v5413_v36 }
 0x6c6   : > { %4210 = vst.msk [vmem:[#allocation4 + $0x1d8] sm:$0xff] %vm4150_vm14, %v4135_v43  ;;  %v4412_v4 = vmul.f32 %v4135_v43, %v4135_v43  ;;  %v4333_v62 = vsel %vm4150_vm14, %v4135_v43, 0.0 }
 0x6c7   : > { %v4318_v2 = vadd.f32 %v4317_v50, %v4316_v45  ;;  %v4517_v0 = vadd.f32 %v4516_v24, %v4515_v61  ;;  %4557 = vst.msk [vmem:[%s8390_s4 + $0x10] sm:$0xf] %vm4552_vm15, %v5413_v36 }
 0x6c8   : > { %v4534_v16 = vsel %vm4150_vm14, %v4412_v4, 0.0  ;;  %4558 = vst.msk [vmem:[%s8390_s4 + $0x14] sm:$0xf] %vm4552_vm15, %v5413_v36 }
 0x6c9   : > { %v4320_v56 = vadd.f32 %v4319_v14, %v4318_v2  ;;  %v4519_v47 = vadd.f32 %v4518_v42, %v4517_v0  ;;  %4559 = vst.msk [vmem:[%s8390_s4 + $0x18] sm:$0xf] %vm4552_vm15, %v5413_v36 }
 0x6ca   : > { %4560 = vst.msk [vmem:[%s8390_s4 + $0x1c] sm:$0xf] %vm4552_vm15, %v5413_v36 }
 0x6cb   : > { %v4521_v23 = vadd.f32 %v4520_v11, %v4519_v47  ;;  %v4322_v6 = vadd.f32 %v4321_v35, %v4320_v56  ;;  %4561 = vst.msk [vmem:[%s8390_s4 + $0x20] sm:$0xf] %vm4552_vm15, %v5413_v36 }
 0x6cc   : > { %4562 = vst.msk [vmem:[%s8390_s4 + $0x24] sm:$0xf] %vm4552_vm15, %v5413_v36 }
 0x6cd   : > { %v4324_v59 = vadd.f32 %v4323_v37, %v4322_v6  ;;  %v4523_v29 = vadd.f32 %v4522_v57, %v4521_v23  ;;  %v4138_v22 = vpop.f32.mrf.mxu3  ;;  %4563 = vst.msk [vmem:[%s8390_s4 + $0x28] sm:$0xf] %vm4552_vm15, %v5413_v36  ;;  %v4215_v37 = vld [vmem:[#allocation5] sm:$0x1] }
 0x6ce   : > { %4211 = vst.msk [vmem:[#allocation4 + $0x1e0] sm:$0xff] %vm4150_vm14, %v4138_v22  ;;  %v4413_v8 = vmul.f32 %v4138_v22, %v4138_v22  ;;  %v4335_v55 = vsel %vm4150_vm14, %v4138_v22, 0.0 }
 0x6cf   : > { %v4326_v3 = vadd.f32 %v4325_v44, %v4324_v59  ;;  %v4525_v32 = vadd.f32 %v4524_v53, %v4523_v29  ;;  %4564 = vst.msk [vmem:[%s8390_s4 + $0x2c] sm:$0xf] %vm4552_vm15, %v5413_v36  ;;  %v4352_v29 = vld [vmem:[#allocation5 + $0x1] sm:$0x1] }
 0x6d0   : > { %v4536_v1 = vsel %vm4150_vm14, %v4413_v8, 0.0  ;;  %4565 = vst.msk [vmem:[%s8390_s4 + $0x30] sm:$0xf] %vm4552_vm15, %v5413_v36 }
 0x6d1   : > { %v4328_v5 = vadd.f32 %v4327_v27, %v4326_v3  ;;  %v4527_v7 = vadd.f32 %v4526_v63, %v4525_v32  ;;  %4566 = vst.msk [vmem:[%s8390_s4 + $0x34] sm:$0xf] %vm4552_vm15, %v5413_v36 }
 0x6d2   : > { %4567 = vst.msk [vmem:[%s8390_s4 + $0x38] sm:$0xf] %vm4552_vm15, %v5413_v36 }
 0x6d3   : > { %v4529_v18 = vadd.f32 %v4528_v15, %v4527_v7  ;;  %v4330_v25 = vadd.f32 %v4329_v12, %v4328_v5  ;;  %4568 = vst.msk [vmem:[%s8390_s4 + $0x3c] sm:$0xf] %vm4552_vm15, %v5413_v36 }
 0x6d4   : > { %4569 = vst.msk [vmem:[%s8390_s4 + $0x40] sm:$0xf] %vm4552_vm15, %v5413_v36 }
 0x6d5   : > { %v4140_v33 = vpop.f32.mrf.mxu3  ;;  %v4531_v49 = vadd.f32 %v4530_v19, %v4529_v18  ;;  %v4332_v58 = vadd.f32 %v4331_v40, %v4330_v25  ;;  %4570 = vst.msk [vmem:[%s8390_s4 + $0x44] sm:$0xf] %vm4552_vm15, %v5413_v36 }
 0x6d6   : > { %4212 = vst.msk [vmem:[#allocation4 + $0x1e8] sm:$0xff] %vm4150_vm14, %v4140_v33  ;;  %v4414_v20 = vmul.f32 %v4140_v33, %v4140_v33  ;;  %v4337_v9 = vsel %vm4150_vm14, %v4140_v33, 0.0 }
 0x6d7   : > { %v4533_v21 = vadd.f32 %v4532_v38, %v4531_v49  ;;  %v4334_v41 = vadd.f32 %v4333_v62, %v4332_v58  ;;  %4571 = vst.msk [vmem:[%s8390_s4 + $0x48] sm:$0xf] %vm4552_vm15, %v5413_v36 }
 0x6d8   : > { %v4538_v31 = vsel %vm4150_vm14, %v4414_v20, 0.0  ;;  %4572 = vst.msk [vmem:[%s8390_s4 + $0x4c] sm:$0xf] %vm4552_vm15, %v5413_v36 }
 0x6d9   : > { %v4535_v39 = vadd.f32 %v4534_v16, %v4533_v21  ;;  %v4336_v46 = vadd.f32 %v4335_v55, %v4334_v41  ;;  %4573 = vst.msk [vmem:[%s8390_s4 + $0x50] sm:$0xf] %vm4552_vm15, %v5413_v36 }
 0x6da   : > { %4574 = vst.msk [vmem:[%s8390_s4 + $0x54] sm:$0xf] %vm4552_vm15, %v5413_v36 }
 0x6db   : > { %v4537_v17 = vadd.f32 %v4536_v1, %v4535_v39  ;;  %v4338_v30 = vadd.f32 %v4337_v9, %v4336_v46  ;;  %4575 = vst.msk [vmem:[%s8390_s4 + $0x58] sm:$0xf] %vm4552_vm15, %v5413_v36 }
 0x6dc   : > { %4576 = vst.msk [vmem:[%s8390_s4 + $0x5c] sm:$0xf] %vm4552_vm15, %v5413_v36 }
 0x6dd   : > { %v4539_v61 = vadd.f32 %v4538_v31, %v4537_v17  ;;  %4577 = vst.msk [vmem:[%s8390_s4 + $0x60] sm:$0xf] %vm4552_vm15, %v5413_v36 }
 0x6de   : > { %v4143_v48 = vpop.f32.mrf.mxu3  ;;  %4578 = vst.msk [vmem:[%s8390_s4 + $0x64] sm:$0xf] %vm4552_vm15, %v5413_v36 }
 0x6df   : > { %4213 = vst.msk [vmem:[#allocation4 + $0x1f0] sm:$0xff] %vm4150_vm14, %v4143_v48  ;;  %v4415_v28 = vmul.f32 %v4143_v48, %v4143_v48  ;;  %v4339_v26 = vsel %vm4150_vm14, %v4143_v48, 0.0 }
 0x6e0   : > { %v4340_v43 = vadd.f32 %v4339_v26, %v4338_v30  ;;  %4579 = vst.msk [vmem:[%s8390_s4 + $0x68] sm:$0xf] %vm4552_vm15, %v5413_v36 }
 0x6e1   : > { %v4540_v45 = vsel %vm4150_vm14, %v4415_v28, 0.0  ;;  %4580 = vst.msk [vmem:[%s8390_s4 + $0x6c] sm:$0xf] %vm4552_vm15, %v5413_v36 }
 0x6e2   : > { %v4541_v2 = vadd.f32 %v4540_v45, %v4539_v61  ;;  %4581 = vst.msk [vmem:[%s8390_s4 + $0x70] sm:$0xf] %vm4552_vm15, %v5413_v36 }
 0x6e3   : > { %4582 = vst.msk [vmem:[%s8390_s4 + $0x74] sm:$0xf] %vm4552_vm15, %v5413_v36 }
 0x6e4   : > { %4583 = vst.msk [vmem:[%s8390_s4 + $0x78] sm:$0xf] %vm4552_vm15, %v5413_v36 }
 0x6e5   : > { %4584 = vst.msk [vmem:[%s8390_s4 + $0x7c] sm:$0xf] %vm4552_vm15, %v5413_v36 }
 0x6e6   : > { %v4145_v24 = vpop.f32.mrf.mxu3  ;;  %4585 = vst.msk [vmem:[%s8390_s4 + $0x80] sm:$0xf] %vm4552_vm15, %v5413_v36 }
 0x6e7   : > { %4214 = vst.msk [vmem:[#allocation4 + $0x1f8] sm:$0xff] %vm4150_vm14, %v4145_v24  ;;  %v4341_v50 = vsel %vm4150_vm14, %v4145_v24, 0.0  ;;  %v4416_v52 = vmul.f32 %v4145_v24, %v4145_v24 }
 0x6e8   : > { %v4342_v0 = vadd.f32 %v4341_v50, %v4340_v43  ;;  %4586 = vst.msk [vmem:[%s8390_s4 + $0x84] sm:$0xf] %vm4552_vm15, %v5413_v36 }
 0x6e9   : > { %v4542_v42 = vsel %vm4150_vm14, %v4416_v52, 0.0  ;;  %4587 = vst.msk [vmem:[%s8390_s4 + $0x88] sm:$0xf] %vm4552_vm15, %v5413_v36 }
 0x6ea   : > { %v4343_v14 = vrot.slane %v4342_v0, 4  ;;  %v4543_v60 = vadd.f32 %v4542_v42, %v4541_v2  ;;  %4588 = vst.msk [vmem:[%s8390_s4 + $0x8c] sm:$0xf] %vm4552_vm15, %v5413_v36 }
 0x6eb   : > { %4589 = vst.msk [vmem:[%s8390_s4 + $0x90] sm:$0xf] %vm4552_vm15, %v5413_v36 }
 0x6ec   : > { %v4344_v56 = vadd.f32 %v4343_v14, %v4342_v0  ;;  %v4544_v47 = vrot.slane %v4543_v60, 4  ;;  %4590 = vst.msk [vmem:[%s8390_s4 + $0x94] sm:$0xf] %vm4552_vm15, %v5413_v36 }
 0x6ed   : > { %4591 = vst.msk [vmem:[%s8390_s4 + $0x98] sm:$0xf] %vm4552_vm15, %v5413_v36 }
 0x6ee   : > { %v4345_v11 = vrot.slane %v4344_v56, 2  ;;  %v4545_v35 = vadd.f32 %v4544_v47, %v4543_v60  ;;  %4592 = vst.msk [vmem:[%s8390_s4 + $0x9c] sm:$0xf] %vm4552_vm15, %v5413_v36 }
 0x6ef   : > { %4593 = vst.msk [vmem:[%s8390_s4 + $0xa0] sm:$0xf] %vm4552_vm15, %v5413_v36 }
 0x6f0   : > { %v4346_v34 = vadd.f32 %v4345_v11, %v4344_v56  ;;  %v4546_v23 = vrot.slane %v4545_v35, 2  ;;  %4594 = vst.msk [vmem:[%s8390_s4 + $0xa4] sm:$0xf] %vm4552_vm15, %v5413_v36 }
 0x6f1   : > { %4595 = vst.msk [vmem:[%s8390_s4 + $0xa8] sm:$0xf] %vm4552_vm15, %v5413_v36 }
 0x6f2   : > { %v4347_v6 = vrot.slane %v4346_v34, 1  ;;  %v4547_v57 = vadd.f32 %v4546_v23, %v4545_v35  ;;  %4596 = vst.msk [vmem:[%s8390_s4 + $0xac] sm:$0xf] %vm4552_vm15, %v5413_v36 }
 0x6f3   : > { %4597 = vst.msk [vmem:[%s8390_s4 + $0xb0] sm:$0xf] %vm4552_vm15, %v5413_v36 }
 0x6f4   : > { %v4348_v10 = vadd.f32 %v4347_v6, %v4346_v34  ;;  %v4548_v59 = vrot.slane %v4547_v57, 1  ;;  %4598 = vst.msk [vmem:[%s8390_s4 + $0xb4] sm:$0xf] %vm4552_vm15, %v5413_v36 }
 0x6f5   : > { %4599 = vst.msk [vmem:[%s8390_s4 + $0xb8] sm:$0xf] %vm4552_vm15, %v5413_v36 }
 0x6f6   : > { %v4349_v22 = vadd.f32 %v4348_v10, %v4215_v37  ;;  %v4549_v53 = vadd.f32 %v4548_v59, %v4547_v57  ;;  %4600 = vst.msk [vmem:[%s8390_s4 + $0xbc] sm:$0xf] %vm4552_vm15, %v5413_v36 }
 0x6f7   : > { %4601 = vst.msk [vmem:[%s8390_s4 + $0xc0] sm:$0xf] %vm4552_vm15, %v5413_v36 }
 0x6f8   : > { %4351 = vst.msk [vmem:[#allocation5] sm:$0x1] %vm4350_vm0, %v4349_v22  ;;  %v4550_v44 = vadd.f32 %v4549_v53, %v4352_v29 }
 0x6f9   : > { %4602 = vst.msk [vmem:[%s8390_s4 + $0xc4] sm:$0xf] %vm4552_vm15, %v5413_v36 }
 0x6fa   : > { %4551 = vst.msk [vmem:[#allocation5 + $0x1] sm:$0x1] %vm4350_vm0, %v4550_v44 }
 0x6fb   : > { %4603 = vst.msk [vmem:[%s8390_s4 + $0xc8] sm:$0xf] %vm4552_vm15, %v5413_v36 }
 0x6fc   : > { %4604 = vst.msk [vmem:[%s8390_s4 + $0xcc] sm:$0xf] %vm4552_vm15, %v5413_v36 }
 0x6fd   : > { %4605 = vst.msk [vmem:[%s8390_s4 + $0xd0] sm:$0xf] %vm4552_vm15, %v5413_v36 }
 0x6fe   : > { %4606 = vst.msk [vmem:[%s8390_s4 + $0xd4] sm:$0xf] %vm4552_vm15, %v5413_v36 }
 0x6ff   : > { %4607 = vst.msk [vmem:[%s8390_s4 + $0xd8] sm:$0xf] %vm4552_vm15, %v5413_v36 }
 0x700   : > { %4608 = vst.msk [vmem:[%s8390_s4 + $0xdc] sm:$0xf] %vm4552_vm15, %v5413_v36 }
 0x701   : > { %4609 = vst.msk [vmem:[%s8390_s4 + $0xe0] sm:$0xf] %vm4552_vm15, %v5413_v36 }
 0x702   : > { %4610 = vst.msk [vmem:[%s8390_s4 + $0xe4] sm:$0xf] %vm4552_vm15, %v5413_v36 }
 0x703   : > { %4611 = vst.msk [vmem:[%s8390_s4 + $0xe8] sm:$0xf] %vm4552_vm15, %v5413_v36 }
 0x704   : > { %4612 = vst.msk [vmem:[%s8390_s4 + $0xec] sm:$0xf] %vm4552_vm15, %v5413_v36 }
 0x705   : > { %4613 = vst.msk [vmem:[%s8390_s4 + $0xf0] sm:$0xf] %vm4552_vm15, %v5413_v36 }
 0x706   : > { %4614 = vst.msk [vmem:[%s8390_s4 + $0xf4] sm:$0xf] %vm4552_vm15, %v5413_v36 }
 0x707   : > { %4615 = vst.msk [vmem:[%s8390_s4 + $0xf8] sm:$0xf] %vm4552_vm15, %v5413_v36 }
 0x708   : > { %4616 = vst.msk [vmem:[%s8390_s4 + $0xfc] sm:$0xf] %vm4552_vm15, %v5413_v36 }
 0x709 PF: > { %p4617_p6 = scmp.eq.s32.totalorder %s5394_s15, 1 }
 0x70a   : > { %v4622_v13 = vld [vmem:[#allocation5] sm:$0x1] (%p4617_p6)  ;;  %v4624_v3 = vld [vmem:[#allocation5 + $0x1] sm:$0x1] (%p4617_p6)  ;;  %vm4642_vm4 = vcmask (%p4617_p6), 57344  }
 0x70b   : > { %4621 = sbr.rel (!%p4617_p6) target bundleno = 1838 (0x72e), region = 48  ;;  %v4623_v32 = vmul.f32 (%p4617_p6), 0.001953125, %v4622_v13  ;;  %v4625_v63 = vmul.f32 (%p4617_p6), 0.001953125, %v4624_v3  ;;  %v4629_v54 = vld [vmem:[%s8388_s2] sm:$0x1] (%p4617_p6) }
 0x70c   : > { %v4644_v58 = vld [vmem:[%s8389_s3] sm:$0x1] (%p4617_p6) }
 0x70d   : > { %v4626_v27 = vmul.f32 (%p4617_p6), %v4623_v32, %v4623_v32 }
 0x70f   : > { %v4627_v51 = vsub.f32 (%p4617_p6), %v4625_v63, %v4626_v27 }
 0x711   : > { %v4628_v5 = vmax.f32 %v4627_v51, 0.0 }
 0x713   : > { %v4630_v7 = vadd.f32 1e-05, %v4628_v5 }
 0x715   : > { %5376 = vrsqrt.f32 %v4630_v7  ;;  %vm4637_vm1 = vweird.f32 %v4630_v7 }
 0x71b   : > { %v5377_v15 = vpop.eup %5376 }
 0x71c   : > { %v4632_v12 = vmul.f32 %v5377_v15, %v4630_v7  ;;  %vm4638_vm2 = vweird.f32 %v5377_v15 }
 0x71d   : > { %vm4639_vm3 = vmor %vm4637_vm1, %vm4638_vm2 }
 0x71e   : > { %v4633_v18 = vmul.f32 %v5377_v15, %v4632_v12 }
 0x720   : > { %v4634_v25 = vmul.f32 0.5, %v4633_v18 }
 0x722   : > { %v4635_v19 = vsub.f32 1.5, %v4634_v25 }
 0x724   : > { %v4636_v33 = vmul.f32 %v5377_v15, %v4635_v19 }
 0x726   : > { %v4640_v49 = vsel %vm4639_vm3, %v5377_v15, %v4636_v33 }
 0x727   : > { %v4641_v40 = vmul.f32 %v4640_v49, %v4629_v54 }
 0x729   : > { %4643 = vst.msk [vmem:[#allocation5 + $0x2] sm:$0x1] %vm4642_vm4, %v4641_v40  ;;  %v4645_v38 = vmul.f32 %v4641_v40, %v4623_v32 }
 0x72b   : > { %v4646_v4 = vsub.f32 %v4644_v58, %v4645_v38 }
 0x72d   : > { %4647 = vst.msk [vmem:[#allocation5 + $0x3] sm:$0x1] %vm4642_vm4, %v4646_v4 }
 0x72e PF: > { %p5165_p7 = scmp.ne.s32.totalorder %s5394_s15, 1 }
 0x730   : > { %4650 = sbr.rel (%p5165_p7) target bundleno = 1919 (0x77f), region = 52 }
 0x735   : > { %v4653_v21 = vld [vmem:[#allocation4] sm:$0xff]  ;;  %v4654_v41 = vld [vmem:[#allocation4 + $0x8] sm:$0xff]  ;;  %v4655_v39 = vld [vmem:[#allocation4 + $0x10] sm:$0xff]  ;;  %vm4977_vm5 = vcmask 60416  }
 0x736   : > { %v7989_v62 = vld [vmem:[#allocation5 + $0x2] ss:$0 sm:$0xff]  ;;  %v7991_v36 = vld [vmem:[#allocation5 + $0x3] ss:$0 sm:$0xff]  ;;  %v4656_v48 = vld [vmem:[#allocation4 + $0x18] sm:$0xff] }
 0x737   : > { %v4719_v16 = vmul.f32 %v7989_v62, %v4653_v21  ;;  %v4720_v8 = vmul.f32 %v7989_v62, %v4654_v41  ;;  %v4657_v55 = vld [vmem:[#allocation4 + $0x20] sm:$0xff]  ;;  %v4721_v46 = vmul.f32 %v7989_v62, %v4655_v39  ;;  %v4722_v1 = vmul.f32 %v7989_v62, %v4656_v48  ;;  %v4658_v28 = vld [vmem:[#allocation4 + $0x28] sm:$0xff]  ;;  %v4659_v17 = vld [vmem:[#allocation4 + $0x30] sm:$0xff] }
 0x738   : > { %v4723_v20 = vmul.f32 %v7989_v62, %v4657_v55  ;;  %v4660_v9 = vld [vmem:[#allocation4 + $0x38] sm:$0xff]  ;;  %v4724_v31 = vmul.f32 %v7989_v62, %v4658_v28  ;;  %v4725_v45 = vmul.f32 %v7989_v62, %v4659_v17  ;;  %v4661_v11 = vld [vmem:[#allocation4 + $0x40] sm:$0xff]  ;;  %v4662_v35 = vld [vmem:[#allocation4 + $0x48] sm:$0xff] }
 0x739   : > { %v4785_v26 = vadd.f32 %v7991_v36, %v4719_v16  ;;  %v4786_v30 = vadd.f32 %v7991_v36, %v4720_v8  ;;  %v4787_v61 = vadd.f32 %v7991_v36, %v4721_v46  ;;  %v4788_v43 = vadd.f32 %v7991_v36, %v4722_v1  ;;  %v4663_v37 = vld [vmem:[#allocation4 + $0x50] sm:$0xff]  ;;  %v4664_v10 = vld [vmem:[#allocation4 + $0x58] sm:$0xff]  ;;  %v4665_v59 = vld [vmem:[#allocation4 + $0x60] sm:$0xff] }
 0x73a   : > { %v4789_v24 = vadd.f32 %v7991_v36, %v4723_v20  ;;  %v4726_v50 = vmul.f32 %v7989_v62, %v4660_v9  ;;  %v4790_v0 = vadd.f32 %v7991_v36, %v4724_v31  ;;  %v4791_v42 = vadd.f32 %v7991_v36, %v4725_v45  ;;  %v4666_v13 = vld [vmem:[#allocation4 + $0x68] sm:$0xff]  ;;  %v4667_v3 = vld [vmem:[#allocation4 + $0x70] sm:$0xff]  ;;  %v4668_v5 = vld [vmem:[#allocation4 + $0x78] sm:$0xff] }
 0x73b   : > { %v4849_v52 = vmax.f32 %v4785_v26, 0.0  ;;  %v4850_v2 = vmax.f32 %v4786_v30, 0.0  ;;  %v4851_v14 = vmax.f32 %v4787_v61, 0.0  ;;  %v4852_v60 = vmax.f32 %v4788_v43, 0.0  ;;  %v4669_v8 = vld [vmem:[#allocation4 + $0x80] sm:$0xff]  ;;  %v4670_v39 = vld [vmem:[#allocation4 + $0x88] sm:$0xff] }
 0x73c   : > { %v4853_v56 = vmax.f32 %v4789_v24, 0.0  ;;  %v4792_v47 = vadd.f32 %v7991_v36, %v4726_v50  ;;  %v4854_v6 = vmax.f32 %v4790_v0, 0.0  ;;  %v4855_v57 = vmax.f32 %v4791_v42, 0.0  ;;  %v4671_v20 = vld [vmem:[#allocation4 + $0x90] sm:$0xff]  ;;  %v4672_v30 = vld [vmem:[#allocation4 + $0x98] sm:$0xff]  ;;  %v4673_v31 = vld [vmem:[#allocation4 + $0xa0] sm:$0xff] }
 0x73d   : > { %v4913_v34 = vpack.c.bf16 %v4849_v52, %v4849_v52  ;;  %v4914_v23 = vpack.c.bf16 %v4850_v2, %v4850_v2  ;;  %v4915_v29 = vpack.c.bf16 %v4851_v14, %v4851_v14  ;;  %v4916_v22 = vpack.c.bf16 %v4852_v60, %v4852_v60  ;;  %v4674_v50 = vld [vmem:[#allocation4 + $0xa8] sm:$0xff]  ;;  %v4675_v52 = vld [vmem:[#allocation4 + $0xb0] sm:$0xff]  ;;  %v4676_v60 = vld [vmem:[#allocation4 + $0xb8] sm:$0xff] }
 0x73e   : > { %v4917_v53 = vpack.c.bf16 %v4853_v56, %v4853_v56  ;;  %v4856_v44 = vmax.f32 %v4792_v47, 0.0  ;;  %v4918_v32 = vpack.c.bf16 %v4854_v6, %v4854_v6  ;;  %v4919_v63 = vpack.c.bf16 %v4855_v57, %v4855_v57 }
 0x73f   : > { %4978 = vst.msk [vmem:[%s8390_s4] sm:$0xf] %vm4977_vm5, %v4913_v34  ;;  %v4727_v27 = vmul.f32 %v7989_v62, %v4661_v11  ;;  %v4728_v51 = vmul.f32 %v7989_v62, %v4662_v35  ;;  %v4729_v15 = vmul.f32 %v7989_v62, %v4663_v37  ;;  %v4730_v12 = vmul.f32 %v7989_v62, %v4664_v10 }
 0x740   : > { %4979 = vst.msk [vmem:[%s8390_s4 + $0x4] sm:$0xf] %vm4977_vm5, %v4914_v23  ;;  %v4920_v7 = vpack.c.bf16 %v4856_v44, %v4856_v44  ;;  %v4731_v18 = vmul.f32 %v7989_v62, %v4665_v59  ;;  %v4732_v54 = vmul.f32 %v7989_v62, %v4666_v13  ;;  %v4733_v33 = vmul.f32 %v7989_v62, %v4667_v3  ;;  %v4677_v3 = vld [vmem:[#allocation4 + $0xc0] sm:$0xff] }
 0x741   : > { %4980 = vst.msk [vmem:[%s8390_s4 + $0x8] sm:$0xf] %vm4977_vm5, %v4915_v29  ;;  %v4793_v25 = vadd.f32 %v7991_v36, %v4727_v27  ;;  %v4794_v19 = vadd.f32 %v7991_v36, %v4728_v51  ;;  %v4795_v49 = vadd.f32 %v7991_v36, %v4729_v15  ;;  %v4796_v40 = vadd.f32 %v7991_v36, %v4730_v12 }
 0x742   : > { %4981 = vst.msk [vmem:[%s8390_s4 + $0xc] sm:$0xf] %vm4977_vm5, %v4916_v22  ;;  %v4797_v58 = vadd.f32 %v7991_v36, %v4731_v18  ;;  %v4734_v38 = vmul.f32 %v7989_v62, %v4668_v5  ;;  %v4798_v41 = vadd.f32 %v7991_v36, %v4732_v54  ;;  %v4799_v16 = vadd.f32 %v7991_v36, %v4733_v33  ;;  %v4681_v54 = vld [vmem:[#allocation4 + $0xe0] sm:$0xff] }
 0x743   : > { %4982 = vst.msk [vmem:[%s8390_s4 + $0x10] sm:$0xf] %vm4977_vm5, %v4917_v53  ;;  %v4857_v4 = vmax.f32 %v4793_v25, 0.0  ;;  %v4858_v21 = vmax.f32 %v4794_v19, 0.0  ;;  %v4859_v48 = vmax.f32 %v4795_v49, 0.0  ;;  %v4860_v55 = vmax.f32 %v4796_v40, 0.0 }
 0x744   : > { %4983 = vst.msk [vmem:[%s8390_s4 + $0x14] sm:$0xf] %vm4977_vm5, %v4918_v32  ;;  %v4861_v46 = vmax.f32 %v4797_v58, 0.0  ;;  %v4800_v1 = vadd.f32 %v7991_v36, %v4734_v38  ;;  %v4862_v9 = vmax.f32 %v4798_v41, 0.0  ;;  %v4863_v26 = vmax.f32 %v4799_v16, 0.0  ;;  %v4678_v32 = vld [vmem:[#allocation4 + $0xc8] sm:$0xff] }
 0x745   : > { %4984 = vst.msk [vmem:[%s8390_s4 + $0x18] sm:$0xf] %vm4977_vm5, %v4919_v63  ;;  %v4921_v28 = vpack.c.bf16 %v4857_v4, %v4857_v4  ;;  %v4922_v17 = vpack.c.bf16 %v4858_v21, %v4858_v21  ;;  %v4923_v45 = vpack.c.bf16 %v4859_v48, %v4859_v48  ;;  %v4924_v61 = vpack.c.bf16 %v4860_v55, %v4860_v55  ;;  %v4680_v19 = vld [vmem:[#allocation4 + $0xd8] sm:$0xff]  ;;  %v4682_v38 = vld [vmem:[#allocation4 + $0xe8] sm:$0xff]  ;;  %v4683_v4 = vld [vmem:[#allocation4 + $0xf0] sm:$0xff] }
 0x746   : > { %4985 = vst.msk [vmem:[%s8390_s4 + $0x1c] sm:$0xf] %vm4977_vm5, %v4920_v7  ;;  %v4925_v43 = vpack.c.bf16 %v4861_v46, %v4861_v46  ;;  %v4864_v24 = vmax.f32 %v4800_v1, 0.0  ;;  %v4926_v2 = vpack.c.bf16 %v4862_v9, %v4862_v9  ;;  %v4927_v0 = vpack.c.bf16 %v4863_v26, %v4863_v26  ;;  %v4679_v7 = vld [vmem:[#allocation4 + $0xd0] sm:$0xff] }
 0x747   : > { %4986 = vst.msk [vmem:[%s8390_s4 + $0x20] sm:$0xf] %vm4977_vm5, %v4921_v28  ;;  %v4735_v42 = vmul.f32 %v7989_v62, %v4669_v8  ;;  %v4736_v14 = vmul.f32 %v7989_v62, %v4670_v39  ;;  %v4737_v47 = vmul.f32 %v7989_v62, %v4671_v20  ;;  %v4738_v11 = vmul.f32 %v7989_v62, %v4672_v30  ;;  %v4684_v39 = vld [vmem:[#allocation4 + $0xf8] sm:$0xff] }
 0x748   : > { %4987 = vst.msk [vmem:[%s8390_s4 + $0x24] sm:$0xf] %vm4977_vm5, %v4922_v17  ;;  %v4928_v56 = vpack.c.bf16 %v4864_v24, %v4864_v24  ;;  %v4739_v35 = vmul.f32 %v7989_v62, %v4673_v31  ;;  %v4740_v6 = vmul.f32 %v7989_v62, %v4674_v50  ;;  %v4741_v57 = vmul.f32 %v7989_v62, %v4675_v52  ;;  %v4685_v52 = vld [vmem:[#allocation4 + $0x100] sm:$0xff] }
 0x749   : > { %4988 = vst.msk [vmem:[%s8390_s4 + $0x28] sm:$0xf] %vm4977_vm5, %v4923_v45  ;;  %v4801_v34 = vadd.f32 %v7991_v36, %v4735_v42  ;;  %v4802_v23 = vadd.f32 %v7991_v36, %v4736_v14  ;;  %v4803_v37 = vadd.f32 %v7991_v36, %v4737_v47  ;;  %v4804_v10 = vadd.f32 %v7991_v36, %v4738_v11 }
 0x74a   : > { %4989 = vst.msk [vmem:[%s8390_s4 + $0x2c] sm:$0xf] %vm4977_vm5, %v4924_v61  ;;  %v4805_v59 = vadd.f32 %v7991_v36, %v4739_v35  ;;  %v4742_v29 = vmul.f32 %v7989_v62, %v4676_v60  ;;  %v4806_v44 = vadd.f32 %v7991_v36, %v4740_v6  ;;  %v4807_v13 = vadd.f32 %v7991_v36, %v4741_v57  ;;  %v4689_v6 = vld [vmem:[#allocation4 + $0x120] sm:$0xff] }
 0x74b   : > { %4990 = vst.msk [vmem:[%s8390_s4 + $0x30] sm:$0xf] %vm4977_vm5, %v4925_v43  ;;  %v4865_v22 = vmax.f32 %v4801_v34, 0.0  ;;  %v4866_v53 = vmax.f32 %v4802_v23, 0.0  ;;  %v4867_v63 = vmax.f32 %v4803_v37, 0.0  ;;  %v4868_v27 = vmax.f32 %v4804_v10, 0.0 }
 0x74c   : > { %4991 = vst.msk [vmem:[%s8390_s4 + $0x34] sm:$0xf] %vm4977_vm5, %v4926_v2  ;;  %v4869_v51 = vmax.f32 %v4805_v59, 0.0  ;;  %v4808_v5 = vadd.f32 %v7991_v36, %v4742_v29  ;;  %v4870_v18 = vmax.f32 %v4806_v44, 0.0  ;;  %v4871_v25 = vmax.f32 %v4807_v13, 0.0  ;;  %v4686_v2 = vld [vmem:[#allocation4 + $0x108] sm:$0xff] }
 0x74d   : > { %4992 = vst.msk [vmem:[%s8390_s4 + $0x38] sm:$0xf] %vm4977_vm5, %v4927_v0  ;;  %v4929_v15 = vpack.c.bf16 %v4865_v22, %v4865_v22  ;;  %v4930_v12 = vpack.c.bf16 %v4866_v53, %v4866_v53  ;;  %v4931_v33 = vpack.c.bf16 %v4867_v63, %v4867_v63  ;;  %v4932_v49 = vpack.c.bf16 %v4868_v27, %v4868_v27  ;;  %v4688_v23 = vld [vmem:[#allocation4 + $0x118] sm:$0xff]  ;;  %v4690_v29 = vld [vmem:[#allocation4 + $0x128] sm:$0xff]  ;;  %v4691_v22 = vld [vmem:[#allocation4 + $0x130] sm:$0xff] }
 0x74e   : > { %4993 = vst.msk [vmem:[%s8390_s4 + $0x3c] sm:$0xf] %vm4977_vm5, %v4928_v56  ;;  %v4933_v40 = vpack.c.bf16 %v4869_v51, %v4869_v51  ;;  %v4872_v58 = vmax.f32 %v4808_v5, 0.0  ;;  %v4934_v21 = vpack.c.bf16 %v4870_v18, %v4870_v18  ;;  %v4935_v41 = vpack.c.bf16 %v4871_v25, %v4871_v25  ;;  %v4687_v56 = vld [vmem:[#allocation4 + $0x110] sm:$0xff] }
 0x74f   : > { %4994 = vst.msk [vmem:[%s8390_s4 + $0x40] sm:$0xf] %vm4977_vm5, %v4929_v15  ;;  %v4743_v16 = vmul.f32 %v7989_v62, %v4677_v3  ;;  %v4744_v8 = vmul.f32 %v7989_v62, %v4678_v32  ;;  %v4745_v55 = vmul.f32 %v7989_v62, %v4679_v7  ;;  %v4746_v46 = vmul.f32 %v7989_v62, %v4680_v19  ;;  %v4692_v32 = vld [vmem:[#allocation4 + $0x138] sm:$0xff] }
 0x750   : > { %4995 = vst.msk [vmem:[%s8390_s4 + $0x44] sm:$0xf] %vm4977_vm5, %v4930_v12  ;;  %v4936_v48 = vpack.c.bf16 %v4872_v58, %v4872_v58  ;;  %v4747_v1 = vmul.f32 %v7989_v62, %v4681_v54  ;;  %v4748_v17 = vmul.f32 %v7989_v62, %v4682_v38  ;;  %v4749_v9 = vmul.f32 %v7989_v62, %v4683_v4  ;;  %v4693_v4 = vld [vmem:[#allocation4 + $0x140] sm:$0xff] }
 0x751   : > { %4996 = vst.msk [vmem:[%s8390_s4 + $0x48] sm:$0xf] %vm4977_vm5, %v4931_v33  ;;  %v4809_v20 = vadd.f32 %v7991_v36, %v4743_v16  ;;  %v4810_v28 = vadd.f32 %v7991_v36, %v4744_v8  ;;  %v4811_v26 = vadd.f32 %v7991_v36, %v4745_v55  ;;  %v4812_v30 = vadd.f32 %v7991_v36, %v4746_v46 }
 0x752   : > { %4997 = vst.msk [vmem:[%s8390_s4 + $0x4c] sm:$0xf] %vm4977_vm5, %v4932_v49  ;;  %v4813_v31 = vadd.f32 %v7991_v36, %v4747_v1  ;;  %v4750_v45 = vmul.f32 %v7989_v62, %v4684_v39  ;;  %v4814_v24 = vadd.f32 %v7991_v36, %v4748_v17  ;;  %v4815_v50 = vadd.f32 %v7991_v36, %v4749_v9  ;;  %v4697_v17 = vld [vmem:[#allocation4 + $0x160] sm:$0xff] }
 0x753   : > { %4998 = vst.msk [vmem:[%s8390_s4 + $0x50] sm:$0xf] %vm4977_vm5, %v4933_v40  ;;  %v4873_v61 = vmax.f32 %v4809_v20, 0.0  ;;  %v4874_v43 = vmax.f32 %v4810_v28, 0.0  ;;  %v4875_v0 = vmax.f32 %v4811_v26, 0.0  ;;  %v4876_v42 = vmax.f32 %v4812_v30, 0.0 }
 0x754   : > { %4999 = vst.msk [vmem:[%s8390_s4 + $0x54] sm:$0xf] %vm4977_vm5, %v4934_v21  ;;  %v4877_v14 = vmax.f32 %v4813_v31, 0.0  ;;  %v4816_v60 = vadd.f32 %v7991_v36, %v4750_v45  ;;  %v4878_v35 = vmax.f32 %v4814_v24, 0.0  ;;  %v4879_v34 = vmax.f32 %v4815_v50, 0.0  ;;  %v4694_v21 = vld [vmem:[#allocation4 + $0x148] sm:$0xff] }
 0x755   : > { %5000 = vst.msk [vmem:[%s8390_s4 + $0x58] sm:$0xf] %vm4977_vm5, %v4935_v41  ;;  %v4937_v47 = vpack.c.bf16 %v4873_v61, %v4873_v61  ;;  %v4938_v11 = vpack.c.bf16 %v4874_v43, %v4874_v43  ;;  %v4939_v57 = vpack.c.bf16 %v4875_v0, %v4875_v0  ;;  %v4940_v37 = vpack.c.bf16 %v4876_v42, %v4876_v42  ;;  %v4696_v28 = vld [vmem:[#allocation4 + $0x158] sm:$0xff]  ;;  %v4698_v45 = vld [vmem:[#allocation4 + $0x168] sm:$0xff]  ;;  %v4699_v61 = vld [vmem:[#allocation4 + $0x170] sm:$0xff] }
 0x756   : > { %5001 = vst.msk [vmem:[%s8390_s4 + $0x5c] sm:$0xf] %vm4977_vm5, %v4936_v48  ;;  %v4941_v10 = vpack.c.bf16 %v4877_v14, %v4877_v14  ;;  %v4880_v59 = vmax.f32 %v4816_v60, 0.0  ;;  %v4942_v53 = vpack.c.bf16 %v4878_v35, %v4878_v35  ;;  %v4943_v44 = vpack.c.bf16 %v4879_v34, %v4879_v34  ;;  %v4695_v48 = vld [vmem:[#allocation4 + $0x150] sm:$0xff] }
 0x757   : > { %5002 = vst.msk [vmem:[%s8390_s4 + $0x60] sm:$0xf] %vm4977_vm5, %v4937_v47  ;;  %v4751_v13 = vmul.f32 %v7989_v62, %v4685_v52  ;;  %v4752_v3 = vmul.f32 %v7989_v62, %v4686_v2  ;;  %v4753_v27 = vmul.f32 %v7989_v62, %v4687_v56  ;;  %v4754_v51 = vmul.f32 %v7989_v62, %v4688_v23  ;;  %v4700_v2 = vld [vmem:[#allocation4 + $0x178] sm:$0xff] }
 0x758   : > { %5003 = vst.msk [vmem:[%s8390_s4 + $0x64] sm:$0xf] %vm4977_vm5, %v4938_v11  ;;  %v4944_v63 = vpack.c.bf16 %v4880_v59, %v4880_v59  ;;  %v4755_v5 = vmul.f32 %v7989_v62, %v4689_v6  ;;  %v4756_v12 = vmul.f32 %v7989_v62, %v4690_v29  ;;  %v4757_v18 = vmul.f32 %v7989_v62, %v4691_v22  ;;  %v4701_v22 = vld [vmem:[#allocation4 + $0x180] sm:$0xff] }
 0x759   : > { %5004 = vst.msk [vmem:[%s8390_s4 + $0x68] sm:$0xf] %vm4977_vm5, %v4939_v57  ;;  %v4817_v7 = vadd.f32 %v7991_v36, %v4751_v13  ;;  %v4818_v15 = vadd.f32 %v7991_v36, %v4752_v3  ;;  %v4819_v25 = vadd.f32 %v7991_v36, %v4753_v27  ;;  %v4820_v19 = vadd.f32 %v7991_v36, %v4754_v51 }
 0x75a   : > { %5005 = vst.msk [vmem:[%s8390_s4 + $0x6c] sm:$0xf] %vm4977_vm5, %v4940_v37  ;;  %v4821_v54 = vadd.f32 %v7991_v36, %v4755_v5  ;;  %v4758_v33 = vmul.f32 %v7989_v62, %v4692_v32  ;;  %v4822_v58 = vadd.f32 %v7991_v36, %v4756_v12  ;;  %v4823_v38 = vadd.f32 %v7991_v36, %v4757_v18  ;;  %v4705_v12 = vld [vmem:[#allocation4 + $0x1a0] sm:$0xff] }
 0x75b   : > { %5006 = vst.msk [vmem:[%s8390_s4 + $0x70] sm:$0xf] %vm4977_vm5, %v4941_v10  ;;  %v4881_v49 = vmax.f32 %v4817_v7, 0.0  ;;  %v4882_v40 = vmax.f32 %v4818_v15, 0.0  ;;  %v4883_v41 = vmax.f32 %v4819_v25, 0.0  ;;  %v4884_v16 = vmax.f32 %v4820_v19, 0.0 }
 0x75c   : > { %5007 = vst.msk [vmem:[%s8390_s4 + $0x74] sm:$0xf] %vm4977_vm5, %v4942_v53  ;;  %v4885_v8 = vmax.f32 %v4821_v54, 0.0  ;;  %v4824_v39 = vadd.f32 %v7991_v36, %v4758_v33  ;;  %v4886_v1 = vmax.f32 %v4822_v58, 0.0  ;;  %v4887_v20 = vmax.f32 %v4823_v38, 0.0  ;;  %v4702_v53 = vld [vmem:[#allocation4 + $0x188] sm:$0xff] }
 0x75d   : > { %5008 = vst.msk [vmem:[%s8390_s4 + $0x78] sm:$0xf] %vm4977_vm5, %v4943_v44  ;;  %v4945_v55 = vpack.c.bf16 %v4881_v49, %v4881_v49  ;;  %v4946_v46 = vpack.c.bf16 %v4882_v40, %v4882_v40  ;;  %v4947_v9 = vpack.c.bf16 %v4883_v41, %v4883_v41  ;;  %v4948_v26 = vpack.c.bf16 %v4884_v16, %v4884_v16  ;;  %v4704_v15 = vld [vmem:[#allocation4 + $0x198] sm:$0xff]  ;;  %v4706_v33 = vld [vmem:[#allocation4 + $0x1a8] sm:$0xff]  ;;  %v4707_v49 = vld [vmem:[#allocation4 + $0x1b0] sm:$0xff] }
 0x75e   : > { %5009 = vst.msk [vmem:[%s8390_s4 + $0x7c] sm:$0xf] %vm4977_vm5, %v4944_v63  ;;  %v4949_v30 = vpack.c.bf16 %v4885_v8, %v4885_v8  ;;  %v4888_v31 = vmax.f32 %v4824_v39, 0.0  ;;  %v4950_v43 = vpack.c.bf16 %v4886_v1, %v4886_v1  ;;  %v4951_v24 = vpack.c.bf16 %v4887_v20, %v4887_v20  ;;  %v4703_v63 = vld [vmem:[#allocation4 + $0x190] sm:$0xff] }
 0x75f   : > { %5010 = vst.msk [vmem:[%s8390_s4 + $0x80] sm:$0xf] %vm4977_vm5, %v4945_v55  ;;  %v4759_v50 = vmul.f32 %v7989_v62, %v4693_v4  ;;  %v4760_v52 = vmul.f32 %v7989_v62, %v4694_v21  ;;  %v4761_v42 = vmul.f32 %v7989_v62, %v4695_v48  ;;  %v4762_v14 = vmul.f32 %v7989_v62, %v4696_v28  ;;  %v4708_v21 = vld [vmem:[#allocation4 + $0x1b8] sm:$0xff] }
 0x760   : > { %5011 = vst.msk [vmem:[%s8390_s4 + $0x84] sm:$0xf] %vm4977_vm5, %v4946_v46  ;;  %v4952_v0 = vpack.c.bf16 %v4888_v31, %v4888_v31  ;;  %v4763_v60 = vmul.f32 %v7989_v62, %v4697_v17  ;;  %v4764_v11 = vmul.f32 %v7989_v62, %v4698_v45  ;;  %v4765_v35 = vmul.f32 %v7989_v62, %v4699_v61  ;;  %v4709_v61 = vld [vmem:[#allocation4 + $0x1c0] sm:$0xff] }
 0x761   : > { %5012 = vst.msk [vmem:[%s8390_s4 + $0x88] sm:$0xf] %vm4977_vm5, %v4947_v9  ;;  %v4825_v56 = vadd.f32 %v7991_v36, %v4759_v50  ;;  %v4826_v47 = vadd.f32 %v7991_v36, %v4760_v52  ;;  %v4827_v34 = vadd.f32 %v7991_v36, %v4761_v42  ;;  %v4828_v23 = vadd.f32 %v7991_v36, %v4762_v14 }
 0x762   : > { %5013 = vst.msk [vmem:[%s8390_s4 + $0x8c] sm:$0xf] %vm4977_vm5, %v4948_v26  ;;  %v4829_v6 = vadd.f32 %v7991_v36, %v4763_v60  ;;  %v4766_v57 = vmul.f32 %v7989_v62, %v4700_v2  ;;  %v4830_v59 = vadd.f32 %v7991_v36, %v4764_v11  ;;  %v4831_v29 = vadd.f32 %v7991_v36, %v4765_v35  ;;  %v4713_v11 = vld [vmem:[#allocation4 + $0x1e0] sm:$0xff] }
 0x763   : > { %5014 = vst.msk [vmem:[%s8390_s4 + $0x90] sm:$0xf] %vm4977_vm5, %v4949_v30  ;;  %v4889_v37 = vmax.f32 %v4825_v56, 0.0  ;;  %v4890_v10 = vmax.f32 %v4826_v47, 0.0  ;;  %v4891_v44 = vmax.f32 %v4827_v34, 0.0  ;;  %v4892_v13 = vmax.f32 %v4828_v23, 0.0 }
 0x764   : > { %5015 = vst.msk [vmem:[%s8390_s4 + $0x94] sm:$0xf] %vm4977_vm5, %v4950_v43  ;;  %v4893_v3 = vmax.f32 %v4829_v6, 0.0  ;;  %v4832_v32 = vadd.f32 %v7991_v36, %v4766_v57  ;;  %v4894_v5 = vmax.f32 %v4830_v59, 0.0  ;;  %v4895_v7 = vmax.f32 %v4831_v29, 0.0  ;;  %v4710_v43 = vld [vmem:[#allocation4 + $0x1c8] sm:$0xff] }
 0x765   : > { %5016 = vst.msk [vmem:[%s8390_s4 + $0x98] sm:$0xf] %vm4977_vm5, %v4951_v24  ;;  %v4953_v27 = vpack.c.bf16 %v4889_v37, %v4889_v37  ;;  %v4954_v51 = vpack.c.bf16 %v4890_v10, %v4890_v10  ;;  %v4955_v18 = vpack.c.bf16 %v4891_v44, %v4891_v44  ;;  %v4956_v25 = vpack.c.bf16 %v4892_v13, %v4892_v13  ;;  %v4712_v47 = vld [vmem:[#allocation4 + $0x1d8] sm:$0xff]  ;;  %v4714_v57 = vld [vmem:[#allocation4 + $0x1e8] sm:$0xff]  ;;  %v4715_v37 = vld [vmem:[#allocation4 + $0x1f0] sm:$0xff] }
 0x766   : > { %5017 = vst.msk [vmem:[%s8390_s4 + $0x9c] sm:$0xf] %vm4977_vm5, %v4952_v0  ;;  %v4957_v19 = vpack.c.bf16 %v4893_v3, %v4893_v3  ;;  %v4896_v54 = vmax.f32 %v4832_v32, 0.0  ;;  %v4958_v40 = vpack.c.bf16 %v4894_v5, %v4894_v5  ;;  %v4959_v58 = vpack.c.bf16 %v4895_v7, %v4895_v7  ;;  %v4711_v0 = vld [vmem:[#allocation4 + $0x1d0] sm:$0xff] }
 0x767   : > { %5018 = vst.msk [vmem:[%s8390_s4 + $0xa0] sm:$0xf] %vm4977_vm5, %v4953_v27  ;;  %v4767_v38 = vmul.f32 %v7989_v62, %v4701_v22  ;;  %v4768_v4 = vmul.f32 %v7989_v62, %v4702_v53  ;;  %v4769_v16 = vmul.f32 %v7989_v62, %v4703_v63  ;;  %v4770_v8 = vmul.f32 %v7989_v62, %v4704_v15  ;;  %v4716_v53 = vld [vmem:[#allocation4 + $0x1f8] sm:$0xff] }
 0x768   : > { %5019 = vst.msk [vmem:[%s8390_s4 + $0xa4] sm:$0xf] %vm4977_vm5, %v4954_v51  ;;  %v4960_v41 = vpack.c.bf16 %v4896_v54, %v4896_v54  ;;  %v4771_v39 = vmul.f32 %v7989_v62, %v4705_v12  ;;  %v4772_v46 = vmul.f32 %v7989_v62, %v4706_v33  ;;  %v4773_v1 = vmul.f32 %v7989_v62, %v4707_v49 }
 0x769   : > { %5020 = vst.msk [vmem:[%s8390_s4 + $0xa8] sm:$0xf] %vm4977_vm5, %v4955_v18  ;;  %v4833_v48 = vadd.f32 %v7991_v36, %v4767_v38  ;;  %v4834_v55 = vadd.f32 %v7991_v36, %v4768_v4  ;;  %v4835_v20 = vadd.f32 %v7991_v36, %v4769_v16  ;;  %v4836_v28 = vadd.f32 %v7991_v36, %v4770_v8 }
 0x76a   : > { %5021 = vst.msk [vmem:[%s8390_s4 + $0xac] sm:$0xf] %vm4977_vm5, %v4956_v25  ;;  %v4837_v17 = vadd.f32 %v7991_v36, %v4771_v39  ;;  %v4774_v9 = vmul.f32 %v7989_v62, %v4708_v21  ;;  %v4838_v31 = vadd.f32 %v7991_v36, %v4772_v46  ;;  %v4839_v45 = vadd.f32 %v7991_v36, %v4773_v1 }
 0x76b   : > { %5022 = vst.msk [vmem:[%s8390_s4 + $0xb0] sm:$0xf] %vm4977_vm5, %v4957_v19  ;;  %v4897_v26 = vmax.f32 %v4833_v48, 0.0  ;;  %v4898_v30 = vmax.f32 %v4834_v55, 0.0  ;;  %v4899_v24 = vmax.f32 %v4835_v20, 0.0  ;;  %v4900_v50 = vmax.f32 %v4836_v28, 0.0 }
 0x76c   : > { %5023 = vst.msk [vmem:[%s8390_s4 + $0xb4] sm:$0xf] %vm4977_vm5, %v4958_v40  ;;  %v4901_v52 = vmax.f32 %v4837_v17, 0.0  ;;  %v4840_v2 = vadd.f32 %v7991_v36, %v4774_v9  ;;  %v4902_v60 = vmax.f32 %v4838_v31, 0.0  ;;  %v4903_v56 = vmax.f32 %v4839_v45, 0.0 }
 0x76d   : > { %5024 = vst.msk [vmem:[%s8390_s4 + $0xb8] sm:$0xf] %vm4977_vm5, %v4959_v58  ;;  %v4961_v42 = vpack.c.bf16 %v4897_v26, %v4897_v26  ;;  %v4962_v14 = vpack.c.bf16 %v4898_v30, %v4898_v30  ;;  %v4963_v35 = vpack.c.bf16 %v4899_v24, %v4899_v24  ;;  %v4964_v34 = vpack.c.bf16 %v4900_v50, %v4900_v50 }
 0x76e   : > { %5025 = vst.msk [vmem:[%s8390_s4 + $0xbc] sm:$0xf] %vm4977_vm5, %v4960_v41  ;;  %v4965_v23 = vpack.c.bf16 %v4901_v52, %v4901_v52  ;;  %v4904_v6 = vmax.f32 %v4840_v2, 0.0  ;;  %v4966_v10 = vpack.c.bf16 %v4902_v60, %v4902_v60  ;;  %v4967_v59 = vpack.c.bf16 %v4903_v56, %v4903_v56 }
 0x76f   : > { %5026 = vst.msk [vmem:[%s8390_s4 + $0xc0] sm:$0xf] %vm4977_vm5, %v4961_v42  ;;  %v4775_v29 = vmul.f32 %v7989_v62, %v4709_v61  ;;  %v4776_v22 = vmul.f32 %v7989_v62, %v4710_v43  ;;  %v4777_v13 = vmul.f32 %v7989_v62, %v4711_v0  ;;  %v4778_v3 = vmul.f32 %v7989_v62, %v4712_v47 }
 0x770   : > { %5027 = vst.msk [vmem:[%s8390_s4 + $0xc4] sm:$0xf] %vm4977_vm5, %v4962_v14  ;;  %v4968_v44 = vpack.c.bf16 %v4904_v6, %v4904_v6  ;;  %v4779_v32 = vmul.f32 %v7989_v62, %v4713_v11  ;;  %v4780_v51 = vmul.f32 %v7989_v62, %v4714_v57  ;;  %v4781_v5 = vmul.f32 %v7989_v62, %v4715_v37 }
 0x771   : > { %5028 = vst.msk [vmem:[%s8390_s4 + $0xc8] sm:$0xf] %vm4977_vm5, %v4963_v35  ;;  %v4841_v63 = vadd.f32 %v7991_v36, %v4775_v29  ;;  %v4842_v27 = vadd.f32 %v7991_v36, %v4776_v22  ;;  %v4843_v7 = vadd.f32 %v7991_v36, %v4777_v13  ;;  %v4844_v15 = vadd.f32 %v7991_v36, %v4778_v3 }
 0x772   : > { %5029 = vst.msk [vmem:[%s8390_s4 + $0xcc] sm:$0xf] %vm4977_vm5, %v4964_v34  ;;  %v4845_v12 = vadd.f32 %v7991_v36, %v4779_v32  ;;  %v4782_v18 = vmul.f32 %v7989_v62, %v4716_v53  ;;  %v4846_v54 = vadd.f32 %v7991_v36, %v4780_v51  ;;  %v4847_v33 = vadd.f32 %v7991_v36, %v4781_v5 }
 0x773   : > { %5030 = vst.msk [vmem:[%s8390_s4 + $0xd0] sm:$0xf] %vm4977_vm5, %v4965_v23  ;;  %v4905_v25 = vmax.f32 %v4841_v63, 0.0  ;;  %v4906_v19 = vmax.f32 %v4842_v27, 0.0  ;;  %v4907_v49 = vmax.f32 %v4843_v7, 0.0  ;;  %v4908_v40 = vmax.f32 %v4844_v15, 0.0 }
 0x774   : > { %5031 = vst.msk [vmem:[%s8390_s4 + $0xd4] sm:$0xf] %vm4977_vm5, %v4966_v10  ;;  %v4909_v58 = vmax.f32 %v4845_v12, 0.0  ;;  %v4848_v62 = vadd.f32 %v7991_v36, %v4782_v18  ;;  %v4910_v21 = vmax.f32 %v4846_v54, 0.0  ;;  %v4911_v41 = vmax.f32 %v4847_v33, 0.0 }
 0x775   : > { %5032 = vst.msk [vmem:[%s8390_s4 + $0xd8] sm:$0xf] %vm4977_vm5, %v4967_v59  ;;  %v4969_v38 = vpack.c.bf16 %v4905_v25, %v4905_v25  ;;  %v4970_v4 = vpack.c.bf16 %v4906_v19, %v4906_v19  ;;  %v4971_v16 = vpack.c.bf16 %v4907_v49, %v4907_v49  ;;  %v4972_v8 = vpack.c.bf16 %v4908_v40, %v4908_v40 }
 0x776   : > { %5033 = vst.msk [vmem:[%s8390_s4 + $0xdc] sm:$0xf] %vm4977_vm5, %v4968_v44  ;;  %v4912_v39 = vmax.f32 %v4848_v62, 0.0  ;;  %v4973_v36 = vpack.c.bf16 %v4909_v58, %v4909_v58  ;;  %v4974_v48 = vpack.c.bf16 %v4910_v21, %v4910_v21  ;;  %v4975_v55 = vpack.c.bf16 %v4911_v41, %v4911_v41 }
 0x777   : > { %5034 = vst.msk [vmem:[%s8390_s4 + $0xe0] sm:$0xf] %vm4977_vm5, %v4969_v38 }
 0x778   : > { %5035 = vst.msk [vmem:[%s8390_s4 + $0xe4] sm:$0xf] %vm4977_vm5, %v4970_v4  ;;  %v4976_v46 = vpack.c.bf16 %v4912_v39, %v4912_v39 }
 0x779   : > { %5036 = vst.msk [vmem:[%s8390_s4 + $0xe8] sm:$0xf] %vm4977_vm5, %v4971_v16 }
 0x77a   : > { %5037 = vst.msk [vmem:[%s8390_s4 + $0xec] sm:$0xf] %vm4977_vm5, %v4972_v8 }
 0x77b   : > { %5038 = vst.msk [vmem:[%s8390_s4 + $0xf0] sm:$0xf] %vm4977_vm5, %v4973_v36 }
 0x77c   : > { %5039 = vst.msk [vmem:[%s8390_s4 + $0xf4] sm:$0xf] %vm4977_vm5, %v4974_v48 }
 0x77d   : > { %5040 = vst.msk [vmem:[%s8390_s4 + $0xf8] sm:$0xf] %vm4977_vm5, %v4975_v55 }
 0x77e   : > { %5041 = vst.msk [vmem:[%s8390_s4 + $0xfc] sm:$0xf] %vm4977_vm5, %v4976_v46 }
 0x77f PF: > { %s14_s17 = sadd.s32 1, %s5402_s17   ;;  %s8394_s15 = smov %s5398_s16 }
 0x780   : > { %p11_p8 = scmp.ge.s32.totalorder %s14_s17, 4   ;;  %s8395_s16 = smov %s8397_s18 }
 0x782   :  { %13 = sbr.rel (!%p11_p8) target bundleno = 2 (0x2), region = 86 }

</bundles_post_ra>
